<compile_context>
chip_gen: v7x
topology: tpu7x:2x2x1
jax: 0.10.0
libtpu: 0.0.40
codegen_flags: <defaults>
</compile_context>

<pallas_src>
import functools
import math

import jax
import jax.numpy as jnp
from jax import lax
from jax.experimental import pallas as pl
from jax.experimental.pallas import tpu as pltpu

EPS = 1e-5      # nn.BatchNorm2d default
C_PAD = 128     # lane-dense channel padding


# ---------------------------------------------------------------------------
# Fused BottleneckBlock kernel
# ---------------------------------------------------------------------------
def _bn_train(v, gamma, beta, mask, inv_count):
  """Training-mode BatchNorm, single pass (sum / sum-of-squares).

  Stats are taken over rows where mask==1 (mask=None -> all rows); the
  normalization is applied to every row (off-grid rows are discarded later
  by the wrapper, so normalizing them is harmless).
  """
  vm = v if mask is None else v * mask
  mean = jnp.sum(vm, axis=0, keepdims=True) * inv_count           # (1, C)
  ex2 = jnp.sum(vm * v, axis=0, keepdims=True) * inv_count        # (1, C)
  var = jnp.maximum(ex2 - mean * mean, 0.0)                       # biased var
  scale = gamma * lax.rsqrt(var + EPS)                            # EUP rsqrt
  return v * scale + (beta - mean * scale)


def bottleneck_kernel(x_ref, w1_ref, g1_ref, b1_ref,
                      w2_ref, c2b_ref, g2_ref, b2_ref,
                      w3_ref, g3_ref, b3_ref,
                      wsc_ref, mask_ref, o_ref, img_ref,
                      *, n, h, w, m_valid):
  f32, bf16 = jnp.float32, jnp.bfloat16
  m0 = n * h * w
  inv_m0 = 1.0 / float(m0)        # BN1 count (full resolution)
  inv_m2 = 1.0 / float(m_valid)   # BN2/BN3 count (stride grid)
  c = w1_ref.shape[1]             # padded channel width (128)

  x = x_ref[...]                  # (m0, c) bf16, channels zero-padded
  mask = mask_ref[...]            # (m0, 1) f32, 1.0 on the stride grid

  # --- C1 (1x1 conv, no bias) + BN1 + ReLU ---------------------------------
  c1 = jnp.dot(x, w1_ref[...], preferred_element_type=f32)
  out1 = jnp.maximum(_bn_train(c1, g1_ref[...], b1_ref[...], None, inv_m0), 0.0)

  # --- C2 (3x3, pad 1, bias): im2col built in-VMEM from a padded image ------
  img_ref[...] = jnp.zeros_like(img_ref)                          # zero border
  img_ref[:, 1:h + 1, 1:w + 1, :] = out1.reshape(n, h, w, c)
  taps = [img_ref[:, ky:ky + h, kx:kx + w, :]
          for ky in range(3) for kx in range(3)]
  a2 = jnp.concatenate(taps, axis=-1).reshape(m0, 9 * c)
  c2 = jnp.dot(a2.astype(bf16), w2_ref[...], preferred_element_type=f32)
  c2 = c2 + c2b_ref[...]          # conv bias (cancelled by BN2; kept for fidelity)
  out2 = jnp.maximum(_bn_train(c2, g2_ref[...], b2_ref[...], mask, inv_m2), 0.0)

  # --- C3 (1x1 conv, no bias) + BN3 -----------------------------------------
  c3 = jnp.dot(out2.astype(bf16), w3_ref[...], preferred_element_type=f32)
  y = _bn_train(c3, g3_ref[...], b3_ref[...], mask, inv_m2)

  # --- shortcut (1x1 conv; identity matrix when indim == outdim) + ReLU ------
  short = jnp.dot(x, wsc_ref[...], preferred_element_type=f32)
  o_ref[...] = jnp.maximum(y + short, 0.0)


# ---------------------------------------------------------------------------
# Glue: packing / padding helpers (plain JAX, no compute in the hot path)
# ---------------------------------------------------------------------------
def _pack_conv(w_oihw, cin_pad=C_PAD, cout_pad=C_PAD):
  """(Cout, Cin, kh, kw) torch layout -> (kh*kw*cin_pad, cout_pad) bf16,
  zero-padded, tap-major rows matching the kernel's in-VMEM im2col order."""
  co, ci, kh, kw = w_oihw.shape
  wt = jnp.transpose(w_oihw, (2, 3, 1, 0))                        # (kh, kw, ci, co)
  wt = jnp.pad(wt, ((0, 0), (0, 0), (0, cin_pad - ci), (0, cout_pad - co)))
  return wt.reshape(kh * kw * cin_pad, cout_pad).astype(jnp.bfloat16)


def _pad_row(v, cpad=C_PAD):
  v = jnp.asarray(v, jnp.float32).reshape(1, -1)
  return jnp.pad(v, ((0, 0), (0, cpad - v.shape[1])))


def _stride_mask(n, h, w, stride):
  keep_h = (jnp.arange(h) % stride) == 0
  keep_w = (jnp.arange(w) % stride) == 0
  keep = jnp.logical_and(keep_h[:, None], keep_w[None, :])        # (h, w)
  keep = jnp.broadcast_to(keep[None, :, :], (n, h, w))
  return keep.reshape(n * h * w, 1).astype(jnp.float32)


# ---------------------------------------------------------------------------
# BottleneckBlock forward
# ---------------------------------------------------------------------------
def bottleneck_block_forward(x_nchw, params, *, indim, outdim, half_res):
  stride = 2 if half_res else 1
  n, _, h, w = x_nchw.shape
  m0 = n * h * w
  h2 = (h - 1) // stride + 1     # == (h + 2*1 - 3)//stride + 1 for 3x3/pad1
  w2 = (w - 1) // stride + 1
  m_valid = n * h2 * w2

  # NCHW -> lane-dense (N*H*W, 128) bf16 activation matrix (1x1 convs need no im2col)
  x = jnp.transpose(x_nchw, (0, 2, 3, 1)).astype(jnp.float32).reshape(m0, indim)
  x = jnp.pad(x, ((0, 0), (0, C_PAD - indim))).astype(jnp.bfloat16)
  mask = _stride_mask(n, h, w, stride)

  kernel = functools.partial(bottleneck_kernel, n=n, h=h, w=w, m_valid=m_valid)
  out_flat = pl.pallas_call(
      kernel,
      out_shape=jax.ShapeDtypeStruct((m0, C_PAD), jnp.float32),
      in_specs=[pl.BlockSpec(memory_space=pltpu.MemorySpace.VMEM)] * 13,
      out_specs=pl.BlockSpec(memory_space=pltpu.MemorySpace.VMEM),
      scratch_shapes=[pltpu.VMEM((n, h + 2, w + 2, C_PAD), jnp.float32)],
      compiler_params=pltpu.CompilerParams(vmem_limit_bytes=32 * 1024 * 1024),
  )(x, params["W1"], params["g1"], params["b1"],
    params["W2"], params["c2b"], params["g2"], params["b2"],
    params["W3"], params["g3"], params["b3"],
    params["Wsc"], mask)

  # select the stride grid + real channels, back to NCHW
  out = out_flat.reshape(n, h, w, C_PAD)[:, ::stride, ::stride, :outdim]
  return jnp.transpose(out, (0, 3, 1, 2))


def init_params(key, indim, outdim):
  """Mirror init_layer: conv weight ~ N(0, sqrt(2/(kh*kw*Cout))); BN weight=1,
  bias=0.  C2 keeps nn.Conv2d's default bias init (exactly cancelled by BN2)."""
  bdim = outdim // 4
  k1, k2, k3, k4, kb = jax.random.split(key, 5)
  w1 = jax.random.normal(k1, (bdim, indim, 1, 1), jnp.float32) * math.sqrt(2.0 / bdim)
  w2 = jax.random.normal(k2, (bdim, bdim, 3, 3), jnp.float32) * math.sqrt(2.0 / (9 * bdim))
  w3 = jax.random.normal(k3, (outdim, bdim, 1, 1), jnp.float32) * math.sqrt(2.0 / outdim)
  bound = 1.0 / math.sqrt(bdim * 9)
  c2_bias = jax.random.uniform(kb, (bdim,), jnp.float32, -bound, bound)
  if indim != outdim:
    wsc = jax.random.normal(k4, (outdim, indim, 1, 1), jnp.float32) * math.sqrt(2.0 / outdim)
  else:
    # identity shortcut == matmul with the identity matrix (valid for half_res=False)
    wsc = jnp.eye(outdim, dtype=jnp.float32)[:, :, None, None]
  ones_b, zeros_b = jnp.ones((bdim,)), jnp.zeros((bdim,))
  ones_o, zeros_o = jnp.ones((outdim,)), jnp.zeros((outdim,))
  return {
      "W1": _pack_conv(w1), "g1": _pad_row(ones_b), "b1": _pad_row(zeros_b),
      "W2": _pack_conv(w2), "c2b": _pad_row(c2_bias),
      "g2": _pad_row(ones_b), "b2": _pad_row(zeros_b),
      "W3": _pack_conv(w3), "g3": _pad_row(ones_o), "b3": _pad_row(zeros_o),
      "Wsc": _pack_conv(wsc),
  }


if __name__ == "__main__":
  indim, outdim, half_res = 4, 8, True
  key = jax.random.PRNGKey(0)
  kx, kp = jax.random.split(key)
  x = jax.random.normal(kx, (2, indim, 16, 16), jnp.float32)   # NCHW like PyTorch
  params = init_params(kp, indim, outdim)

  fwd = jax.jit(functools.partial(bottleneck_block_forward,
                                  indim=indim, outdim=outdim, half_res=half_res))
  out = fwd(x, params)
  jax.block_until_ready(out)

  s = 2 if half_res else 1
  h_out = (16 - 1) // s + 1
  assert out.shape == (2, outdim, h_out, h_out), out.shape
  assert bool(jnp.all(out >= 0.0)), "ReLU output must be non-negative"
  print("KERNEL_OK")
</pallas_src>

<mosaic_0001>
module attributes {stable_mosaic.version = 11 : i64} {
  func.func @bottleneck_kernel(%arg0: memref<512x128xbf16, #tpu.memory_space<vmem>>, %arg1: memref<128x128xbf16, #tpu.memory_space<vmem>>, %arg2: memref<1x128xf32, #tpu.memory_space<vmem>>, %arg3: memref<1x128xf32, #tpu.memory_space<vmem>>, %arg4: memref<1152x128xbf16, #tpu.memory_space<vmem>>, %arg5: memref<1x128xf32, #tpu.memory_space<vmem>>, %arg6: memref<1x128xf32, #tpu.memory_space<vmem>>, %arg7: memref<1x128xf32, #tpu.memory_space<vmem>>, %arg8: memref<128x128xbf16, #tpu.memory_space<vmem>>, %arg9: memref<1x128xf32, #tpu.memory_space<vmem>>, %arg10: memref<1x128xf32, #tpu.memory_space<vmem>>, %arg11: memref<128x128xbf16, #tpu.memory_space<vmem>>, %arg12: memref<512x1xf32, #tpu.memory_space<vmem>>, %arg13: memref<512x128xf32, #tpu.memory_space<vmem>>, %arg14: memref<2x18x18x128xf32, #tpu.memory_space<vmem>>) attributes {dimension_semantics = [], scalar_prefetch = 0 : i64, scratch_operands = 1 : i64, tpu.core_type = #tpu.core_type<tc>} {
    %c0 = arith.constant 0 : index
    %c0_0 = arith.constant 0 : index
    %0 = vector.load %arg0[%c0, %c0_0] : memref<512x128xbf16, #tpu.memory_space<vmem>>, vector<512x128xbf16>
    %c0_1 = arith.constant 0 : index
    %c0_2 = arith.constant 0 : index
    %1 = vector.load %arg12[%c0_1, %c0_2] : memref<512x1xf32, #tpu.memory_space<vmem>>, vector<512x1xf32>
    %c0_3 = arith.constant 0 : index
    %c0_4 = arith.constant 0 : index
    %2 = vector.load %arg1[%c0_3, %c0_4] : memref<128x128xbf16, #tpu.memory_space<vmem>>, vector<128x128xbf16>
    %cst = arith.constant dense<0.000000e+00> : vector<512x128xf32>
    %3 = tpu.matmul %0, %2, %cst {dimension_numbers = #tpu.dot_dimension_numbers<[1], [0], [0], [1], [0, 0, 1, 1], [], []>} : vector<512x128xbf16>, vector<128x128xbf16>, vector<512x128xf32> -> vector<512x128xf32>
    %c0_5 = arith.constant 0 : index
    %c0_6 = arith.constant 0 : index
    %4 = vector.load %arg2[%c0_5, %c0_6] : memref<1x128xf32, #tpu.memory_space<vmem>>, vector<1x128xf32>
    %c0_7 = arith.constant 0 : index
    %c0_8 = arith.constant 0 : index
    %5 = vector.load %arg3[%c0_7, %c0_8] : memref<1x128xf32, #tpu.memory_space<vmem>>, vector<1x128xf32>
    %cst_9 = arith.constant dense<0.000000e+00> : vector<128xf32>
    %6 = vector.multi_reduction <add>, %3, %cst_9 [0] : vector<512x128xf32> to vector<128xf32>
    %7 = vector.shape_cast %6 : vector<128xf32> to vector<1x128xf32>
    %cst_10 = arith.constant 0.001953125 : f32
    %8 = vector.broadcast %cst_10 : f32 to vector<1x128xf32>
    %9 = arith.mulf %7, %8 : vector<1x128xf32>
    %10 = arith.mulf %3, %3 : vector<512x128xf32>
    %cst_11 = arith.constant dense<0.000000e+00> : vector<128xf32>
    %11 = vector.multi_reduction <add>, %10, %cst_11 [0] : vector<512x128xf32> to vector<128xf32>
    %12 = vector.shape_cast %11 : vector<128xf32> to vector<1x128xf32>
    %cst_12 = arith.constant 0.001953125 : f32
    %13 = vector.broadcast %cst_12 : f32 to vector<1x128xf32>
    %14 = arith.mulf %12, %13 : vector<1x128xf32>
    %15 = arith.mulf %9, %9 : vector<1x128xf32>
    %16 = arith.subf %14, %15 : vector<1x128xf32>
    %cst_13 = arith.constant 0.000000e+00 : f32
    %17 = vector.broadcast %cst_13 : f32 to vector<1x128xf32>
    %18 = arith.maximumf %16, %17 : vector<1x128xf32>
    %cst_14 = arith.constant 9.99999974E-6 : f32
    %19 = vector.broadcast %cst_14 : f32 to vector<1x128xf32>
    %20 = arith.addf %18, %19 : vector<1x128xf32>
    %21 = math.rsqrt %20 : vector<1x128xf32>
    %22 = arith.mulf %4, %21 : vector<1x128xf32>
    %23 = vector.broadcast %22 : vector<1x128xf32> to vector<512x128xf32>
    %24 = arith.mulf %3, %23 : vector<512x128xf32>
    %25 = arith.mulf %9, %22 : vector<1x128xf32>
    %26 = arith.subf %5, %25 : vector<1x128xf32>
    %27 = vector.broadcast %26 : vector<1x128xf32> to vector<512x128xf32>
    %28 = arith.addf %24, %27 : vector<512x128xf32>
    %cst_15 = arith.constant 0.000000e+00 : f32
    %29 = vector.broadcast %cst_15 : f32 to vector<512x128xf32>
    %30 = arith.maximumf %28, %29 : vector<512x128xf32>
    %cst_16 = arith.constant 0.000000e+00 : f32
    %31 = vector.broadcast %cst_16 : f32 to vector<2x18x18x128xf32>
    %c0_17 = arith.constant 0 : index
    %c0_18 = arith.constant 0 : index
    %c0_19 = arith.constant 0 : index
    %c0_20 = arith.constant 0 : index
    %32 = vector.load %arg14[%c0_17, %c0_18, %c0_19, %c0_20] : memref<2x18x18x128xf32, #tpu.memory_space<vmem>>, vector<2x18x18x128xf32>
    tpu.vector_store %arg14[%c0_17, %c0_18, %c0_19, %c0_20], %31 {strides = array<i32>} : memref<2x18x18x128xf32, #tpu.memory_space<vmem>>, vector<2x18x18x128xf32>,
    %33 = vector.shape_cast %30 : vector<512x128xf32> to vector<2x16x16x128xf32>
    %c0_21 = arith.constant 0 : index
    %c1 = arith.constant 1 : index
    %c1_22 = arith.constant 1 : index
    %c0_23 = arith.constant 0 : index
    %34 = vector.load %arg14[%c0_21, %c1, %c1_22, %c0_23] : memref<2x18x18x128xf32, #tpu.memory_space<vmem>>, vector<2x16x16x128xf32>
    tpu.vector_store %arg14[%c0_21, %c1, %c1_22, %c0_23], %33 {strides = array<i32>} : memref<2x18x18x128xf32, #tpu.memory_space<vmem>>, vector<2x16x16x128xf32>,
    %c0_24 = arith.constant 0 : index
    %c0_25 = arith.constant 0 : index
    %c0_26 = arith.constant 0 : index
    %c0_27 = arith.constant 0 : index
    %35 = vector.load %arg14[%c0_24, %c0_25, %c0_26, %c0_27] : memref<2x18x18x128xf32, #tpu.memory_space<vmem>>, vector<2x16x16x128xf32>
    %c0_28 = arith.constant 0 : index
    %c0_29 = arith.constant 0 : index
    %c1_30 = arith.constant 1 : index
    %c0_31 = arith.constant 0 : index
    %36 = vector.load %arg14[%c0_28, %c0_29, %c1_30, %c0_31] : memref<2x18x18x128xf32, #tpu.memory_space<vmem>>, vector<2x16x16x128xf32>
    %c0_32 = arith.constant 0 : index
    %c0_33 = arith.constant 0 : index
    %c2 = arith.constant 2 : index
    %c0_34 = arith.constant 0 : index
    %37 = vector.load %arg14[%c0_32, %c0_33, %c2, %c0_34] : memref<2x18x18x128xf32, #tpu.memory_space<vmem>>, vector<2x16x16x128xf32>
    %c0_35 = arith.constant 0 : index
    %c1_36 = arith.constant 1 : index
    %c0_37 = arith.constant 0 : index
    %c0_38 = arith.constant 0 : index
    %38 = vector.load %arg14[%c0_35, %c1_36, %c0_37, %c0_38] : memref<2x18x18x128xf32, #tpu.memory_space<vmem>>, vector<2x16x16x128xf32>
    %c0_39 = arith.constant 0 : index
    %c1_40 = arith.constant 1 : index
    %c1_41 = arith.constant 1 : index
    %c0_42 = arith.constant 0 : index
    %39 = vector.load %arg14[%c0_39, %c1_40, %c1_41, %c0_42] : memref<2x18x18x128xf32, #tpu.memory_space<vmem>>, vector<2x16x16x128xf32>
    %c0_43 = arith.constant 0 : index
    %c1_44 = arith.constant 1 : index
    %c2_45 = arith.constant 2 : index
    %c0_46 = arith.constant 0 : index
    %40 = vector.load %arg14[%c0_43, %c1_44, %c2_45, %c0_46] : memref<2x18x18x128xf32, #tpu.memory_space<vmem>>, vector<2x16x16x128xf32>
    %c0_47 = arith.constant 0 : index
    %c2_48 = arith.constant 2 : index
    %c0_49 = arith.constant 0 : index
    %c0_50 = arith.constant 0 : index
    %41 = vector.load %arg14[%c0_47, %c2_48, %c0_49, %c0_50] : memref<2x18x18x128xf32, #tpu.memory_space<vmem>>, vector<2x16x16x128xf32>
    %c0_51 = arith.constant 0 : index
    %c2_52 = arith.constant 2 : index
    %c1_53 = arith.constant 1 : index
    %c0_54 = arith.constant 0 : index
    %42 = vector.load %arg14[%c0_51, %c2_52, %c1_53, %c0_54] : memref<2x18x18x128xf32, #tpu.memory_space<vmem>>, vector<2x16x16x128xf32>
    %c0_55 = arith.constant 0 : index
    %c2_56 = arith.constant 2 : index
    %c2_57 = arith.constant 2 : index
    %c0_58 = arith.constant 0 : index
    %43 = vector.load %arg14[%c0_55, %c2_56, %c2_57, %c0_58] : memref<2x18x18x128xf32, #tpu.memory_space<vmem>>, vector<2x16x16x128xf32>
    %44 = tpu.concatenate %35, %36, %37, %38, %39, %40, %41, %42, %43 in 3 : vector<2x16x16x128xf32>, vector<2x16x16x128xf32>, vector<2x16x16x128xf32>, vector<2x16x16x128xf32>, vector<2x16x16x128xf32>, vector<2x16x16x128xf32>, vector<2x16x16x128xf32>, vector<2x16x16x128xf32>, vector<2x16x16x128xf32> -> vector<2x16x16x1152xf32>
    %45 = vector.shape_cast %44 : vector<2x16x16x1152xf32> to vector<512x1152xf32>
    %46 = arith.truncf %45 : vector<512x1152xf32> to vector<512x1152xbf16>
    %c0_59 = arith.constant 0 : index
    %c0_60 = arith.constant 0 : index
    %47 = vector.load %arg4[%c0_59, %c0_60] : memref<1152x128xbf16, #tpu.memory_space<vmem>>, vector<1152x128xbf16>
    %cst_61 = arith.constant dense<0.000000e+00> : vector<512x128xf32>
    %48 = tpu.matmul %46, %47, %cst_61 {dimension_numbers = #tpu.dot_dimension_numbers<[1], [0], [0], [1], [0, 0, 1, 1], [], []>} : vector<512x1152xbf16>, vector<1152x128xbf16>, vector<512x128xf32> -> vector<512x128xf32>
    %c0_62 = arith.constant 0 : index
    %c0_63 = arith.constant 0 : index
    %49 = vector.load %arg5[%c0_62, %c0_63] : memref<1x128xf32, #tpu.memory_space<vmem>>, vector<1x128xf32>
    %50 = vector.broadcast %49 : vector<1x128xf32> to vector<512x128xf32>
    %51 = arith.addf %48, %50 : vector<512x128xf32>
    %c0_64 = arith.constant 0 : index
    %c0_65 = arith.constant 0 : index
    %52 = vector.load %arg6[%c0_64, %c0_65] : memref<1x128xf32, #tpu.memory_space<vmem>>, vector<1x128xf32>
    %c0_66 = arith.constant 0 : index
    %c0_67 = arith.constant 0 : index
    %53 = vector.load %arg7[%c0_66, %c0_67] : memref<1x128xf32, #tpu.memory_space<vmem>>, vector<1x128xf32>
    %54 = vector.broadcast %1 : vector<512x1xf32> to vector<512x128xf32>
    %55 = arith.mulf %51, %54 : vector<512x128xf32>
    %cst_68 = arith.constant dense<0.000000e+00> : vector<128xf32>
    %56 = vector.multi_reduction <add>, %55, %cst_68 [0] : vector<512x128xf32> to vector<128xf32>
    %57 = vector.shape_cast %56 : vector<128xf32> to vector<1x128xf32>
    %cst_69 = arith.constant 7.812500e-03 : f32
    %58 = vector.broadcast %cst_69 : f32 to vector<1x128xf32>
    %59 = arith.mulf %57, %58 : vector<1x128xf32>
    %60 = arith.mulf %55, %51 : vector<512x128xf32>
    %cst_70 = arith.constant dense<0.000000e+00> : vector<128xf32>
    %61 = vector.multi_reduction <add>, %60, %cst_70 [0] : vector<512x128xf32> to vector<128xf32>
    %62 = vector.shape_cast %61 : vector<128xf32> to vector<1x128xf32>
    %cst_71 = arith.constant 7.812500e-03 : f32
    %63 = vector.broadcast %cst_71 : f32 to vector<1x128xf32>
    %64 = arith.mulf %62, %63 : vector<1x128xf32>
    %65 = arith.mulf %59, %59 : vector<1x128xf32>
    %66 = arith.subf %64, %65 : vector<1x128xf32>
    %cst_72 = arith.constant 0.000000e+00 : f32
    %67 = vector.broadcast %cst_72 : f32 to vector<1x128xf32>
    %68 = arith.maximumf %66, %67 : vector<1x128xf32>
    %cst_73 = arith.constant 9.99999974E-6 : f32
    %69 = vector.broadcast %cst_73 : f32 to vector<1x128xf32>
    %70 = arith.addf %68, %69 : vector<1x128xf32>
    %71 = math.rsqrt %70 : vector<1x128xf32>
    %72 = arith.mulf %52, %71 : vector<1x128xf32>
    %73 = vector.broadcast %72 : vector<1x128xf32> to vector<512x128xf32>
    %74 = arith.mulf %51, %73 : vector<512x128xf32>
    %75 = arith.mulf %59, %72 : vector<1x128xf32>
    %76 = arith.subf %53, %75 : vector<1x128xf32>
    %77 = vector.broadcast %76 : vector<1x128xf32> to vector<512x128xf32>
    %78 = arith.addf %74, %77 : vector<512x128xf32>
    %cst_74 = arith.constant 0.000000e+00 : f32
    %79 = vector.broadcast %cst_74 : f32 to vector<512x128xf32>
    %80 = arith.maximumf %78, %79 : vector<512x128xf32>
    %81 = arith.truncf %80 : vector<512x128xf32> to vector<512x128xbf16>
    %c0_75 = arith.constant 0 : index
    %c0_76 = arith.constant 0 : index
    %82 = vector.load %arg8[%c0_75, %c0_76] : memref<128x128xbf16, #tpu.memory_space<vmem>>, vector<128x128xbf16>
    %cst_77 = arith.constant dense<0.000000e+00> : vector<512x128xf32>
    %83 = tpu.matmul %81, %82, %cst_77 {dimension_numbers = #tpu.dot_dimension_numbers<[1], [0], [0], [1], [0, 0, 1, 1], [], []>} : vector<512x128xbf16>, vector<128x128xbf16>, vector<512x128xf32> -> vector<512x128xf32>
    %c0_78 = arith.constant 0 : index
    %c0_79 = arith.constant 0 : index
    %84 = vector.load %arg9[%c0_78, %c0_79] : memref<1x128xf32, #tpu.memory_space<vmem>>, vector<1x128xf32>
    %c0_80 = arith.constant 0 : index
    %c0_81 = arith.constant 0 : index
    %85 = vector.load %arg10[%c0_80, %c0_81] : memref<1x128xf32, #tpu.memory_space<vmem>>, vector<1x128xf32>
    %86 = vector.broadcast %1 : vector<512x1xf32> to vector<512x128xf32>
    %87 = arith.mulf %83, %86 : vector<512x128xf32>
    %cst_82 = arith.constant dense<0.000000e+00> : vector<128xf32>
    %88 = vector.multi_reduction <add>, %87, %cst_82 [0] : vector<512x128xf32> to vector<128xf32>
    %89 = vector.shape_cast %88 : vector<128xf32> to vector<1x128xf32>
    %cst_83 = arith.constant 7.812500e-03 : f32
    %90 = vector.broadcast %cst_83 : f32 to vector<1x128xf32>
    %91 = arith.mulf %89, %90 : vector<1x128xf32>
    %92 = arith.mulf %87, %83 : vector<512x128xf32>
    %cst_84 = arith.constant dense<0.000000e+00> : vector<128xf32>
    %93 = vector.multi_reduction <add>, %92, %cst_84 [0] : vector<512x128xf32> to vector<128xf32>
    %94 = vector.shape_cast %93 : vector<128xf32> to vector<1x128xf32>
    %cst_85 = arith.constant 7.812500e-03 : f32
    %95 = vector.broadcast %cst_85 : f32 to vector<1x128xf32>
    %96 = arith.mulf %94, %95 : vector<1x128xf32>
    %97 = arith.mulf %91, %91 : vector<1x128xf32>
    %98 = arith.subf %96, %97 : vector<1x128xf32>
    %cst_86 = arith.constant 0.000000e+00 : f32
    %99 = vector.broadcast %cst_86 : f32 to vector<1x128xf32>
    %100 = arith.maximumf %98, %99 : vector<1x128xf32>
    %cst_87 = arith.constant 9.99999974E-6 : f32
    %101 = vector.broadcast %cst_87 : f32 to vector<1x128xf32>
    %102 = arith.addf %100, %101 : vector<1x128xf32>
    %103 = math.rsqrt %102 : vector<1x128xf32>
    %104 = arith.mulf %84, %103 : vector<1x128xf32>
    %105 = vector.broadcast %104 : vector<1x128xf32> to vector<512x128xf32>
    %106 = arith.mulf %83, %105 : vector<512x128xf32>
    %107 = arith.mulf %91, %104 : vector<1x128xf32>
    %108 = arith.subf %85, %107 : vector<1x128xf32>
    %109 = vector.broadcast %108 : vector<1x128xf32> to vector<512x128xf32>
    %110 = arith.addf %106, %109 : vector<512x128xf32>
    %c0_88 = arith.constant 0 : index
    %c0_89 = arith.constant 0 : index
    %111 = vector.load %arg11[%c0_88, %c0_89] : memref<128x128xbf16, #tpu.memory_space<vmem>>, vector<128x128xbf16>
    %cst_90 = arith.constant dense<0.000000e+00> : vector<512x128xf32>
    %112 = tpu.matmul %0, %111, %cst_90 {dimension_numbers = #tpu.dot_dimension_numbers<[1], [0], [0], [1], [0, 0, 1, 1], [], []>} : vector<512x128xbf16>, vector<128x128xbf16>, vector<512x128xf32> -> vector<512x128xf32>
    %113 = arith.addf %110, %112 : vector<512x128xf32>
    %cst_91 = arith.constant 0.000000e+00 : f32
    %114 = vector.broadcast %cst_91 : f32 to vector<512x128xf32>
    %115 = arith.maximumf %113, %114 : vector<512x128xf32>
    %c0_92 = arith.constant 0 : index
    %c0_93 = arith.constant 0 : index
    %116 = vector.load %arg13[%c0_92, %c0_93] : memref<512x128xf32, #tpu.memory_space<vmem>>, vector<512x128xf32>
    tpu.vector_store %arg13[%c0_92, %c0_93], %115 {strides = array<i32>} : memref<512x128xf32, #tpu.memory_space<vmem>>, vector<512x128xf32>,
    return
  }
}

</mosaic_0001>

<bundles_post_ra>
// kernel: bottleneck_block_forward.1
= control target key start
LH: loop header
LB: loop body
LE: loop exit
PB: predicated region body
PF: predicated region fallthrough
CT: control target
= control target key end

     0   :  { %v7522_v33 = vmov 0.0   ;;  %v11854_v42 = vmov 0   ;;  %s11838_s1 = inlined_call_operand.vmem [shape: bf16[128,128], index: 1, kind: input, shape index: {}]   ;;  %s11839_s0 = inlined_call_operand.vmem [shape: bf16[512,128], index: 0, kind: input, shape index: {}]   ;;  %s11840_s4 = inlined_call_operand.vmem [shape: bf16[1152,128], index: 4, kind: input, shape index: {}]   ;;  %s11841_s2 = inlined_call_operand.vmem [shape: f32[1,128], index: 2, kind: input, shape index: {}]   ;;  %s11842_s3 = inlined_call_operand.vmem [shape: f32[1,128], index: 3, kind: input, shape index: {}]   ;;  %s11843_s12 = inlined_call_operand.vmem [shape: f32[512,1], index: 12, kind: input, shape index: {}]   ;;  %s11844_s5 = inlined_call_operand.vmem [shape: f32[1,128], index: 5, kind: input, shape index: {}]   ;;  %s11845_s8 = inlined_call_operand.vmem [shape: bf16[128,128], index: 8, kind: input, shape index: {}]   ;;  %s11846_s11 = inlined_call_operand.vmem [shape: bf16[128,128], index: 11, kind: input, shape index: {}]   ;;  %s11847_s6 = inlined_call_operand.vmem [shape: f32[1,128], index: 6, kind: input, shape index: {}]   ;;  %s11848_s7 = inlined_call_operand.vmem [shape: f32[1,128], index: 7, kind: input, shape index: {}]   ;;  %s11849_s9 = inlined_call_operand.vmem [shape: f32[1,128], index: 9, kind: input, shape index: {}]   ;;  %s11850_s10 = inlined_call_operand.vmem [shape: f32[1,128], index: 10, kind: input, shape index: {}]   ;;  %s11851_s13 = inlined_call_operand.vmem [shape: f32[512,128], index: 13, kind: output, shape index: {}]  }
   0x1   :  { %v7353_v0 = vld [vmem:[%s11838_s1] sm:$0xff]   ;;  %v7354_v1 = vld [vmem:[%s11838_s1 + $0x8] sm:$0xff]   ;;  %v7355_v2 = vld [vmem:[%s11838_s1 + $0x10] sm:$0xff]   ;;  %1142 = vst [vmem:[#allocation2 + $0x30] sm:$0xff] %v7522_v33  ;;  %3046 = vmatprep.subr.bf16.mxu1 %v11854_v42  ;;  %7351 = vset.pattern.permute.xlu0 %v11854_v42 }
   0x2   :  { %6645 = vmatprep.subr.bf16.mxu0 %v7353_v0  ;;  %v7356_v3 = vld [vmem:[%s11838_s1 + $0x18] sm:$0xff]   ;;  %v7361_v4 = vld [vmem:[%s11839_s0] sm:$0xff]   ;;  %v7358_v6 = vld [vmem:[%s11838_s1 + $0x28] sm:$0xff]   ;;  %1143 = vst [vmem:[#allocation2 + $0x38] sm:$0xff] %v7522_v33  ;;  %7352 = vset.pattern.permute.xlu1 %v11854_v42 }
   0x3   :  { %6646 = vmatpush3.bf16.msra.mxu0 %v7353_v0  ;;  %6661 = vmatprep.mubr.bf16.mxu0 %v7361_v4  ;;  %v7357_v5 = vld [vmem:[%s11838_s1 + $0x20] sm:$0xff]   ;;  %v7359_v7 = vld [vmem:[%s11838_s1 + $0x30] sm:$0xff]   ;;  %v7360_v8 = vld [vmem:[%s11838_s1 + $0x38] sm:$0xff]   ;;  %1136 = vst [vmem:[#allocation2] sm:$0xff] %v7522_v33 }
   0x4   :  { %6647 = vmatprep.subr.bf16.mxu0 %v7354_v1  ;;  %v7362_v9 = vld [vmem:[%s11839_s0 + $0x8] sm:$0xff]   ;;  %v7363_v10 = vld [vmem:[%s11839_s0 + $0x10] sm:$0xff]   ;;  %v7364_v11 = vld [vmem:[%s11839_s0 + $0x18] sm:$0xff]   ;;  %1137 = vst [vmem:[#allocation2 + $0x8] sm:$0xff] %v7522_v33 }
   0x5   :  { %v7365_v12 = vld [vmem:[%s11839_s0 + $0x20] sm:$0xff]   ;;  %v7366_v13 = vld [vmem:[%s11839_s0 + $0x28] sm:$0xff]   ;;  %v7367_v14 = vld [vmem:[%s11839_s0 + $0x30] sm:$0xff]   ;;  %1138 = vst [vmem:[#allocation2 + $0x10] sm:$0x3] %v7522_v33 }
   0x6   :  { %v7368_v15 = vld [vmem:[%s11839_s0 + $0x38] sm:$0xff]   ;;  %v7369_v16 = vld [vmem:[%s11839_s0 + $0x40] sm:$0xff]   ;;  %v7370_v17 = vld [vmem:[%s11839_s0 + $0x48] sm:$0xff]   ;;  %1139 = vst [vmem:[#allocation2 + $0x18] sm:$0xff] %v7522_v33 }
   0x7   :  { %6648 = vmatpush3.bf16.msra.mxu0 %v7354_v1  ;;  %v7371_v18 = vld [vmem:[%s11839_s0 + $0x50] sm:$0xff]   ;;  %v7372_v19 = vld [vmem:[%s11839_s0 + $0x58] sm:$0xff]   ;;  %v7373_v20 = vld [vmem:[%s11839_s0 + $0x60] sm:$0xff]   ;;  %1140 = vst [vmem:[#allocation2 + $0x20] sm:$0xff] %v7522_v33 }
   0x8   :  { %6649 = vmatprep.subr.bf16.mxu0 %v7355_v2  ;;  %v7374_v21 = vld [vmem:[%s11839_s0 + $0x68] sm:$0xff]   ;;  %v7375_v22 = vld [vmem:[%s11839_s0 + $0x70] sm:$0xff]   ;;  %v7376_v23 = vld [vmem:[%s11839_s0 + $0x78] sm:$0xff]   ;;  %1141 = vst [vmem:[#allocation2 + $0x28] sm:$0x3] %v7522_v33 }
   0x9   :  { %v7377_v24 = vld [vmem:[%s11839_s0 + $0x80] sm:$0xff]   ;;  %v7378_v25 = vld [vmem:[%s11839_s0 + $0x88] sm:$0xff]   ;;  %v7379_v26 = vld [vmem:[%s11839_s0 + $0x90] sm:$0xff]   ;;  %1144 = vst [vmem:[#allocation2 + $0x40] sm:$0x3] %v7522_v33 }
   0xa   :  { %v7380_v27 = vld [vmem:[%s11839_s0 + $0x98] sm:$0xff]   ;;  %v7381_v28 = vld [vmem:[%s11839_s0 + $0xa0] sm:$0xff]   ;;  %v7382_v29 = vld [vmem:[%s11839_s0 + $0xa8] sm:$0xff]   ;;  %1145 = vst [vmem:[#allocation2 + $0x48] sm:$0xff] %v7522_v33 }
   0xb   :  { %6650 = vmatpush3.bf16.msra.mxu0 %v7355_v2  ;;  %v7383_v30 = vld [vmem:[%s11839_s0 + $0xb0] sm:$0xff]   ;;  %v7690_v31 = vld [vmem:[%s11839_s0 + $0xb8] sm:$0xff]   ;;  %v7695_v32 = vld [vmem:[%s11839_s0 + $0xc0] sm:$0xff]   ;;  %1146 = vst [vmem:[#allocation2 + $0x50] sm:$0xff] %v7522_v33 }
   0xc   :  { %6651 = vmatprep.subr.bf16.mxu0 %v7356_v3  ;;  %1147 = vst [vmem:[#allocation2 + $0x58] sm:$0x3] %v7522_v33  ;;  %1148 = vst [vmem:[#allocation2 + $0x60] sm:$0xff] %v7522_v33  ;;  %v7386_v34 = vld [vmem:[%s11839_s0 + $0xc8] sm:$0xff]   ;;  %v7387_v35 = vld [vmem:[%s11839_s0 + $0xd0] sm:$0xff]  }
   0xd   :  { %1149 = vst [vmem:[#allocation2 + $0x68] sm:$0xff] %v7522_v33  ;;  %1150 = vst [vmem:[#allocation2 + $0x70] sm:$0x3] %v7522_v33  ;;  %v7388_v36 = vld [vmem:[%s11839_s0 + $0xd8] sm:$0xff]   ;;  %v7389_v37 = vld [vmem:[%s11839_s0 + $0xe0] sm:$0xff]  }
   0xe   :  { %1151 = vst [vmem:[#allocation2 + $0x78] sm:$0xff] %v7522_v33  ;;  %1152 = vst [vmem:[#allocation2 + $0x80] sm:$0xff] %v7522_v33  ;;  %v7390_v38 = vld [vmem:[%s11839_s0 + $0xe8] sm:$0xff]   ;;  %v7391_v39 = vld [vmem:[%s11839_s0 + $0xf0] sm:$0xff]  }
   0xf   :  { %6652 = vmatpush3.bf16.msra.mxu0 %v7356_v3  ;;  %1153 = vst [vmem:[#allocation2 + $0x88] sm:$0x3] %v7522_v33  ;;  %1154 = vst [vmem:[#allocation2 + $0x90] sm:$0xff] %v7522_v33  ;;  %v7392_v40 = vld [vmem:[%s11839_s0 + $0xf8] sm:$0xff]   ;;  %v7393_v41 = vld [vmem:[%s11840_s4] sm:$0xff]  }
  0x10   :  { %6653 = vmatprep.subr.bf16.mxu0 %v7357_v5  ;;  %1155 = vst [vmem:[#allocation2 + $0x98] sm:$0xff] %v7522_v33  ;;  %1156 = vst [vmem:[#allocation2 + $0xa0] sm:$0x3] %v7522_v33  ;;  %v7394_v43 = vld [vmem:[%s11840_s4 + $0x8] sm:$0xff]   ;;  %v7395_v44 = vld [vmem:[%s11840_s4 + $0x80] sm:$0xff]  }
  0x11   :  { %1157 = vst [vmem:[#allocation2 + $0xa8] sm:$0xff] %v7522_v33  ;;  %1158 = vst [vmem:[#allocation2 + $0xb0] sm:$0xff] %v7522_v33  ;;  %3047 = vmatpush1.bf16.msra.mxu1 %v7395_v44 }
  0x12   :  { %1159 = vst [vmem:[#allocation2 + $0xb8] sm:$0x3] %v7522_v33  ;;  %1160 = vst [vmem:[#allocation2 + $0xc0] sm:$0xff] %v7522_v33  ;;  %3048 = vmatprep.subr.bf16.mxu1 %v11854_v42 }
  0x13   :  { %6654 = vmatpush3.bf16.msra.mxu0 %v7357_v5  ;;  %1161 = vst [vmem:[#allocation2 + $0xc8] sm:$0xff] %v7522_v33  ;;  %1162 = vst [vmem:[#allocation2 + $0xd0] sm:$0x3] %v7522_v33 }
  0x14   :  { %6655 = vmatprep.subr.bf16.mxu0 %v7358_v6  ;;  %1163 = vst [vmem:[#allocation2 + $0xd8] sm:$0xff] %v7522_v33  ;;  %1164 = vst [vmem:[#allocation2 + $0xe0] sm:$0xff] %v7522_v33 }
  0x15   :  { %1165 = vst [vmem:[#allocation2 + $0xe8] sm:$0x3] %v7522_v33  ;;  %1166 = vst [vmem:[#allocation2 + $0xf0] sm:$0xff] %v7522_v33 }
  0x16   :  { %1167 = vst [vmem:[#allocation2 + $0xf8] sm:$0xff] %v7522_v33  ;;  %1168 = vst [vmem:[#allocation2 + $0x100] sm:$0x3] %v7522_v33 }
  0x17   :  { %6656 = vmatpush3.bf16.msra.mxu0 %v7358_v6  ;;  %1169 = vst [vmem:[#allocation2 + $0x108] sm:$0xff] %v7522_v33  ;;  %1170 = vst [vmem:[#allocation2 + $0x110] sm:$0xff] %v7522_v33 }
  0x18   :  { %6657 = vmatprep.subr.bf16.mxu0 %v7359_v7  ;;  %1171 = vst [vmem:[#allocation2 + $0x118] sm:$0x3] %v7522_v33  ;;  %1172 = vst [vmem:[#allocation2 + $0x120] sm:$0xff] %v7522_v33 }
  0x19   :  { %1173 = vst [vmem:[#allocation2 + $0x128] sm:$0xff] %v7522_v33  ;;  %1174 = vst [vmem:[#allocation2 + $0x130] sm:$0x3] %v7522_v33 }
  0x1a   :  { %1175 = vst [vmem:[#allocation2 + $0x138] sm:$0xff] %v7522_v33  ;;  %1176 = vst [vmem:[#allocation2 + $0x140] sm:$0xff] %v7522_v33 }
  0x1b   :  { %6658 = vmatpush3.bf16.msra.mxu0 %v7359_v7  ;;  %1177 = vst [vmem:[#allocation2 + $0x148] sm:$0x3] %v7522_v33  ;;  %1178 = vst [vmem:[#allocation2 + $0x150] sm:$0xff] %v7522_v33 }
  0x1c   :  { %6659 = vmatprep.subr.bf16.mxu0 %v7360_v8  ;;  %1179 = vst [vmem:[#allocation2 + $0x158] sm:$0xff] %v7522_v33  ;;  %1180 = vst [vmem:[#allocation2 + $0x160] sm:$0x3] %v7522_v33 }
  0x1d   :  { %1181 = vst [vmem:[#allocation2 + $0x168] sm:$0xff] %v7522_v33  ;;  %1182 = vst [vmem:[#allocation2 + $0x170] sm:$0xff] %v7522_v33 }
  0x1e   :  { %1183 = vst [vmem:[#allocation2 + $0x178] sm:$0x3] %v7522_v33  ;;  %1184 = vst [vmem:[#allocation2 + $0x180] sm:$0xff] %v7522_v33 }
  0x1f   :  { %6660 = vmatpush3.bf16.msra.mxu0 %v7360_v8  ;;  %1185 = vst [vmem:[#allocation2 + $0x188] sm:$0xff] %v7522_v33  ;;  %1186 = vst [vmem:[#allocation2 + $0x190] sm:$0x3] %v7522_v33 }
  0x20   :  { %1187 = vst [vmem:[#allocation2 + $0x198] sm:$0xff] %v7522_v33  ;;  %1188 = vst [vmem:[#allocation2 + $0x1a0] sm:$0xff] %v7522_v33  ;;  %2757 = vmatprep.subr.bf16.mxu0 %v11854_v42 }
  0x21   :  { %1189 = vst [vmem:[#allocation2 + $0x1a8] sm:$0x3] %v7522_v33  ;;  %1190 = vst [vmem:[#allocation2 + $0x1b0] sm:$0xff] %v7522_v33 }
  0x22   :  { %6662 = vmatmul.mubr.bf16.vlgmr.msra.gmra.mrb[0].mxu0 %v7362_v9  ;;  %1191 = vst [vmem:[#allocation2 + $0x1b8] sm:$0xff] %v7522_v33  ;;  %1192 = vst [vmem:[#allocation2 + $0x1c0] sm:$0x3] %v7522_v33 }
  0x23   :  { %6665 = vmatprep.mubr.bf16.mxu0 %v7363_v10  ;;  %1193 = vst [vmem:[#allocation2 + $0x1c8] sm:$0xff] %v7522_v33  ;;  %1194 = vst [vmem:[#allocation2 + $0x1d0] sm:$0xff] %v7522_v33  ;;  %2758 = vmatpush1.bf16.msra.mxu0 %v7393_v41 }
  0x24   :  { %1195 = vst [vmem:[#allocation2 + $0x1d8] sm:$0x3] %v7522_v33  ;;  %1196 = vst [vmem:[#allocation2 + $0x1e0] sm:$0xff] %v7522_v33  ;;  %2759 = vmatprep.subr.bf16.mxu0 %v11854_v42 }
  0x25   :  { %1197 = vst [vmem:[#allocation2 + $0x1e8] sm:$0xff] %v7522_v33  ;;  %1198 = vst [vmem:[#allocation2 + $0x1f0] sm:$0x3] %v7522_v33 }
  0x26   :  { %1199 = vst [vmem:[#allocation2 + $0x1f8] sm:$0xff] %v7522_v33  ;;  %1200 = vst [vmem:[#allocation2 + $0x200] sm:$0xff] %v7522_v33 }
  0x27   :  { %1201 = vst [vmem:[#allocation2 + $0x208] sm:$0x3] %v7522_v33  ;;  %1202 = vst [vmem:[#allocation2 + $0x210] sm:$0xff] %v7522_v33  ;;  %2760 = vmatpush1.bf16.msra.mxu0 %v7394_v43 }
  0x28   :  { %1203 = vst [vmem:[#allocation2 + $0x218] sm:$0xff] %v7522_v33  ;;  %1204 = vst [vmem:[#allocation2 + $0x220] sm:$0x3] %v7522_v33  ;;  %2761 = vmatprep.subr.bf16.mxu0 %v11854_v42 }
  0x29   :  { %1205 = vst [vmem:[#allocation2 + $0x228] sm:$0xff] %v7522_v33  ;;  %1206 = vst [vmem:[#allocation2 + $0x230] sm:$0xff] %v7522_v33 }
  0x2a   :  { %6666 = vmatmul.mubr.bf16.gmra.mrb[4].mxu0 %v7364_v11  ;;  %1207 = vst [vmem:[#allocation2 + $0x238] sm:$0x3] %v7522_v33  ;;  %1208 = vst [vmem:[#allocation2 + $0x240] sm:$0xff] %v7522_v33 }
  0x2b   :  { %6669 = vmatprep.mubr.bf16.mxu0 %v7365_v12  ;;  %1209 = vst [vmem:[#allocation2 + $0x248] sm:$0xff] %v7522_v33  ;;  %1210 = vst [vmem:[#allocation2 + $0x250] sm:$0x3] %v7522_v33 }
  0x2c   :  { %1211 = vst [vmem:[#allocation2 + $0x258] sm:$0xff] %v7522_v33  ;;  %1212 = vst [vmem:[#allocation2 + $0x260] sm:$0xff] %v7522_v33 }
  0x2d   :  { %1213 = vst [vmem:[#allocation2 + $0x268] sm:$0x3] %v7522_v33  ;;  %1214 = vst [vmem:[#allocation2 + $0x270] sm:$0xff] %v7522_v33 }
  0x2e   :  { %1215 = vst [vmem:[#allocation2 + $0x278] sm:$0xff] %v7522_v33  ;;  %1216 = vst [vmem:[#allocation2 + $0x280] sm:$0x3] %v7522_v33 }
  0x2f   :  { %1217 = vst [vmem:[#allocation2 + $0x288] sm:$0xff] %v7522_v33  ;;  %1218 = vst [vmem:[#allocation2 + $0x290] sm:$0xff] %v7522_v33 }
  0x30   :  { %1219 = vst [vmem:[#allocation2 + $0x298] sm:$0x3] %v7522_v33  ;;  %1220 = vst [vmem:[#allocation2 + $0x2a0] sm:$0xff] %v7522_v33 }
  0x31   :  { %1221 = vst [vmem:[#allocation2 + $0x2a8] sm:$0xff] %v7522_v33  ;;  %1222 = vst [vmem:[#allocation2 + $0x2b0] sm:$0x3] %v7522_v33 }
  0x32   :  { %6670 = vmatmul.mubr.bf16.gmra.mrb[8].mxu0 %v7366_v13  ;;  %1223 = vst [vmem:[#allocation2 + $0x2b8] sm:$0xff] %v7522_v33  ;;  %1224 = vst [vmem:[#allocation2 + $0x2c0] sm:$0xff] %v7522_v33 }
  0x33   :  { %6673 = vmatprep.mubr.bf16.mxu0 %v7367_v14  ;;  %1225 = vst [vmem:[#allocation2 + $0x2c8] sm:$0x3] %v7522_v33  ;;  %1226 = vst [vmem:[#allocation2 + $0x2d0] sm:$0xff] %v7522_v33 }
  0x34   :  { %1227 = vst [vmem:[#allocation2 + $0x2d8] sm:$0xff] %v7522_v33  ;;  %1228 = vst [vmem:[#allocation2 + $0x2e0] sm:$0x3] %v7522_v33 }
  0x35   :  { %1229 = vst [vmem:[#allocation2 + $0x2e8] sm:$0xff] %v7522_v33  ;;  %1230 = vst [vmem:[#allocation2 + $0x2f0] sm:$0xff] %v7522_v33 }
  0x36   :  { %1231 = vst [vmem:[#allocation2 + $0x2f8] sm:$0x3] %v7522_v33  ;;  %1232 = vst [vmem:[#allocation2 + $0x300] sm:$0xff] %v7522_v33 }
  0x37   :  { %1233 = vst [vmem:[#allocation2 + $0x308] sm:$0xff] %v7522_v33  ;;  %1234 = vst [vmem:[#allocation2 + $0x310] sm:$0x3] %v7522_v33 }
  0x38   :  { %1235 = vst [vmem:[#allocation2 + $0x318] sm:$0xff] %v7522_v33  ;;  %1236 = vst [vmem:[#allocation2 + $0x320] sm:$0xff] %v7522_v33 }
  0x39   :  { %1237 = vst [vmem:[#allocation2 + $0x328] sm:$0x3] %v7522_v33  ;;  %1238 = vst [vmem:[#allocation2 + $0x330] sm:$0xff] %v7522_v33 }
  0x3a   :  { %6674 = vmatmul.mubr.bf16.gmra.mrb[12].mxu0 %v7368_v15  ;;  %1239 = vst [vmem:[#allocation2 + $0x338] sm:$0xff] %v7522_v33  ;;  %1240 = vst [vmem:[#allocation2 + $0x340] sm:$0x3] %v7522_v33 }
  0x3b   :  { %6677 = vmatprep.mubr.bf16.mxu0 %v7369_v16  ;;  %1241 = vst [vmem:[#allocation2 + $0x348] sm:$0xff] %v7522_v33  ;;  %1242 = vst [vmem:[#allocation2 + $0x350] sm:$0xff] %v7522_v33 }
  0x3c   :  { %1243 = vst [vmem:[#allocation2 + $0x358] sm:$0x3] %v7522_v33 }
  0x42   :  { %6678 = vmatmul.mubr.bf16.gmra.mrb[16].mxu0 %v7370_v17 }
  0x43   :  { %6681 = vmatprep.mubr.bf16.mxu0 %v7371_v18 }
  0x4a   :  { %6682 = vmatmul.mubr.bf16.gmra.mrb[20].mxu0 %v7372_v19 }
  0x4b   :  { %6685 = vmatprep.mubr.bf16.mxu0 %v7373_v20 }
  0x52   :  { %6686 = vmatmul.mubr.bf16.gmra.mrb[24].mxu0 %v7374_v21 }
  0x53   :  { %6689 = vmatprep.mubr.bf16.mxu0 %v7375_v22 }
  0x5a   :  { %6690 = vmatmul.mubr.bf16.gmra.mrb[28].mxu0 %v7376_v23 }
  0x5b   :  { %6693 = vmatprep.mubr.bf16.mxu0 %v7377_v24 }
  0x62   :  { %6694 = vmatmul.mubr.bf16.gmra.mrb[32].mxu0 %v7378_v25 }
  0x63   :  { %6697 = vmatprep.mubr.bf16.mxu0 %v7379_v26 }
  0x6a   :  { %6698 = vmatmul.mubr.bf16.gmra.mrb[36].mxu0 %v7380_v27 }
  0x6b   :  { %6701 = vmatprep.mubr.bf16.mxu0 %v7381_v28 }
  0x72   :  { %6702 = vmatmul.mubr.bf16.gmra.mrb[40].mxu0 %v7382_v29 }
  0x73   :  { %6705 = vmatprep.mubr.bf16.mxu0 %v7383_v30 }
  0x7a   :  { %6706 = vmatmul.mubr.bf16.gmra.mrb[44].mxu0 %v7690_v31 }
  0x7b   :  { %6709 = vmatprep.mubr.bf16.mxu0 %v7695_v32 }
  0x82   :  { %6710 = vmatmul.mubr.bf16.gmra.mrb[48].mxu0 %v7386_v34 }
  0x83   :  { %6713 = vmatprep.mubr.bf16.mxu0 %v7387_v35 }
  0x8a   :  { %6714 = vmatmul.mubr.bf16.gmra.mrb[52].mxu0 %v7388_v36 }
  0x8b   :  { %6717 = vmatprep.mubr.bf16.mxu0 %v7389_v37 }
  0x92   :  { %6718 = vmatmul.mubr.bf16.gmra.mrb[56].mxu0 %v7390_v38 }
  0x93   :  { %6721 = vmatprep.mubr.bf16.mxu0 %v7391_v39 }
  0x9a   :  { %6722 = vmatmul.mubr.bf16.gmra.mrb[60].mxu0 %v7392_v40 }
  0xf5   :  { %v7844_v45 = vpop.f32.mrb[0].mxu0 }
  0xf6   :  { %v7846_v46 = vpop.f32.mrb[1].mxu0  ;;  %v792_v52 = vmul.f32 %v7844_v45, %v7844_v45 }
  0xf7   :  { %v7848_v47 = vpop.f32.mrb[2].mxu0  ;;  %v790_v49 = vmul.f32 %v7846_v46, %v7846_v46 }
  0xf8   :  { %v7850_v48 = vpop.f32.mrb[3].mxu0  ;;  %v793_v55 = vmul.f32 %v7848_v47, %v7848_v47 }
  0xf9   :  { %v720_v50 = vadd.f32 %v7850_v48, %v7846_v46  ;;  %v791_v51 = vmul.f32 %v7850_v48, %v7850_v48 }
  0xfb   :  { %v721_v53 = vadd.f32 %v7844_v45, %v720_v50  ;;  %v854_v54 = vadd.f32 %v791_v51, %v790_v49  ;;  %v7396_v49 = vld [vmem:[%s11840_s4 + $0x10] sm:$0xff]  }
  0xfc   :  { %2762 = vmatpush1.bf16.msra.mxu0 %v7396_v49  ;;  %v7403_v49 = vld [vmem:[%s11840_s4 + $0xa0] sm:$0xff]  }
  0xfd   :  { %v855_v56 = vadd.f32 %v854_v54, %v792_v52  ;;  %v7863_v57 = vpop.f32.mrb[4].mxu0  ;;  %v722_v58 = vadd.f32 %v7848_v47, %v721_v53  ;;  %2763 = vmatprep.subr.bf16.mxu0 %v11854_v42 }
  0xfe   :  { %v7866_v59 = vpop.f32.mrb[5].mxu0  ;;  %v796_v4 = vmul.f32 %v7863_v57, %v7863_v57 }
  0xff   :  { %v723_v60 = vadd.f32 %v722_v58, %v7866_v59  ;;  %v794_v61 = vmul.f32 %v7866_v59, %v7866_v59  ;;  %v856_v62 = vadd.f32 %v855_v56, %v793_v55  ;;  %v7871_v63 = vpop.f32.mrb[6].mxu0 }
 0x100   :  { %v7873_v0 = vpop.f32.mrb[7].mxu0  ;;  %v797_v7 = vmul.f32 %v7871_v63, %v7871_v63 }
 0x101   :  { %v857_v1 = vadd.f32 %v856_v62, %v794_v61  ;;  %v724_v2 = vadd.f32 %v723_v60, %v7873_v0  ;;  %v795_v3 = vmul.f32 %v7873_v0, %v7873_v0  ;;  %v7398_v60 = vld [vmem:[%s11840_s4 + $0x18] sm:$0xff]  }
 0x102   :  { %2764 = vmatpush1.bf16.msra.mxu0 %v7398_v60 }
 0x103   :  { %v725_v5 = vadd.f32 %v7863_v57, %v724_v2  ;;  %v858_v6 = vadd.f32 %v857_v1, %v795_v3  ;;  %v7397_v2 = vld [vmem:[%s11840_s4 + $0x88] sm:$0xff]   ;;  %2765 = vmatprep.subr.bf16.mxu0 %v11854_v42 }
 0x104   :  { %3049 = vmatpush1.bf16.msra.mxu1 %v7397_v2 }
 0x105   :  { %v859_v8 = vadd.f32 %v858_v6, %v796_v4  ;;  %v7883_v9 = vpop.f32.mrb[8].mxu0  ;;  %v726_v10 = vadd.f32 %v7871_v63, %v725_v5  ;;  %3050 = vmatprep.subr.bf16.mxu1 %v11854_v42 }
 0x106   :  { %v7886_v11 = vpop.f32.mrb[9].mxu0  ;;  %v800_v20 = vmul.f32 %v7883_v9, %v7883_v9 }
 0x107   :  { %v727_v12 = vadd.f32 %v726_v10, %v7886_v11  ;;  %v798_v13 = vmul.f32 %v7886_v11, %v7886_v11  ;;  %v860_v14 = vadd.f32 %v859_v8, %v797_v7  ;;  %v7891_v15 = vpop.f32.mrb[10].mxu0  ;;  %v7400_v8 = vld [vmem:[%s11840_s4 + $0x20] sm:$0xff]  }
 0x108   :  { %v7893_v16 = vpop.f32.mrb[11].mxu0  ;;  %v801_v23 = vmul.f32 %v7891_v15, %v7891_v15  ;;  %2766 = vmatpush1.bf16.msra.mxu0 %v7400_v8 }
 0x109   :  { %v861_v17 = vadd.f32 %v860_v14, %v798_v13  ;;  %v728_v18 = vadd.f32 %v727_v12, %v7893_v16  ;;  %v799_v19 = vmul.f32 %v7893_v16, %v7893_v16  ;;  %2767 = vmatprep.subr.bf16.mxu0 %v11854_v42 }
 0x10b   :  { %v729_v21 = vadd.f32 %v7883_v9, %v728_v18  ;;  %v862_v22 = vadd.f32 %v861_v17, %v799_v19  ;;  %v7399_v18 = vld [vmem:[%s11840_s4 + $0x90] sm:$0xff]  }
 0x10c   :  { %3051 = vmatpush1.bf16.msra.mxu1 %v7399_v18 }
 0x10d   :  { %v863_v24 = vadd.f32 %v862_v22, %v800_v20  ;;  %v7903_v25 = vpop.f32.mrb[12].mxu0  ;;  %v730_v26 = vadd.f32 %v7891_v15, %v729_v21  ;;  %v7402_v22 = vld [vmem:[%s11840_s4 + $0x28] sm:$0xff]   ;;  %3052 = vmatprep.subr.bf16.mxu1 %v11854_v42 }
 0x10e   :  { %v7906_v27 = vpop.f32.mrb[13].mxu0  ;;  %v804_v36 = vmul.f32 %v7903_v25, %v7903_v25  ;;  %2768 = vmatpush1.bf16.msra.mxu0 %v7402_v22 }
 0x10f   :  { %v731_v28 = vadd.f32 %v730_v26, %v7906_v27  ;;  %v802_v29 = vmul.f32 %v7906_v27, %v7906_v27  ;;  %v864_v30 = vadd.f32 %v863_v24, %v801_v23  ;;  %v7911_v31 = vpop.f32.mrb[14].mxu0  ;;  %2769 = vmatprep.subr.bf16.mxu0 %v11854_v42 }
 0x110   :  { %v7913_v32 = vpop.f32.mrb[15].mxu0  ;;  %v805_v39 = vmul.f32 %v7911_v31, %v7911_v31 }
 0x111   :  { %v865_v33 = vadd.f32 %v864_v30, %v802_v29  ;;  %v732_v34 = vadd.f32 %v731_v28, %v7913_v32  ;;  %v803_v35 = vmul.f32 %v7913_v32, %v7913_v32  ;;  %v7401_v28 = vld [vmem:[%s11840_s4 + $0x98] sm:$0xff]  }
 0x112   :  { %3053 = vmatpush1.bf16.msra.mxu1 %v7401_v28 }
 0x113   :  { %v733_v37 = vadd.f32 %v7903_v25, %v732_v34  ;;  %v866_v38 = vadd.f32 %v865_v33, %v803_v35  ;;  %3054 = vmatprep.subr.bf16.mxu1 %v11854_v42 }
 0x115   :  { %v867_v40 = vadd.f32 %v866_v38, %v804_v36  ;;  %v7923_v41 = vpop.f32.mrb[16].mxu0  ;;  %v734_v43 = vadd.f32 %v7911_v31, %v733_v37  ;;  %v7404_v36 = vld [vmem:[%s11840_s4 + $0x30] sm:$0xff]  }
 0x116   :  { %v7926_v44 = vpop.f32.mrb[17].mxu0  ;;  %v808_v61 = vmul.f32 %v7923_v41, %v7923_v41  ;;  %2770 = vmatpush1.bf16.msra.mxu0 %v7404_v36  ;;  %3055 = vmatpush1.bf16.msra.mxu1 %v7403_v49 }
 0x117   :  { %v735_v50 = vadd.f32 %v734_v43, %v7926_v44  ;;  %v806_v51 = vmul.f32 %v7926_v44, %v7926_v44  ;;  %v868_v52 = vadd.f32 %v867_v40, %v805_v39  ;;  %v7934_v53 = vpop.f32.mrb[18].mxu0  ;;  %2771 = vmatprep.subr.bf16.mxu0 %v11854_v42  ;;  %3056 = vmatprep.subr.bf16.mxu1 %v11854_v42 }
 0x118   :  { %v7936_v54 = vpop.f32.mrb[19].mxu0  ;;  %v809_v3 = vmul.f32 %v7934_v53, %v7934_v53 }
 0x119   :  { %v869_v55 = vadd.f32 %v868_v52, %v806_v51  ;;  %v736_v56 = vadd.f32 %v735_v50, %v7936_v54  ;;  %v807_v58 = vmul.f32 %v7936_v54, %v7936_v54 }
 0x11b   :  { %v737_v62 = vadd.f32 %v7923_v41, %v736_v56  ;;  %v870_v1 = vadd.f32 %v869_v55, %v807_v58  ;;  %v7406_v55 = vld [vmem:[%s11840_s4 + $0x38] sm:$0xff]  }
 0x11c   :  { %2772 = vmatpush1.bf16.msra.mxu0 %v7406_v55 }
 0x11d   :  { %v871_v4 = vadd.f32 %v870_v1, %v808_v61  ;;  %v7953_v5 = vpop.f32.mrb[20].mxu0  ;;  %v738_v6 = vadd.f32 %v7934_v53, %v737_v62  ;;  %v7405_v61 = vld [vmem:[%s11840_s4 + $0xa8] sm:$0xff]   ;;  %2773 = vmatprep.subr.bf16.mxu0 %v11854_v42 }
 0x11e   :  { %v7957_v7 = vpop.f32.mrb[21].mxu0  ;;  %v812_v23 = vmul.f32 %v7953_v5, %v7953_v5  ;;  %3057 = vmatpush1.bf16.msra.mxu1 %v7405_v61 }
 0x11f   :  { %v739_v10 = vadd.f32 %v738_v6, %v7957_v7  ;;  %v810_v12 = vmul.f32 %v7957_v7, %v7957_v7  ;;  %v872_v13 = vadd.f32 %v871_v4, %v809_v3  ;;  %v7965_v14 = vpop.f32.mrb[22].mxu0  ;;  %v7408_v6 = vld [vmem:[%s11840_s4 + $0x40] sm:$0xff]   ;;  %3058 = vmatprep.subr.bf16.mxu1 %v11854_v42 }
 0x120   :  { %v7968_v17 = vpop.f32.mrb[23].mxu0  ;;  %v813_v29 = vmul.f32 %v7965_v14, %v7965_v14  ;;  %2774 = vmatpush1.bf16.msra.mxu0 %v7408_v6 }
 0x121   :  { %v873_v19 = vadd.f32 %v872_v13, %v810_v12  ;;  %v740_v20 = vadd.f32 %v739_v10, %v7968_v17  ;;  %v811_v21 = vmul.f32 %v7968_v17, %v7968_v17  ;;  %2775 = vmatprep.subr.bf16.mxu0 %v11854_v42 }
 0x123   :  { %v741_v24 = vadd.f32 %v7953_v5, %v740_v20  ;;  %v874_v26 = vadd.f32 %v873_v19, %v811_v21  ;;  %v7407_v19 = vld [vmem:[%s11840_s4 + $0xb0] sm:$0xff]  }
 0x124   :  { %3059 = vmatpush1.bf16.msra.mxu1 %v7407_v19 }
 0x125   :  { %v875_v30 = vadd.f32 %v874_v26, %v812_v23  ;;  %v7989_v33 = vpop.f32.mrb[24].mxu0  ;;  %v742_v34 = vadd.f32 %v7965_v14, %v741_v24  ;;  %v7410_v23 = vld [vmem:[%s11840_s4 + $0x48] sm:$0xff]   ;;  %3060 = vmatprep.subr.bf16.mxu1 %v11854_v42 }
 0x126   :  { %v7993_v35 = vpop.f32.mrb[25].mxu0  ;;  %v816_v56 = vmul.f32 %v7989_v33, %v7989_v33  ;;  %2776 = vmatpush1.bf16.msra.mxu0 %v7410_v23 }
 0x127   :  { %v743_v37 = vadd.f32 %v742_v34, %v7993_v35  ;;  %v814_v38 = vmul.f32 %v7993_v35, %v7993_v35  ;;  %v876_v39 = vadd.f32 %v875_v30, %v813_v29  ;;  %v8001_v40 = vpop.f32.mrb[26].mxu0  ;;  %v7409_v29 = vld [vmem:[%s11840_s4 + $0xb8] sm:$0xff]   ;;  %2777 = vmatprep.subr.bf16.mxu0 %v11854_v42 }
 0x128   :  { %v8004_v43 = vpop.f32.mrb[27].mxu0  ;;  %v817_v62 = vmul.f32 %v8001_v40, %v8001_v40  ;;  %3061 = vmatpush1.bf16.msra.mxu1 %v7409_v29 }
 0x129   :  { %v877_v50 = vadd.f32 %v876_v39, %v814_v38  ;;  %v744_v51 = vadd.f32 %v743_v37, %v8004_v43  ;;  %v815_v52 = vmul.f32 %v8004_v43, %v8004_v43  ;;  %v7412_v39 = vld [vmem:[%s11840_s4 + $0x50] sm:$0xff]   ;;  %3062 = vmatprep.subr.bf16.mxu1 %v11854_v42 }
 0x12a   :  { %2778 = vmatpush1.bf16.msra.mxu0 %v7412_v39 }
 0x12b   :  { %v745_v58 = vadd.f32 %v7989_v33, %v744_v51  ;;  %v878_v60 = vadd.f32 %v877_v50, %v815_v52  ;;  %2779 = vmatprep.subr.bf16.mxu0 %v11854_v42 }
 0x12d   :  { %v879_v1 = vadd.f32 %v878_v60, %v816_v56  ;;  %v8025_v2 = vpop.f32.mrb[28].mxu0  ;;  %v746_v3 = vadd.f32 %v8001_v40, %v745_v58  ;;  %v7411_v56 = vld [vmem:[%s11840_s4 + $0xc0] sm:$0xff]  }
 0x12e   :  { %v8029_v4 = vpop.f32.mrb[29].mxu0  ;;  %v820_v24 = vmul.f32 %v8025_v2, %v8025_v2  ;;  %3063 = vmatpush1.bf16.msra.mxu1 %v7411_v56 }
 0x12f   :  { %v747_v8 = vadd.f32 %v746_v3, %v8029_v4  ;;  %v818_v10 = vmul.f32 %v8029_v4, %v8029_v4  ;;  %v880_v12 = vadd.f32 %v879_v1, %v817_v62  ;;  %v8037_v13 = vpop.f32.mrb[30].mxu0  ;;  %v7414_v62 = vld [vmem:[%s11840_s4 + $0x58] sm:$0xff]   ;;  %3064 = vmatprep.subr.bf16.mxu1 %v11854_v42 }
 0x130   :  { %v8040_v18 = vpop.f32.mrb[31].mxu0  ;;  %v821_v30 = vmul.f32 %v8037_v13, %v8037_v13  ;;  %2780 = vmatpush1.bf16.msra.mxu0 %v7414_v62 }
 0x131   :  { %v881_v20 = vadd.f32 %v880_v12, %v818_v10  ;;  %v748_v21 = vadd.f32 %v747_v8, %v8040_v18  ;;  %v819_v22 = vmul.f32 %v8040_v18, %v8040_v18  ;;  %v7413_v8 = vld [vmem:[%s11840_s4 + $0xc8] sm:$0xff]   ;;  %2781 = vmatprep.subr.bf16.mxu0 %v11854_v42 }
 0x132   :  { %3065 = vmatpush1.bf16.msra.mxu1 %v7413_v8 }
 0x133   :  { %v749_v26 = vadd.f32 %v8025_v2, %v748_v21  ;;  %v882_v28 = vadd.f32 %v881_v20, %v819_v22  ;;  %v7416_v22 = vld [vmem:[%s11840_s4 + $0x60] sm:$0xff]   ;;  %3066 = vmatprep.subr.bf16.mxu1 %v11854_v42 }
 0x134   :  { %2782 = vmatpush1.bf16.msra.mxu0 %v7416_v22 }
 0x135   :  { %v883_v34 = vadd.f32 %v882_v28, %v820_v24  ;;  %v8061_v36 = vpop.f32.mrb[32].mxu0  ;;  %v750_v37 = vadd.f32 %v8037_v13, %v749_v26  ;;  %2783 = vmatprep.subr.bf16.mxu0 %v11854_v42 }
 0x136   :  { %v8065_v38 = vpop.f32.mrb[33].mxu0  ;;  %v824_v1 = vmul.f32 %v8061_v36, %v8061_v36 }
 0x137   :  { %v751_v49 = vadd.f32 %v750_v37, %v8065_v38  ;;  %v822_v50 = vmul.f32 %v8065_v38, %v8065_v38  ;;  %v884_v51 = vadd.f32 %v883_v34, %v821_v30  ;;  %v8073_v52 = vpop.f32.mrb[34].mxu0  ;;  %v7415_v30 = vld [vmem:[%s11840_s4 + $0xd0] sm:$0xff]  }
 0x138   :  { %v8076_v55 = vpop.f32.mrb[35].mxu0  ;;  %v825_v10 = vmul.f32 %v8073_v52, %v8073_v52  ;;  %3067 = vmatpush1.bf16.msra.mxu1 %v7415_v30 }
 0x139   :  { %v885_v58 = vadd.f32 %v884_v51, %v822_v50  ;;  %v752_v60 = vadd.f32 %v751_v49, %v8076_v55  ;;  %v823_v61 = vmul.f32 %v8076_v55, %v8076_v55  ;;  %v7418_v49 = vld [vmem:[%s11840_s4 + $0x68] sm:$0xff]   ;;  %3068 = vmatprep.subr.bf16.mxu1 %v11854_v42 }
 0x13a   :  { %2784 = vmatpush1.bf16.msra.mxu0 %v7418_v49 }
 0x13b   :  { %v753_v3 = vadd.f32 %v8061_v36, %v752_v60  ;;  %v886_v6 = vadd.f32 %v885_v58, %v823_v61  ;;  %v7417_v58 = vld [vmem:[%s11840_s4 + $0xd8] sm:$0xff]   ;;  %2785 = vmatprep.subr.bf16.mxu0 %v11854_v42 }
 0x13c   :  { %3069 = vmatpush1.bf16.msra.mxu1 %v7417_v58 }
 0x13d   :  { %v887_v12 = vadd.f32 %v886_v6, %v824_v1  ;;  %v8097_v19 = vpop.f32.mrb[36].mxu0  ;;  %v754_v20 = vadd.f32 %v8073_v52, %v753_v3  ;;  %v7420_v6 = vld [vmem:[%s11840_s4 + $0x70] sm:$0xff]   ;;  %3070 = vmatprep.subr.bf16.mxu1 %v11854_v42 }
 0x13e   :  { %12026 = vst [vmem:[#allocation3_spill] sm:$0xff] %v8097_v19  ;;  %v8101_v21 = vpop.f32.mrb[37].mxu0  ;;  %v828_v50 = vmul.f32 %v8097_v19, %v8097_v19  ;;  %2786 = vmatpush1.bf16.msra.mxu0 %v7420_v6 }
 0x13f   :  { %v755_v23 = vadd.f32 %v754_v20, %v8101_v21  ;;  %v826_v24 = vmul.f32 %v8101_v21, %v8101_v21  ;;  %v888_v26 = vadd.f32 %v887_v12, %v825_v10  ;;  %v8109_v28 = vpop.f32.mrb[38].mxu0  ;;  %2787 = vmatprep.subr.bf16.mxu0 %v11854_v42 }
 0x140   :  { %12027 = vst [vmem:[#allocation4_spill] sm:$0xff] %v8109_v28  ;;  %v8112_v29 = vpop.f32.mrb[39].mxu0  ;;  %v829_v60 = vmul.f32 %v8109_v28, %v8109_v28 }
 0x141   :  { %v889_v34 = vadd.f32 %v888_v26, %v826_v24  ;;  %v756_v37 = vadd.f32 %v755_v23, %v8112_v29  ;;  %v827_v39 = vmul.f32 %v8112_v29, %v8112_v29  ;;  %v7419_v23 = vld [vmem:[%s11840_s4 + $0xe0] sm:$0xff]  }
 0x142   :  { %3071 = vmatpush1.bf16.msra.mxu1 %v7419_v23  ;;  %v7423_v23 = vld [vmem:[%s11840_s4 + $0xf0] sm:$0xff]  }
 0x143   :  { %v757_v51 = vadd.f32 %v8097_v19, %v756_v37  ;;  %v890_v56 = vadd.f32 %v889_v34, %v827_v39  ;;  %v7422_v34 = vld [vmem:[%s11840_s4 + $0x78] sm:$0xff]   ;;  %3072 = vmatprep.subr.bf16.mxu1 %v11854_v42 }
 0x144   :  { %2788 = vmatpush1.bf16.msra.mxu0 %v7422_v34 }
 0x145   :  { %v891_v61 = vadd.f32 %v890_v56, %v828_v50  ;;  %v8133_v62 = vpop.f32.mrb[40].mxu0  ;;  %v758_v1 = vadd.f32 %v8109_v28, %v757_v51  ;;  %v1373_v50 = vld [vmem:[#allocation2 + $0x1] sm:$0xff]  ;;  %v1374_v51 = vld [vmem:[#allocation2 + $0x9] sm:$0xff] }
 0x146   :  { %12028 = vst [vmem:[#allocation5_spill] sm:$0xff] %v8133_v62  ;;  %v8137_v3 = vpop.f32.mrb[41].mxu0  ;;  %v832_v37 = vmul.f32 %v8133_v62, %v8133_v62  ;;  %v7421_v56 = vld [vmem:[%s11840_s4 + $0xe8] sm:$0xff]   ;;  %v1887_v58 = vpack.c.bf16 %v1374_v51, %v1373_v50  ;;  %v7424_v51 = vld [vmem:[%s11840_s4 + $0xf8] sm:$0xff]  }
 0x147   :  { %12029 = vst [vmem:[#allocation6_spill] sm:$0xff] %v8137_v3  ;;  %v759_v8 = vadd.f32 %v758_v1, %v8137_v3  ;;  %v830_v10 = vmul.f32 %v8137_v3, %v8137_v3  ;;  %v892_v12 = vadd.f32 %v891_v61, %v829_v60  ;;  %v8145_v20 = vpop.f32.mrb[42].mxu0  ;;  %3073 = vmatpush1.bf16.msra.mxu1 %v7421_v56 }
 0x148   :  { %12030 = vst [vmem:[#allocation7_spill] sm:$0xff] %v8145_v20  ;;  %v8148_v22 = vpop.f32.mrb[43].mxu0  ;;  %v833_v60 = vmul.f32 %v8145_v20, %v8145_v20  ;;  %2789 = vmatprep.mubr.bf16.mxu0 %v1887_v58  ;;  %3074 = vmatprep.subr.bf16.mxu1 %v11854_v42 }
 0x149   :  { %12031 = vst [vmem:[#allocation8_spill] sm:$0xff] %v8148_v22  ;;  %v893_v24 = vadd.f32 %v892_v12, %v830_v10  ;;  %v760_v26 = vadd.f32 %v759_v8, %v8148_v22  ;;  %v831_v30 = vmul.f32 %v8148_v22, %v8148_v22  ;;  %v7487_v8 = vld [vmem:[#allocation2 + $0x30] sm:$0xff] }
 0x14a   :  { %v8172_v10 = vpack.c.bf16 %v7487_v8, %v7487_v8 }
 0x14b   :  { %v761_v39 = vadd.f32 %v8133_v62, %v760_v26  ;;  %v894_v49 = vadd.f32 %v893_v24, %v831_v30  ;;  %3075 = vmatpush1.bf16.msra.mxu1 %v7423_v23 }
 0x14c   :  { %12033 = vst [vmem:[#allocation10_spill] sm:$0xff] %v8172_v10  ;;  %2790 = vmatmul.mubr.bf16.vlgmr.msra.gmra.mrb[64].mxu0 %v8172_v10  ;;  %3076 = vmatprep.subr.bf16.mxu1 %v11854_v42 }
 0x14d   :  { %v895_v61 = vadd.f32 %v894_v49, %v832_v37  ;;  %v8169_v1 = vpop.f32.mrb[44].mxu0  ;;  %v762_v6 = vadd.f32 %v8145_v20, %v761_v39 }
 0x14e   :  { %12032 = vst [vmem:[#allocation9_spill] sm:$0xff] %v8169_v1  ;;  %v8174_v12 = vpop.f32.mrb[45].mxu0  ;;  %v836_v56 = vmul.f32 %v8169_v1, %v8169_v1 }
 0x14f   :  { %12034 = vst [vmem:[#allocation11_spill] sm:$0xff] %v8174_v12  ;;  %v763_v24 = vadd.f32 %v762_v6, %v8174_v12  ;;  %v834_v26 = vmul.f32 %v8174_v12, %v8174_v12  ;;  %v896_v30 = vadd.f32 %v895_v61, %v833_v60  ;;  %v8182_v34 = vpop.f32.mrb[46].mxu0  ;;  %3077 = vmatpush1.bf16.msra.mxu1 %v7424_v51 }
 0x150   :  { %12035 = vst [vmem:[#allocation12_spill] sm:$0xff] %v8182_v34  ;;  %v8186_v37 = vpop.f32.mrb[47].mxu0  ;;  %v837_v61 = vmul.f32 %v8182_v34, %v8182_v34  ;;  %3335 = vmatprep.subr.bf16.mxu1 %v11854_v42 }
 0x151   :  { %12036 = vst [vmem:[#allocation13_spill] sm:$0xff] %v8186_v37  ;;  %v897_v39 = vadd.f32 %v896_v30, %v834_v26  ;;  %v764_v49 = vadd.f32 %v763_v24, %v8186_v37  ;;  %v835_v50 = vmul.f32 %v8186_v37, %v8186_v37 }
 0x153   :  { %v765_v58 = vadd.f32 %v8169_v1, %v764_v49  ;;  %v898_v60 = vadd.f32 %v897_v39, %v835_v50 }
 0x155   :  { %v899_v6 = vadd.f32 %v898_v60, %v836_v56  ;;  %v8200_v8 = vpop.f32.mrb[48].mxu0  ;;  %v766_v23 = vadd.f32 %v8182_v34, %v765_v58 }
 0x156   :  { %12037 = vst [vmem:[#allocation14_spill] sm:$0xff] %v8200_v8  ;;  %v8203_v24 = vpop.f32.mrb[49].mxu0  ;;  %v840_v51 = vmul.f32 %v8200_v8, %v8200_v8 }
 0x157   :  { %12038 = vst [vmem:[#allocation15_spill] sm:$0xff] %v8203_v24  ;;  %v767_v26 = vadd.f32 %v766_v23, %v8203_v24  ;;  %v838_v30 = vmul.f32 %v8203_v24, %v8203_v24  ;;  %v900_v49 = vadd.f32 %v899_v6, %v837_v61  ;;  %v8208_v39 = vpop.f32.mrb[50].mxu0 }
 0x158   :  { %12039 = vst [vmem:[#allocation16_spill] sm:$0xff] %v8208_v39  ;;  %v8211_v50 = vpop.f32.mrb[51].mxu0  ;;  %v841_v61 = vmul.f32 %v8208_v39, %v8208_v39 }
 0x159   :  { %12040 = vst [vmem:[#allocation17_spill] sm:$0xff] %v8211_v50  ;;  %v901_v56 = vadd.f32 %v900_v49, %v838_v30  ;;  %v768_v60 = vadd.f32 %v767_v26, %v8211_v50  ;;  %v839_v58 = vmul.f32 %v8211_v50, %v8211_v50 }
 0x15b   :  { %v769_v23 = vadd.f32 %v8200_v8, %v768_v60  ;;  %v902_v10 = vadd.f32 %v901_v56, %v839_v58 }
 0x15d   :  { %v903_v6 = vadd.f32 %v902_v10, %v840_v51  ;;  %v8221_v24 = vpop.f32.mrb[52].mxu0  ;;  %v770_v42 = vadd.f32 %v8208_v39, %v769_v23 }
 0x15e   :  { %12041 = vst [vmem:[#allocation18_spill] sm:$0xff] %v8221_v24  ;;  %v8224_v30 = vpop.f32.mrb[53].mxu0  ;;  %v844_v51 = vmul.f32 %v8221_v24, %v8221_v24 }
 0x15f   :  { %12042 = vst [vmem:[#allocation19_spill] sm:$0xff] %v8224_v30  ;;  %v771_v26 = vadd.f32 %v770_v42, %v8224_v30  ;;  %v842_v49 = vmul.f32 %v8224_v30, %v8224_v30  ;;  %v904_v50 = vadd.f32 %v903_v6, %v841_v61  ;;  %v8229_v34 = vpop.f32.mrb[54].mxu0 }
 0x160   :  { %12043 = vst [vmem:[#allocation20_spill] sm:$0xff] %v8229_v34  ;;  %v8231_v60 = vpop.f32.mrb[55].mxu0  ;;  %v845_v30 = vmul.f32 %v8229_v34, %v8229_v34 }
 0x161   :  { %12044 = vst [vmem:[#allocation21_spill] sm:$0xff] %v8231_v60  ;;  %v905_v56 = vadd.f32 %v904_v50, %v842_v49  ;;  %v772_v58 = vadd.f32 %v771_v26, %v8231_v60  ;;  %v843_v10 = vmul.f32 %v8231_v60, %v8231_v60 }
 0x163   :  { %v773_v23 = vadd.f32 %v8221_v24, %v772_v58  ;;  %v906_v42 = vadd.f32 %v905_v56, %v843_v10 }
 0x165   :  { %v907_v61 = vadd.f32 %v906_v42, %v844_v51  ;;  %v8241_v6 = vpop.f32.mrb[56].mxu0  ;;  %v774_v39 = vadd.f32 %v8229_v34, %v773_v23 }
 0x166   :  { %12045 = vst [vmem:[#allocation22_spill] sm:$0xff] %v8241_v6  ;;  %v8244_v50 = vpop.f32.mrb[57].mxu0  ;;  %v848_v23 = vmul.f32 %v8241_v6, %v8241_v6 }
 0x167   :  { %12046 = vst [vmem:[#allocation23_spill] sm:$0xff] %v8244_v50  ;;  %v775_v26 = vadd.f32 %v774_v39, %v8244_v50  ;;  %v846_v49 = vmul.f32 %v8244_v50, %v8244_v50  ;;  %v908_v60 = vadd.f32 %v907_v61, %v845_v30  ;;  %v8249_v8 = vpop.f32.mrb[58].mxu0 }
 0x168   :  { %12047 = vst [vmem:[#allocation24_spill] sm:$0xff] %v8249_v8  ;;  %v8251_v58 = vpop.f32.mrb[59].mxu0  ;;  %v849_v50 = vmul.f32 %v8249_v8, %v8249_v8 }
 0x169   :  { %12048 = vst [vmem:[#allocation25_spill] sm:$0xff] %v8251_v58  ;;  %v909_v56 = vadd.f32 %v908_v60, %v846_v49  ;;  %v776_v10 = vadd.f32 %v775_v26, %v8251_v58  ;;  %v847_v51 = vmul.f32 %v8251_v58, %v8251_v58 }
 0x16b   :  { %v777_v42 = vadd.f32 %v8241_v6, %v776_v10  ;;  %v910_v39 = vadd.f32 %v909_v56, %v847_v51 }
 0x16d   :  { %v911_v30 = vadd.f32 %v910_v39, %v848_v23  ;;  %v8261_v61 = vpop.f32.mrb[60].mxu0  ;;  %v778_v34 = vadd.f32 %v8249_v8, %v777_v42 }
 0x16e   :  { %12049 = vst [vmem:[#allocation26_spill] sm:$0xff] %v8261_v61  ;;  %v8264_v60 = vpop.f32.mrb[61].mxu0  ;;  %v852_v23 = vmul.f32 %v8261_v61, %v8261_v61 }
 0x16f   :  { %12050 = vst [vmem:[#allocation27_spill] sm:$0xff] %v8264_v60  ;;  %v779_v26 = vadd.f32 %v778_v34, %v8264_v60  ;;  %v850_v49 = vmul.f32 %v8264_v60, %v8264_v60  ;;  %v912_v58 = vadd.f32 %v911_v30, %v849_v50  ;;  %v8269_v24 = vpop.f32.mrb[62].mxu0 }
 0x170   :  { %v706_v10 = vpop.f32.mrb[63].mxu0  ;;  %v853_v8 = vmul.f32 %v8269_v24, %v8269_v24 }
 0x171   :  { %v913_v56 = vadd.f32 %v912_v58, %v850_v49  ;;  %v780_v51 = vadd.f32 %v779_v26, %v706_v10  ;;  %v851_v6 = vmul.f32 %v706_v10, %v706_v10 }
 0x173   :  { %v781_v39 = vadd.f32 %v8261_v61, %v780_v51  ;;  %v914_v42 = vadd.f32 %v913_v56, %v851_v6 }
 0x175   :  { %v782_v34 = vadd.f32 %v8269_v24, %v781_v39  ;;  %v915_v1 = vadd.f32 %v914_v42, %v852_v23  ;;  %v931_v23 = vlaneseq }
 0x177   :  { %v783_v60 = vrot.slane %v782_v34, 4  ;;  %v916_v50 = vadd.f32 %v915_v1, %v853_v8  ;;  %v932_v1 = vshrl.u32 %v931_v23, 7  ;;  %v12057_v23 = vld [vmem:[#allocation8_spill] sm:$0xff] }
 0x179   :  { %v784_v30 = vadd.f32 %v783_v60, %v782_v34  ;;  %v917_v37 = vrot.slane %v916_v50, 4 }
 0x17b   :  { %v785_v12 = vrot.slane %v784_v30, 2  ;;  %v918_v58 = vadd.f32 %v917_v37, %v916_v50  ;;  %v718_v37 = vld [vmem:[%s11841_s2] sm:$0x1] }
 0x17d   :  { %v786_v26 = vadd.f32 %v785_v12, %v784_v30  ;;  %v919_v49 = vrot.slane %v918_v58, 2  ;;  %v8280_v12 = vsub.s32 0, %v932_v1  ;;  %v12058_v1 = vld [vmem:[#allocation5_spill] sm:$0xff] }
 0x17f   :  { %v787_v20 = vrot.slane %v786_v26, 1  ;;  %v920_v62 = vadd.f32 %v919_v49, %v918_v58  ;;  %12051 = vst [vmem:[#allocation28_spill] sm:$0xff] %v8280_v12 }
 0x181   :  { %v788_v22 = vadd.f32 %v787_v20, %v786_v26  ;;  %v921_v3 = vrot.slane %v920_v62, 1  ;;  %v8282_v20 = vld [vmem:[#allocation2 + $0x2] sm:$0xff] }
 0x182   :  { %12052 = vst [vmem:[#allocation29_spill] sm:$0xff] %v8282_v20  ;;  %v12074_v20 = vld [vmem:[#allocation18_spill] sm:$0xff] }
 0x183   :  { %v789_v51 = vmul.f32 0.001953125, %v788_v22  ;;  %v922_v6 = vadd.f32 %v921_v3, %v920_v62  ;;  %v8284_v22 = vld [vmem:[#allocation2 + $0xa] sm:$0xff]  ;;  %v12070_v3 = vld [vmem:[#allocation19_spill] sm:$0xff] }
 0x184   :  { %12053 = vst [vmem:[#allocation30_spill] sm:$0xff] %v8284_v22  ;;  %v12076_v22 = vld [vmem:[#allocation20_spill] sm:$0xff] }
 0x185   :  { %v923_v56 = vmul.f32 0.001953125, %v922_v6  ;;  %v924_v61 = vmul.f32 %v789_v51, %v789_v51  ;;  %v12054_v6 = vld [vmem:[#allocation3_spill] sm:$0xff] }
 0x187   :  { %v925_v28 = vsub.f32 %v923_v56, %v924_v61  ;;  %v12055_v56 = vld [vmem:[#allocation4_spill] sm:$0xff] }
 0x189   :  { %v926_v19 = vmax.f32 %v925_v28, 0.0  ;;  %v719_v28 = vld [vmem:[%s11842_s3] sm:$0x1] }
 0x18b   :  { %v927_v39 = vadd.f32 1e-05, %v926_v19 }
 0x18d   :  { %7481 = vrsqrt.f32 %v927_v39  ;;  %v12056_v39 = vld [vmem:[#allocation6_spill] sm:$0xff] }
 0x197   :  { %v7482_v8 = vpop.eup %7481 }
 0x198   :  { %v929_v60 = vmul.f32 %v7482_v8, %v718_v37  ;;  %v12059_v37 = vld [vmem:[#allocation7_spill] sm:$0xff] }
 0x19a   :  { %v8290_v19 = vrot.slane %v929_v60, %v8280_v12  ;;  %v1000_v62 = vmul.f32 %v929_v60, %v789_v51  ;;  %v12060_v60 = vld [vmem:[#allocation11_spill] sm:$0xff] }
 0x19c   :  { %v997_v61 = vmul.f32 %v8290_v19, %v706_v10  ;;  %v1001_v42 = vsub.f32 %v719_v28, %v1000_v62  ;;  %v8297_v34 = vmul.f32 %v8290_v19, %v7846_v46  ;;  %v8301_v50 = vmul.f32 %v8290_v19, %v7850_v48  ;;  %v12061_v62 = vld [vmem:[#allocation13_spill] sm:$0xff] }
 0x19d   :  { %v8305_v30 = vmul.f32 %v7844_v45, %v8290_v19  ;;  %v8309_v58 = vmul.f32 %v7848_v47, %v8290_v19  ;;  %v8313_v10 = vmul.f32 %v8290_v19, %v7866_v59  ;;  %v8317_v46 = vmul.f32 %v8290_v19, %v7873_v0 }
 0x19e   :  { %v8320_v26 = vrot.slane %v1001_v42, %v8280_v12  ;;  %v8324_v48 = vmul.f32 %v7863_v57, %v8290_v19  ;;  %v8328_v45 = vmul.f32 %v7871_v63, %v8290_v19  ;;  %v8332_v47 = vmul.f32 %v8290_v19, %v7886_v11  ;;  %v12062_v42 = vld [vmem:[#allocation9_spill] sm:$0xff] }
 0x19f   :  { %v8336_v59 = vmul.f32 %v8290_v19, %v7893_v16  ;;  %v8340_v0 = vmul.f32 %v7883_v9, %v8290_v19  ;;  %v8344_v57 = vmul.f32 %v7891_v15, %v8290_v19  ;;  %v8348_v63 = vmul.f32 %v8290_v19, %v7906_v27  ;;  %v12072_v12 = vld [vmem:[#allocation21_spill] sm:$0xff] }
 0x1a0   :  { %v1069_v49 = vadd.f32 %v8320_v26, %v997_v61  ;;  %v8353_v11 = vmul.f32 %v8290_v19, %v7913_v32  ;;  %v8357_v16 = vmul.f32 %v7903_v25, %v8290_v19  ;;  %v8361_v9 = vmul.f32 %v7911_v31, %v8290_v19 }
 0x1a1   :  { %v8365_v15 = vmul.f32 %v8290_v19, %v7926_v44  ;;  %v8369_v27 = vmul.f32 %v8290_v19, %v7936_v54  ;;  %v8373_v32 = vmul.f32 %v7923_v41, %v8290_v19  ;;  %v8377_v25 = vmul.f32 %v7934_v53, %v8290_v19 }
 0x1a2   :  { %v1133_v51 = vmax.f32 %v1069_v49, 0.0  ;;  %v8381_v31 = vmul.f32 %v8290_v19, %v7957_v7  ;;  %v8385_v44 = vmul.f32 %v8290_v19, %v7968_v17  ;;  %v8389_v54 = vmul.f32 %v7953_v5, %v8290_v19 }
 0x1a3   :  { %v8393_v41 = vmul.f32 %v7965_v14, %v8290_v19  ;;  %v8397_v53 = vmul.f32 %v8290_v19, %v7993_v35  ;;  %v8401_v7 = vmul.f32 %v8290_v19, %v8004_v43  ;;  %v8405_v17 = vmul.f32 %v7989_v33, %v8290_v19 }
 0x1a4   :  { %1306 = vst [vmem:[#allocation2 + $0x321] sm:$0xff] %v1133_v51  ;;  %v8409_v5 = vmul.f32 %v8001_v40, %v8290_v19  ;;  %v8413_v14 = vmul.f32 %v8290_v19, %v8029_v4  ;;  %v8417_v35 = vmul.f32 %v8290_v19, %v8040_v18  ;;  %v8421_v43 = vmul.f32 %v8025_v2, %v8290_v19  ;;  %v12063_v51 = vld [vmem:[#allocation12_spill] sm:$0xff] }
 0x1a5   :  { %v8425_v33 = vmul.f32 %v8037_v13, %v8290_v19  ;;  %v8429_v40 = vmul.f32 %v8290_v19, %v8065_v38  ;;  %v8433_v4 = vmul.f32 %v8290_v19, %v8076_v55  ;;  %v8437_v18 = vmul.f32 %v8061_v36, %v8290_v19 }
 0x1a6   :  { %v8441_v2 = vmul.f32 %v8073_v52, %v8290_v19  ;;  %v8445_v13 = vmul.f32 %v8290_v19, %v8101_v21  ;;  %v8449_v38 = vmul.f32 %v8290_v19, %v8112_v29  ;;  %v8453_v55 = vmul.f32 %v12054_v6, %v8290_v19 }
 0x1a7   :  { %v8457_v36 = vmul.f32 %v12055_v56, %v8290_v19  ;;  %v8461_v52 = vmul.f32 %v8290_v19, %v12056_v39  ;;  %v8465_v21 = vmul.f32 %v8290_v19, %v12057_v23  ;;  %v8469_v29 = vmul.f32 %v12058_v1, %v8290_v19  ;;  %v12064_v56 = vld [vmem:[#allocation15_spill] sm:$0xff]  ;;  %v12065_v23 = vld [vmem:[#allocation17_spill] sm:$0xff] }
 0x1a8   :  { %v8473_v8 = vmul.f32 %v12059_v37, %v8290_v19  ;;  %v8477_v28 = vmul.f32 %v8290_v19, %v12060_v60  ;;  %v8481_v61 = vmul.f32 %v8290_v19, %v12061_v62  ;;  %v8485_v49 = vmul.f32 %v12062_v42, %v8290_v19  ;;  %v12066_v37 = vld [vmem:[#allocation14_spill] sm:$0xff]  ;;  %v12068_v62 = vld [vmem:[#allocation16_spill] sm:$0xff] }
 0x1a9   :  { %v8489_v6 = vmul.f32 %v12063_v51, %v8290_v19  ;;  %v8493_v39 = vmul.f32 %v8290_v19, %v12064_v56  ;;  %v8497_v1 = vmul.f32 %v8290_v19, %v12065_v23  ;;  %v8501_v60 = vmul.f32 %v12066_v37, %v8290_v19 }
 0x1aa   :  { %v8505_v42 = vmul.f32 %v12068_v62, %v8290_v19  ;;  %v8509_v51 = vmul.f32 %v8290_v19, %v12070_v3  ;;  %v8513_v56 = vmul.f32 %v8290_v19, %v12072_v12  ;;  %v8517_v23 = vmul.f32 %v12074_v20, %v8290_v19 }
 0x1ab   :  { %12067 = vst [vmem:[#allocation3_spill] sm:$0xff] %v8501_v60  ;;  %v8521_v37 = vmul.f32 %v12076_v22, %v8290_v19  ;;  %v12078_v60 = vld [vmem:[#allocation23_spill] sm:$0xff] }
 0x1ac   :  { %12069 = vst [vmem:[#allocation4_spill] sm:$0xff] %v8505_v42  ;;  %12071 = vst [vmem:[#allocation6_spill] sm:$0xff] %v8509_v51  ;;  %v8525_v62 = vmul.f32 %v8290_v19, %v12078_v60  ;;  %v12079_v42 = vld [vmem:[#allocation25_spill] sm:$0xff]  ;;  %v12080_v51 = vld [vmem:[#allocation22_spill] sm:$0xff] }
 0x1ad   :  { %12073 = vst [vmem:[#allocation8_spill] sm:$0xff] %v8513_v56  ;;  %12075 = vst [vmem:[#allocation5_spill] sm:$0xff] %v8517_v23  ;;  %v8529_v3 = vmul.f32 %v8290_v19, %v12079_v42  ;;  %v8533_v12 = vmul.f32 %v12080_v51, %v8290_v19  ;;  %v12081_v56 = vld [vmem:[#allocation24_spill] sm:$0xff]  ;;  %v12082_v23 = vld [vmem:[#allocation27_spill] sm:$0xff]  ;;  %v8549_v42 = vmul.f32 %v8269_v24, %v8290_v19 }
 0x1ae   :  { %12077 = vst [vmem:[#allocation7_spill] sm:$0xff] %v8521_v37  ;;  %v8537_v20 = vmul.f32 %v12081_v56, %v8290_v19  ;;  %v8541_v22 = vmul.f32 %v8290_v19, %v12082_v23  ;;  %v12083_v37 = vld [vmem:[#allocation26_spill] sm:$0xff]  ;;  %v8553_v51 = vadd.f32 %v8320_v26, %v8297_v34  ;;  %v8557_v56 = vadd.f32 %v8320_v26, %v8301_v50 }
 0x1af   :  { %v8545_v60 = vmul.f32 %v12083_v37, %v8290_v19  ;;  %v8561_v23 = vadd.f32 %v8320_v26, %v8305_v30  ;;  %v8565_v37 = vadd.f32 %v8320_v26, %v8309_v58  ;;  %v8569_v24 = vadd.f32 %v8320_v26, %v8313_v10 }
 0x1b0   :  { %v8573_v19 = vadd.f32 %v8320_v26, %v8317_v46  ;;  %v8577_v34 = vadd.f32 %v8320_v26, %v8324_v48  ;;  %v8581_v50 = vadd.f32 %v8320_v26, %v8328_v45  ;;  %v8585_v30 = vadd.f32 %v8320_v26, %v8332_v47 }
 0x1b1   :  { %v8589_v58 = vadd.f32 %v8320_v26, %v8336_v59  ;;  %v8593_v10 = vadd.f32 %v8320_v26, %v8340_v0  ;;  %v8597_v46 = vadd.f32 %v8320_v26, %v8344_v57  ;;  %v8601_v48 = vadd.f32 %v8320_v26, %v8348_v63 }
 0x1b2   :  { %v8605_v45 = vadd.f32 %v8320_v26, %v8353_v11  ;;  %v8609_v47 = vadd.f32 %v8320_v26, %v8357_v16  ;;  %v8613_v59 = vadd.f32 %v8320_v26, %v8361_v9  ;;  %v8617_v0 = vadd.f32 %v8320_v26, %v8365_v15 }
 0x1b3   :  { %v8621_v57 = vadd.f32 %v8320_v26, %v8369_v27  ;;  %v8625_v63 = vadd.f32 %v8320_v26, %v8373_v32  ;;  %v8629_v11 = vadd.f32 %v8320_v26, %v8377_v25  ;;  %v8633_v16 = vadd.f32 %v8320_v26, %v8381_v31 }
 0x1b4   :  { %v8637_v9 = vadd.f32 %v8320_v26, %v8385_v44  ;;  %v8641_v15 = vadd.f32 %v8320_v26, %v8389_v54  ;;  %v8645_v27 = vadd.f32 %v8320_v26, %v8393_v41  ;;  %v8649_v32 = vadd.f32 %v8320_v26, %v8397_v53 }
 0x1b5   :  { %v8653_v25 = vadd.f32 %v8320_v26, %v8401_v7  ;;  %v8657_v31 = vadd.f32 %v8320_v26, %v8405_v17  ;;  %v8661_v44 = vadd.f32 %v8320_v26, %v8409_v5  ;;  %v8665_v54 = vadd.f32 %v8320_v26, %v8413_v14 }
 0x1b6   :  { %v8669_v41 = vadd.f32 %v8320_v26, %v8417_v35  ;;  %v8673_v53 = vadd.f32 %v8320_v26, %v8421_v43  ;;  %v8677_v7 = vadd.f32 %v8320_v26, %v8425_v33  ;;  %v8681_v17 = vadd.f32 %v8320_v26, %v8429_v40 }
 0x1b7   :  { %v8685_v5 = vadd.f32 %v8320_v26, %v8433_v4  ;;  %v8689_v14 = vadd.f32 %v8320_v26, %v8437_v18  ;;  %v8693_v35 = vadd.f32 %v8320_v26, %v8441_v2  ;;  %v8697_v43 = vadd.f32 %v8320_v26, %v8445_v13 }
 0x1b8   :  { %v8701_v33 = vadd.f32 %v8320_v26, %v8449_v38  ;;  %v8705_v40 = vadd.f32 %v8320_v26, %v8453_v55  ;;  %v8709_v4 = vadd.f32 %v8320_v26, %v8457_v36  ;;  %v8713_v18 = vadd.f32 %v8320_v26, %v8461_v52 }
 0x1b9   :  { %v8717_v2 = vadd.f32 %v8320_v26, %v8465_v21  ;;  %v8721_v13 = vadd.f32 %v8320_v26, %v8469_v29  ;;  %v8725_v38 = vadd.f32 %v8320_v26, %v8473_v8  ;;  %v8729_v55 = vadd.f32 %v8320_v26, %v8477_v28  ;;  %v12089_v28 = vld [vmem:[#allocation3_spill] sm:$0xff] }
 0x1ba   :  { %v8733_v36 = vadd.f32 %v8320_v26, %v8481_v61  ;;  %v8737_v52 = vadd.f32 %v8320_v26, %v8485_v49  ;;  %v8741_v21 = vadd.f32 %v8320_v26, %v8489_v6  ;;  %v8745_v29 = vadd.f32 %v8320_v26, %v8493_v39 }
 0x1bb   :  { %v8749_v8 = vadd.f32 %v8320_v26, %v8497_v1  ;;  %v8753_v61 = vadd.f32 %v8320_v26, %v12089_v28 }
 0x1bc   :  { %12084 = vst [vmem:[#allocation11_spill] sm:$0xff] %v8733_v36  ;;  %12085 = vst [vmem:[#allocation13_spill] sm:$0xff] %v8737_v52  ;;  %v12090_v36 = vld [vmem:[#allocation4_spill] sm:$0xff]  ;;  %v12091_v52 = vld [vmem:[#allocation6_spill] sm:$0xff] }
 0x1bd   :  { %12086 = vst [vmem:[#allocation9_spill] sm:$0xff] %v8741_v21  ;;  %12087 = vst [vmem:[#allocation12_spill] sm:$0xff] %v8745_v29  ;;  %v8757_v49 = vadd.f32 %v8320_v26, %v12090_v36  ;;  %v8761_v6 = vadd.f32 %v8320_v26, %v12091_v52  ;;  %v12092_v21 = vld [vmem:[#allocation8_spill] sm:$0xff]  ;;  %v12093_v29 = vld [vmem:[#allocation5_spill] sm:$0xff]  ;;  %v8777_v36 = vadd.f32 %v8320_v26, %v8525_v62 }
 0x1be   :  { %12088 = vst [vmem:[#allocation15_spill] sm:$0xff] %v8749_v8  ;;  %v8765_v39 = vadd.f32 %v8320_v26, %v12092_v21  ;;  %v8769_v1 = vadd.f32 %v8320_v26, %v12093_v29  ;;  %v12094_v8 = vld [vmem:[#allocation7_spill] sm:$0xff]  ;;  %v8781_v52 = vadd.f32 %v8320_v26, %v8529_v3  ;;  %v8785_v21 = vadd.f32 %v8320_v26, %v8533_v12 }
 0x1bf   :  { %v8773_v28 = vadd.f32 %v8320_v26, %v12094_v8  ;;  %v8789_v29 = vadd.f32 %v8320_v26, %v8537_v20  ;;  %v8793_v8 = vadd.f32 %v8320_v26, %v8541_v22  ;;  %v8797_v62 = vadd.f32 %v8320_v26, %v8545_v60 }
 0x1c0   :  { %12095 = vst [vmem:[#allocation17_spill] sm:$0xff] %v8781_v52  ;;  %12096 = vst [vmem:[#allocation14_spill] sm:$0xff] %v8785_v21  ;;  %v8801_v3 = vadd.f32 %v8320_v26, %v8549_v42  ;;  %v11883_v52 = vmax.f32 %v8553_v51, 0.0  ;;  %v11884_v12 = vmax.f32 %v8557_v56, 0.0  ;;  %v11886_v22 = vmax.f32 %v8573_v19, 0.0 }
 0x1c1   :  { %12097 = vst [vmem:[#allocation16_spill] sm:$0xff] %v8789_v29  ;;  %12098 = vst [vmem:[#allocation19_spill] sm:$0xff] %v8793_v8  ;;  %v11885_v29 = vmax.f32 %v8569_v24, 0.0  ;;  %v11888_v26 = vmax.f32 %v8589_v58, 0.0  ;;  %v12100_v8 = vmax.f32 %v8561_v23, 0.0  ;;  %v12101_v60 = vmax.f32 %v8565_v37, 0.0 }
 0x1c2   :  { %12099 = vst [vmem:[#allocation21_spill] sm:$0xff] %v8797_v62  ;;  %v11887_v62 = vmax.f32 %v8585_v30, 0.0  ;;  %1245 = vst [vmem:[#allocation2 + $0x19] sm:$0xff] %v11883_v52  ;;  %v11889_v52 = vmax.f32 %v8605_v45, 0.0  ;;  %v11890_v42 = vmax.f32 %v8609_v47, 0.0  ;;  %v1103_v21 = vmax.f32 %v8677_v7, 0.0 }
 0x1c3   :  { %1246 = vst [vmem:[#allocation2 + $0x21] sm:$0xff] %v11884_v12  ;;  %1247 = vst [vmem:[#allocation2 + $0x31] sm:$0xff] %v12100_v8  ;;  %v12102_v12 = vmax.f32 %v8577_v34, 0.0  ;;  %v12103_v8 = vmax.f32 %v8581_v50, 0.0  ;;  %v11894_v20 = vmax.f32 %v8681_v17, 0.0  ;;  %v1111_v7 = vmax.f32 %v8709_v4, 0.0 }
 0x1c4   :  { %1248 = vst [vmem:[#allocation2 + $0x39] sm:$0xff] %v12101_v60  ;;  %1249 = vst [vmem:[#allocation2 + $0x49] sm:$0xff] %v11885_v29  ;;  %v11891_v60 = vmax.f32 %v8621_v57, 0.0  ;;  %v11893_v29 = vmax.f32 %v8641_v15, 0.0  ;;  %v12117_v4 = vmax.f32 %v8689_v14, 0.0 }
 0x1c5   :  { %1250 = vst [vmem:[#allocation2 + $0x51] sm:$0xff] %v11886_v22  ;;  %1251 = vst [vmem:[#allocation2 + $0x61] sm:$0xff] %v12102_v12  ;;  %v12104_v22 = vmax.f32 %v8593_v10, 0.0  ;;  %v12105_v12 = vmax.f32 %v8597_v46, 0.0 }
 0x1c6   :  { %1252 = vst [vmem:[#allocation2 + $0x69] sm:$0xff] %v12103_v8  ;;  %1253 = vst [vmem:[#allocation2 + $0x79] sm:$0xff] %v11887_v62  ;;  %v12106_v8 = vmax.f32 %v8601_v48, 0.0  ;;  %v11892_v62 = vmax.f32 %v8637_v9, 0.0 }
 0x1c7   :  { %1254 = vst [vmem:[#allocation2 + $0x81] sm:$0xff] %v11888_v26  ;;  %1255 = vst [vmem:[#allocation2 + $0x91] sm:$0xff] %v12104_v22  ;;  %v12107_v22 = vmax.f32 %v8613_v59, 0.0  ;;  %v1102_v26 = vmax.f32 %v8673_v53, 0.0  ;;  %v1110_v53 = vmax.f32 %v8705_v40, 0.0  ;;  %v1116_v40 = vmax.f32 %v8729_v55, 0.0 }
 0x1c8   :  { %1256 = vst [vmem:[#allocation2 + $0x99] sm:$0xff] %v12105_v12  ;;  %1257 = vst [vmem:[#allocation2 + $0xa9] sm:$0xff] %v12106_v8  ;;  %v12108_v12 = vmax.f32 %v8617_v0, 0.0  ;;  %v11896_v8 = vmax.f32 %v8653_v25, 0.0 }
 0x1c9   :  { %1258 = vst [vmem:[#allocation2 + $0xb1] sm:$0xff] %v11889_v52  ;;  %1259 = vst [vmem:[#allocation2 + $0xc1] sm:$0xff] %v11890_v42  ;;  %v12109_v52 = vmax.f32 %v8625_v63, 0.0  ;;  %v12110_v42 = vmax.f32 %v8629_v11, 0.0 }
 0x1ca   :  { %1260 = vst [vmem:[#allocation2 + $0xc9] sm:$0xff] %v12107_v22  ;;  %1261 = vst [vmem:[#allocation2 + $0xd9] sm:$0xff] %v12108_v12  ;;  %v12111_v22 = vmax.f32 %v8633_v16, 0.0  ;;  %v11895_v12 = vmax.f32 %v8669_v41, 0.0 }
 0x1cb   :  { %1262 = vst [vmem:[#allocation2 + $0xe1] sm:$0xff] %v11891_v60  ;;  %1263 = vst [vmem:[#allocation2 + $0xf1] sm:$0xff] %v12109_v52  ;;  %v12112_v52 = vmax.f32 %v8645_v27, 0.0  ;;  %v1112_v60 = vmax.f32 %v8713_v18, 0.0  ;;  %v12118_v18 = vmax.f32 %v8693_v35, 0.0 }
 0x1cc   :  { %1264 = vst [vmem:[#allocation2 + $0xf9] sm:$0xff] %v12110_v42  ;;  %1265 = vst [vmem:[#allocation2 + $0x109] sm:$0xff] %v12111_v22  ;;  %v12113_v42 = vmax.f32 %v8649_v32, 0.0  ;;  %v11897_v22 = vmax.f32 %v8685_v5, 0.0 }
 0x1cd   :  { %1266 = vst [vmem:[#allocation2 + $0x111] sm:$0xff] %v11892_v62  ;;  %1267 = vst [vmem:[#allocation2 + $0x121] sm:$0xff] %v11893_v29  ;;  %v12114_v62 = vmax.f32 %v8657_v31, 0.0  ;;  %v12115_v29 = vmax.f32 %v8661_v44, 0.0 }
 0x1ce   :  { %1268 = vst [vmem:[#allocation2 + $0x129] sm:$0xff] %v12112_v52  ;;  %1269 = vst [vmem:[#allocation2 + $0x139] sm:$0xff] %v12113_v42  ;;  %v12116_v52 = vmax.f32 %v8665_v54, 0.0  ;;  %v1109_v42 = vmax.f32 %v8701_v33, 0.0 }
 0x1cf   :  { %1270 = vst [vmem:[#allocation2 + $0x141] sm:$0xff] %v11896_v8  ;;  %1271 = vst [vmem:[#allocation2 + $0x151] sm:$0xff] %v12114_v62  ;;  %v1114_v62 = vmax.f32 %v8721_v13, 0.0  ;;  %v12123_v8 = vld [vmem:[#allocation12_spill] sm:$0xff] }
 0x1d0   :  { %1272 = vst [vmem:[#allocation2 + $0x159] sm:$0xff] %v12115_v29  ;;  %1273 = vst [vmem:[#allocation2 + $0x169] sm:$0xff] %v12116_v52  ;;  %v1113_v29 = vmax.f32 %v8717_v2, 0.0  ;;  %v1115_v52 = vmax.f32 %v8725_v38, 0.0  ;;  %v1120_v55 = vmax.f32 %v12123_v8, 0.0  ;;  %v1502_v8 = vld [vmem:[#allocation2 + $0x20] sm:$0xff] }
 0x1d1   :  { %1274 = vst [vmem:[#allocation2 + $0x171] sm:$0xff] %v11895_v12  ;;  %1275 = vst [vmem:[#allocation2 + $0x181] sm:$0xff] %v1102_v26  ;;  %v12120_v26 = vld [vmem:[#allocation11_spill] sm:$0xff]  ;;  %v12122_v12 = vld [vmem:[#allocation9_spill] sm:$0xff] }
 0x1d2   :  { %1276 = vst [vmem:[#allocation2 + $0x189] sm:$0xff] %v1103_v21  ;;  %1277 = vst [vmem:[#allocation2 + $0x1c9] sm:$0xff] %v11894_v20  ;;  %v12119_v21 = vmax.f32 %v8697_v43, 0.0  ;;  %v1117_v2 = vmax.f32 %v12120_v26, 0.0  ;;  %v12121_v20 = vld [vmem:[#allocation13_spill] sm:$0xff]  ;;  %v1119_v38 = vmax.f32 %v12122_v12, 0.0 }
 0x1d3   :  { %1278 = vst [vmem:[#allocation2 + $0x1d1] sm:$0xff] %v11897_v22  ;;  %1279 = vst [vmem:[#allocation2 + $0x1e1] sm:$0xff] %v12117_v4  ;;  %v1118_v13 = vmax.f32 %v12121_v20, 0.0  ;;  %v12124_v4 = vld [vmem:[#allocation15_spill] sm:$0xff]  ;;  %v1124_v26 = vmax.f32 %v8761_v6, 0.0  ;;  %v1501_v20 = vld [vmem:[#allocation2 + $0x18] sm:$0xff] }
 0x1d4   :  { %1280 = vst [vmem:[#allocation2 + $0x1e9] sm:$0xff] %v12118_v18  ;;  %1281 = vst [vmem:[#allocation2 + $0x1f9] sm:$0xff] %v12119_v21  ;;  %v1121_v22 = vmax.f32 %v12124_v4, 0.0  ;;  %v1122_v18 = vmax.f32 %v8753_v61, 0.0  ;;  %v1123_v21 = vmax.f32 %v8757_v49, 0.0  ;;  %v1125_v12 = vmax.f32 %v8765_v39, 0.0 }
 0x1d5   :  { %1282 = vst [vmem:[#allocation2 + $0x201] sm:$0xff] %v1109_v42  ;;  %1283 = vst [vmem:[#allocation2 + $0x211] sm:$0xff] %v1110_v53  ;;  %v1126_v53 = vmax.f32 %v8769_v1, 0.0  ;;  %v12125_v61 = vld [vmem:[#allocation17_spill] sm:$0xff]  ;;  %v12126_v6 = vld [vmem:[#allocation14_spill] sm:$0xff] }
 0x1d6   :  { %1284 = vst [vmem:[#allocation2 + $0x219] sm:$0xff] %v1111_v7  ;;  %1285 = vst [vmem:[#allocation2 + $0x229] sm:$0xff] %v1112_v60  ;;  %v1127_v60 = vmax.f32 %v8773_v28, 0.0  ;;  %v1128_v7 = vmax.f32 %v8777_v36, 0.0  ;;  %v1129_v49 = vmax.f32 %v12125_v61, 0.0  ;;  %v12129_v39 = vld [vmem:[#allocation21_spill] sm:$0xff] }
 0x1d7   :  { %1286 = vst [vmem:[#allocation2 + $0x231] sm:$0xff] %v1113_v29  ;;  %1287 = vst [vmem:[#allocation2 + $0x241] sm:$0xff] %v1114_v62  ;;  %v1130_v29 = vmax.f32 %v12126_v6, 0.0  ;;  %v12127_v62 = vld [vmem:[#allocation16_spill] sm:$0xff]  ;;  %v1134_v1 = vmax.f32 %v12129_v39, 0.0  ;;  %v1135_v28 = vmax.f32 %v8801_v3, 0.0 }
 0x1d8   :  { %1288 = vst [vmem:[#allocation2 + $0x249] sm:$0xff] %v1115_v52  ;;  %1289 = vst [vmem:[#allocation2 + $0x259] sm:$0xff] %v1116_v40  ;;  %v1131_v52 = vmax.f32 %v12127_v62, 0.0  ;;  %v12128_v40 = vld [vmem:[#allocation19_spill] sm:$0xff]  ;;  %v12130_v36 = vmax.f32 %v8553_v51, 0.0  ;;  %v12132_v3 = vmax.f32 %v8561_v23, 0.0 }
 0x1d9   :  { %1290 = vst [vmem:[#allocation2 + $0x261] sm:$0xff] %v1117_v2  ;;  %1291 = vst [vmem:[#allocation2 + $0x271] sm:$0xff] %v1118_v13  ;;  %v1132_v4 = vmax.f32 %v12128_v40, 0.0  ;;  %v12131_v2 = vmax.f32 %v8557_v56, 0.0  ;;  %v12134_v51 = vmax.f32 %v8569_v24, 0.0  ;;  %v12135_v56 = vmax.f32 %v8573_v19, 0.0 }
 0x1da   :  { %1292 = vst [vmem:[#allocation2 + $0x279] sm:$0xff] %v1119_v38  ;;  %1293 = vst [vmem:[#allocation2 + $0x289] sm:$0xff] %v1120_v55  ;;  %v1889_v38 = vpack.c.bf16 %v1502_v8, %v1501_v20  ;;  %v1503_v55 = vld [vmem:[#allocation2 + $0x30] sm:$0xff]  ;;  %v12136_v8 = vmax.f32 %v8577_v34, 0.0  ;;  %v12141_v24 = vmax.f32 %v8585_v30, 0.0  ;;  %v12142_v19 = vmax.f32 %v8589_v58, 0.0 }
 0x1db   :  { %1294 = vst [vmem:[#allocation2 + $0x291] sm:$0xff] %v1121_v22  ;;  %1295 = vst [vmem:[#allocation2 + $0x2a1] sm:$0xff] %v1122_v18  ;;  %v1896_v13 = vpack.c.bf16 %v12131_v2, %v12130_v36  ;;  %v7425_v22 = vld [vmem:[%s11840_s4 + $0x100] sm:$0xff]   ;;  %v1504_v18 = vld [vmem:[#allocation2 + $0x38] sm:$0xff]  ;;  %v1914_v20 = vpack.c.bf16 %v12135_v56, %v12134_v51  ;;  %v12146_v30 = vmax.f32 %v8601_v48, 0.0  ;;  %v12147_v58 = vmax.f32 %v8605_v45, 0.0 }
 0x1dc   :  { %1296 = vst [vmem:[#allocation2 + $0x2a9] sm:$0xff] %v1123_v21  ;;  %1297 = vst [vmem:[#allocation2 + $0x2b9] sm:$0xff] %v1124_v26  ;;  %v12133_v21 = vmax.f32 %v8565_v37, 0.0  ;;  %3078 = vmatprep.mubr.bf16.mxu1 %v1889_v38  ;;  %v12139_v23 = vld [vmem:[#allocation29_spill] sm:$0xff]  ;;  %v1898_v37 = vpack.c.bf16 %v1504_v18, %v1503_v55  ;;  %v1932_v61 = vpack.c.bf16 %v12142_v19, %v12141_v24  ;;  %v7426_v34 = vld [vmem:[%s11840_s4 + $0x108] sm:$0xff]   ;;  %v12149_v39 = vmax.f32 %v8613_v59, 0.0 }
 0x1dd   :  { %1298 = vst [vmem:[#allocation2 + $0x2c1] sm:$0xff] %v1125_v12  ;;  %1299 = vst [vmem:[#allocation2 + $0x2d1] sm:$0xff] %v1126_v53  ;;  %2797 = vmatprep.mubr.bf16.mxu0 %v1896_v13  ;;  %v12137_v12 = vmax.f32 %v8581_v50, 0.0  ;;  %v12143_v50 = vmax.f32 %v8593_v10, 0.0  ;;  %v8978_v62 = vpack.c.bf16 %v12147_v58, %v12146_v30  ;;  %v1440_v40 = vld [vmem:[#allocation2 + $0x22] sm:$0xff]  ;;  %v12151_v36 = vmax.f32 %v8621_v57, 0.0 }
 0x1de   :  { %1300 = vst [vmem:[#allocation2 + $0x2d9] sm:$0xff] %v1127_v60  ;;  %1301 = vst [vmem:[#allocation2 + $0x2e9] sm:$0xff] %v1128_v7  ;;  %v1905_v26 = vpack.c.bf16 %v12133_v21, %v12132_v3  ;;  %2798 = vmatmul.mubr.bf16.gmra.mrb[68].mxu0 %v1889_v38  ;;  %v12138_v60 = vld [vmem:[#allocation30_spill] sm:$0xff]  ;;  %v12152_v48 = vmax.f32 %v8625_v63, 0.0  ;;  %v12153_v45 = vmax.f32 %v8629_v11, 0.0  ;;  %v12155_v59 = vmax.f32 %v8637_v9, 0.0 }
 0x1df   :  { %1302 = vst [vmem:[#allocation2 + $0x2f1] sm:$0xff] %v1129_v49  ;;  %1303 = vst [vmem:[#allocation2 + $0x301] sm:$0xff] %v1130_v29  ;;  %v1923_v53 = vpack.c.bf16 %v12137_v12, %v12136_v8  ;;  %v12140_v7 = vpack.c.bf16 %v12138_v60, %v12139_v23  ;;  %v12144_v49 = vmax.f32 %v8597_v46, 0.0  ;;  %v12145_v29 = vmov 0   ;;  %v1505_v46 = vld [vmem:[#allocation2 + $0x48] sm:$0xff]  ;;  %v7427_v63 = vld [vmem:[%s11840_s4 + $0x110] sm:$0xff]  }
 0x1e0   :  { %1304 = vst [vmem:[#allocation2 + $0x309] sm:$0xff] %v1131_v52  ;;  %1305 = vst [vmem:[#allocation2 + $0x319] sm:$0xff] %v1132_v4  ;;  %2805 = vmatprep.mubr.bf16.mxu0 %v1905_v26  ;;  %v1439_v52 = vld [vmem:[#allocation2 + $0x1a] sm:$0xff]  ;;  %v12148_v4 = vmax.f32 %v8609_v47, 0.0  ;;  %v8996_v13 = vpack.c.bf16 %v12153_v45, %v12152_v48  ;;  %v12154_v47 = vmax.f32 %v8633_v16, 0.0  ;;  %v12158_v11 = vmax.f32 %v8649_v32, 0.0 }
 0x1e1   :  { %1307 = vst [vmem:[#allocation2 + $0x331] sm:$0xff] %v1134_v1  ;;  %1308 = vst [vmem:[#allocation2 + $0x339] sm:$0xff] %v1135_v28  ;;  %3079 = vmatmul.mubr.bf16.vlgmr.msra.gmra.mrb[0].mxu1 %v12140_v7  ;;  %v8971_v6 = vpack.c.bf16 %v12144_v49, %v12143_v50  ;;  %v1506_v1 = vld [vmem:[#allocation2 + $0x50] sm:$0xff]  ;;  %v12150_v28 = vmax.f32 %v8617_v0, 0.0  ;;  %v12157_v0 = vmax.f32 %v8645_v27, 0.0  ;;  %v1897_v55 = vpack.c.bf16 %v1440_v40, %v1439_v52  ;;  %v1442_v12 = vld [vmem:[#allocation2 + $0x3a] sm:$0xff] }
 0x1e2   :  { %3336 = vmatpush1.bf16.msra.mxu1 %v7425_v22  ;;  %3086 = vmatprep.mubr.bf16.mxu1 %v1898_v37  ;;  %v8984_v10 = vpack.c.bf16 %v12149_v39, %v12148_v4  ;;  %v9002_v38 = vpack.c.bf16 %v12155_v59, %v12154_v47  ;;  %v12156_v22 = vmax.f32 %v8641_v15, 0.0  ;;  %v12159_v16 = vmax.f32 %v8653_v25, 0.0  ;;  %v1444_v23 = vld [vmem:[#allocation2 + $0x52] sm:$0xff]  ;;  %v1445_v50 = vld [vmem:[#allocation2 + $0x62] sm:$0xff]  ;;  %v1446_v49 = vld [vmem:[#allocation2 + $0x6a] sm:$0xff] }
 0x1e3   :  { %3337 = vmatprep.subr.bf16.mxu1 %v12145_v29  ;;  %v8990_v2 = vpack.c.bf16 %v12151_v36, %v12150_v28  ;;  %v12160_v18 = vmax.f32 %v8657_v31, 0.0  ;;  %v12161_v15 = vmax.f32 %v8661_v44, 0.0  ;;  %v1907_v3 = vpack.c.bf16 %v1506_v1, %v1505_v46  ;;  %v1509_v7 = vld [vmem:[#allocation2 + $0x78] sm:$0xff]  ;;  %v7431_v19 = vld [vmem:[%s11840_s4 + $0x130] sm:$0xff]   ;;  %v7433_v40 = vld [vmem:[%s11840_s4 + $0x140] sm:$0xff]  }
 0x1e4   :  { %v9008_v57 = vpack.c.bf16 %v12157_v0, %v12156_v22  ;;  %v9018_v9 = vpack.c.bf16 %v12159_v16, %v12158_v11  ;;  %v12162_v21 = vmax.f32 %v8665_v54, 0.0  ;;  %v12163_v26 = vmax.f32 %v8669_v41, 0.0  ;;  %v1511_v30 = vld [vmem:[#allocation2 + $0x90] sm:$0xff]  ;;  %v1512_v58 = vld [vmem:[#allocation2 + $0x98] sm:$0xff]  ;;  %v1448_v46 = vld [vmem:[#allocation2 + $0x82] sm:$0xff] }
 0x1e5   :  { %v9024_v27 = vpack.c.bf16 %v12161_v15, %v12160_v18  ;;  %v12164_v56 = vmax.f32 %v8681_v17, 0.0  ;;  %v12165_v32 = vmax.f32 %v8685_v5, 0.0  ;;  %v12166_v31 = vmax.f32 %v8689_v14, 0.0  ;;  %v7428_v17 = vld [vmem:[%s11840_s4 + $0x118] sm:$0xff]   ;;  %v1507_v14 = vld [vmem:[#allocation2 + $0x60] sm:$0xff]  ;;  %v1513_v1 = vld [vmem:[#allocation2 + $0xa8] sm:$0xff] }
 0x1e6   :  { %3338 = vmatpush1.bf16.msra.mxu1 %v7426_v34  ;;  %v9030_v51 = vpack.c.bf16 %v12163_v26, %v12162_v21  ;;  %2806 = vmatmul.mubr.bf16.gmra.mrb[72].mxu0 %v1898_v37  ;;  %v12167_v44 = vmax.f32 %v8693_v35, 0.0  ;;  %v12168_v54 = vmax.f32 %v8697_v43, 0.0  ;;  %v1441_v5 = vld [vmem:[#allocation2 + $0x32] sm:$0xff]  ;;  %v1508_v35 = vld [vmem:[#allocation2 + $0x68] sm:$0xff]  ;;  %v7429_v43 = vld [vmem:[%s11840_s4 + $0x120] sm:$0xff]   ;;  %v1924_v52 = vpack.c.bf16 %v1446_v49, %v1445_v50 }
 0x1e7   :  { %3339 = vmatprep.subr.bf16.mxu1 %v12145_v29  ;;  %v9036_v25 = vpack.c.bf16 %v12165_v32, %v12164_v56  ;;  %2813 = vmatprep.mubr.bf16.mxu0 %v1914_v20  ;;  %v1906_v60 = vpack.c.bf16 %v1442_v12, %v1441_v5  ;;  %v1916_v33 = vpack.c.bf16 %v1508_v35, %v1507_v14  ;;  %v1443_v20 = vld [vmem:[#allocation2 + $0x4a] sm:$0xff]  ;;  %v1510_v37 = vld [vmem:[#allocation2 + $0x80] sm:$0xff]  ;;  %v1452_v11 = vld [vmem:[#allocation2 + $0xb2] sm:$0xff] }
 0x1e8   :  { %v9042_v8 = vpack.c.bf16 %v12167_v44, %v12166_v31  ;;  %v9048_v41 = vpack.c.bf16 %v1109_v42, %v12168_v54  ;;  %v7430_v42 = vld [vmem:[%s11840_s4 + $0x128] sm:$0xff]   ;;  %v1915_v24 = vpack.c.bf16 %v1444_v23, %v1443_v20  ;;  %v1925_v34 = vpack.c.bf16 %v1510_v37, %v1509_v7  ;;  %v1447_v39 = vld [vmem:[#allocation2 + $0x7a] sm:$0xff]  ;;  %v1514_v28 = vld [vmem:[#allocation2 + $0xb0] sm:$0xff] }
 0x1e9   :  { %3087 = vmatmul.mubr.bf16.gmra.mrb[4].mxu1 %v1897_v55  ;;  %v1934_v4 = vpack.c.bf16 %v1512_v58, %v1511_v30  ;;  %v1933_v36 = vpack.c.bf16 %v1448_v46, %v1447_v39  ;;  %v7435_v48 = vld [vmem:[%s11840_s4 + $0x150] sm:$0xff]   ;;  %v1943_v45 = vpack.c.bf16 %v1514_v28, %v1513_v1  ;;  %v1450_v47 = vld [vmem:[#allocation2 + $0x9a] sm:$0xff]  ;;  %v1516_v22 = vld [vmem:[#allocation2 + $0xc8] sm:$0xff] }
 0x1ea   :  { %3094 = vmatprep.mubr.bf16.mxu1 %v1907_v3  ;;  %3340 = vmatpush1.bf16.msra.mxu1 %v7427_v63  ;;  %v1515_v59 = vld [vmem:[#allocation2 + $0xc0] sm:$0xff]  ;;  %v7436_v63 = vld [vmem:[%s11840_s4 + $0x158] sm:$0xff]   ;;  %v1454_v26 = vld [vmem:[#allocation2 + $0xca] sm:$0xff] }
 0x1eb   :  { %3341 = vmatprep.subr.bf16.mxu1 %v12145_v29  ;;  %v1952_v55 = vpack.c.bf16 %v1516_v22, %v1515_v59  ;;  %v1517_v16 = vld [vmem:[#allocation2 + $0xd8] sm:$0xff]  ;;  %v1518_v18 = vld [vmem:[#allocation2 + $0xe0] sm:$0xff]  ;;  %v1519_v56 = vld [vmem:[#allocation2 + $0xf0] sm:$0xff] }
 0x1ec   :  { %v1453_v21 = vld [vmem:[#allocation2 + $0xc2] sm:$0xff]  ;;  %v1520_v32 = vld [vmem:[#allocation2 + $0xf8] sm:$0xff]  ;;  %v1522_v5 = vld [vmem:[#allocation2 + $0x110] sm:$0xff] }
 0x1ed   :  { %v1970_v31 = vpack.c.bf16 %v1520_v32, %v1519_v56  ;;  %v7437_v44 = vld [vmem:[%s11840_s4 + $0x160] sm:$0xff]   ;;  %v1457_v35 = vld [vmem:[#allocation2 + $0xf2] sm:$0xff]  ;;  %v7438_v20 = vld [vmem:[%s11840_s4 + $0x168] sm:$0xff]  }
 0x1ee   :  { %3342 = vmatpush1.bf16.msra.mxu1 %v7428_v17  ;;  %2814 = vmatmul.mubr.bf16.gmra.mrb[76].mxu0 %v1907_v3  ;;  %v1961_v3 = vpack.c.bf16 %v1518_v18, %v1517_v16  ;;  %v1455_v54 = vld [vmem:[#allocation2 + $0xda] sm:$0xff]  ;;  %v1456_v17 = vld [vmem:[#allocation2 + $0xe2] sm:$0xff]  ;;  %v1459_v23 = vld [vmem:[#allocation2 + $0x10a] sm:$0xff] }
 0x1ef   :  { %3343 = vmatprep.subr.bf16.mxu1 %v12145_v29  ;;  %2821 = vmatprep.mubr.bf16.mxu0 %v1923_v53  ;;  %v7432_v53 = vld [vmem:[%s11840_s4 + $0x138] sm:$0xff]   ;;  %v1969_v12 = vpack.c.bf16 %v1456_v17, %v1455_v54  ;;  %v1461_v30 = vld [vmem:[#allocation2 + $0x122] sm:$0xff]  ;;  %v1462_v58 = vld [vmem:[#allocation2 + $0x12a] sm:$0xff] }
 0x1f0   :  { %v1460_v7 = vld [vmem:[#allocation2 + $0x112] sm:$0xff]  ;;  %v1463_v1 = vld [vmem:[#allocation2 + $0x13a] sm:$0xff]  ;;  %v1464_v28 = vld [vmem:[#allocation2 + $0x142] sm:$0xff] }
 0x1f1   :  { %3095 = vmatmul.mubr.bf16.gmra.mrb[8].mxu1 %v1906_v60  ;;  %v1458_v60 = vld [vmem:[#allocation2 + $0xfa] sm:$0xff]  ;;  %v7442_v46 = vld [vmem:[%s11840_s4 + $0x210] sm:$0xff]   ;;  %v1533_v56 = vld [vmem:[#allocation2 + $0x1c8] sm:$0xff] }
 0x1f2   :  { %3102 = vmatprep.mubr.bf16.mxu1 %v1916_v33  ;;  %3344 = vmatpush1.bf16.msra.mxu1 %v7429_v43  ;;  %v1523_v43 = vld [vmem:[#allocation2 + $0x120] sm:$0xff]  ;;  %v1525_v37 = vld [vmem:[#allocation2 + $0x138] sm:$0xff]  ;;  %v1534_v32 = vld [vmem:[#allocation2 + $0x1d0] sm:$0xff] }
 0x1f3   :  { %3345 = vmatprep.subr.bf16.mxu1 %v12145_v29  ;;  %v1405_v59 = vld [vmem:[#allocation2 + $0x1b1] sm:$0xff]  ;;  %v1406_v22 = vld [vmem:[#allocation2 + $0x1b9] sm:$0xff] }
 0x1f4   :  { %v2031_v16 = vpack.c.bf16 %v1406_v22, %v1405_v59  ;;  %v12169_v54 = vld [vmem:[#allocation10_spill] sm:$0xff] }
 0x1f5   :  { %v1469_v17 = vld [vmem:[#allocation2 + $0x1b2] sm:$0xff] }
 0x1f6   :  { %3346 = vmatpush1.bf16.msra.mxu1 %v7430_v42  ;;  %2822 = vmatmul.mubr.bf16.gmra.mrb[80].mxu0 %v1916_v33  ;;  %v1524_v33 = vld [vmem:[#allocation2 + $0x128] sm:$0xff]  ;;  %v1480_v59 = vld [vmem:[#allocation2 + $0x232] sm:$0xff] }
 0x1f7   :  { %3347 = vmatprep.subr.bf16.mxu1 %v12145_v29  ;;  %2829 = vmatprep.mubr.bf16.mxu0 %v1932_v61  ;;  %v7434_v61 = vld [vmem:[%s11840_s4 + $0x148] sm:$0xff]   ;;  %v1988_v42 = vpack.c.bf16 %v1524_v33, %v1523_v43  ;;  %v1472_v43 = vld [vmem:[#allocation2 + $0x1d2] sm:$0xff] }
 0x1f8   :  { %v1537_v33 = vld [vmem:[#allocation2 + $0x1f8] sm:$0xff] }
 0x1f9   :  { %3103 = vmatmul.mubr.bf16.gmra.mrb[12].mxu1 %v1915_v24  ;;  %v1526_v24 = vld [vmem:[#allocation2 + $0x140] sm:$0xff] }
 0x1fa   :  { %3110 = vmatprep.mubr.bf16.mxu1 %v1925_v34  ;;  %3348 = vmatpush1.bf16.msra.mxu1 %v7431_v19  ;;  %v1997_v49 = vpack.c.bf16 %v1526_v24, %v1525_v37  ;;  %v1414_v37 = vld [vmem:[#allocation2 + $0x219] sm:$0xff]  ;;  %v1539_v24 = vld [vmem:[#allocation2 + $0x210] sm:$0xff] }
 0x1fb   :  { %3349 = vmatprep.subr.bf16.mxu1 %v12145_v29  ;;  %v1419_v22 = vld [vmem:[#allocation2 + $0x259] sm:$0xff] }
 0x1fe   :  { %3350 = vmatpush1.bf16.msra.mxu1 %v7432_v53  ;;  %2830 = vmatmul.mubr.bf16.gmra.mrb[84].mxu0 %v1925_v34  ;;  %v1987_v53 = vpack.c.bf16 %v1460_v7, %v1459_v23  ;;  %v1474_v23 = vld [vmem:[#allocation2 + $0x1ea] sm:$0xff] }
 0x1ff   :  { %3351 = vmatprep.subr.bf16.mxu1 %v12145_v29  ;;  %2837 = vmatprep.mubr.bf16.mxu0 %v8971_v6  ;;  %v1449_v6 = vld [vmem:[#allocation2 + $0x92] sm:$0xff] }
 0x200   :  { %v1942_v0 = vpack.c.bf16 %v1450_v47, %v1449_v6  ;;  %v9124_v6 = vpack.c.bf16 %v1464_v28, %v1463_v1  ;;  %v1413_v7 = vld [vmem:[#allocation2 + $0x211] sm:$0xff]  ;;  %v1418_v1 = vld [vmem:[#allocation2 + $0x249] sm:$0xff]  ;;  %v1543_v28 = vld [vmem:[#allocation2 + $0x240] sm:$0xff] }
 0x201   :  { %3111 = vmatmul.mubr.bf16.gmra.mrb[16].mxu1 %v1924_v52  ;;  %v1527_v52 = vld [vmem:[#allocation2 + $0x150] sm:$0xff] }
 0x202   :  { %3118 = vmatprep.mubr.bf16.mxu1 %v1934_v4  ;;  %3352 = vmatpush1.bf16.msra.mxu1 %v7433_v40  ;;  %v1528_v40 = vld [vmem:[#allocation2 + $0x158] sm:$0xff] }
 0x203   :  { %3353 = vmatprep.subr.bf16.mxu1 %v12145_v29  ;;  %v2006_v39 = vpack.c.bf16 %v1528_v40, %v1527_v52  ;;  %v1542_v52 = vld [vmem:[#allocation2 + $0x230] sm:$0xff] }
 0x206   :  { %3354 = vmatpush1.bf16.msra.mxu1 %v7434_v61  ;;  %2838 = vmatmul.mubr.bf16.gmra.mrb[88].mxu0 %v1934_v4  ;;  %v7440_v4 = vld [vmem:[%s11840_s4 + $0x208] sm:$0xff]   ;;  %v1996_v61 = vpack.c.bf16 %v1462_v58, %v1461_v30 }
 0x207   :  { %3355 = vmatprep.subr.bf16.mxu1 %v12145_v29  ;;  %2845 = vmatprep.mubr.bf16.mxu0 %v8978_v62  ;;  %v1451_v62 = vld [vmem:[#allocation2 + $0xaa] sm:$0xff] }
 0x208   :  { %v1951_v15 = vpack.c.bf16 %v1452_v11, %v1451_v62  ;;  %v1532_v62 = vld [vmem:[#allocation2 + $0x188] sm:$0xff] }
 0x209   :  { %3119 = vmatmul.mubr.bf16.gmra.mrb[20].mxu1 %v1933_v36  ;;  %v1529_v36 = vld [vmem:[#allocation2 + $0x168] sm:$0xff] }
 0x20a   :  { %3126 = vmatprep.mubr.bf16.mxu1 %v1943_v45  ;;  %3356 = vmatpush1.bf16.msra.mxu1 %v7435_v48  ;;  %v1530_v48 = vld [vmem:[#allocation2 + $0x170] sm:$0xff]  ;;  %v7445_v11 = vld [vmem:[%s11840_s4 + $0x228] sm:$0xff]  }
 0x20b   :  { %3357 = vmatprep.subr.bf16.mxu1 %v12145_v29  ;;  %v2015_v47 = vpack.c.bf16 %v1530_v48, %v1529_v36  ;;  %v1415_v30 = vld [vmem:[#allocation2 + $0x229] sm:$0xff] }
 0x20c   :  { %v1541_v58 = vld [vmem:[#allocation2 + $0x228] sm:$0xff] }
 0x20d   :  { %v1544_v36 = vld [vmem:[#allocation2 + $0x248] sm:$0xff] }
 0x20e   :  { %2846 = vmatmul.mubr.bf16.gmra.mrb[92].mxu0 %v1943_v45  ;;  %3358 = vmatpush1.bf16.msra.mxu1 %v7436_v63  ;;  %v7443_v45 = vld [vmem:[%s11840_s4 + $0x218] sm:$0xff]   ;;  %v1531_v63 = vld [vmem:[#allocation2 + $0x180] sm:$0xff] }
 0x20f   :  { %2853 = vmatprep.mubr.bf16.mxu0 %v8984_v10  ;;  %3359 = vmatprep.subr.bf16.mxu1 %v12145_v29  ;;  %v1960_v10 = vpack.c.bf16 %v1454_v26, %v1453_v21  ;;  %v1467_v21 = vld [vmem:[#allocation2 + $0x16a] sm:$0xff]  ;;  %v1468_v26 = vld [vmem:[#allocation2 + $0x172] sm:$0xff] }
 0x211   :  { %3127 = vmatmul.mubr.bf16.gmra.mrb[24].mxu1 %v1942_v0  ;;  %v1465_v0 = vld [vmem:[#allocation2 + $0x152] sm:$0xff] }
 0x212   :  { %3134 = vmatprep.mubr.bf16.mxu1 %v1952_v55  ;;  %3360 = vmatpush1.bf16.msra.mxu1 %v7437_v44  ;;  %v2033_v44 = vpack.c.bf16 %v1534_v32, %v1533_v56  ;;  %v1548_v56 = vld [vmem:[#allocation2 + $0x278] sm:$0xff] }
 0x213   :  { %3361 = vmatprep.subr.bf16.mxu1 %v12145_v29 }
 0x216   :  { %2854 = vmatmul.mubr.bf16.gmra.mrb[96].mxu0 %v1952_v55  ;;  %3362 = vmatpush1.bf16.msra.mxu1 %v7438_v20  ;;  %v1466_v55 = vld [vmem:[#allocation2 + $0x15a] sm:$0xff] }
 0x217   :  { %2861 = vmatprep.mubr.bf16.mxu0 %v8990_v2  ;;  %v1521_v2 = vld [vmem:[#allocation2 + $0x108] sm:$0xff]  ;;  %3363 = vmatprep.subr.bf16.mxu1 %v12145_v29  ;;  %v9134_v18 = vpack.c.bf16 %v1466_v55, %v1465_v0  ;;  %v1545_v55 = vld [vmem:[#allocation2 + $0x258] sm:$0xff] }
 0x218   :  { %v1979_v14 = vpack.c.bf16 %v1522_v5, %v1521_v2  ;;  %v1470_v2 = vld [vmem:[#allocation2 + $0x1ba] sm:$0xff] }
 0x219   :  { %3135 = vmatmul.mubr.bf16.gmra.mrb[28].mxu1 %v1951_v15  ;;  %v2024_v15 = vpack.c.bf16 %v1532_v62, %v1531_v63  ;;  %v2032_v5 = vpack.c.bf16 %v1470_v2, %v1469_v17  ;;  %v1420_v0 = vld [vmem:[#allocation2 + $0x261] sm:$0xff]  ;;  %v1423_v2 = vld [vmem:[#allocation2 + $0x289] sm:$0xff] }
 0x21a   :  { %3142 = vmatprep.mubr.bf16.mxu1 %v1961_v3  ;;  %v1546_v63 = vld [vmem:[#allocation2 + $0x260] sm:$0xff] }
 0x21b   :  { %v1484_v17 = vld [vmem:[#allocation2 + $0x262] sm:$0xff] }
 0x21e   :  { %2862 = vmatmul.mubr.bf16.gmra.mrb[100].mxu0 %v1961_v3  ;;  %v7447_v3 = vld [vmem:[%s11840_s4 + $0x230] sm:$0xff]  }
 0x21f   :  { %2869 = vmatprep.mubr.bf16.mxu0 %v8996_v13  ;;  %v1978_v13 = vpack.c.bf16 %v1458_v60, %v1457_v35  ;;  %v1471_v60 = vld [vmem:[#allocation2 + $0x1ca] sm:$0xff] }
 0x221   :  { %3143 = vmatmul.mubr.bf16.gmra.mrb[32].mxu1 %v1960_v10  ;;  %v7448_v10 = vld [vmem:[%s11840_s4 + $0x238] sm:$0xff]  }
 0x222   :  { %3150 = vmatprep.mubr.bf16.mxu1 %v1970_v31 }
 0x226   :  { %2870 = vmatmul.mubr.bf16.gmra.mrb[104].mxu0 %v1970_v31  ;;  %v9147_v31 = vpack.c.bf16 %v1468_v26, %v1467_v21  ;;  %v1422_v21 = vld [vmem:[#allocation2 + $0x279] sm:$0xff]  ;;  %v1547_v26 = vld [vmem:[#allocation2 + $0x270] sm:$0xff] }
 0x227   :  { %2877 = vmatprep.mubr.bf16.mxu0 %v9002_v38  ;;  %v9101_v38 = vpop.f32.mrb[64].mxu0 }
 0x228   :  { %v2793_v19 = vpop.f32.mrb[65].mxu0 }
 0x229   :  { %3151 = vmatmul.mubr.bf16.gmra.mrb[36].mxu1 %v1969_v12  ;;  %v9104_v34 = vpop.f32.mrb[66].mxu0  ;;  %v1535_v12 = vld [vmem:[#allocation2 + $0x1e0] sm:$0xff]  ;;  %v1540_v19 = vld [vmem:[#allocation2 + $0x218] sm:$0xff] }
 0x22a   :  { %3158 = vmatprep.mubr.bf16.mxu1 %v1979_v14  ;;  %v2796_v50 = vpop.f32.mrb[67].mxu0 }
 0x22b   :  { %v2060_v50 = vpack.c.bf16 %v1540_v19, %v1539_v24  ;;  %v1487_v19 = vld [vmem:[#allocation2 + $0x28a] sm:$0xff] }
 0x22e   :  { %2878 = vmatmul.mubr.bf16.gmra.mrb[108].mxu0 %v1979_v14  ;;  %v1536_v14 = vld [vmem:[#allocation2 + $0x1e8] sm:$0xff] }
 0x22f   :  { %2885 = vmatprep.mubr.bf16.mxu0 %v9008_v57  ;;  %v7439_v57 = vld [vmem:[%s11840_s4 + $0x200] sm:$0xff]   ;;  %v2042_v35 = vpack.c.bf16 %v1536_v14, %v1535_v12  ;;  %v1549_v12 = vld [vmem:[#allocation2 + $0x288] sm:$0xff]  ;;  %v1550_v14 = vld [vmem:[#allocation2 + $0x290] sm:$0xff] }
 0x230   :  { %6725 = vmatprep.subr.bf16.mxu0 %v7439_v57 }
 0x231   :  { %3159 = vmatmul.mubr.bf16.gmra.mrb[40].mxu1 %v1978_v13  ;;  %6726 = vmatpush3.bf16.msra.mxu0 %v7439_v57  ;;  %v1538_v13 = vld [vmem:[#allocation2 + $0x200] sm:$0xff] }
 0x232   :  { %3166 = vmatprep.mubr.bf16.mxu1 %v1988_v42  ;;  %6727 = vmatprep.subr.bf16.mxu0 %v7440_v4  ;;  %v2051_v20 = vpack.c.bf16 %v1538_v13, %v1537_v33  ;;  %v1476_v57 = vld [vmem:[#allocation2 + $0x202] sm:$0xff]  ;;  %v1485_v33 = vld [vmem:[#allocation2 + $0x272] sm:$0xff]  ;;  %v1486_v13 = vld [vmem:[#allocation2 + $0x27a] sm:$0xff] }
 0x235   :  { %6728 = vmatpush3.bf16.msra.mxu0 %v7440_v4 }
 0x236   :  { %2886 = vmatmul.mubr.bf16.gmra.mrb[112].mxu0 %v1988_v42  ;;  %6729 = vmatprep.subr.bf16.mxu0 %v7442_v46  ;;  %v2041_v42 = vpack.c.bf16 %v1472_v43, %v1471_v60  ;;  %v2105_v43 = vpack.c.bf16 %v1550_v14, %v1549_v12 }
 0x237   :  { %2893 = vmatprep.mubr.bf16.mxu0 %v9018_v9  ;;  %v7441_v9 = vld [vmem:[%s11840_s4 + $0x170] sm:$0xff]  }
 0x238   :  { %3364 = vmatpush1.bf16.msra.mxu1 %v7441_v9  ;;  %v1478_v9 = vld [vmem:[#allocation2 + $0x21a] sm:$0xff] }
 0x239   :  { %3167 = vmatmul.mubr.bf16.gmra.mrb[44].mxu1 %v1987_v53  ;;  %6730 = vmatpush3.bf16.msra.mxu0 %v7442_v46  ;;  %v1417_v46 = vld [vmem:[#allocation2 + $0x241] sm:$0xff] }
 0x23a   :  { %3174 = vmatprep.mubr.bf16.mxu1 %v1997_v49  ;;  %3365 = vmatprep.subr.bf16.mxu1 %v12145_v29 }
 0x23b   :  { %6731 = vmatprep.subr.bf16.mxu0 %v7443_v45 }
 0x23d   :  { %6732 = vmatpush3.bf16.msra.mxu0 %v7443_v45  ;;  %v2085_v45 = vpack.c.bf16 %v1418_v1, %v1417_v46  ;;  %v1555_v46 = vld [vmem:[#allocation2 + $0x2d0] sm:$0xff]  ;;  %v1556_v1 = vld [vmem:[#allocation2 + $0x2d8] sm:$0xff] }
 0x23e   :  { %2894 = vmatmul.mubr.bf16.gmra.mrb[116].mxu0 %v1997_v49  ;;  %v1475_v49 = vld [vmem:[#allocation2 + $0x1fa] sm:$0xff] }
 0x23f   :  { %2901 = vmatprep.mubr.bf16.mxu0 %v9024_v27  ;;  %v7444_v27 = vld [vmem:[%s11840_s4 + $0x220] sm:$0xff]   ;;  %v9157_v40 = vpack.c.bf16 %v1476_v57, %v1475_v49  ;;  %v1553_v57 = vld [vmem:[#allocation2 + $0x2b8] sm:$0xff] }
 0x240   :  { %6733 = vmatprep.subr.bf16.mxu0 %v7444_v27  ;;  %v1428_v49 = vld [vmem:[#allocation2 + $0x2c1] sm:$0xff] }
 0x241   :  { %3175 = vmatmul.mubr.bf16.gmra.mrb[48].mxu1 %v1996_v61  ;;  %6734 = vmatpush3.bf16.msra.mxu0 %v7444_v27  ;;  %v2069_v61 = vpack.c.bf16 %v1542_v52, %v1541_v58  ;;  %v1479_v27 = vld [vmem:[#allocation2 + $0x22a] sm:$0xff] }
 0x242   :  { %3182 = vmatprep.mubr.bf16.mxu1 %v2006_v39  ;;  %6735 = vmatprep.subr.bf16.mxu0 %v7445_v11  ;;  %v9163_v62 = vpack.c.bf16 %v1480_v59, %v1479_v27  ;;  %v1491_v27 = vld [vmem:[#allocation2 + $0x2ba] sm:$0xff]  ;;  %v1492_v59 = vld [vmem:[#allocation2 + $0x2c2] sm:$0xff] }
 0x245   :  { %6736 = vmatpush3.bf16.msra.mxu0 %v7445_v11  ;;  %v2094_v11 = vpack.c.bf16 %v1420_v0, %v1419_v22  ;;  %v1431_v22 = vld [vmem:[#allocation2 + $0x2e9] sm:$0xff] }
 0x246   :  { %2902 = vmatmul.mubr.bf16.gmra.mrb[120].mxu0 %v2006_v39  ;;  %6737 = vmatprep.subr.bf16.mxu0 %v7447_v3  ;;  %v1477_v39 = vld [vmem:[#allocation2 + $0x212] sm:$0xff] }
 0x247   :  { %2909 = vmatprep.mubr.bf16.mxu0 %v9030_v51  ;;  %v7446_v51 = vld [vmem:[%s11840_s4 + $0x178] sm:$0xff]   ;;  %v9160_v48 = vpack.c.bf16 %v1478_v9, %v1477_v39 }
 0x248   :  { %3366 = vmatpush1.bf16.msra.mxu1 %v7446_v51  ;;  %v1482_v51 = vld [vmem:[#allocation2 + $0x24a] sm:$0xff]  ;;  %v1430_v9 = vld [vmem:[#allocation2 + $0x2d9] sm:$0xff] }
 0x249   :  { %3183 = vmatmul.mubr.bf16.gmra.mrb[52].mxu1 %v9124_v6  ;;  %6738 = vmatpush3.bf16.msra.mxu0 %v7447_v3  ;;  %v1421_v3 = vld [vmem:[#allocation2 + $0x271] sm:$0xff] }
 0x24a   :  { %3190 = vmatprep.mubr.bf16.mxu1 %v2015_v47  ;;  %3624 = vmatprep.subr.bf16.mxu1 %v12145_v29  ;;  %v1429_v39 = vld [vmem:[#allocation2 + $0x2d1] sm:$0xff] }
 0x24b   :  { %6739 = vmatprep.subr.bf16.mxu0 %v7448_v10 }
 0x24d   :  { %6740 = vmatpush3.bf16.msra.mxu0 %v7448_v10  ;;  %v2103_v10 = vpack.c.bf16 %v1422_v21, %v1421_v3 }
 0x24e   :  { %2910 = vmatmul.mubr.bf16.gmra.mrb[124].mxu0 %v2015_v47  ;;  %v2078_v47 = vpack.c.bf16 %v1544_v36, %v1543_v28  ;;  %v2139_v36 = vpack.c.bf16 %v1430_v9, %v1429_v39  ;;  %v1564_v9 = vld [vmem:[#allocation2 + $0x338] sm:$0xff] }
 0x24f   :  { %2917 = vmatprep.mubr.bf16.mxu0 %v2031_v16  ;;  %v2087_v16 = vpack.c.bf16 %v1546_v63, %v1545_v55  ;;  %v1432_v55 = vld [vmem:[#allocation2 + $0x2f1] sm:$0xff]  ;;  %v1557_v63 = vld [vmem:[#allocation2 + $0x2e8] sm:$0xff] }
 0x250   :  { %v2148_v3 = vpack.c.bf16 %v1432_v55, %v1431_v22  ;;  %v1500_v55 = vld [vmem:[#allocation2 + $0x322] sm:$0xff] }
 0x251   :  { %3191 = vmatmul.mubr.bf16.gmra.mrb[56].mxu1 %v9134_v18 }
 0x252   :  { %3198 = vmatprep.mubr.bf16.mxu1 %v2024_v15  ;;  %v1481_v15 = vld [vmem:[#allocation2 + $0x242] sm:$0xff] }
 0x253   :  { %v9166_v32 = vpack.c.bf16 %v1482_v51, %v1481_v15  ;;  %v9185_v51 = vpack.c.bf16 %v1492_v59, %v1491_v27 }
 0x256   :  { %2918 = vmatmul.mubr.bf16.gmra.mrb[128].mxu0 %v12169_v54  ;;  %v1483_v54 = vld [vmem:[#allocation2 + $0x25a] sm:$0xff] }
 0x257   :  { %2925 = vmatprep.mubr.bf16.mxu0 %v9036_v25  ;;  %v1473_v25 = vld [vmem:[#allocation2 + $0x1e2] sm:$0xff] }
 0x258   :  { %v9154_v53 = vpack.c.bf16 %v1474_v23, %v1473_v25  ;;  %v1551_v25 = vld [vmem:[#allocation2 + $0x2a0] sm:$0xff]  ;;  %v1552_v23 = vld [vmem:[#allocation2 + $0x2a8] sm:$0xff] }
 0x259   :  { %3199 = vmatmul.mubr.bf16.gmra.mrb[60].mxu1 %v9147_v31  ;;  %v2114_v24 = vpack.c.bf16 %v1552_v23, %v1551_v25  ;;  %v1436_v25 = vld [vmem:[#allocation2 + $0x321] sm:$0xff] }
 0x25a   :  { %3206 = vmatprep.mubr.bf16.mxu1 %v2033_v44 }
 0x25e   :  { %2926 = vmatmul.mubr.bf16.gmra.mrb[132].mxu0 %v2033_v44  ;;  %v2096_v44 = vpack.c.bf16 %v1548_v56, %v1547_v26  ;;  %v1493_v56 = vld [vmem:[#allocation2 + $0x2d2] sm:$0xff] }
 0x25f   :  { %2933 = vmatprep.mubr.bf16.mxu0 %v9042_v8  ;;  %v2067_v8 = vpack.c.bf16 %v1414_v37, %v1413_v7  ;;  %v9172_v7 = vpack.c.bf16 %v1486_v13, %v1485_v33 }
 0x261   :  { %3207 = vmatmul.mubr.bf16.gmra.mrb[64].mxu1 %v2032_v5  ;;  %v1424_v5 = vld [vmem:[#allocation2 + $0x291] sm:$0xff] }
 0x262   :  { %3214 = vmatprep.mubr.bf16.mxu1 %v2042_v35  ;;  %v2112_v60 = vpack.c.bf16 %v1424_v5, %v1423_v2  ;;  %v1559_v2 = vld [vmem:[#allocation2 + $0x300] sm:$0xff]  ;;  %v1560_v5 = vld [vmem:[#allocation2 + $0x308] sm:$0xff] }
 0x263   :  { %v2150_v33 = vpack.c.bf16 %v1560_v5, %v1559_v2 }
 0x266   :  { %2934 = vmatmul.mubr.bf16.gmra.mrb[136].mxu0 %v2042_v35  ;;  %v9169_v35 = vpack.c.bf16 %v1484_v17, %v1483_v54  ;;  %v1434_v17 = vld [vmem:[#allocation2 + $0x309] sm:$0xff] }
 0x267   :  { %2941 = vmatprep.mubr.bf16.mxu0 %v9048_v41  ;;  %v1416_v41 = vld [vmem:[#allocation2 + $0x231] sm:$0xff] }
 0x268   :  { %v2076_v4 = vpack.c.bf16 %v1416_v41, %v1415_v30  ;;  %v1554_v30 = vld [vmem:[#allocation2 + $0x2c0] sm:$0xff] }
 0x269   :  { %3215 = vmatmul.mubr.bf16.gmra.mrb[68].mxu1 %v2041_v42  ;;  %v1425_v42 = vld [vmem:[#allocation2 + $0x2a1] sm:$0xff]  ;;  %v2123_v52 = vpack.c.bf16 %v1554_v30, %v1553_v57 }
 0x26a   :  { %3222 = vmatprep.mubr.bf16.mxu1 %v2051_v20 }
 0x26e   :  { %2942 = vmatmul.mubr.bf16.gmra.mrb[140].mxu0 %v2051_v20  ;;  %v1426_v20 = vld [vmem:[#allocation2 + $0x2a9] sm:$0xff] }
 0x26f   :  { %2949 = vmatprep.mubr.bf16.mxu0 %v2067_v8  ;;  %v2121_v37 = vpack.c.bf16 %v1426_v20, %v1425_v42  ;;  %v1488_v8 = vld [vmem:[#allocation2 + $0x292] sm:$0xff]  ;;  %v1495_v42 = vld [vmem:[#allocation2 + $0x2ea] sm:$0xff] }
 0x270   :  { %v9175_v41 = vpack.c.bf16 %v1488_v8, %v1487_v19  ;;  %v1496_v20 = vld [vmem:[#allocation2 + $0x2f2] sm:$0xff]  ;;  %v1562_v19 = vld [vmem:[#allocation2 + $0x320] sm:$0xff] }
 0x271   :  { %3223 = vmatmul.mubr.bf16.gmra.mrb[72].mxu1 %v9154_v53 }
 0x272   :  { %3230 = vmatprep.mubr.bf16.mxu1 %v2060_v50 }
 0x276   :  { %2950 = vmatmul.mubr.bf16.gmra.mrb[144].mxu0 %v2060_v50  ;;  %v1427_v50 = vld [vmem:[#allocation2 + $0x2b9] sm:$0xff] }
 0x277   :  { %2957 = vmatprep.mubr.bf16.mxu0 %v2076_v4  ;;  %v2130_v58 = vpack.c.bf16 %v1428_v49, %v1427_v50  ;;  %v1489_v4 = vld [vmem:[#allocation2 + $0x2a2] sm:$0xff]  ;;  %v9199_v49 = vpack.c.bf16 %v1496_v20, %v1495_v42 }
 0x278   :  { %v1566_v20 = vld [vmem:[#allocation2 + $0x21] sm:$0xff] }
 0x279   :  { %3231 = vmatmul.mubr.bf16.gmra.mrb[76].mxu1 %v9157_v40 }
 0x27a   :  { %3238 = vmatprep.mubr.bf16.mxu1 %v2069_v61 }
 0x27e   :  { %2958 = vmatmul.mubr.bf16.gmra.mrb[148].mxu0 %v2069_v61  ;;  %v1490_v61 = vld [vmem:[#allocation2 + $0x2aa] sm:$0xff] }
 0x27f   :  { %2965 = vmatprep.mubr.bf16.mxu0 %v2085_v45  ;;  %v9178_v28 = vpack.c.bf16 %v1490_v61, %v1489_v4  ;;  %v2132_v45 = vpack.c.bf16 %v1556_v1, %v1555_v46  ;;  %v1498_v4 = vld [vmem:[#allocation2 + $0x30a] sm:$0xff]  ;;  %v1822_v46 = vld [vmem:[#allocation2 + $0x32] sm:$0xff]  ;;  %v1823_v1 = vld [vmem:[#allocation2 + $0x3a] sm:$0xff] }
 0x280   :  { %v1563_v61 = vld [vmem:[#allocation2 + $0x330] sm:$0xff]  ;;  %v1894_v22 = vpack.c.bf16 %v1823_v1, %v1822_v46  ;;  %v1568_v1 = vld [vmem:[#allocation2 + $0x39] sm:$0xff] }
 0x281   :  { %3239 = vmatmul.mubr.bf16.gmra.mrb[80].mxu1 %v9160_v48  ;;  %v2168_v59 = vpack.c.bf16 %v1564_v9, %v1563_v61  ;;  %v1567_v9 = vld [vmem:[#allocation2 + $0x31] sm:$0xff] }
 0x282   :  { %3246 = vmatprep.mubr.bf16.mxu1 %v2078_v47 }
 0x286   :  { %2966 = vmatmul.mubr.bf16.gmra.mrb[152].mxu0 %v2078_v47 }
 0x287   :  { %2973 = vmatprep.mubr.bf16.mxu0 %v2094_v11  ;;  %v1558_v11 = vld [vmem:[#allocation2 + $0x2f0] sm:$0xff] }
 0x288   :  { %v2141_v21 = vpack.c.bf16 %v1558_v11, %v1557_v63  ;;  %v1824_v11 = vld [vmem:[#allocation2 + $0x4a] sm:$0xff] }
 0x289   :  { %3247 = vmatmul.mubr.bf16.gmra.mrb[84].mxu1 %v9163_v62 }
 0x28a   :  { %3254 = vmatprep.mubr.bf16.mxu1 %v2087_v16 }
 0x28e   :  { %2974 = vmatmul.mubr.bf16.gmra.mrb[156].mxu0 %v2087_v16 }
 0x28f   :  { %2981 = vmatprep.mubr.bf16.mxu0 %v2103_v10  ;;  %v1494_v10 = vld [vmem:[#allocation2 + $0x2da] sm:$0xff] }
 0x291   :  { %3255 = vmatmul.mubr.bf16.gmra.mrb[88].mxu1 %v9166_v32 }
 0x292   :  { %3262 = vmatprep.mubr.bf16.mxu1 %v2096_v44 }
 0x296   :  { %2982 = vmatmul.mubr.bf16.gmra.mrb[160].mxu0 %v2096_v44  ;;  %v1433_v44 = vld [vmem:[#allocation2 + $0x301] sm:$0xff] }
 0x297   :  { %2989 = vmatprep.mubr.bf16.mxu0 %v2112_v60  ;;  %v9192_v60 = vpack.c.bf16 %v1494_v10, %v1493_v56  ;;  %v1630_v56 = vld [vmem:[#allocation2 + $0x22] sm:$0xff] }
 0x298   :  { %v1826_v10 = vld [vmem:[#allocation2 + $0x62] sm:$0xff] }
 0x299   :  { %3263 = vmatmul.mubr.bf16.gmra.mrb[92].mxu1 %v9169_v35 }
 0x29a   :  { %3270 = vmatprep.mubr.bf16.mxu1 %v2105_v43 }
 0x29e   :  { %2990 = vmatmul.mubr.bf16.gmra.mrb[164].mxu0 %v2105_v43  ;;  %v2157_v43 = vpack.c.bf16 %v1434_v17, %v1433_v44  ;;  %v1827_v44 = vld [vmem:[#allocation2 + $0x6a] sm:$0xff] }
 0x29f   :  { %2997 = vmatprep.mubr.bf16.mxu0 %v2121_v37  ;;  %v1435_v37 = vld [vmem:[#allocation2 + $0x319] sm:$0xff] }
 0x2a0   :  { %v2166_v57 = vpack.c.bf16 %v1436_v25, %v1435_v37  ;;  %v1828_v25 = vld [vmem:[#allocation2 + $0x7a] sm:$0xff] }
 0x2a1   :  { %3271 = vmatmul.mubr.bf16.gmra.mrb[96].mxu1 %v9172_v7 }
 0x2a2   :  { %3278 = vmatprep.mubr.bf16.mxu1 %v2114_v24 }
 0x2a6   :  { %2998 = vmatmul.mubr.bf16.gmra.mrb[168].mxu0 %v2114_v24  ;;  %v1561_v24 = vld [vmem:[#allocation2 + $0x318] sm:$0xff] }
 0x2a7   :  { %3005 = vmatprep.mubr.bf16.mxu0 %v2130_v58  ;;  %v2159_v30 = vpack.c.bf16 %v1562_v19, %v1561_v24  ;;  %v7449_v19 = vld [vmem:[%s11840_s4 + $0x180] sm:$0xff]  }
 0x2a9   :  { %3279 = vmatmul.mubr.bf16.gmra.mrb[100].mxu1 %v9175_v41 }
 0x2aa   :  { %3286 = vmatprep.mubr.bf16.mxu1 %v2123_v52 }
 0x2ae   :  { %3006 = vmatmul.mubr.bf16.gmra.mrb[172].mxu0 %v2123_v52  ;;  %v1497_v52 = vld [vmem:[#allocation2 + $0x302] sm:$0xff] }
 0x2af   :  { %3013 = vmatprep.mubr.bf16.mxu0 %v2139_v36  ;;  %v9206_v27 = vpack.c.bf16 %v1498_v4, %v1497_v52 }
 0x2b1   :  { %3287 = vmatmul.mubr.bf16.gmra.mrb[104].mxu1 %v9178_v28  ;;  %v9181_v47 = vpop.f32.mrb[68].mxu0 }
 0x2b2   :  { %3294 = vmatprep.mubr.bf16.mxu1 %v2132_v45  ;;  %v2801_v0 = vpop.f32.mrb[69].mxu0 }
 0x2b3   :  { %v9183_v16 = vpop.f32.mrb[70].mxu0  ;;  %v1499_v0 = vld [vmem:[#allocation2 + $0x31a] sm:$0xff] }
 0x2b4   :  { %v2804_v15 = vpop.f32.mrb[71].mxu0  ;;  %v9213_v2 = vpack.c.bf16 %v1500_v55, %v1499_v0  ;;  %v1834_v55 = vld [vmem:[#allocation2 + $0xc2] sm:$0xff] }
 0x2b5   :  { %v1825_v15 = vld [vmem:[#allocation2 + $0x52] sm:$0xff] }
 0x2b6   :  { %3014 = vmatmul.mubr.bf16.gmra.mrb[176].mxu0 %v2132_v45  ;;  %v1903_v5 = vpack.c.bf16 %v1825_v15, %v1824_v11  ;;  %v1835_v11 = vld [vmem:[#allocation2 + $0xca] sm:$0xff] }
 0x2b7   :  { %3021 = vmatprep.mubr.bf16.mxu0 %v2148_v3  ;;  %v1629_v3 = vld [vmem:[#allocation2 + $0x1a] sm:$0xff] }
 0x2b9   :  { %3295 = vmatmul.mubr.bf16.gmra.mrb[108].mxu1 %v9185_v51  ;;  %v9188_v26 = vpop.f32.mrb[72].mxu0 }
 0x2ba   :  { %3302 = vmatprep.mubr.bf16.mxu1 %v2141_v21  ;;  %v2809_v54 = vpop.f32.mrb[73].mxu0 }
 0x2bb   :  { %v9190_v12 = vpop.f32.mrb[74].mxu0 }
 0x2bc   :  { %v2812_v14 = vpop.f32.mrb[75].mxu0 }
 0x2bd   :  { %v1891_v14 = vpack.c.bf16 %v1630_v56, %v1629_v3  ;;  %v1899_v3 = vpack.c.bf16 %v1568_v1, %v1567_v9  ;;  %v7451_v56 = vld [vmem:[%s11840_s4 + $0x190] sm:$0xff]   ;;  %v1571_v9 = vld [vmem:[#allocation2 + $0x61] sm:$0xff] }
 0x2be   :  { %3022 = vmatmul.mubr.bf16.gmra.mrb[180].mxu0 %v2141_v21  ;;  %v7454_v1 = vld [vmem:[%s11840_s4 + $0x1a8] sm:$0xff]  }
 0x2bf   :  { %3029 = vmatprep.mubr.bf16.mxu0 %v2157_v43  ;;  %v9215_v43 = vpack.c.bf16 %v1827_v44, %v1826_v10  ;;  %v9246_v10 = vpack.c.bf16 %v1835_v11, %v1834_v55  ;;  %v1569_v44 = vld [vmem:[#allocation2 + $0x49] sm:$0xff]  ;;  %v1841_v55 = vld [vmem:[#allocation2 + $0x112] sm:$0xff] }
 0x2c1   :  { %3303 = vmatmul.mubr.bf16.gmra.mrb[112].mxu1 %v9192_v60  ;;  %v9195_v13 = vpop.f32.mrb[76].mxu0 }
 0x2c2   :  { %3310 = vmatprep.mubr.bf16.mxu1 %v2150_v33  ;;  %v2817_v23 = vpop.f32.mrb[77].mxu0 }
 0x2c3   :  { %v9197_v8 = vpop.f32.mrb[78].mxu0  ;;  %v1829_v23 = vld [vmem:[#allocation2 + $0x82] sm:$0xff] }
 0x2c4   :  { %v2820_v50 = vpop.f32.mrb[79].mxu0  ;;  %v9226_v4 = vpack.c.bf16 %v1829_v23, %v1828_v25  ;;  %v1837_v25 = vld [vmem:[#allocation2 + $0xe2] sm:$0xff] }
 0x2c5   :  { %v1830_v50 = vld [vmem:[#allocation2 + $0x92] sm:$0xff] }
 0x2c6   :  { %3030 = vmatmul.mubr.bf16.gmra.mrb[184].mxu0 %v2150_v33  ;;  %v1565_v33 = vld [vmem:[#allocation2 + $0x19] sm:$0xff] }
 0x2c7   :  { %3037 = vmatprep.mubr.bf16.mxu0 %v2166_v57  ;;  %v1831_v57 = vld [vmem:[#allocation2 + $0x9a] sm:$0xff]  ;;  %v1890_v52 = vpack.c.bf16 %v1566_v20, %v1565_v33  ;;  %v1570_v33 = vld [vmem:[#allocation2 + $0x51] sm:$0xff] }
 0x2c8   :  { %v9229_v61 = vpack.c.bf16 %v1831_v57, %v1830_v50  ;;  %v1836_v20 = vld [vmem:[#allocation2 + $0xda] sm:$0xff]  ;;  %v1908_v57 = vpack.c.bf16 %v1570_v33, %v1569_v44  ;;  %v7455_v33 = vld [vmem:[%s11840_s4 + $0x1b0] sm:$0xff]  }
 0x2c9   :  { %3311 = vmatmul.mubr.bf16.gmra.mrb[116].mxu1 %v9199_v49  ;;  %v9202_v58 = vpop.f32.mrb[80].mxu0 }
 0x2ca   :  { %3318 = vmatprep.mubr.bf16.mxu1 %v2159_v30  ;;  %v2825_v39 = vpop.f32.mrb[81].mxu0 }
 0x2cb   :  { %v9204_v36 = vpop.f32.mrb[82].mxu0  ;;  %v7450_v39 = vld [vmem:[%s11840_s4 + $0x188] sm:$0xff]  }
 0x2cc   :  { %v2828_v45 = vpop.f32.mrb[83].mxu0 }
 0x2cd   :  { %v1832_v45 = vld [vmem:[#allocation2 + $0xaa] sm:$0xff] }
 0x2ce   :  { %3038 = vmatmul.mubr.bf16.gmra.mrb[188].mxu0 %v2159_v30 }
 0x2cf   :  { %6741 = vmatprep.mubr.bf16.mxu0 %v1894_v22 }
 0x2d1   :  { %3319 = vmatmul.mubr.bf16.gmra.mrb[120].mxu1 %v9206_v27  ;;  %v9209_v63 = vpop.f32.mrb[84].mxu0 }
 0x2d2   :  { %3326 = vmatprep.mubr.bf16.mxu1 %v2168_v59  ;;  %v2833_v21 = vpop.f32.mrb[85].mxu0  ;;  %v1833_v59 = vld [vmem:[#allocation2 + $0xb2] sm:$0xff] }
 0x2d3   :  { %v9211_v54 = vpop.f32.mrb[86].mxu0  ;;  %v9240_v21 = vpack.c.bf16 %v1833_v59, %v1832_v45  ;;  %v1572_v59 = vld [vmem:[#allocation2 + $0x69] sm:$0xff] }
 0x2d4   :  { %v2836_v17 = vpop.f32.mrb[87].mxu0  ;;  %v1917_v44 = vpack.c.bf16 %v1572_v59, %v1571_v9 }
 0x2d5   :  { %v7452_v17 = vld [vmem:[%s11840_s4 + $0x198] sm:$0xff]  }
 0x2d6   :  { %6742 = vmatmul.mubr.bf16.vlgmr.msra.gmra.mrb[192].mxu0 %v1903_v5 }
 0x2d7   :  { %6745 = vmatprep.mubr.bf16.mxu0 %v9215_v43 }
 0x2d9   :  { %3327 = vmatmul.mubr.bf16.gmra.mrb[124].mxu1 %v9213_v2  ;;  %v9219_v42 = vpop.f32.mrb[88].mxu0 }
 0x2da   :  { %3367 = vmatprep.mubr.bf16.mxu1 %v1891_v14  ;;  %v2841_v37 = vpop.f32.mrb[89].mxu0 }
 0x2db   :  { %v9221_v24 = vpop.f32.mrb[90].mxu0  ;;  %v1838_v37 = vld [vmem:[#allocation2 + $0xf2] sm:$0xff] }
 0x2dc   :  { %v2844_v30 = vpop.f32.mrb[91].mxu0 }
 0x2dd   :  { %v9258_v30 = vpack.c.bf16 %v1837_v25, %v1836_v20  ;;  %v7456_v25 = vld [vmem:[%s11840_s4 + $0x1b8] sm:$0xff]  }
 0x2de   :  { %6746 = vmatmul.mubr.bf16.gmra.mrb[196].mxu0 %v9226_v4 }
 0x2df   :  { %6749 = vmatprep.mubr.bf16.mxu0 %v9229_v61 }
 0x2e1   :  { %3368 = vmatmul.mubr.bf16.vlgmr.msra.gmra.mrb[0].mxu1 %v1890_v52  ;;  %v9236_v46 = vpop.f32.mrb[92].mxu0  ;;  %v7453_v52 = vld [vmem:[%s11840_s4 + $0x1a0] sm:$0xff]  }
 0x2e2   :  { %3625 = vmatpush1.bf16.msra.mxu1 %v7449_v19  ;;  %3375 = vmatprep.mubr.bf16.mxu1 %v1894_v22  ;;  %12170 = vst [vmem:[#allocation18_spill] sm:$0xff] %v9236_v46  ;;  %v2849_v0 = vpop.f32.mrb[93].mxu0  ;;  %v1839_v19 = vld [vmem:[#allocation2 + $0xfa] sm:$0xff]  ;;  %v1696_v46 = vld [vmem:[#allocation2 + $0x48] sm:$0xff] }
 0x2e3   :  { %3626 = vmatprep.subr.bf16.mxu1 %v12145_v29  ;;  %v9238_v15 = vpop.f32.mrb[94].mxu0  ;;  %v1840_v0 = vld [vmem:[#allocation2 + $0x10a] sm:$0xff] }
 0x2e4   :  { %12171 = vst [vmem:[#allocation20_spill] sm:$0xff] %v9238_v15  ;;  %v2852_v22 = vpop.f32.mrb[95].mxu0  ;;  %v1694_v15 = vld [vmem:[#allocation2 + $0x30] sm:$0xff] }
 0x2e5   :  { %v1842_v22 = vld [vmem:[#allocation2 + $0x122] sm:$0xff] }
 0x2e6   :  { %3627 = vmatpush1.bf16.msra.mxu1 %v7450_v39  ;;  %6750 = vmatmul.mubr.bf16.gmra.mrb[200].mxu0 %v9240_v21  ;;  %v9263_v39 = vpack.c.bf16 %v1839_v19, %v1838_v37  ;;  %v1573_v37 = vld [vmem:[#allocation2 + $0x79] sm:$0xff]  ;;  %v1574_v19 = vld [vmem:[#allocation2 + $0x81] sm:$0xff] }
 0x2e7   :  { %3628 = vmatprep.subr.bf16.mxu1 %v12145_v29  ;;  %6753 = vmatprep.mubr.bf16.mxu0 %v9246_v10  ;;  %v1926_v9 = vpack.c.bf16 %v1574_v19, %v1573_v37  ;;  %v1577_v19 = vld [vmem:[#allocation2 + $0xa9] sm:$0xff] }
 0x2e9   :  { %3376 = vmatmul.mubr.bf16.gmra.mrb[4].mxu1 %v1899_v3  ;;  %v9253_v14 = vpop.f32.mrb[96].mxu0  ;;  %v1843_v3 = vld [vmem:[#allocation2 + $0x12a] sm:$0xff] }
 0x2ea   :  { %3383 = vmatprep.mubr.bf16.mxu1 %v1903_v5  ;;  %3629 = vmatpush1.bf16.msra.mxu1 %v7451_v56  ;;  %12172 = vst [vmem:[#allocation23_spill] sm:$0xff] %v9253_v14  ;;  %v2857_v23 = vpop.f32.mrb[97].mxu0  ;;  %v9282_v20 = vpack.c.bf16 %v1843_v3, %v1842_v22  ;;  %v1850_v22 = vld [vmem:[#allocation2 + $0x182] sm:$0xff]  ;;  %v1851_v3 = vld [vmem:[#allocation2 + $0x18a] sm:$0xff] }
 0x2eb   :  { %3630 = vmatprep.subr.bf16.mxu1 %v12145_v29  ;;  %v9256_v50 = vpop.f32.mrb[98].mxu0  ;;  %v1626_v14 = vld [vmem:[#allocation2 + $0x321] sm:$0xff] }
 0x2ec   :  { %12173 = vst [vmem:[#allocation25_spill] sm:$0xff] %v9256_v50  ;;  %v2860_v5 = vpop.f32.mrb[99].mxu0  ;;  %v119_v50 = vld [vmem:[%s11843_s12 + $0x50] sm:$0xff] }
 0x2ee   :  { %3631 = vmatpush1.bf16.msra.mxu1 %v7452_v17  ;;  %6754 = vmatmul.mubr.bf16.gmra.mrb[204].mxu0 %v9258_v30  ;;  %v9277_v17 = vpack.c.bf16 %v1841_v55, %v1840_v0  ;;  %v1575_v0 = vld [vmem:[#allocation2 + $0x91] sm:$0xff]  ;;  %v1576_v55 = vld [vmem:[#allocation2 + $0x99] sm:$0xff] }
 0x2ef   :  { %3632 = vmatprep.subr.bf16.mxu1 %v12145_v29  ;;  %6757 = vmatprep.mubr.bf16.mxu0 %v9263_v39 }
 0x2f1   :  { %3384 = vmatmul.mubr.bf16.gmra.mrb[8].mxu1 %v1908_v57  ;;  %v9272_v45 = vpop.f32.mrb[100].mxu0 }
 0x2f2   :  { %3391 = vmatprep.mubr.bf16.mxu1 %v9215_v43  ;;  %3633 = vmatpush1.bf16.msra.mxu1 %v7453_v52  ;;  %12174 = vst [vmem:[#allocation22_spill] sm:$0xff] %v9272_v45  ;;  %v2865_v11 = vpop.f32.mrb[101].mxu0  ;;  %v118_v45 = vld [vmem:[%s11843_s12 + $0x48] sm:$0xff] }
 0x2f3   :  { %3634 = vmatprep.subr.bf16.mxu1 %v12145_v29  ;;  %v9275_v56 = vpop.f32.mrb[102].mxu0 }
 0x2f4   :  { %12175 = vst [vmem:[#allocation24_spill] sm:$0xff] %v9275_v56  ;;  %v2868_v43 = vpop.f32.mrb[103].mxu0 }
 0x2f6   :  { %3635 = vmatpush1.bf16.msra.mxu1 %v7454_v1  ;;  %6758 = vmatmul.mubr.bf16.gmra.mrb[208].mxu0 %v9277_v17  ;;  %v7458_v1 = vld [vmem:[%s11840_s4 + $0x1c8] sm:$0xff]  }
 0x2f7   :  { %3636 = vmatprep.subr.bf16.mxu1 %v12145_v29  ;;  %6761 = vmatprep.mubr.bf16.mxu0 %v9282_v20 }
 0x2f9   :  { %3392 = vmatmul.mubr.bf16.gmra.mrb[12].mxu1 %v1917_v44  ;;  %v9291_v23 = vpop.f32.mrb[104].mxu0  ;;  %v9314_v44 = vpack.c.bf16 %v1851_v3, %v1850_v22 }
 0x2fa   :  { %3399 = vmatprep.mubr.bf16.mxu1 %v9226_v4  ;;  %3637 = vmatpush1.bf16.msra.mxu1 %v7455_v33  ;;  %12176 = vst [vmem:[#allocation27_spill] sm:$0xff] %v9291_v23  ;;  %v2873_v5 = vpop.f32.mrb[105].mxu0  ;;  %v7457_v4 = vld [vmem:[%s11840_s4 + $0x1c0] sm:$0xff]  }
 0x2fb   :  { %3638 = vmatprep.subr.bf16.mxu1 %v12145_v29  ;;  %v9294_v57 = vpop.f32.mrb[106].mxu0  ;;  %v1852_v33 = vld [vmem:[#allocation2 + $0x19a] sm:$0xff]  ;;  %v1578_v5 = vld [vmem:[#allocation2 + $0xb1] sm:$0xff] }
 0x2fc   :  { %12177 = vst [vmem:[#allocation26_spill] sm:$0xff] %v9294_v57  ;;  %v2876_v52 = vpop.f32.mrb[107].mxu0  ;;  %v1623_v57 = vld [vmem:[#allocation2 + $0x301] sm:$0xff] }
 0x2fe   :  { %3639 = vmatpush1.bf16.msra.mxu1 %v7456_v25  ;;  %6762 = vmatmul.mubr.bf16.gmra.mrb[212].mxu0 %v9124_v6  ;;  %v1853_v25 = vld [vmem:[#allocation2 + $0x1a2] sm:$0xff] }
 0x2ff   :  { %3640 = vmatprep.subr.bf16.mxu1 %v12145_v29  ;;  %6765 = vmatprep.mubr.bf16.mxu0 %v9134_v18  ;;  %v7459_v18 = vld [vmem:[%s11840_s4 + $0x1d0] sm:$0xff]  }
 0x301   :  { %3400 = vmatmul.mubr.bf16.gmra.mrb[16].mxu1 %v1926_v9  ;;  %v9306_v59 = vpop.f32.mrb[108].mxu0  ;;  %v2029_v9 = vpack.c.bf16 %v1853_v25, %v1852_v33 }
 0x302   :  { %3407 = vmatprep.mubr.bf16.mxu1 %v9229_v61  ;;  %3641 = vmatpush1.bf16.msra.mxu1 %v7457_v4  ;;  %12178 = vst [vmem:[#allocation3_spill] sm:$0xff] %v9306_v59  ;;  %v2881_v11 = vpop.f32.mrb[109].mxu0  ;;  %v1935_v61 = vpack.c.bf16 %v1576_v55, %v1575_v0  ;;  %v1944_v0 = vpack.c.bf16 %v1578_v5, %v1577_v19  ;;  %v1579_v55 = vld [vmem:[#allocation2 + $0xc1] sm:$0xff]  ;;  %v115_v59 = vld [vmem:[%s11843_s12 + $0x30] sm:$0xff] }
 0x303   :  { %3642 = vmatprep.subr.bf16.mxu1 %v12145_v29  ;;  %v9309_v43 = vpop.f32.mrb[110].mxu0  ;;  %v1580_v11 = vld [vmem:[#allocation2 + $0xc9] sm:$0xff] }
 0x304   :  { %12179 = vst [vmem:[#allocation4_spill] sm:$0xff] %v9309_v43  ;;  %v2884_v6 = vpop.f32.mrb[111].mxu0  ;;  %v114_v43 = vld [vmem:[%s11843_s12 + $0x28] sm:$0xff] }
 0x306   :  { %3643 = vmatpush1.bf16.msra.mxu1 %v7458_v1  ;;  %6766 = vmatmul.mubr.bf16.gmra.mrb[216].mxu0 %v9147_v31  ;;  %v7460_v31 = vld [vmem:[%s11840_s4 + $0x1d8] sm:$0xff]  }
 0x307   :  { %3644 = vmatprep.subr.bf16.mxu1 %v12145_v29  ;;  %6769 = vmatprep.mubr.bf16.mxu0 %v9314_v44 }
 0x309   :  { %3408 = vmatmul.mubr.bf16.gmra.mrb[20].mxu1 %v1935_v61  ;;  %v9320_v37 = vpop.f32.mrb[112].mxu0  ;;  %v1953_v61 = vpack.c.bf16 %v1580_v11, %v1579_v55 }
 0x30a   :  { %3415 = vmatprep.mubr.bf16.mxu1 %v9240_v21  ;;  %3645 = vmatpush1.bf16.msra.mxu1 %v7459_v18  ;;  %12180 = vst [vmem:[#allocation6_spill] sm:$0xff] %v9320_v37  ;;  %v2889_v52 = vpop.f32.mrb[113].mxu0  ;;  %v1582_v18 = vld [vmem:[#allocation2 + $0xe1] sm:$0xff] }
 0x30b   :  { %3646 = vmatprep.subr.bf16.mxu1 %v12145_v29  ;;  %v9323_v4 = vpop.f32.mrb[114].mxu0  ;;  %v1584_v52 = vld [vmem:[#allocation2 + $0xf9] sm:$0xff] }
 0x30c   :  { %12181 = vst [vmem:[#allocation8_spill] sm:$0xff] %v9323_v4  ;;  %v2892_v1 = vpop.f32.mrb[115].mxu0 }
 0x30e   :  { %6770 = vmatmul.mubr.bf16.gmra.mrb[220].mxu0 %v2029_v9  ;;  %3647 = vmatpush1.bf16.msra.mxu1 %v7460_v31  ;;  %v1586_v31 = vld [vmem:[#allocation2 + $0x111] sm:$0xff] }
 0x30f   :  { %6773 = vmatprep.mubr.bf16.mxu0 %v9154_v53  ;;  %3648 = vmatprep.subr.bf16.mxu1 %v12145_v29 }
 0x311   :  { %3416 = vmatmul.mubr.bf16.gmra.mrb[24].mxu1 %v1944_v0  ;;  %v9330_v21 = vpop.f32.mrb[116].mxu0 }
 0x312   :  { %3423 = vmatprep.mubr.bf16.mxu1 %v9246_v10  ;;  %12182 = vst [vmem:[#allocation5_spill] sm:$0xff] %v9330_v21  ;;  %v2897_v22 = vpop.f32.mrb[117].mxu0  ;;  %v1581_v10 = vld [vmem:[#allocation2 + $0xd9] sm:$0xff]  ;;  %v1622_v21 = vld [vmem:[#allocation2 + $0x2f1] sm:$0xff] }
 0x313   :  { %v9333_v3 = vpop.f32.mrb[118].mxu0  ;;  %v9342_v5 = vpack.c.bf16 %v1582_v18, %v1581_v10  ;;  %v1653_v18 = vld [vmem:[#allocation2 + $0x13a] sm:$0xff] }
 0x314   :  { %12183 = vst [vmem:[#allocation7_spill] sm:$0xff] %v9333_v3  ;;  %v2900_v6 = vpop.f32.mrb[119].mxu0 }
 0x316   :  { %6774 = vmatmul.mubr.bf16.gmra.mrb[224].mxu0 %v9157_v40  ;;  %v7461_v40 = vld [vmem:[%s11840_s4 + $0x1e0] sm:$0xff]  }
 0x317   :  { %6777 = vmatprep.mubr.bf16.mxu0 %v9160_v48  ;;  %3649 = vmatpush1.bf16.msra.mxu1 %v7461_v40 }
 0x318   :  { %3650 = vmatprep.subr.bf16.mxu1 %v12145_v29 }
 0x319   :  { %3424 = vmatmul.mubr.bf16.gmra.mrb[28].mxu1 %v1953_v61  ;;  %v9338_v53 = vpop.f32.mrb[120].mxu0  ;;  %v1588_v61 = vld [vmem:[#allocation2 + $0x129] sm:$0xff] }
 0x31a   :  { %3431 = vmatprep.mubr.bf16.mxu1 %v9258_v30  ;;  %12184 = vst [vmem:[#allocation11_spill] sm:$0xff] %v9338_v53  ;;  %v2905_v33 = vpop.f32.mrb[121].mxu0  ;;  %v1583_v30 = vld [vmem:[#allocation2 + $0xf1] sm:$0xff] }
 0x31b   :  { %v9340_v25 = vpop.f32.mrb[122].mxu0  ;;  %v1654_v33 = vld [vmem:[#allocation2 + $0x142] sm:$0xff] }
 0x31c   :  { %12185 = vst [vmem:[#allocation13_spill] sm:$0xff] %v9340_v25  ;;  %v2908_v19 = vpop.f32.mrb[123].mxu0  ;;  %v1686_v25 = vld [vmem:[#allocation2 + $0x2f2] sm:$0xff] }
 0x31e   :  { %6778 = vmatmul.mubr.bf16.gmra.mrb[228].mxu0 %v9163_v62  ;;  %v9356_v62 = vpack.c.bf16 %v1584_v52, %v1583_v30  ;;  %v1999_v30 = vpack.c.bf16 %v1654_v33, %v1653_v18  ;;  %v1590_v52 = vld [vmem:[#allocation2 + $0x141] sm:$0xff]  ;;  %v1658_v33 = vld [vmem:[#allocation2 + $0x172] sm:$0xff] }
 0x31f   :  { %6781 = vmatprep.mubr.bf16.mxu0 %v9166_v32 }
 0x321   :  { %3432 = vmatmul.mubr.bf16.gmra.mrb[32].mxu1 %v9342_v5  ;;  %v9351_v48 = vpop.f32.mrb[124].mxu0 }
 0x322   :  { %3439 = vmatprep.mubr.bf16.mxu1 %v9263_v39  ;;  %12186 = vst [vmem:[#allocation9_spill] sm:$0xff] %v9351_v48  ;;  %v2913_v9 = vpop.f32.mrb[125].mxu0  ;;  %v1585_v39 = vld [vmem:[#allocation2 + $0x109] sm:$0xff] }
 0x323   :  { %v9354_v1 = vpop.f32.mrb[126].mxu0  ;;  %v9366_v22 = vpack.c.bf16 %v1586_v31, %v1585_v39  ;;  %v1656_v39 = vld [vmem:[#allocation2 + $0x15a] sm:$0xff]  ;;  %v1685_v48 = vld [vmem:[#allocation2 + $0x2ea] sm:$0xff] }
 0x324   :  { %12187 = vst [vmem:[#allocation12_spill] sm:$0xff] %v9354_v1  ;;  %v2916_v0 = vpop.f32.mrb[127].mxu0 }
 0x325   :  { %v1655_v0 = vld [vmem:[#allocation2 + $0x152] sm:$0xff] }
 0x326   :  { %6782 = vmatmul.mubr.bf16.gmra.mrb[232].mxu0 %v9169_v35  ;;  %v7462_v35 = vld [vmem:[%s11840_s4 + $0x1e8] sm:$0xff]  }
 0x327   :  { %6785 = vmatprep.mubr.bf16.mxu0 %v9172_v7  ;;  %3651 = vmatpush1.bf16.msra.mxu1 %v7462_v35  ;;  %v2008_v35 = vpack.c.bf16 %v1656_v39, %v1655_v0  ;;  %v1594_v39 = vld [vmem:[#allocation2 + $0x171] sm:$0xff] }
 0x328   :  { %3652 = vmatprep.subr.bf16.mxu1 %v12145_v29 }
 0x329   :  { %3440 = vmatmul.mubr.bf16.gmra.mrb[36].mxu1 %v9356_v62  ;;  %v9362_v32 = vpop.f32.mrb[128].mxu0 }
 0x32a   :  { %3447 = vmatprep.mubr.bf16.mxu1 %v9277_v17  ;;  %12188 = vst [vmem:[#allocation15_spill] sm:$0xff] %v9362_v32  ;;  %v2921_v55 = vpop.f32.mrb[129].mxu0  ;;  %v1587_v17 = vld [vmem:[#allocation2 + $0x121] sm:$0xff] }
 0x32b   :  { %v9364_v11 = vpop.f32.mrb[130].mxu0  ;;  %v9380_v40 = vpack.c.bf16 %v1588_v61, %v1587_v17  ;;  %v1591_v17 = vld [vmem:[#allocation2 + $0x151] sm:$0xff]  ;;  %v1592_v61 = vld [vmem:[#allocation2 + $0x159] sm:$0xff] }
 0x32c   :  { %12189 = vst [vmem:[#allocation17_spill] sm:$0xff] %v9364_v11  ;;  %v2924_v6 = vpop.f32.mrb[131].mxu0 }
 0x32e   :  { %6786 = vmatmul.mubr.bf16.gmra.mrb[236].mxu0 %v9175_v41 }
 0x32f   :  { %6789 = vmatprep.mubr.bf16.mxu0 %v9178_v28 }
 0x331   :  { %3448 = vmatmul.mubr.bf16.gmra.mrb[40].mxu1 %v9366_v22  ;;  %v9375_v7 = vpop.f32.mrb[132].mxu0 }
 0x332   :  { %3455 = vmatprep.mubr.bf16.mxu1 %v9282_v20  ;;  %12190 = vst [vmem:[#allocation14_spill] sm:$0xff] %v9375_v7  ;;  %v2929_v10 = vpop.f32.mrb[133].mxu0  ;;  %v1589_v20 = vld [vmem:[#allocation2 + $0x139] sm:$0xff] }
 0x333   :  { %v9378_v19 = vpop.f32.mrb[134].mxu0  ;;  %v9389_v6 = vpack.c.bf16 %v1590_v52, %v1589_v20  ;;  %v1657_v10 = vld [vmem:[#allocation2 + $0x16a] sm:$0xff]  ;;  %v9402_v52 = vpack.c.bf16 %v1592_v61, %v1591_v17  ;;  %v7464_v61 = vld [vmem:[%s11840_s4 + $0x1f8] sm:$0xff]  }
 0x334   :  { %12191 = vst [vmem:[#allocation16_spill] sm:$0xff] %v9378_v19  ;;  %v2932_v41 = vpop.f32.mrb[135].mxu0 }
 0x335   :  { %v1882_v41 = vld [vmem:[#allocation2 + $0x332] sm:$0xff] }
 0x336   :  { %6790 = vmatmul.mubr.bf16.gmra.mrb[240].mxu0 %v9185_v51  ;;  %v7463_v51 = vld [vmem:[%s11840_s4 + $0x1f0] sm:$0xff]  }
 0x337   :  { %6793 = vmatprep.mubr.bf16.mxu0 %v9192_v60  ;;  %3653 = vmatpush1.bf16.msra.mxu1 %v7463_v51 }
 0x338   :  { %3654 = vmatprep.subr.bf16.mxu1 %v12145_v29 }
 0x339   :  { %3456 = vmatmul.mubr.bf16.gmra.mrb[44].mxu1 %v9380_v40  ;;  %v9385_v28 = vpop.f32.mrb[136].mxu0 }
 0x33a   :  { %3463 = vmatprep.mubr.bf16.mxu1 %v1999_v30  ;;  %12192 = vst [vmem:[#allocation19_spill] sm:$0xff] %v9385_v28  ;;  %v2937_v9 = vpop.f32.mrb[137].mxu0  ;;  %v1883_v30 = vld [vmem:[#allocation2 + $0x33a] sm:$0xff] }
 0x33b   :  { %v9387_v31 = vpop.f32.mrb[138].mxu0  ;;  %v2017_v9 = vpack.c.bf16 %v1658_v33, %v1657_v10  ;;  %v9404_v0 = vpack.c.bf16 %v1883_v30, %v1882_v41  ;;  %3655 = vmatpush1.bf16.msra.mxu1 %v7464_v61  ;;  %v1595_v10 = vld [vmem:[#allocation2 + $0x181] sm:$0xff]  ;;  %v1661_v41 = vld [vmem:[#allocation2 + $0x1ca] sm:$0xff]  ;;  %v1662_v30 = vld [vmem:[#allocation2 + $0x1d2] sm:$0xff] }
 0x33c   :  { %12193 = vst [vmem:[#allocation21_spill] sm:$0xff] %v9387_v31  ;;  %v2940_v55 = vpop.f32.mrb[139].mxu0 }
 0x33e   :  { %6794 = vmatmul.mubr.bf16.gmra.mrb[244].mxu0 %v9199_v49 }
 0x33f   :  { %6797 = vmatprep.mubr.bf16.mxu0 %v9206_v27  ;;  %v1593_v27 = vld [vmem:[#allocation2 + $0x169] sm:$0xff] }
 0x340   :  { %v9413_v17 = vpack.c.bf16 %v1594_v39, %v1593_v27  ;;  %v2035_v39 = vpack.c.bf16 %v1662_v30, %v1661_v41  ;;  %v1600_v41 = vld [vmem:[#allocation2 + $0x1e9] sm:$0xff] }
 0x341   :  { %3464 = vmatmul.mubr.bf16.gmra.mrb[48].mxu1 %v9389_v6  ;;  %v9397_v60 = vpop.f32.mrb[140].mxu0 }
 0x342   :  { %3471 = vmatprep.mubr.bf16.mxu1 %v2008_v35  ;;  %12194 = vst [vmem:[#allocation30_spill] sm:$0xff] %v9397_v60  ;;  %v2945_v18 = vpop.f32.mrb[141].mxu0 }
 0x343   :  { %v9400_v49 = vpop.f32.mrb[142].mxu0  ;;  %v1596_v18 = vld [vmem:[#allocation2 + $0x189] sm:$0xff] }
 0x344   :  { %12195 = vst [vmem:[#allocation29_spill] sm:$0xff] %v9400_v49  ;;  %v2948_v20 = vpop.f32.mrb[143].mxu0  ;;  %v9424_v27 = vpack.c.bf16 %v1596_v18, %v1595_v10  ;;  %v1599_v18 = vld [vmem:[#allocation2 + $0x1e1] sm:$0xff] }
 0x346   :  { %6798 = vmatmul.mubr.bf16.gmra.mrb[248].mxu0 %v9213_v2 }
 0x347   :  { %6801 = vmatprep.mubr.bf16.mxu0 %v9404_v0 }
 0x349   :  { %3472 = vmatmul.mubr.bf16.gmra.mrb[52].mxu1 %v9402_v52  ;;  %v9409_v29 = vpop.f32.mrb[144].mxu0 }
 0x34a   :  { %3479 = vmatprep.mubr.bf16.mxu1 %v2017_v9  ;;  %12196 = vst [vmem:[#allocation10_spill] sm:$0xff] %v9409_v29  ;;  %v2953_v55 = vpop.f32.mrb[145].mxu0 }
 0x34b   :  { %v9411_v35 = vpop.f32.mrb[146].mxu0 }
 0x34c   :  { %12197 = vst [vmem:[#allocation31_spill] sm:$0xff] %v9411_v35  ;;  %v2956_v51 = vpop.f32.mrb[147].mxu0  ;;  %v1664_v35 = vld [vmem:[#allocation2 + $0x1ea] sm:$0xff] }
 0x34d   :  { %v1598_v51 = vld [vmem:[#allocation2 + $0x1d1] sm:$0xff] }
 0x351   :  { %3480 = vmatmul.mubr.bf16.gmra.mrb[56].mxu1 %v9413_v17  ;;  %v9420_v2 = vpop.f32.mrb[148].mxu0 }
 0x352   :  { %3487 = vmatprep.mubr.bf16.mxu1 %v9314_v44  ;;  %12198 = vst [vmem:[#allocation32_spill] sm:$0xff] %v9420_v2  ;;  %v2961_v33 = vpop.f32.mrb[149].mxu0  ;;  %v1597_v44 = vld [vmem:[#allocation2 + $0x1c9] sm:$0xff] }
 0x353   :  { %v9422_v20 = vpop.f32.mrb[150].mxu0  ;;  %v1663_v2 = vld [vmem:[#allocation2 + $0x1e2] sm:$0xff]  ;;  %v2034_v49 = vpack.c.bf16 %v1598_v51, %v1597_v44  ;;  %v1668_v51 = vld [vmem:[#allocation2 + $0x21a] sm:$0xff] }
 0x354   :  { %12199 = vst [vmem:[#allocation33_spill] sm:$0xff] %v9422_v20  ;;  %v2964_v9 = vpop.f32.mrb[151].mxu0  ;;  %v2044_v60 = vpack.c.bf16 %v1664_v35, %v1663_v2  ;;  %v1667_v2 = vld [vmem:[#allocation2 + $0x212] sm:$0xff] }
 0x355   :  { %v1665_v9 = vld [vmem:[#allocation2 + $0x1fa] sm:$0xff] }
 0x359   :  { %3488 = vmatmul.mubr.bf16.gmra.mrb[60].mxu1 %v9424_v27  ;;  %v9427_v55 = vpop.f32.mrb[152].mxu0 }
 0x35a   :  { %3495 = vmatprep.mubr.bf16.mxu1 %v2035_v39  ;;  %12200 = vst [vmem:[#allocation34_spill] sm:$0xff] %v9427_v55  ;;  %v2969_v61 = vpop.f32.mrb[153].mxu0  ;;  %v1666_v39 = vld [vmem:[#allocation2 + $0x202] sm:$0xff] }
 0x35b   :  { %v9429_v29 = vpop.f32.mrb[154].mxu0  ;;  %v9435_v61 = vpack.c.bf16 %v1600_v41, %v1599_v18  ;;  %v2053_v31 = vpack.c.bf16 %v1666_v39, %v1665_v9  ;;  %v1603_v18 = vld [vmem:[#allocation2 + $0x211] sm:$0xff] }
 0x35c   :  { %12201 = vst [vmem:[#allocation35_spill] sm:$0xff] %v9429_v29  ;;  %v2972_v33 = vpop.f32.mrb[155].mxu0  ;;  %v1669_v9 = vld [vmem:[#allocation2 + $0x22a] sm:$0xff]  ;;  %v1670_v39 = vld [vmem:[#allocation2 + $0x232] sm:$0xff] }
 0x361   :  { %3496 = vmatmul.mubr.bf16.gmra.mrb[64].mxu1 %v2034_v49  ;;  %v9431_v10 = vpop.f32.mrb[156].mxu0  ;;  %v1601_v49 = vld [vmem:[#allocation2 + $0x1f9] sm:$0xff] }
 0x362   :  { %3503 = vmatprep.mubr.bf16.mxu1 %v2044_v60  ;;  %12202 = vst [vmem:[#allocation36_spill] sm:$0xff] %v9431_v10  ;;  %v2977_v30 = vpop.f32.mrb[157].mxu0  ;;  %v1602_v60 = vld [vmem:[#allocation2 + $0x201] sm:$0xff] }
 0x363   :  { %v9433_v55 = vpop.f32.mrb[158].mxu0  ;;  %v9442_v10 = vpack.c.bf16 %v1602_v60, %v1601_v49  ;;  %v1605_v60 = vld [vmem:[#allocation2 + $0x229] sm:$0xff] }
 0x364   :  { %12203 = vst [vmem:[#allocation37_spill] sm:$0xff] %v9433_v55  ;;  %v2980_v20 = vpop.f32.mrb[159].mxu0  ;;  %v2062_v55 = vpack.c.bf16 %v1668_v51, %v1667_v2  ;;  %v1671_v51 = vld [vmem:[#allocation2 + $0x242] sm:$0xff] }
 0x369   :  { %3504 = vmatmul.mubr.bf16.gmra.mrb[68].mxu1 %v9435_v61  ;;  %v9438_v44 = vpop.f32.mrb[160].mxu0 }
 0x36a   :  { %3511 = vmatprep.mubr.bf16.mxu1 %v2053_v31  ;;  %12204 = vst [vmem:[#allocation38_spill] sm:$0xff] %v9438_v44  ;;  %v2985_v35 = vpop.f32.mrb[161].mxu0  ;;  %v1604_v31 = vld [vmem:[#allocation2 + $0x219] sm:$0xff] }
 0x36b   :  { %v9440_v33 = vpop.f32.mrb[162].mxu0  ;;  %v9449_v29 = vpack.c.bf16 %v1604_v31, %v1603_v18  ;;  %v1607_v31 = vld [vmem:[#allocation2 + $0x241] sm:$0xff] }
 0x36c   :  { %12205 = vst [vmem:[#allocation39_spill] sm:$0xff] %v9440_v33  ;;  %v2988_v30 = vpop.f32.mrb[163].mxu0  ;;  %v2071_v33 = vpack.c.bf16 %v1670_v39, %v1669_v9  ;;  %v1673_v39 = vld [vmem:[#allocation2 + $0x25a] sm:$0xff] }
 0x36d   :  { %v1672_v30 = vld [vmem:[#allocation2 + $0x24a] sm:$0xff] }
 0x371   :  { %3512 = vmatmul.mubr.bf16.gmra.mrb[72].mxu1 %v9442_v10  ;;  %v9445_v20 = vpop.f32.mrb[164].mxu0 }
 0x372   :  { %3519 = vmatprep.mubr.bf16.mxu1 %v2062_v55  ;;  %12206 = vst [vmem:[#allocation40_spill] sm:$0xff] %v9445_v20  ;;  %v2993_v41 = vpop.f32.mrb[165].mxu0  ;;  %v1606_v55 = vld [vmem:[#allocation2 + $0x231] sm:$0xff] }
 0x373   :  { %v9447_v44 = vpop.f32.mrb[166].mxu0  ;;  %v9456_v28 = vpack.c.bf16 %v1606_v55, %v1605_v60  ;;  %v1609_v55 = vld [vmem:[#allocation2 + $0x259] sm:$0xff] }
 0x374   :  { %12207 = vst [vmem:[#allocation41_spill] sm:$0xff] %v9447_v44  ;;  %v2996_v35 = vpop.f32.mrb[167].mxu0  ;;  %v2080_v44 = vpack.c.bf16 %v1672_v30, %v1671_v51  ;;  %v1675_v30 = vld [vmem:[#allocation2 + $0x272] sm:$0xff] }
 0x375   :  { %v1674_v35 = vld [vmem:[#allocation2 + $0x262] sm:$0xff] }
 0x379   :  { %3520 = vmatmul.mubr.bf16.gmra.mrb[76].mxu1 %v9449_v29  ;;  %v9452_v49 = vpop.f32.mrb[168].mxu0 }
 0x37a   :  { %3527 = vmatprep.mubr.bf16.mxu1 %v2071_v33  ;;  %12208 = vst [vmem:[#allocation42_spill] sm:$0xff] %v9452_v49  ;;  %v3001_v2 = vpop.f32.mrb[169].mxu0  ;;  %v1608_v33 = vld [vmem:[#allocation2 + $0x249] sm:$0xff] }
 0x37b   :  { %v9454_v20 = vpop.f32.mrb[170].mxu0  ;;  %v9463_v19 = vpack.c.bf16 %v1608_v33, %v1607_v31  ;;  %v1611_v33 = vld [vmem:[#allocation2 + $0x271] sm:$0xff] }
 0x37c   :  { %12209 = vst [vmem:[#allocation43_spill] sm:$0xff] %v9454_v20  ;;  %v3004_v41 = vpop.f32.mrb[171].mxu0  ;;  %v2089_v20 = vpack.c.bf16 %v1674_v35, %v1673_v39  ;;  %v1677_v35 = vld [vmem:[#allocation2 + $0x28a] sm:$0xff] }
 0x37d   :  { %v1676_v41 = vld [vmem:[#allocation2 + $0x27a] sm:$0xff] }
 0x381   :  { %3528 = vmatmul.mubr.bf16.gmra.mrb[80].mxu1 %v9456_v28  ;;  %v9459_v18 = vpop.f32.mrb[172].mxu0 }
 0x382   :  { %3535 = vmatprep.mubr.bf16.mxu1 %v2080_v44  ;;  %12210 = vst [vmem:[#allocation44_spill] sm:$0xff] %v9459_v18  ;;  %v3009_v9 = vpop.f32.mrb[173].mxu0  ;;  %v1610_v44 = vld [vmem:[#allocation2 + $0x261] sm:$0xff] }
 0x383   :  { %v9461_v49 = vpop.f32.mrb[174].mxu0  ;;  %v9470_v7 = vpack.c.bf16 %v1610_v44, %v1609_v55  ;;  %v1613_v44 = vld [vmem:[#allocation2 + $0x289] sm:$0xff] }
 0x384   :  { %12211 = vst [vmem:[#allocation45_spill] sm:$0xff] %v9461_v49  ;;  %v3012_v2 = vpop.f32.mrb[175].mxu0  ;;  %v2098_v49 = vpack.c.bf16 %v1676_v41, %v1675_v30  ;;  %v1679_v41 = vld [vmem:[#allocation2 + $0x2a2] sm:$0xff] }
 0x385   :  { %v1678_v2 = vld [vmem:[#allocation2 + $0x292] sm:$0xff] }
 0x389   :  { %3536 = vmatmul.mubr.bf16.gmra.mrb[84].mxu1 %v9463_v19  ;;  %v9466_v60 = vpop.f32.mrb[176].mxu0 }
 0x38a   :  { %3543 = vmatprep.mubr.bf16.mxu1 %v2089_v20  ;;  %12212 = vst [vmem:[#allocation46_spill] sm:$0xff] %v9466_v60  ;;  %v3017_v51 = vpop.f32.mrb[177].mxu0  ;;  %v1612_v20 = vld [vmem:[#allocation2 + $0x279] sm:$0xff] }
 0x38b   :  { %v9468_v18 = vpop.f32.mrb[178].mxu0  ;;  %v9477_v11 = vpack.c.bf16 %v1612_v20, %v1611_v33  ;;  %v1615_v20 = vld [vmem:[#allocation2 + $0x2a1] sm:$0xff] }
 0x38c   :  { %12213 = vst [vmem:[#allocation47_spill] sm:$0xff] %v9468_v18  ;;  %v3020_v9 = vpop.f32.mrb[179].mxu0  ;;  %v2107_v18 = vpack.c.bf16 %v1678_v2, %v1677_v35  ;;  %v1681_v2 = vld [vmem:[#allocation2 + $0x2ba] sm:$0xff] }
 0x38d   :  { %v1680_v9 = vld [vmem:[#allocation2 + $0x2aa] sm:$0xff] }
 0x391   :  { %3544 = vmatmul.mubr.bf16.gmra.mrb[88].mxu1 %v9470_v7  ;;  %v9473_v31 = vpop.f32.mrb[180].mxu0 }
 0x392   :  { %3551 = vmatprep.mubr.bf16.mxu1 %v2098_v49  ;;  %12214 = vst [vmem:[#allocation48_spill] sm:$0xff] %v9473_v31  ;;  %v3025_v39 = vpop.f32.mrb[181].mxu0  ;;  %v1614_v49 = vld [vmem:[#allocation2 + $0x291] sm:$0xff] }
 0x393   :  { %v9475_v60 = vpop.f32.mrb[182].mxu0  ;;  %v9484_v32 = vpack.c.bf16 %v1614_v49, %v1613_v44  ;;  %v1617_v49 = vld [vmem:[#allocation2 + $0x2b9] sm:$0xff] }
 0x394   :  { %12215 = vst [vmem:[#allocation49_spill] sm:$0xff] %v9475_v60  ;;  %v3028_v51 = vpop.f32.mrb[183].mxu0  ;;  %v2116_v60 = vpack.c.bf16 %v1680_v9, %v1679_v41  ;;  %v1683_v9 = vld [vmem:[#allocation2 + $0x2d2] sm:$0xff] }
 0x395   :  { %v1682_v51 = vld [vmem:[#allocation2 + $0x2c2] sm:$0xff] }
 0x399   :  { %3552 = vmatmul.mubr.bf16.gmra.mrb[92].mxu1 %v9477_v11  ;;  %v9480_v55 = vpop.f32.mrb[184].mxu0 }
 0x39a   :  { %3559 = vmatprep.mubr.bf16.mxu1 %v2107_v18  ;;  %12216 = vst [vmem:[#allocation50_spill] sm:$0xff] %v9480_v55  ;;  %v3033_v30 = vpop.f32.mrb[185].mxu0  ;;  %v1616_v18 = vld [vmem:[#allocation2 + $0x2a9] sm:$0xff] }
 0x39b   :  { %v9482_v31 = vpop.f32.mrb[186].mxu0  ;;  %v9491_v1 = vpack.c.bf16 %v1616_v18, %v1615_v20 }
 0x39c   :  { %12217 = vst [vmem:[#allocation51_spill] sm:$0xff] %v9482_v31  ;;  %v3036_v39 = vpop.f32.mrb[187].mxu0  ;;  %v2125_v31 = vpack.c.bf16 %v1682_v51, %v1681_v2  ;;  %v1619_v2 = vld [vmem:[#allocation2 + $0x2d1] sm:$0xff]  ;;  %v1620_v51 = vld [vmem:[#allocation2 + $0x2d9] sm:$0xff] }
 0x39d   :  { %v1684_v39 = vld [vmem:[#allocation2 + $0x2da] sm:$0xff] }
 0x39e   :  { %v2134_v20 = vpack.c.bf16 %v1684_v39, %v1683_v9  ;;  %v2143_v9 = vpack.c.bf16 %v1686_v25, %v1685_v48  ;;  %v111_v39 = vld [vmem:[%s11843_s12 + $0x10] sm:$0xff]  ;;  %v112_v25 = vld [vmem:[%s11843_s12 + $0x18] sm:$0xff]  ;;  %v113_v48 = vld [vmem:[%s11843_s12 + $0x20] sm:$0xff] }
 0x39f   :  { %4216 = vperm.xlu1 %7352, %v111_v39  }
 0x3a1   :  { %3560 = vmatmul.mubr.bf16.gmra.mrb[96].mxu1 %v9484_v32  ;;  %v9487_v33 = vpop.f32.mrb[188].mxu0 }
 0x3a2   :  { %3567 = vmatprep.mubr.bf16.mxu1 %v2116_v60  ;;  %12218 = vst [vmem:[#allocation52_spill] sm:$0xff] %v9487_v33  ;;  %v3041_v35 = vpop.f32.mrb[189].mxu0  ;;  %v1618_v60 = vld [vmem:[#allocation2 + $0x2c1] sm:$0xff] }
 0x3a3   :  { %v9489_v55 = vpop.f32.mrb[190].mxu0  ;;  %4221 = vperm.xlu1 %7352, %v112_v25   ;;  %v117_v25 = vld [vmem:[%s11843_s12 + $0x40] sm:$0xff] }
 0x3a4   :  { %12219 = vst [vmem:[#allocation53_spill] sm:$0xff] %v9489_v55  ;;  %v3044_v30 = vpop.f32.mrb[191].mxu0  ;;  %v9502_v55 = vpack.c.bf16 %v1618_v60, %v1617_v49  ;;  %v9516_v60 = vpack.c.bf16 %v1620_v51, %v1619_v2  ;;  %v1687_v51 = vld [vmem:[#allocation2 + $0x302] sm:$0xff] }
 0x3a7   :  { %4231 = vperm.xlu1 %7352, %v114_v43  }
 0x3a9   :  { %3568 = vmatmul.mubr.bf16.gmra.mrb[100].mxu1 %v9491_v1  ;;  %v9494_v44 = vpop.f32.mrb[192].mxu0 }
 0x3aa   :  { %3575 = vmatprep.mubr.bf16.mxu1 %v2125_v31  ;;  %v9496_v41 = vpop.f32.mrb[193].mxu0  ;;  %v109_v31 = vld [vmem:[%s11843_s12] sm:$0xff] }
 0x3ab   :  { %v9498_v35 = vpop.f32.mrb[194].mxu0  ;;  %4206 = vperm.xlu0 %7351, %v109_v31   ;;  %v1621_v31 = vld [vmem:[#allocation2 + $0x2e9] sm:$0xff] }
 0x3ac   :  { %v9500_v33 = vpop.f32.mrb[195].mxu0  ;;  %v9539_v39 = vpack.c.bf16 %v1622_v21, %v1621_v31  ;;  %v1624_v21 = vld [vmem:[#allocation2 + $0x309] sm:$0xff]  ;;  %v116_v31 = vld [vmem:[%s11843_s12 + $0x38] sm:$0xff] }
 0x3ad   :  { %4241 = vperm.xlu1 %7352, %v116_v31   ;;  %v121_v31 = vld [vmem:[%s11843_s12 + $0x60] sm:$0xff] }
 0x3b1   :  { %3576 = vmatmul.mubr.bf16.gmra.mrb[104].mxu1 %v9502_v55  ;;  %v9508_v18 = vpop.f32.mrb[196].mxu0  ;;  %4251 = vperm.xlu1 %7352, %v118_v45   ;;  %v123_v45 = vld [vmem:[%s11843_s12 + $0x70] sm:$0xff] }
 0x3b2   :  { %3583 = vmatprep.mubr.bf16.mxu1 %v2134_v20  ;;  %v9510_v30 = vpop.f32.mrb[197].mxu0  ;;  %v110_v20 = vld [vmem:[%s11843_s12 + $0x8] sm:$0xff] }
 0x3b3   :  { %v9512_v53 = vpop.f32.mrb[198].mxu0  ;;  %4211 = vperm.xlu0 %7351, %v110_v20  }
 0x3b4   :  { %v9514_v49 = vpop.f32.mrb[199].mxu0 }
 0x3b7   :  { %4226 = vperm.xlu0 %7351, %v113_v48  }
 0x3b9   :  { %3584 = vmatmul.mubr.bf16.gmra.mrb[108].mxu1 %v9516_v60  ;;  %v9525_v3 = vpop.f32.mrb[200].mxu0 }
 0x3ba   :  { %3591 = vmatprep.mubr.bf16.mxu1 %v2143_v9  ;;  %v9533_v2 = vpop.f32.mrb[201].mxu0  ;;  %v1688_v9 = vld [vmem:[#allocation2 + $0x30a] sm:$0xff] }
 0x3bb   :  { %v9535_v4 = vpop.f32.mrb[202].mxu0  ;;  %v2152_v20 = vpack.c.bf16 %v1688_v9, %v1687_v51  ;;  %4236 = vperm.xlu0 %7351, %v115_v59   ;;  %v1689_v51 = vld [vmem:[#allocation2 + $0x31a] sm:$0xff]  ;;  %v1690_v9 = vld [vmem:[#allocation2 + $0x322] sm:$0xff]  ;;  %v9562_v59 = vpack.c.bf16 %v1624_v21, %v1623_v57 }
 0x3bc   :  { %v9537_v37 = vpop.f32.mrb[203].mxu0  ;;  %v2161_v43 = vpack.c.bf16 %v1690_v9, %v1689_v51  ;;  %v1625_v57 = vld [vmem:[#allocation2 + $0x319] sm:$0xff] }
 0x3bd   :  { %v120_v21 = vld [vmem:[%s11843_s12 + $0x58] sm:$0xff] }
 0x3be   :  { %4261 = vperm.xlu1 %7352, %v120_v21   ;;  %v125_v21 = vld [vmem:[%s11843_s12 + $0x80] sm:$0xff] }
 0x3bf   :  { %4246 = vperm.xlu0 %7351, %v117_v25  }
 0x3c1   :  { %3592 = vmatmul.mubr.bf16.gmra.mrb[112].mxu1 %v9539_v39  ;;  %v9548_v23 = vpop.f32.mrb[204].mxu0 }
 0x3c2   :  { %3599 = vmatprep.mubr.bf16.mxu1 %v2152_v20  ;;  %12220 = vst [vmem:[#allocation54_spill] sm:$0xff] %v9548_v23  ;;  %v9556_v48 = vpop.f32.mrb[205].mxu0 }
 0x3c3   :  { %v9558_v20 = vpop.f32.mrb[206].mxu0  ;;  %4256 = vperm.xlu0 %7351, %v119_v50   ;;  %v122_v50 = vld [vmem:[%s11843_s12 + $0x68] sm:$0xff] }
 0x3c4   :  { %12221 = vst [vmem:[#allocation55_spill] sm:$0xff] %v9558_v20  ;;  %v9560_v56 = vpop.f32.mrb[207].mxu0  ;;  %4271 = vperm.xlu1 %7352, %v122_v50  }
 0x3c7   :  { %4266 = vperm.xlu0 %7351, %v121_v31  }
 0x3c9   :  { %3600 = vmatmul.mubr.bf16.gmra.mrb[116].mxu1 %v9562_v59  ;;  %v9571_v20 = vpop.f32.mrb[208].mxu0 }
 0x3ca   :  { %3607 = vmatprep.mubr.bf16.mxu1 %v2161_v43  ;;  %12222 = vst [vmem:[#allocation56_spill] sm:$0xff] %v9571_v20  ;;  %v9579_v25 = vpop.f32.mrb[209].mxu0  ;;  %v9585_v43 = vpack.c.bf16 %v1626_v14, %v1625_v57  ;;  %v1627_v20 = vld [vmem:[#allocation2 + $0x331] sm:$0xff]  ;;  %v1628_v14 = vld [vmem:[#allocation2 + $0x339] sm:$0xff] }
 0x3cb   :  { %12223 = vst [vmem:[#allocation57_spill] sm:$0xff] %v9579_v25  ;;  %v9581_v51 = vpop.f32.mrb[210].mxu0  ;;  %4276 = vperm.xlu0 %7351, %v123_v45   ;;  %v124_v57 = vld [vmem:[%s11843_s12 + $0x78] sm:$0xff]  ;;  %v9609_v50 = vpack.c.bf16 %v1628_v14, %v1627_v20 }
 0x3cc   :  { %12224 = vst [vmem:[#allocation58_spill] sm:$0xff] %v9581_v51  ;;  %v9583_v9 = vpop.f32.mrb[211].mxu0  ;;  %v1759_v25 = vld [vmem:[#allocation2 + $0x39] sm:$0xff]  ;;  %4281 = vperm.xlu1 %7352, %v124_v57   ;;  %v1760_v57 = vld [vmem:[#allocation2 + $0x49] sm:$0xff] }
 0x3cd   :  { %12225 = vst [vmem:[#allocation59_spill] sm:$0xff] %v9583_v9  ;;  %v1758_v9 = vld [vmem:[#allocation2 + $0x31] sm:$0xff] }
 0x3ce   :  { %v1893_v45 = vpack.c.bf16 %v1759_v25, %v1758_v9  ;;  %v1695_v20 = vld [vmem:[#allocation2 + $0x38] sm:$0xff]  ;;  %v129_v9 = vld [vmem:[%s11843_s12 + $0xa0] sm:$0xff] }
 0x3cf   :  { %4286 = vperm.xlu0 %7351, %v125_v21   ;;  %v128_v25 = vld [vmem:[%s11843_s12 + $0x98] sm:$0xff] }
 0x3d0   :  { %v1761_v21 = vld [vmem:[#allocation2 + $0x51] sm:$0xff] }
 0x3d1   :  { %3608 = vmatmul.mubr.bf16.gmra.mrb[120].mxu1 %v9585_v43  ;;  %v9595_v51 = vpop.f32.mrb[212].mxu0 }
 0x3d2   :  { %3615 = vmatprep.mubr.bf16.mxu1 %v9404_v0  ;;  %12226 = vst [vmem:[#allocation60_spill] sm:$0xff] %v9595_v51  ;;  %v9603_v31 = vpop.f32.mrb[213].mxu0  ;;  %v126_v51 = vld [vmem:[%s11843_s12 + $0x88] sm:$0xff] }
 0x3d3   :  { %12227 = vst [vmem:[#allocation61_spill] sm:$0xff] %v9603_v31  ;;  %v9605_v23 = vpop.f32.mrb[214].mxu0  ;;  %v127_v31 = vld [vmem:[%s11843_s12 + $0x90] sm:$0xff]  ;;  %4291 = vperm.xlu1 %7352, %v126_v51   ;;  %v1892_v51 = vpack.c.bf16 %v1695_v20, %v1694_v15  ;;  %v132_v15 = vld [vmem:[%s11843_s12 + $0xb8] sm:$0xff]  ;;  %v133_v20 = vld [vmem:[%s11843_s12 + $0xc0] sm:$0xff] }
 0x3d4   :  { %12228 = vst [vmem:[#allocation62_spill] sm:$0xff] %v9605_v23  ;;  %v9607_v0 = vpop.f32.mrb[215].mxu0  ;;  %4296 = vperm.xlu0 %7351, %v127_v31   ;;  %v1902_v31 = vpack.c.bf16 %v1761_v21, %v1760_v57  ;;  %v1763_v57 = vld [vmem:[#allocation2 + $0x69] sm:$0xff] }
 0x3d5   :  { %12229 = vst [vmem:[#allocation63_spill] sm:$0xff] %v9607_v0 }
 0x3d7   :  { %4301 = vperm.xlu1 %7352, %v128_v25  }
 0x3d8   :  { %4306 = vperm.xlu0 %7351, %v129_v9   ;;  %v1762_v9 = vld [vmem:[#allocation2 + $0x61] sm:$0xff] }
 0x3d9   :  { %3616 = vmatmul.mubr.bf16.gmra.mrb[124].mxu1 %v9609_v50  ;;  %v9618_v23 = vpop.f32.mrb[216].mxu0 }
 0x3da   :  { %3656 = vmatprep.mubr.bf16.mxu1 %v1893_v45  ;;  %12230 = vst [vmem:[#allocation64_spill] sm:$0xff] %v9618_v23  ;;  %v9626_v14 = vpop.f32.mrb[217].mxu0  ;;  %v130_v23 = vld [vmem:[%s11843_s12 + $0xa8] sm:$0xff] }
 0x3db   :  { %12231 = vst [vmem:[#allocation65_spill] sm:$0xff] %v9626_v14  ;;  %v9628_v45 = vpop.f32.mrb[218].mxu0  ;;  %v131_v14 = vld [vmem:[%s11843_s12 + $0xb0] sm:$0xff]  ;;  %4311 = vperm.xlu1 %7352, %v130_v23  }
 0x3dc   :  { %12232 = vst [vmem:[#allocation66_spill] sm:$0xff] %v9628_v45  ;;  %v9630_v0 = vpop.f32.mrb[219].mxu0  ;;  %4316 = vperm.xlu0 %7351, %v131_v14   ;;  %v1911_v14 = vpack.c.bf16 %v1763_v57, %v1762_v9  ;;  %v1764_v9 = vld [vmem:[#allocation2 + $0x79] sm:$0xff]  ;;  %v1765_v57 = vld [vmem:[#allocation2 + $0x81] sm:$0xff] }
 0x3dd   :  { %12233 = vst [vmem:[#allocation67_spill] sm:$0xff] %v9630_v0  ;;  %v1697_v0 = vld [vmem:[#allocation2 + $0x50] sm:$0xff] }
 0x3df   :  { %4321 = vperm.xlu1 %7352, %v132_v15   ;;  %v137_v15 = vld [vmem:[%s11843_s12 + $0xe0] sm:$0xff] }
 0x3e0   :  { %4326 = vperm.xlu0 %7351, %v133_v20  }
 0x3e1   :  { %3657 = vmatmul.mubr.bf16.vlgmr.msra.gmra.mrb[0].mxu1 %v1892_v51  ;;  %v9638_v45 = vpop.f32.mrb[220].mxu0  ;;  %v1901_v51 = vpack.c.bf16 %v1697_v0, %v1696_v46  ;;  %v1699_v46 = vld [vmem:[#allocation2 + $0x68] sm:$0xff]  ;;  %v136_v0 = vld [vmem:[%s11843_s12 + $0xd8] sm:$0xff] }
 0x3e2   :  { %3664 = vmatprep.mubr.bf16.mxu1 %v1902_v31  ;;  %12234 = vst [vmem:[#allocation68_spill] sm:$0xff] %v9638_v45  ;;  %v9646_v25 = vpop.f32.mrb[221].mxu0  ;;  %v134_v31 = vld [vmem:[%s11843_s12 + $0xc8] sm:$0xff]  ;;  %v135_v45 = vld [vmem:[%s11843_s12 + $0xd0] sm:$0xff] }
 0x3e3   :  { %12235 = vst [vmem:[#allocation69_spill] sm:$0xff] %v9646_v25  ;;  %v9648_v21 = vpop.f32.mrb[222].mxu0  ;;  %v1698_v25 = vld [vmem:[#allocation2 + $0x60] sm:$0xff]  ;;  %4331 = vperm.xlu1 %7352, %v134_v31   ;;  %v1920_v31 = vpack.c.bf16 %v1765_v57, %v1764_v9 }
 0x3e4   :  { %12236 = vst [vmem:[#allocation70_spill] sm:$0xff] %v9648_v21  ;;  %v9650_v23 = vpop.f32.mrb[223].mxu0  ;;  %4336 = vperm.xlu0 %7351, %v135_v45   ;;  %v1910_v45 = vpack.c.bf16 %v1699_v46, %v1698_v25  ;;  %v140_v25 = vld [vmem:[%s11843_s12 + $0xf8] sm:$0xff]  ;;  %v141_v46 = vld [vmem:[%s11843_s12 + $0x100] sm:$0xff] }
 0x3e5   :  { %12237 = vst [vmem:[#allocation71_spill] sm:$0xff] %v9650_v23  ;;  %v1700_v23 = vld [vmem:[#allocation2 + $0x78] sm:$0xff] }
 0x3e6   :  { %v1767_v9 = vld [vmem:[#allocation2 + $0x99] sm:$0xff] }
 0x3e7   :  { %4341 = vperm.xlu1 %7352, %v136_v0  }
 0x3e8   :  { %4346 = vperm.xlu0 %7351, %v137_v15   ;;  %v1766_v15 = vld [vmem:[#allocation2 + $0x91] sm:$0xff] }
 0x3e9   :  { %3665 = vmatmul.mubr.bf16.gmra.mrb[4].mxu1 %v1901_v51  ;;  %v9658_v21 = vpop.f32.mrb[224].mxu0 }
 0x3ea   :  { %3672 = vmatprep.mubr.bf16.mxu1 %v1911_v14  ;;  %12238 = vst [vmem:[#allocation72_spill] sm:$0xff] %v9658_v21  ;;  %v9666_v20 = vpop.f32.mrb[225].mxu0  ;;  %v138_v21 = vld [vmem:[%s11843_s12 + $0xe8] sm:$0xff] }
 0x3eb   :  { %12239 = vst [vmem:[#allocation73_spill] sm:$0xff] %v9666_v20  ;;  %v9668_v51 = vpop.f32.mrb[226].mxu0  ;;  %v139_v20 = vld [vmem:[%s11843_s12 + $0xf0] sm:$0xff]  ;;  %4351 = vperm.xlu1 %7352, %v138_v21  }
 0x3ec   :  { %12240 = vst [vmem:[#allocation74_spill] sm:$0xff] %v9668_v51  ;;  %v9670_v14 = vpop.f32.mrb[227].mxu0  ;;  %4356 = vperm.xlu0 %7351, %v139_v20   ;;  %v1929_v20 = vpack.c.bf16 %v1767_v9, %v1766_v15  ;;  %v1769_v15 = vld [vmem:[#allocation2 + $0xb1] sm:$0xff] }
 0x3ed   :  { %12241 = vst [vmem:[#allocation75_spill] sm:$0xff] %v9670_v14  ;;  %v1701_v14 = vld [vmem:[#allocation2 + $0x80] sm:$0xff] }
 0x3ee   :  { %v1919_v21 = vpack.c.bf16 %v1701_v14, %v1700_v23  ;;  %v144_v23 = vld [vmem:[%s11843_s12 + $0x118] sm:$0xff]  ;;  %v145_v14 = vld [vmem:[%s11843_s12 + $0x120] sm:$0xff] }
 0x3ef   :  { %4361 = vperm.xlu1 %7352, %v140_v25  }
 0x3f0   :  { %4366 = vperm.xlu0 %7351, %v141_v46   ;;  %v1768_v46 = vld [vmem:[#allocation2 + $0xa9] sm:$0xff] }
 0x3f1   :  { %3673 = vmatmul.mubr.bf16.gmra.mrb[8].mxu1 %v1910_v45  ;;  %v9678_v51 = vpop.f32.mrb[228].mxu0 }
 0x3f2   :  { %3680 = vmatprep.mubr.bf16.mxu1 %v1920_v31  ;;  %12242 = vst [vmem:[#allocation76_spill] sm:$0xff] %v9678_v51  ;;  %v9686_v0 = vpop.f32.mrb[229].mxu0  ;;  %v142_v31 = vld [vmem:[%s11843_s12 + $0x108] sm:$0xff]  ;;  %v143_v51 = vld [vmem:[%s11843_s12 + $0x110] sm:$0xff] }
 0x3f3   :  { %12243 = vst [vmem:[#allocation77_spill] sm:$0xff] %v9686_v0  ;;  %v9688_v57 = vpop.f32.mrb[230].mxu0  ;;  %v1702_v0 = vld [vmem:[#allocation2 + $0x90] sm:$0xff]  ;;  %4371 = vperm.xlu1 %7352, %v142_v31   ;;  %v146_v31 = vld [vmem:[%s11843_s12 + $0x128] sm:$0xff] }
 0x3f4   :  { %12244 = vst [vmem:[#allocation78_spill] sm:$0xff] %v9688_v57  ;;  %v9690_v45 = vpop.f32.mrb[231].mxu0  ;;  %4376 = vperm.xlu0 %7351, %v143_v51  }
 0x3f5   :  { %12245 = vst [vmem:[#allocation79_spill] sm:$0xff] %v9690_v45  ;;  %v1703_v45 = vld [vmem:[#allocation2 + $0x98] sm:$0xff] }
 0x3f6   :  { %v1928_v51 = vpack.c.bf16 %v1703_v45, %v1702_v0  ;;  %v148_v0 = vld [vmem:[%s11843_s12 + $0x138] sm:$0xff]  ;;  %v149_v45 = vld [vmem:[%s11843_s12 + $0x140] sm:$0xff] }
 0x3f7   :  { %4381 = vperm.xlu1 %7352, %v144_v23  }
 0x3f8   :  { %4386 = vperm.xlu0 %7351, %v145_v14   ;;  %v1770_v14 = vld [vmem:[#allocation2 + $0xc1] sm:$0xff] }
 0x3f9   :  { %3681 = vmatmul.mubr.bf16.gmra.mrb[12].mxu1 %v1919_v21  ;;  %v9698_v57 = vpop.f32.mrb[232].mxu0 }
 0x3fa   :  { %3688 = vmatprep.mubr.bf16.mxu1 %v1929_v20  ;;  %12246 = vst [vmem:[#allocation80_spill] sm:$0xff] %v9698_v57  ;;  %v9706_v25 = vpop.f32.mrb[233].mxu0  ;;  %v1938_v20 = vpack.c.bf16 %v1769_v15, %v1768_v46  ;;  %v147_v57 = vld [vmem:[%s11843_s12 + $0x130] sm:$0xff] }
 0x3fb   :  { %12247 = vst [vmem:[#allocation81_spill] sm:$0xff] %v9706_v25  ;;  %v9708_v9 = vpop.f32.mrb[234].mxu0  ;;  %v1704_v25 = vld [vmem:[#allocation2 + $0xa8] sm:$0xff]  ;;  %4391 = vperm.xlu1 %7352, %v146_v31  }
 0x3fc   :  { %12248 = vst [vmem:[#allocation82_spill] sm:$0xff] %v9708_v9  ;;  %v9710_v21 = vpop.f32.mrb[235].mxu0  ;;  %4396 = vperm.xlu0 %7351, %v147_v57   ;;  %v1771_v46 = vld [vmem:[#allocation2 + $0xc9] sm:$0xff] }
 0x3fd   :  { %12249 = vst [vmem:[#allocation83_spill] sm:$0xff] %v9710_v21  ;;  %v1705_v21 = vld [vmem:[#allocation2 + $0xb0] sm:$0xff]  ;;  %v150_v31 = vld [vmem:[%s11843_s12 + $0x148] sm:$0xff] }
 0x3fe   :  { %v1937_v57 = vpack.c.bf16 %v1705_v21, %v1704_v25  ;;  %v152_v25 = vld [vmem:[%s11843_s12 + $0x158] sm:$0xff]  ;;  %v153_v21 = vld [vmem:[%s11843_s12 + $0x160] sm:$0xff] }
 0x3ff   :  { %4401 = vperm.xlu1 %7352, %v148_v0  }
 0x400   :  { %4406 = vperm.xlu0 %7351, %v149_v45  }
 0x401   :  { %3689 = vmatmul.mubr.bf16.gmra.mrb[16].mxu1 %v1928_v51  ;;  %v9718_v9 = vpop.f32.mrb[236].mxu0 }
 0x402   :  { %3696 = vmatprep.mubr.bf16.mxu1 %v1938_v20  ;;  %12250 = vst [vmem:[#allocation84_spill] sm:$0xff] %v9718_v9  ;;  %v9726_v23 = vpop.f32.mrb[237].mxu0  ;;  %v1947_v20 = vpack.c.bf16 %v1771_v46, %v1770_v14  ;;  %v151_v9 = vld [vmem:[%s11843_s12 + $0x150] sm:$0xff] }
 0x403   :  { %12251 = vst [vmem:[#allocation85_spill] sm:$0xff] %v9726_v23  ;;  %v9728_v15 = vpop.f32.mrb[238].mxu0  ;;  %v1706_v23 = vld [vmem:[#allocation2 + $0xc0] sm:$0xff]  ;;  %4411 = vperm.xlu1 %7352, %v150_v31  }
 0x404   :  { %12252 = vst [vmem:[#allocation86_spill] sm:$0xff] %v9728_v15  ;;  %v9730_v51 = vpop.f32.mrb[239].mxu0  ;;  %4416 = vperm.xlu0 %7351, %v151_v9   ;;  %v154_v9 = vld [vmem:[%s11843_s12 + $0x168] sm:$0xff] }
 0x405   :  { %12253 = vst [vmem:[#allocation87_spill] sm:$0xff] %v9730_v51  ;;  %v1707_v51 = vld [vmem:[#allocation2 + $0xc8] sm:$0xff] }
 0x406   :  { %v1946_v46 = vpack.c.bf16 %v1707_v51, %v1706_v23  ;;  %v156_v23 = vld [vmem:[%s11843_s12 + $0x178] sm:$0xff] }
 0x407   :  { %4421 = vperm.xlu1 %7352, %v152_v25  }
 0x408   :  { %4426 = vperm.xlu0 %7351, %v153_v21  }
 0x409   :  { %3697 = vmatmul.mubr.bf16.gmra.mrb[20].mxu1 %v1937_v57  ;;  %v9738_v15 = vpop.f32.mrb[240].mxu0  ;;  %v155_v57 = vld [vmem:[%s11843_s12 + $0x170] sm:$0xff] }
 0x40a   :  { %3704 = vmatprep.mubr.bf16.mxu1 %v1947_v20  ;;  %v9746_v0 = vpop.f32.mrb[241].mxu0  ;;  %v1708_v20 = vld [vmem:[#allocation2 + $0xd8] sm:$0xff] }
 0x40b   :  { %v9748_v45 = vpop.f32.mrb[242].mxu0  ;;  %4431 = vperm.xlu1 %7352, %v154_v9   ;;  %v158_v9 = vld [vmem:[%s11843_s12 + $0x188] sm:$0xff] }
 0x40c   :  { %12254 = vst [vmem:[#allocation88_spill] sm:$0xff] %v9748_v45  ;;  %v9750_v14 = vpop.f32.mrb[243].mxu0  ;;  %4436 = vperm.xlu0 %7351, %v155_v57   ;;  %v1709_v45 = vld [vmem:[#allocation2 + $0xe0] sm:$0xff]  ;;  %v159_v57 = vld [vmem:[%s11843_s12 + $0x190] sm:$0xff] }
 0x40f   :  { %4441 = vperm.xlu1 %7352, %v156_v23  }
 0x411   :  { %3705 = vmatmul.mubr.bf16.gmra.mrb[24].mxu1 %v1946_v46  ;;  %v9759_v31 = vpop.f32.mrb[244].mxu0  ;;  %v1955_v46 = vpack.c.bf16 %v1709_v45, %v1708_v20  ;;  %v160_v45 = vld [vmem:[%s11843_s12 + $0x198] sm:$0xff] }
 0x412   :  { %3712 = vmatprep.mubr.bf16.mxu1 %v9342_v5  ;;  %12255 = vst [vmem:[#allocation89_spill] sm:$0xff] %v9759_v31  ;;  %v157_v5 = vld [vmem:[%s11843_s12 + $0x180] sm:$0xff]  ;;  %v9767_v51 = vpop.f32.mrb[245].mxu0  ;;  %v1710_v31 = vld [vmem:[#allocation2 + $0xf0] sm:$0xff] }
 0x413   :  { %v9769_v25 = vpop.f32.mrb[246].mxu0  ;;  %4446 = vperm.xlu0 %7351, %v157_v5   ;;  %4451 = vperm.xlu1 %7352, %v158_v9   ;;  %v162_v9 = vld [vmem:[%s11843_s12 + $0x1a8] sm:$0xff] }
 0x414   :  { %12256 = vst [vmem:[#allocation90_spill] sm:$0xff] %v9769_v25  ;;  %v9771_v21 = vpop.f32.mrb[247].mxu0 }
 0x415   :  { %12257 = vst [vmem:[#allocation91_spill] sm:$0xff] %v9771_v21  ;;  %v1711_v21 = vld [vmem:[#allocation2 + $0xf8] sm:$0xff] }
 0x417   :  { %4456 = vperm.xlu0 %7351, %v159_v57   ;;  %4461 = vperm.xlu1 %7352, %v160_v45   ;;  %v163_v57 = vld [vmem:[%s11843_s12 + $0x1b0] sm:$0xff]  ;;  %v166_v45 = vld [vmem:[%s11843_s12 + $0x1c8] sm:$0xff] }
 0x419   :  { %3713 = vmatmul.mubr.bf16.gmra.mrb[28].mxu1 %v1955_v46  ;;  %v9780_v25 = vpop.f32.mrb[248].mxu0  ;;  %v1964_v46 = vpack.c.bf16 %v1711_v21, %v1710_v31  ;;  %v164_v31 = vld [vmem:[%s11843_s12 + $0x1b8] sm:$0xff] }
 0x41a   :  { %3720 = vmatprep.mubr.bf16.mxu1 %v9356_v62  ;;  %12258 = vst [vmem:[#allocation92_spill] sm:$0xff] %v9780_v25  ;;  %v161_v62 = vld [vmem:[%s11843_s12 + $0x1a0] sm:$0xff]  ;;  %v9788_v20 = vpop.f32.mrb[249].mxu0  ;;  %v1712_v25 = vld [vmem:[#allocation2 + $0x108] sm:$0xff] }
 0x41b   :  { %v9790_v23 = vpop.f32.mrb[250].mxu0  ;;  %4466 = vperm.xlu0 %7351, %v161_v62   ;;  %4471 = vperm.xlu1 %7352, %v162_v9   ;;  %v167_v62 = vld [vmem:[%s11843_s12 + $0x1d0] sm:$0xff]  ;;  %v1715_v9 = vld [vmem:[#allocation2 + $0x128] sm:$0xff] }
 0x41c   :  { %12259 = vst [vmem:[#allocation93_spill] sm:$0xff] %v9790_v23  ;;  %v9792_v5 = vpop.f32.mrb[251].mxu0  ;;  %v1713_v23 = vld [vmem:[#allocation2 + $0x110] sm:$0xff] }
 0x41d   :  { %12260 = vst [vmem:[#allocation94_spill] sm:$0xff] %v9792_v5  ;;  %v1973_v21 = vpack.c.bf16 %v1713_v23, %v1712_v25  ;;  %v168_v25 = vld [vmem:[%s11843_s12 + $0x1d8] sm:$0xff]  ;;  %v7488_v5 = vld [vmem:[#allocation2] sm:$0xff] }
 0x41f   :  { %4476 = vperm.xlu0 %7351, %v163_v57   ;;  %4481 = vperm.xlu1 %7352, %v164_v31   ;;  %v170_v57 = vld [vmem:[%s11843_s12 + $0x1e8] sm:$0xff]  ;;  %v171_v31 = vld [vmem:[%s11843_s12 + $0x1f0] sm:$0xff] }
 0x421   :  { %3721 = vmatmul.mubr.bf16.gmra.mrb[32].mxu1 %v1964_v46  ;;  %v1714_v46 = vld [vmem:[#allocation2 + $0x120] sm:$0xff] }
 0x422   :  { %3728 = vmatprep.mubr.bf16.mxu1 %v9366_v22  ;;  %v165_v22 = vld [vmem:[%s11843_s12 + $0x1c0] sm:$0xff]  ;;  %v1982_v23 = vpack.c.bf16 %v1715_v9, %v1714_v46  ;;  %v1719_v46 = vld [vmem:[#allocation2 + $0x158] sm:$0xff] }
 0x423   :  { %4486 = vperm.xlu0 %7351, %v165_v22   ;;  %4491 = vperm.xlu1 %7352, %v166_v45   ;;  %v1716_v22 = vld [vmem:[#allocation2 + $0x138] sm:$0xff] }
 0x427   :  { %4496 = vperm.xlu0 %7351, %v167_v62   ;;  %4501 = vperm.xlu1 %7352, %v168_v25   ;;  %v1718_v62 = vld [vmem:[#allocation2 + $0x150] sm:$0xff]  ;;  %v1720_v25 = vld [vmem:[#allocation2 + $0x168] sm:$0xff] }
 0x428   :  { %v2000_v9 = vpack.c.bf16 %v1719_v46, %v1718_v62  ;;  %v1884_v62 = vld [vmem:[#allocation2 + $0x34a] sm:$0xff]  ;;  %v1885_v46 = vld [vmem:[#allocation2 + $0x352] sm:$0xff] }
 0x429   :  { %3729 = vmatmul.mubr.bf16.gmra.mrb[36].mxu1 %v1973_v21  ;;  %v1717_v21 = vld [vmem:[#allocation2 + $0x140] sm:$0xff] }
 0x42a   :  { %3736 = vmatprep.mubr.bf16.mxu1 %v9380_v40  ;;  %v169_v40 = vld [vmem:[%s11843_s12 + $0x1e0] sm:$0xff]  ;;  %v1991_v45 = vpack.c.bf16 %v1717_v21, %v1716_v22  ;;  %v1723_v22 = vld [vmem:[#allocation2 + $0x188] sm:$0xff] }
 0x42b   :  { %4506 = vperm.xlu0 %7351, %v169_v40   ;;  %4511 = vperm.xlu1 %7352, %v170_v57   ;;  %v1721_v40 = vld [vmem:[#allocation2 + $0x170] sm:$0xff]  ;;  %v1788_v57 = vld [vmem:[#allocation2 + $0x199] sm:$0xff] }
 0x42f   :  { %4516 = vperm.xlu0 %7351, %v171_v31   ;;  %v1789_v31 = vld [vmem:[#allocation2 + $0x1a1] sm:$0xff] }
 0x430   :  { %v2028_v21 = vpack.c.bf16 %v1789_v31, %v1788_v57  ;;  %v1731_v31 = vld [vmem:[#allocation2 + $0x218] sm:$0xff] }
 0x431   :  { %3737 = vmatmul.mubr.bf16.gmra.mrb[40].mxu1 %v1982_v23  ;;  %v2009_v23 = vpack.c.bf16 %v1721_v40, %v1720_v25  ;;  %v1728_v40 = vld [vmem:[#allocation2 + $0x1f8] sm:$0xff] }
 0x432   :  { %3744 = vmatprep.mubr.bf16.mxu1 %v9389_v6  ;;  %v172_v6 = vld [vmem:[%s11843_s12 + $0x1f8] sm:$0xff] }
 0x433   :  { %4521 = vperm.xlu1 %7352, %v172_v6   ;;  %v9833_v6 = vpack.c.bf16 %v7488_v5, %v7488_v5  ;;  %v1730_v5 = vld [vmem:[#allocation2 + $0x210] sm:$0xff] }
 0x439   :  { %3745 = vmatmul.mubr.bf16.gmra.mrb[44].mxu1 %v1991_v45 }
 0x43a   :  { %3752 = vmatprep.mubr.bf16.mxu1 %v9402_v52  ;;  %v1722_v52 = vld [vmem:[#allocation2 + $0x180] sm:$0xff] }
 0x43b   :  { %v2018_v45 = vpack.c.bf16 %v1723_v22, %v1722_v52  ;;  %v2054_v52 = vpack.c.bf16 %v1731_v31, %v1730_v5  ;;  %v1733_v22 = vld [vmem:[#allocation2 + $0x230] sm:$0xff]  ;;  %v1744_v5 = vld [vmem:[#allocation2 + $0x2b8] sm:$0xff] }
 0x441   :  { %3753 = vmatmul.mubr.bf16.gmra.mrb[48].mxu1 %v2000_v9  ;;  %v1727_v9 = vld [vmem:[#allocation2 + $0x1e8] sm:$0xff] }
 0x442   :  { %3760 = vmatprep.mubr.bf16.mxu1 %v9413_v17  ;;  %v2173_v17 = vpack.c.bf16 %v1885_v46, %v1884_v62  ;;  %v1736_v46 = vld [vmem:[#allocation2 + $0x258] sm:$0xff] }
 0x444   :  { %6802 = vmatmul.mubr.bf16.gmra.mrb[252].mxu0 %v2173_v17 }
 0x449   :  { %3761 = vmatmul.mubr.bf16.gmra.mrb[52].mxu1 %v2009_v23  ;;  %v1729_v23 = vld [vmem:[#allocation2 + $0x200] sm:$0xff] }
 0x44a   :  { %3768 = vmatprep.mubr.bf16.mxu1 %v9424_v27  ;;  %v1726_v27 = vld [vmem:[#allocation2 + $0x1e0] sm:$0xff]  ;;  %v2045_v57 = vpack.c.bf16 %v1729_v23, %v1728_v40 }
 0x44b   :  { %v2036_v25 = vpack.c.bf16 %v1727_v9, %v1726_v27  ;;  %v1738_v27 = vld [vmem:[#allocation2 + $0x270] sm:$0xff]  ;;  %v1742_v23 = vld [vmem:[#allocation2 + $0x2a0] sm:$0xff] }
 0x451   :  { %3769 = vmatmul.mubr.bf16.gmra.mrb[56].mxu1 %v2018_v45  ;;  %v1734_v45 = vld [vmem:[#allocation2 + $0x240] sm:$0xff] }
 0x452   :  { %3776 = vmatprep.mubr.bf16.mxu1 %v2028_v21 }
 0x459   :  { %3777 = vmatmul.mubr.bf16.gmra.mrb[60].mxu1 %v9833_v6 }
 0x45a   :  { %3784 = vmatprep.mubr.bf16.mxu1 %v9435_v61  ;;  %v1732_v61 = vld [vmem:[#allocation2 + $0x228] sm:$0xff] }
 0x45b   :  { %v2063_v21 = vpack.c.bf16 %v1733_v22, %v1732_v61 }
 0x461   :  { %3785 = vmatmul.mubr.bf16.gmra.mrb[64].mxu1 %v2036_v25  ;;  %v1740_v25 = vld [vmem:[#allocation2 + $0x288] sm:$0xff] }
 0x462   :  { %3792 = vmatprep.mubr.bf16.mxu1 %v9442_v10  ;;  %v1735_v10 = vld [vmem:[#allocation2 + $0x248] sm:$0xff] }
 0x463   :  { %v2072_v62 = vpack.c.bf16 %v1735_v10, %v1734_v45  ;;  %v1749_v45 = vld [vmem:[#allocation2 + $0x2f0] sm:$0xff] }
 0x469   :  { %3793 = vmatmul.mubr.bf16.gmra.mrb[68].mxu1 %v2045_v57 }
 0x46a   :  { %3800 = vmatprep.mubr.bf16.mxu1 %v9449_v29  ;;  %v1737_v29 = vld [vmem:[#allocation2 + $0x260] sm:$0xff] }
 0x46b   :  { %v2081_v17 = vpack.c.bf16 %v1737_v29, %v1736_v46 }
 0x471   :  { %3801 = vmatmul.mubr.bf16.gmra.mrb[72].mxu1 %v2054_v52  ;;  %v1746_v52 = vld [vmem:[#allocation2 + $0x2d0] sm:$0xff] }
 0x472   :  { %3808 = vmatprep.mubr.bf16.mxu1 %v9456_v28  ;;  %v1739_v28 = vld [vmem:[#allocation2 + $0x278] sm:$0xff] }
 0x473   :  { %v2090_v9 = vpack.c.bf16 %v1739_v28, %v1738_v27 }
 0x479   :  { %3809 = vmatmul.mubr.bf16.gmra.mrb[76].mxu1 %v2063_v21  ;;  %v1748_v21 = vld [vmem:[#allocation2 + $0x2e8] sm:$0xff] }
 0x47a   :  { %3816 = vmatprep.mubr.bf16.mxu1 %v9463_v19  ;;  %v1741_v19 = vld [vmem:[#allocation2 + $0x290] sm:$0xff]  ;;  %v2135_v28 = vpack.c.bf16 %v1749_v45, %v1748_v21 }
 0x47b   :  { %v2099_v40 = vpack.c.bf16 %v1741_v19, %v1740_v25  ;;  %v1750_v25 = vld [vmem:[#allocation2 + $0x300] sm:$0xff]  ;;  %v1751_v19 = vld [vmem:[#allocation2 + $0x308] sm:$0xff] }
 0x47c   :  { %v1820_v45 = vld [vmem:[#allocation2 + $0x349] sm:$0xff] }
 0x481   :  { %3817 = vmatmul.mubr.bf16.gmra.mrb[80].mxu1 %v2072_v62 }
 0x482   :  { %3824 = vmatprep.mubr.bf16.mxu1 %v9470_v7  ;;  %v1743_v7 = vld [vmem:[#allocation2 + $0x2a8] sm:$0xff] }
 0x483   :  { %v2108_v57 = vpack.c.bf16 %v1743_v7, %v1742_v23 }
 0x489   :  { %3825 = vmatmul.mubr.bf16.gmra.mrb[84].mxu1 %v2081_v17 }
 0x48a   :  { %3832 = vmatprep.mubr.bf16.mxu1 %v9477_v11  ;;  %v1745_v11 = vld [vmem:[#allocation2 + $0x2c0] sm:$0xff] }
 0x48b   :  { %v2117_v31 = vpack.c.bf16 %v1745_v11, %v1744_v5  ;;  %v2144_v5 = vpack.c.bf16 %v1751_v19, %v1750_v25 }
 0x491   :  { %3833 = vmatmul.mubr.bf16.gmra.mrb[88].mxu1 %v2090_v9 }
 0x492   :  { %3840 = vmatprep.mubr.bf16.mxu1 %v9484_v32  ;;  %v1747_v32 = vld [vmem:[#allocation2 + $0x2d8] sm:$0xff] }
 0x493   :  { %v2126_v61 = vpack.c.bf16 %v1747_v32, %v1746_v52  ;;  %v1753_v52 = vld [vmem:[#allocation2 + $0x320] sm:$0xff] }
 0x499   :  { %3841 = vmatmul.mubr.bf16.gmra.mrb[92].mxu1 %v2099_v40 }
 0x49a   :  { %3848 = vmatprep.mubr.bf16.mxu1 %v9491_v1  ;;  %v9850_v1 = vld [vmem:[%s11844_s5] ss:$0 sm:$0xff] }
 0x49b   :  { %v2824_v25 = vadd.f32 %v9850_v1, %v9202_v58  ;;  %v2832_v58 = vadd.f32 %v9850_v1, %v9209_v63 }
 0x4a1   :  { %3849 = vmatmul.mubr.bf16.gmra.mrb[96].mxu1 %v2108_v57 }
 0x4a2   :  { %3856 = vmatprep.mubr.bf16.mxu1 %v9502_v55  ;;  %v2792_v55 = vadd.f32 %v9850_v1, %v9101_v38  ;;  %v2800_v38 = vadd.f32 %v9850_v1, %v9181_v47  ;;  %v2808_v47 = vadd.f32 %v9850_v1, %v9188_v26  ;;  %v2816_v26 = vadd.f32 %v9850_v1, %v9195_v13 }
 0x4a9   :  { %3857 = vmatmul.mubr.bf16.gmra.mrb[100].mxu1 %v2117_v31  ;;  %v1752_v31 = vld [vmem:[#allocation2 + $0x318] sm:$0xff] }
 0x4aa   :  { %3864 = vmatprep.mubr.bf16.mxu1 %v9516_v60  ;;  %v2795_v60 = vadd.f32 %v9850_v1, %v9104_v34  ;;  %v2153_v21 = vpack.c.bf16 %v1753_v52, %v1752_v31 }
 0x4b1   :  { %3865 = vmatmul.mubr.bf16.gmra.mrb[104].mxu1 %v2126_v61 }
 0x4b2   :  { %3872 = vmatprep.mubr.bf16.mxu1 %v9539_v39 }
 0x4b4   :  { %v3658_v22 = vpop.f32.mrb[0].mxu1 }
 0x4b5   :  { %v6966_v10 = vadd.f32 %v3658_v22, %v2792_v55  ;;  %v3660_v62 = vpop.f32.mrb[1].mxu1 }
 0x4b6   :  { %v3661_v46 = vpop.f32.mrb[2].mxu1 }
 0x4b7   :  { %v9858_v29 = vadd.f32 %v6966_v10, %v9496_v41  ;;  %v6968_v17 = vadd.f32 %v3661_v46, %v2795_v60  ;;  %v3663_v27 = vpop.f32.mrb[3].mxu1  ;;  %v2803_v41 = vadd.f32 %v9850_v1, %v9183_v16  ;;  %v1821_v10 = vld [vmem:[#allocation2 + $0x351] sm:$0xff] }
 0x4b8   :  { %v1755_v60 = vld [vmem:[#allocation2 + $0x338] sm:$0xff] }
 0x4b9   :  { %v9861_v39 = vadd.f32 %v6968_v17, %v9500_v33  ;;  %3873 = vmatmul.mubr.bf16.gmra.mrb[108].mxu1 %v2135_v28  ;;  %v2819_v17 = vadd.f32 %v9850_v1, %v9197_v8  ;;  %v2172_v28 = vpack.c.bf16 %v1821_v10, %v1820_v45  ;;  %v2827_v8 = vadd.f32 %v9850_v1, %v9204_v36  ;;  %v12262_v10 = vld [vmem:[#allocation20_spill] sm:$0xff] }
 0x4ba   :  { %3880 = vmatprep.mubr.bf16.mxu1 %v9562_v59  ;;  %v2835_v36 = vadd.f32 %v9850_v1, %v9211_v54 }
 0x4bc   :  { %v3666_v9 = vpop.f32.mrb[4].mxu1 }
 0x4bd   :  { %v6970_v34 = vadd.f32 %v3666_v9, %v2800_v38  ;;  %v3668_v40 = vpop.f32.mrb[5].mxu1 }
 0x4be   :  { %v3669_v23 = vpop.f32.mrb[6].mxu1 }
 0x4bf   :  { %v9869_v7 = vadd.f32 %v6970_v34, %v9494_v44  ;;  %v6972_v33 = vadd.f32 %v3669_v23, %v2803_v41  ;;  %v3671_v57 = vpop.f32.mrb[7].mxu1  ;;  %v2811_v44 = vadd.f32 %v9850_v1, %v9190_v12  ;;  %v1754_v12 = vld [vmem:[#allocation2 + $0x330] sm:$0xff] }
 0x4c0   :  { %v2162_v9 = vpack.c.bf16 %v1755_v60, %v1754_v12  ;;  %v9931_v12 = vpop.permute.xlu0 %4206  ;;  %v12264_v60 = vld [vmem:[#allocation54_spill] sm:$0xff] }
 0x4c1   :  { %v9872_v59 = vadd.f32 %v6972_v33, %v9498_v35  ;;  %3881 = vmatmul.mubr.bf16.gmra.mrb[112].mxu1 %v2144_v5 }
 0x4c2   :  { %3888 = vmatprep.mubr.bf16.mxu1 %v9585_v43 }
 0x4c4   :  { %v3674_v11 = vpop.f32.mrb[8].mxu1 }
 0x4c5   :  { %v6974_v16 = vadd.f32 %v3674_v11, %v2808_v47  ;;  %v3676_v32 = vpop.f32.mrb[9].mxu1 }
 0x4c6   :  { %v3677_v61 = vpop.f32.mrb[10].mxu1 }
 0x4c7   :  { %v9880_v55 = vadd.f32 %v6974_v16, %v9510_v30  ;;  %v6976_v35 = vadd.f32 %v3677_v61, %v2811_v44  ;;  %v3679_v22 = vpop.f32.mrb[11].mxu1  ;;  %v2843_v44 = vadd.f32 %v9850_v1, %v9221_v24 }
 0x4c9   :  { %v9883_v43 = vadd.f32 %v6976_v35, %v9514_v49  ;;  %3889 = vmatmul.mubr.bf16.gmra.mrb[116].mxu1 %v2153_v21 }
 0x4ca   :  { %3896 = vmatprep.mubr.bf16.mxu1 %v9609_v50 }
 0x4cc   :  { %v3682_v62 = vpop.f32.mrb[12].mxu1 }
 0x4cd   :  { %v6978_v46 = vadd.f32 %v3682_v62, %v2816_v26  ;;  %v3684_v30 = vpop.f32.mrb[13].mxu1  ;;  %v2851_v62 = vadd.f32 %v9850_v1, %v12262_v10 }
 0x4ce   :  { %v3685_v27 = vpop.f32.mrb[14].mxu1 }
 0x4cf   :  { %v9891_v49 = vadd.f32 %v6978_v46, %v9508_v18  ;;  %v6980_v38 = vadd.f32 %v3685_v27, %v2819_v17  ;;  %v3687_v50 = vpop.f32.mrb[15].mxu1  ;;  %v12265_v17 = vld [vmem:[#allocation55_spill] sm:$0xff] }
 0x4d0   :  { %v9944_v50 = vpop.permute.xlu0 %4211 }
 0x4d1   :  { %v9894_v13 = vadd.f32 %v6980_v38, %v9512_v53  ;;  %3897 = vmatmul.mubr.bf16.gmra.mrb[120].mxu1 %v2162_v9  ;;  %12267 = vst [vmem:[#allocation20_spill] sm:$0xff] %v9944_v50 }
 0x4d2   :  { %3904 = vmatprep.mubr.bf16.mxu1 %v2172_v28  ;;  %v12266_v28 = vld [vmem:[#allocation23_spill] sm:$0xff] }
 0x4d3   :  { %v2856_v38 = vadd.f32 %v9850_v1, %v12266_v28  ;;  %v7466_v28 = vld [vmem:[%s11845_s8 + $0x8] sm:$0xff]  }
 0x4d4   :  { %v3690_v19 = vpop.f32.mrb[16].mxu1 }
 0x4d5   :  { %v6982_v34 = vadd.f32 %v3690_v19, %v2824_v25  ;;  %v3692_v40 = vpop.f32.mrb[17].mxu1  ;;  %v9946_v25 = vpop.permute.xlu1 %4216 }
 0x4d6   :  { %v3693_v41 = vpop.f32.mrb[18].mxu1  ;;  %12268 = vst [vmem:[#allocation54_spill] sm:$0xff] %v9946_v25  ;;  %v12269_v40 = vld [vmem:[#allocation25_spill] sm:$0xff] }
 0x4d7   :  { %v9901_v18 = vadd.f32 %v6982_v34, %v9533_v2  ;;  %v6984_v23 = vadd.f32 %v3693_v41, %v2827_v8  ;;  %v3695_v33 = vpop.f32.mrb[19].mxu1  ;;  %v2859_v8 = vadd.f32 %v9850_v1, %v12269_v40 }
 0x4d8   :  { %v12270_v33 = vld [vmem:[#allocation57_spill] sm:$0xff] }
 0x4d9   :  { %v9904_v53 = vadd.f32 %v6984_v23, %v9537_v37  ;;  %3905 = vmatmul.mubr.bf16.gmra.mrb[124].mxu1 %v9833_v6  ;;  %v2840_v6 = vadd.f32 %v9850_v1, %v9219_v42  ;;  %v4525_v23 = vmul.f32 %v9944_v50, %v9861_v39 }
 0x4dc   :  { %v3698_v57 = vpop.f32.mrb[20].mxu1 }
 0x4dd   :  { %v6986_v5 = vadd.f32 %v3698_v57, %v2832_v58  ;;  %v3700_v47 = vpop.f32.mrb[21].mxu1 }
 0x4de   :  { %v3701_v11 = vpop.f32.mrb[22].mxu1  ;;  %v4524_v47 = vmul.f32 %v9931_v12, %v9858_v29 }
 0x4df   :  { %v9912_v2 = vadd.f32 %v6986_v5, %v9525_v3  ;;  %v6988_v31 = vadd.f32 %v3701_v11, %v2835_v36  ;;  %v3703_v52 = vpop.f32.mrb[23].mxu1  ;;  %v4526_v36 = vmul.f32 %v9946_v25, %v9869_v7  ;;  %v12271_v11 = vld [vmem:[#allocation59_spill] sm:$0xff]  ;;  %v12331_v25 = vld [vmem:[#allocation73_spill] sm:$0xff] }
 0x4e0   :  { %v4659_v52 = vmul.f32 %v4525_v23, %v9861_v39 }
 0x4e1   :  { %v9915_v37 = vadd.f32 %v6988_v31, %v9535_v4  ;;  %v12261_v4 = vld [vmem:[#allocation18_spill] sm:$0xff] }
 0x4e2   :  { %v2848_v21 = vadd.f32 %v9850_v1, %v12261_v4  ;;  %12263 = vst [vmem:[#allocation18_spill] sm:$0xff] %v9931_v12  ;;  %v4658_v4 = vmul.f32 %v4524_v47, %v9858_v29 }
 0x4e4   :  { %v3706_v16 = vpop.f32.mrb[24].mxu1 }
 0x4e5   :  { %v6990_v63 = vadd.f32 %v3706_v16, %v2840_v6  ;;  %v3708_v32 = vpop.f32.mrb[25].mxu1  ;;  %v9963_v6 = vpop.permute.xlu1 %4221  ;;  %v12273_v16 = vld [vmem:[#allocation22_spill] sm:$0xff] }
 0x4e6   :  { %v3709_v61 = vpop.f32.mrb[26].mxu1  ;;  %12272 = vst [vmem:[#allocation55_spill] sm:$0xff] %v9963_v6  ;;  %v4588_v32 = vadd.f32 %v4525_v23, %v4524_v47 }
 0x4e7   :  { %v9922_v54 = vadd.f32 %v6990_v63, %v9556_v48  ;;  %v6992_v3 = vadd.f32 %v3709_v61, %v2843_v44  ;;  %v3711_v35 = vpop.f32.mrb[27].mxu1  ;;  %v2864_v63 = vadd.f32 %v9850_v1, %v12273_v16  ;;  %v9967_v44 = vpop.permute.xlu0 %4226 }
 0x4e8   :  { %12274 = vst [vmem:[#allocation23_spill] sm:$0xff] %v9967_v44  ;;  %v4589_v10 = vadd.f32 %v4588_v32, %v4526_v36  ;;  %v12281_v32 = vld [vmem:[#allocation26_spill] sm:$0xff] }
 0x4e9   :  { %v9925_v22 = vadd.f32 %v6992_v3, %v9560_v56  ;;  %v7465_v56 = vld [vmem:[%s11845_s8] sm:$0xff]   ;;  %v12275_v3 = vld [vmem:[#allocation24_spill] sm:$0xff] }
 0x4ea   :  { %6805 = vmatprep.subr.bf16.mxu0 %v7465_v56  ;;  %v2867_v35 = vadd.f32 %v9850_v1, %v12275_v3 }
 0x4eb   :  { %6806 = vmatpush3.bf16.msra.mxu0 %v7465_v56 }
 0x4ec   :  { %v3714_v26 = vpop.f32.mrb[28].mxu1  ;;  %6807 = vmatprep.subr.bf16.mxu0 %v7466_v28 }
 0x4ed   :  { %v6994_v42 = vadd.f32 %v3714_v26, %v2848_v21  ;;  %v3716_v45 = vpop.f32.mrb[29].mxu1  ;;  %v4660_v21 = vmul.f32 %v4526_v36, %v9869_v7  ;;  %v4527_v26 = vmul.f32 %v9963_v6, %v9872_v59 }
 0x4ee   :  { %v3717_v24 = vpop.f32.mrb[30].mxu1 }
 0x4ef   :  { %v9934_v48 = vadd.f32 %v6994_v42, %v12264_v60  ;;  %v6996_v46 = vadd.f32 %v3717_v24, %v2851_v62  ;;  %v3719_v30 = vpop.f32.mrb[31].mxu1  ;;  %v4722_v24 = vadd.f32 %v4659_v52, %v4658_v4  ;;  %v4528_v60 = vmul.f32 %v9967_v44, %v9880_v55  ;;  %6808 = vmatpush3.bf16.msra.mxu0 %v7466_v28 }
 0x4f1   :  { %v9940_v27 = vadd.f32 %v6996_v46, %v12265_v17  ;;  %v12276_v46 = vld [vmem:[#allocation56_spill] sm:$0xff]  ;;  %v4662_v23 = vmul.f32 %v4528_v60, %v9880_v55 }
 0x4f4   :  { %v3722_v9 = vpop.f32.mrb[32].mxu1 }
 0x4f5   :  { %v6998_v19 = vadd.f32 %v3722_v9, %v2856_v38  ;;  %v3724_v34 = vpop.f32.mrb[33].mxu1  ;;  %v4723_v38 = vadd.f32 %v4722_v24, %v4660_v21  ;;  %v4661_v9 = vmul.f32 %v4527_v26, %v9872_v59 }
 0x4f6   :  { %v3725_v41 = vpop.f32.mrb[34].mxu1  ;;  %v12278_v34 = vld [vmem:[#allocation58_spill] sm:$0xff] }
 0x4f7   :  { %v9953_v58 = vadd.f32 %v6998_v19, %v12270_v33  ;;  %v7000_v57 = vadd.f32 %v3725_v41, %v2859_v8  ;;  %v3727_v5 = vpop.f32.mrb[35].mxu1  ;;  %v9984_v19 = vpop.permute.xlu1 %4231  ;;  %v4590_v8 = vadd.f32 %v4589_v10, %v4527_v26  ;;  %v12283_v26 = vld [vmem:[#allocation61_spill] sm:$0xff] }
 0x4f8   :  { %12277 = vst [vmem:[#allocation25_spill] sm:$0xff] %v9984_v19  ;;  %v9989_v41 = vpop.permute.xlu0 %4236  ;;  %v4529_v33 = vmul.f32 %v9984_v19, %v9883_v43  ;;  %v12320_v19 = vld [vmem:[#allocation9_spill] sm:$0xff] }
 0x4f9   :  { %v9960_v31 = vadd.f32 %v7000_v57, %v12271_v11  ;;  %12279 = vst [vmem:[#allocation57_spill] sm:$0xff] %v9989_v41  ;;  %v12280_v57 = vld [vmem:[#allocation27_spill] sm:$0xff]  ;;  %v4591_v47 = vadd.f32 %v4590_v8, %v4528_v60  ;;  %v4724_v11 = vadd.f32 %v4723_v38, %v4661_v9  ;;  %v4530_v52 = vmul.f32 %v9989_v41, %v9891_v49 }
 0x4fa   :  { %v2872_v5 = vadd.f32 %v9850_v1, %v12280_v57  ;;  %v4663_v21 = vmul.f32 %v4529_v33, %v9883_v43 }
 0x4fb   :  { %v10000_v4 = vpop.permute.xlu1 %4241  ;;  %v4592_v24 = vadd.f32 %v4591_v47, %v4529_v33  ;;  %v4664_v60 = vmul.f32 %v4530_v52, %v9891_v49 }
 0x4fc   :  { %v3730_v61 = vpop.f32.mrb[36].mxu1  ;;  %12282 = vst [vmem:[#allocation59_spill] sm:$0xff] %v10000_v4 }
 0x4fd   :  { %v7002_v42 = vadd.f32 %v3730_v61, %v2864_v63  ;;  %v3732_v45 = vpop.f32.mrb[37].mxu1  ;;  %v2875_v61 = vadd.f32 %v9850_v1, %v12281_v32  ;;  %v4593_v28 = vadd.f32 %v4592_v24, %v4530_v52 }
 0x4fe   :  { %v3733_v62 = vpop.f32.mrb[38].mxu1 }
 0x4ff   :  { %v9978_v30 = vadd.f32 %v7002_v42, %v12276_v46  ;;  %v7004_v56 = vadd.f32 %v3733_v62, %v2867_v35  ;;  %v3735_v17 = vpop.f32.mrb[39].mxu1  ;;  %v4725_v35 = vadd.f32 %v4724_v11, %v4662_v23  ;;  %v10006_v62 = vpop.permute.xlu0 %4246  ;;  %v4531_v46 = vmul.f32 %v10000_v4, %v9894_v13  ;;  %v12289_v11 = vld [vmem:[#allocation4_spill] sm:$0xff] }
 0x500   :  { %12285 = vst [vmem:[#allocation24_spill] sm:$0xff] %v10006_v62  ;;  %v4532_v9 = vmul.f32 %v10006_v62, %v9901_v18  ;;  %v10018_v57 = vpop.permute.xlu1 %4251 }
 0x501   :  { %v9987_v40 = vadd.f32 %v7004_v56, %v12278_v34  ;;  %v12286_v56 = vld [vmem:[#allocation63_spill] sm:$0xff]  ;;  %v4726_v38 = vadd.f32 %v4725_v35, %v4663_v21  ;;  %12288 = vst [vmem:[#allocation56_spill] sm:$0xff] %v10018_v57  ;;  %v4594_v52 = vadd.f32 %v4593_v28, %v4531_v46  ;;  %v12291_v35 = vld [vmem:[#allocation60_spill] sm:$0xff] }
 0x502   :  { %v12287_v34 = vld [vmem:[#allocation3_spill] sm:$0xff] }
 0x503   :  { %v2880_v8 = vadd.f32 %v9850_v1, %v12287_v34  ;;  %v4727_v33 = vadd.f32 %v4726_v38, %v4664_v60  ;;  %v4595_v24 = vadd.f32 %v4594_v52, %v4532_v9 }
 0x504   :  { %v3738_v36 = vpop.f32.mrb[40].mxu1  ;;  %v10039_v38 = vpop.permute.xlu1 %4261 }
 0x505   :  { %v7006_v16 = vadd.f32 %v3738_v36, %v2872_v5  ;;  %v3740_v63 = vpop.f32.mrb[41].mxu1  ;;  %v4665_v5 = vmul.f32 %v4531_v46, %v9894_v13  ;;  %12295 = vst [vmem:[#allocation61_spill] sm:$0xff] %v10039_v38 }
 0x506   :  { %v3741_v3 = vpop.f32.mrb[42].mxu1  ;;  %v10023_v63 = vpop.permute.xlu0 %4256 }
 0x507   :  { %v10004_v42 = vadd.f32 %v7006_v16, %v12283_v26  ;;  %v7008_v45 = vadd.f32 %v3741_v3, %v2875_v61  ;;  %v3743_v10 = vpop.f32.mrb[43].mxu1  ;;  %v2883_v16 = vadd.f32 %v9850_v1, %v12289_v11  ;;  %12290 = vst [vmem:[#allocation58_spill] sm:$0xff] %v10023_v63  ;;  %v4666_v61 = vmul.f32 %v4532_v9, %v9901_v18 }
 0x508   :  { %v4533_v3 = vmul.f32 %v10018_v57, %v9904_v53  ;;  %v7467_v10 = vld [vmem:[%s11845_s8 + $0x10] sm:$0xff]   ;;  %v4728_v60 = vadd.f32 %v4727_v33, %v4665_v5  ;;  %v4534_v46 = vmul.f32 %v10023_v63, %v9912_v2  ;;  %v4535_v11 = vmul.f32 %v10039_v38, %v9915_v37  ;;  %v12308_v38 = vld [vmem:[#allocation64_spill] sm:$0xff] }
 0x509   :  { %12284 = vst [vmem:[#allocation22_spill] sm:$0xff] %v10004_v42  ;;  %v10012_v17 = vadd.f32 %v7008_v45, %v12286_v56  ;;  %v12293_v56 = vld [vmem:[#allocation62_spill] sm:$0xff]  ;;  %6809 = vmatprep.subr.bf16.mxu0 %v7467_v10 }
 0x50a   :  { %6810 = vmatpush3.bf16.msra.mxu0 %v7467_v10  ;;  %v4729_v34 = vadd.f32 %v4728_v60, %v4666_v61  ;;  %v4596_v9 = vadd.f32 %v4595_v24, %v4533_v3  ;;  %v4668_v5 = vmul.f32 %v4534_v46, %v9912_v2  ;;  %v12299_v60 = vld [vmem:[#allocation65_spill] sm:$0xff] }
 0x50c   :  { %v3746_v23 = vpop.f32.mrb[44].mxu1  ;;  %v4597_v61 = vadd.f32 %v4596_v9, %v4534_v46  ;;  %v12305_v9 = vld [vmem:[#allocation5_spill] sm:$0xff] }
 0x50d   :  { %v7010_v47 = vadd.f32 %v3746_v23, %v2880_v8  ;;  %v3748_v36 = vpop.f32.mrb[45].mxu1  ;;  %v4667_v8 = vmul.f32 %v4533_v3, %v9904_v53  ;;  %v12296_v23 = vld [vmem:[#allocation6_spill] sm:$0xff] }
 0x50e   :  { %v3749_v32 = vpop.f32.mrb[46].mxu1  ;;  %v10044_v36 = vpop.permute.xlu0 %4266  ;;  %v4598_v46 = vadd.f32 %v4597_v61, %v4535_v11 }
 0x50f   :  { %v10029_v21 = vadd.f32 %v7010_v47, %v12291_v35  ;;  %v7012_v26 = vadd.f32 %v3749_v32, %v2883_v16  ;;  %v3751_v45 = vpop.f32.mrb[47].mxu1  ;;  %v2888_v47 = vadd.f32 %v9850_v1, %v12296_v23  ;;  %12297 = vst [vmem:[#allocation63_spill] sm:$0xff] %v10044_v36  ;;  %v12298_v32 = vld [vmem:[#allocation8_spill] sm:$0xff]  ;;  %v4536_v10 = vmul.f32 %v10044_v36, %v9922_v54  ;;  %v10056_v23 = vpop.permute.xlu1 %4271 }
 0x510   :  { %v2891_v35 = vadd.f32 %v9850_v1, %v12298_v32  ;;  %v4730_v45 = vadd.f32 %v4729_v34, %v4667_v8  ;;  %12301 = vst [vmem:[#allocation4_spill] sm:$0xff] %v10056_v23  ;;  %v4537_v8 = vmul.f32 %v10056_v23, %v9925_v22 }
 0x511   :  { %12292 = vst [vmem:[#allocation27_spill] sm:$0xff] %v10029_v21  ;;  %v10037_v28 = vadd.f32 %v7012_v26, %v12293_v56  ;;  %v4670_v34 = vmul.f32 %v4536_v10, %v9922_v54 }
 0x512   :  { %v4731_v57 = vadd.f32 %v4730_v45, %v4668_v5  ;;  %v10062_v32 = vpop.permute.xlu0 %4276  ;;  %v4671_v23 = vmul.f32 %v4537_v8, %v9925_v22 }
 0x513   :  { %12294 = vst [vmem:[#allocation26_spill] sm:$0xff] %v10037_v28  ;;  %12304 = vst [vmem:[#allocation62_spill] sm:$0xff] %v10062_v32  ;;  %v4538_v5 = vmul.f32 %v10062_v32, %v9934_v48  ;;  %v10073_v61 = vpop.permute.xlu1 %4281 }
 0x514   :  { %v3754_v33 = vpop.f32.mrb[48].mxu1  ;;  %12307 = vst [vmem:[#allocation6_spill] sm:$0xff] %v10073_v61 }
 0x515   :  { %v7014_v16 = vadd.f32 %v3754_v33, %v2888_v47  ;;  %v3756_v52 = vpop.f32.mrb[49].mxu1  ;;  %v4669_v47 = vmul.f32 %v4535_v11, %v9915_v37  ;;  %v12302_v33 = vld [vmem:[#allocation67_spill] sm:$0xff] }
 0x516   :  { %v3757_v26 = vpop.f32.mrb[50].mxu1 }
 0x517   :  { %v10054_v56 = vadd.f32 %v7014_v16, %v12299_v60  ;;  %v7016_v3 = vadd.f32 %v3757_v26, %v2891_v35  ;;  %v3759_v24 = vpop.f32.mrb[51].mxu1  ;;  %v2896_v16 = vadd.f32 %v9850_v1, %v12305_v9  ;;  %v4599_v35 = vadd.f32 %v4598_v46, %v4536_v10 }
 0x518   :  { %v4732_v60 = vadd.f32 %v4731_v57, %v4669_v47  ;;  %v12306_v24 = vld [vmem:[#allocation7_spill] sm:$0xff]  ;;  %v7468_v57 = vld [vmem:[%s11845_s8 + $0x18] sm:$0xff]   ;;  %v10082_v47 = vpop.permute.xlu0 %4286 }
 0x519   :  { %12300 = vst [vmem:[#allocation3_spill] sm:$0xff] %v10054_v56  ;;  %v10060_v52 = vadd.f32 %v7016_v3, %v12302_v33  ;;  %v2899_v33 = vadd.f32 %v9850_v1, %v12306_v24  ;;  %12310 = vst [vmem:[#allocation65_spill] sm:$0xff] %v10082_v47  ;;  %v4600_v9 = vadd.f32 %v4599_v35, %v4537_v8  ;;  %6811 = vmatprep.subr.bf16.mxu0 %v7468_v57  ;;  %v12312_v24 = vld [vmem:[#allocation11_spill] sm:$0xff]  ;;  %v10094_v8 = vpop.permute.xlu1 %4291 }
 0x51a   :  { %v4733_v36 = vadd.f32 %v4732_v60, %v4670_v34  ;;  %v12311_v34 = vld [vmem:[#allocation66_spill] sm:$0xff]  ;;  %6812 = vmatpush3.bf16.msra.mxu0 %v7468_v57  ;;  %12313 = vst [vmem:[#allocation67_spill] sm:$0xff] %v10094_v8 }
 0x51b   :  { %12303 = vst [vmem:[#allocation60_spill] sm:$0xff] %v10060_v52 }
 0x51c   :  { %v3762_v26 = vpop.f32.mrb[52].mxu1 }
 0x51d   :  { %v7018_v45 = vadd.f32 %v3762_v26, %v2896_v16  ;;  %v3764_v3 = vpop.f32.mrb[53].mxu1  ;;  %v4672_v16 = vmul.f32 %v4538_v5, %v9934_v48  ;;  %v4539_v26 = vmul.f32 %v10073_v61, %v9940_v27 }
 0x51e   :  { %v3765_v11 = vpop.f32.mrb[54].mxu1  ;;  %v4540_v3 = vmul.f32 %v10082_v47, %v9953_v58 }
 0x51f   :  { %v10077_v63 = vadd.f32 %v7018_v45, %v12308_v38  ;;  %v7020_v10 = vadd.f32 %v3765_v11, %v2899_v33  ;;  %v3767_v46 = vpop.f32.mrb[55].mxu1  ;;  %v4601_v38 = vadd.f32 %v4600_v9, %v4538_v5  ;;  %v4734_v45 = vadd.f32 %v4733_v36, %v4671_v23  ;;  %v10099_v5 = vpop.permute.xlu0 %4296 }
 0x520   :  { %v2904_v33 = vadd.f32 %v9850_v1, %v12312_v24  ;;  %v4673_v46 = vmul.f32 %v4539_v26, %v9940_v27  ;;  %12315 = vst [vmem:[#allocation5_spill] sm:$0xff] %v10099_v5  ;;  %v4674_v57 = vmul.f32 %v4540_v3, %v9953_v58  ;;  %v4541_v9 = vmul.f32 %v10094_v8, %v9960_v31  ;;  %v12316_v24 = vld [vmem:[#allocation69_spill] sm:$0xff] }
 0x521   :  { %12309 = vst [vmem:[#allocation8_spill] sm:$0xff] %v10077_v63  ;;  %v10088_v60 = vadd.f32 %v7020_v10, %v12311_v34  ;;  %v4735_v35 = vadd.f32 %v4734_v45, %v4672_v16  ;;  %v12314_v10 = vld [vmem:[#allocation13_spill] sm:$0xff]  ;;  %v4602_v36 = vadd.f32 %v4601_v38, %v4539_v26  ;;  %v10112_v26 = vpop.permute.xlu1 %4301  ;;  %v2912_v8 = vadd.f32 %v9850_v1, %v12320_v19  ;;  %v7469_v19 = vld [vmem:[%s11845_s8 + $0x20] sm:$0xff]  }
 0x522   :  { %v2907_v34 = vadd.f32 %v9850_v1, %v12314_v10  ;;  %12319 = vst [vmem:[#allocation64_spill] sm:$0xff] %v10112_v26  ;;  %v4675_v4 = vmul.f32 %v4541_v9, %v9960_v31  ;;  %6813 = vmatprep.subr.bf16.mxu0 %v7469_v19 }
 0x523   :  { %v4603_v62 = vadd.f32 %v4602_v36, %v4540_v3  ;;  %6814 = vmatpush3.bf16.msra.mxu0 %v7469_v19 }
 0x524   :  { %v3770_v11 = vpop.f32.mrb[56].mxu1 }
 0x525   :  { %v7022_v61 = vadd.f32 %v3770_v11, %v2904_v33  ;;  %v3772_v32 = vpop.f32.mrb[57].mxu1  ;;  %v4736_v33 = vadd.f32 %v4735_v35, %v4673_v46  ;;  %v12318_v11 = vld [vmem:[#allocation71_spill] sm:$0xff]  ;;  %v4543_v35 = vmul.f32 %v10112_v26, %v9987_v40  ;;  %v12323_v26 = vld [vmem:[#allocation68_spill] sm:$0xff] }
 0x526   :  { %v3773_v23 = vpop.f32.mrb[58].mxu1  ;;  %v4542_v32 = vmul.f32 %v10099_v5, %v9978_v30 }
 0x527   :  { %v10105_v47 = vadd.f32 %v7022_v61, %v12316_v24  ;;  %v7024_v16 = vadd.f32 %v3773_v23, %v2907_v34  ;;  %v3775_v45 = vpop.f32.mrb[59].mxu1  ;;  %v4737_v38 = vadd.f32 %v4736_v33, %v4674_v57  ;;  %v10117_v61 = vpop.permute.xlu0 %4306  ;;  %v4604_v34 = vadd.f32 %v4603_v62, %v4541_v9  ;;  %v12322_v24 = vld [vmem:[#allocation12_spill] sm:$0xff] }
 0x528   :  { %12321 = vst [vmem:[#allocation66_spill] sm:$0xff] %v10117_v61  ;;  %v4676_v3 = vmul.f32 %v4542_v32, %v9978_v30  ;;  %v10124_v57 = vpop.f32.mrb[252].mxu0 }
 0x529   :  { %12317 = vst [vmem:[#allocation7_spill] sm:$0xff] %v10105_v47  ;;  %v10110_v10 = vadd.f32 %v7024_v16, %v12318_v11  ;;  %v2915_v16 = vadd.f32 %v9850_v1, %v12322_v24  ;;  %v4605_v45 = vadd.f32 %v4604_v34, %v4542_v32  ;;  %v10129_v62 = vpop.f32.mrb[253].mxu0  ;;  %v4738_v9 = vadd.f32 %v4737_v38, %v4675_v4  ;;  %v12325_v34 = vld [vmem:[#allocation70_spill] sm:$0xff]  ;;  %v10144_v4 = vpop.permute.xlu1 %4311 }
 0x52a   :  { %v4544_v11 = vmul.f32 %v10117_v61, %v10004_v42  ;;  %v10136_v24 = vpop.f32.mrb[254].mxu0  ;;  %v4677_v32 = vmul.f32 %v4543_v35, %v9987_v40  ;;  %12327 = vst [vmem:[#allocation69_spill] sm:$0xff] %v10144_v4  ;;  %v12328_v61 = vld [vmem:[#allocation15_spill] sm:$0xff] }
 0x52b   :  { %v10138_v5 = vpop.f32.mrb[255].mxu0  ;;  %v4739_v41 = vadd.f32 %v4738_v9, %v4676_v3  ;;  %v4606_v38 = vadd.f32 %v4605_v45, %v4543_v35  ;;  %v10151_v19 = vpop.permute.xlu0 %4316  ;;  %v12330_v9 = vld [vmem:[#allocation17_spill] sm:$0xff] }
 0x52c   :  { %v3778_v23 = vpop.f32.mrb[60].mxu1  ;;  %12329 = vst [vmem:[#allocation71_spill] sm:$0xff] %v10151_v19 }
 0x52d   :  { %v7026_v46 = vadd.f32 %v3778_v23, %v2912_v8  ;;  %v3780_v36 = vpop.f32.mrb[61].mxu1 }
 0x52e   :  { %v3781_v33 = vpop.f32.mrb[62].mxu1 }
 0x52f   :  { %v10134_v8 = vadd.f32 %v7026_v46, %v12323_v26  ;;  %v7028_v23 = vadd.f32 %v3781_v33, %v2915_v16  ;;  %v3783_v36 = vpop.f32.mrb[63].mxu1  ;;  %v2920_v26 = vadd.f32 %v9850_v1, %v12328_v61  ;;  %v4678_v46 = vmul.f32 %v4544_v11, %v10004_v42 }
 0x530   :  { %v4545_v16 = vmul.f32 %v10144_v4, %v10012_v17  ;;  %v4607_v33 = vadd.f32 %v4606_v38, %v4544_v11  ;;  %v2923_v36 = vadd.f32 %v9850_v1, %v12330_v9  ;;  %v10161_v11 = vpop.permute.xlu1 %4321 }
 0x531   :  { %12324 = vst [vmem:[#allocation11_spill] sm:$0xff] %v10134_v8  ;;  %v10142_v44 = vadd.f32 %v7028_v23, %v12325_v34  ;;  %v4740_v23 = vadd.f32 %v4739_v41, %v4677_v32  ;;  %v4546_v34 = vmul.f32 %v10151_v19, %v10029_v21  ;;  %12333 = vst [vmem:[#allocation12_spill] sm:$0xff] %v10161_v11  ;;  %v12334_v32 = vld [vmem:[#allocation75_spill] sm:$0xff] }
 0x532   :  { %v4679_v50 = vmul.f32 %v4545_v16, %v10012_v17  ;;  %v4608_v38 = vadd.f32 %v4607_v33, %v4545_v16  ;;  %v4547_v41 = vmul.f32 %v10161_v11, %v10037_v28  ;;  %v12338_v16 = vld [vmem:[#allocation16_spill] sm:$0xff] }
 0x533   :  { %12326 = vst [vmem:[#allocation13_spill] sm:$0xff] %v10142_v44  ;;  %v4741_v61 = vadd.f32 %v4740_v23, %v4678_v46  ;;  %v4680_v9 = vmul.f32 %v4546_v34, %v10029_v21  ;;  %v12337_v23 = vld [vmem:[#allocation14_spill] sm:$0xff]  ;;  %v2931_v33 = vadd.f32 %v9850_v1, %v12338_v16 }
 0x534   :  { %v3786_v3 = vpop.f32.mrb[64].mxu1  ;;  %v4609_v46 = vadd.f32 %v4608_v38, %v4546_v34 }
 0x535   :  { %v7030_v35 = vadd.f32 %v3786_v3, %v2920_v26  ;;  %v3788_v45 = vpop.f32.mrb[65].mxu1  ;;  %v10169_v3 = vpop.permute.xlu0 %4326 }
 0x536   :  { %v3789_v6 = vpop.f32.mrb[66].mxu1  ;;  %12336 = vst [vmem:[#allocation70_spill] sm:$0xff] %v10169_v3  ;;  %v4681_v45 = vmul.f32 %v4547_v41, %v10037_v28  ;;  %v4610_v19 = vadd.f32 %v4609_v46, %v4547_v41  ;;  %v12344_v46 = vld [vmem:[#allocation19_spill] sm:$0xff] }
 0x537   :  { %v10159_v12 = vadd.f32 %v7030_v35, %v12331_v25  ;;  %v7032_v4 = vadd.f32 %v3789_v6, %v2923_v36  ;;  %v3791_v42 = vpop.f32.mrb[67].mxu1  ;;  %v2928_v25 = vadd.f32 %v9850_v1, %v12337_v23  ;;  %v4742_v35 = vadd.f32 %v4741_v61, %v4679_v50  ;;  %v12340_v61 = vld [vmem:[#allocation72_spill] sm:$0xff]  ;;  %v12350_v28 = vld [vmem:[#allocation79_spill] sm:$0xff] }
 0x538   :  { %v4548_v6 = vmul.f32 %v10169_v3, %v10054_v56 }
 0x539   :  { %12332 = vst [vmem:[#allocation9_spill] sm:$0xff] %v10159_v12  ;;  %v10167_v26 = vadd.f32 %v7032_v4, %v12334_v32  ;;  %v4743_v36 = vadd.f32 %v4742_v35, %v4680_v9  ;;  %v10178_v32 = vpop.permute.xlu1 %4331  ;;  %v10186_v16 = vpop.permute.xlu0 %4336 }
 0x53a   :  { %12339 = vst [vmem:[#allocation15_spill] sm:$0xff] %v10178_v32  ;;  %v4682_v38 = vmul.f32 %v4548_v6, %v10054_v56  ;;  %v4549_v50 = vmul.f32 %v10178_v32, %v10060_v52  ;;  %12342 = vst [vmem:[#allocation73_spill] sm:$0xff] %v10186_v16  ;;  %v4611_v9 = vadd.f32 %v4610_v19, %v4548_v6 }
 0x53b   :  { %12335 = vst [vmem:[#allocation68_spill] sm:$0xff] %v10167_v26  ;;  %v4744_v35 = vadd.f32 %v4743_v36, %v4681_v45 }
 0x53c   :  { %v3794_v42 = vpop.f32.mrb[68].mxu1  ;;  %v4683_v32 = vmul.f32 %v4549_v50, %v10060_v52 }
 0x53d   :  { %v7034_v11 = vadd.f32 %v3794_v42, %v2928_v25  ;;  %v3796_v4 = vpop.f32.mrb[69].mxu1  ;;  %v4550_v25 = vmul.f32 %v10186_v16, %v10077_v63  ;;  %v12343_v42 = vld [vmem:[#allocation74_spill] sm:$0xff]  ;;  %v4745_v56 = vadd.f32 %v4744_v35, %v4682_v38 }
 0x53e   :  { %v3797_v34 = vpop.f32.mrb[70].mxu1  ;;  %v2936_v4 = vadd.f32 %v9850_v1, %v12344_v46 }
 0x53f   :  { %v10184_v23 = vadd.f32 %v7034_v11, %v12340_v61  ;;  %v7036_v3 = vadd.f32 %v3797_v34, %v2931_v33  ;;  %v3799_v21 = vpop.f32.mrb[71].mxu1  ;;  %v10196_v11 = vpop.permute.xlu1 %4341  ;;  %v4612_v33 = vadd.f32 %v4611_v9, %v4549_v50  ;;  %v12346_v34 = vld [vmem:[#allocation21_spill] sm:$0xff]  ;;  %v4684_v6 = vmul.f32 %v4550_v25, %v10077_v63 }
 0x540   :  { %12345 = vst [vmem:[#allocation75_spill] sm:$0xff] %v10196_v11  ;;  %v2939_v19 = vadd.f32 %v9850_v1, %v12346_v34  ;;  %v4551_v36 = vmul.f32 %v10196_v11, %v10088_v60  ;;  %v10203_v61 = vpop.permute.xlu0 %4346  ;;  %v4746_v35 = vadd.f32 %v4745_v56, %v4683_v32  ;;  %v12348_v50 = vld [vmem:[#allocation77_spill] sm:$0xff] }
 0x541   :  { %12341 = vst [vmem:[#allocation17_spill] sm:$0xff] %v10184_v23  ;;  %v10191_v41 = vadd.f32 %v7036_v3, %v12343_v42  ;;  %12347 = vst [vmem:[#allocation14_spill] sm:$0xff] %v10203_v61  ;;  %v4613_v42 = vadd.f32 %v4612_v33, %v4550_v25  ;;  %v4552_v46 = vmul.f32 %v10203_v61, %v10105_v47  ;;  %v12352_v25 = vld [vmem:[#allocation30_spill] sm:$0xff] }
 0x542   :  { %v4747_v52 = vadd.f32 %v4746_v35, %v4684_v6  ;;  %v4685_v63 = vmul.f32 %v4551_v36, %v10088_v60  ;;  %v2944_v56 = vadd.f32 %v9850_v1, %v12352_v25  ;;  %v12355_v25 = vld [vmem:[#allocation76_spill] sm:$0xff] }
 0x543   :  { %v4686_v32 = vmul.f32 %v4552_v46, %v10105_v47 }
 0x544   :  { %v3802_v21 = vpop.f32.mrb[72].mxu1 }
 0x545   :  { %v7038_v3 = vadd.f32 %v3802_v21, %v2936_v4  ;;  %v3804_v45 = vpop.f32.mrb[73].mxu1  ;;  %v10214_v4 = vpop.permute.xlu1 %4351  ;;  %v4614_v21 = vadd.f32 %v4613_v42, %v4551_v36 }
 0x546   :  { %v3805_v38 = vpop.f32.mrb[74].mxu1  ;;  %12351 = vst [vmem:[#allocation72_spill] sm:$0xff] %v10214_v4  ;;  %v4553_v33 = vmul.f32 %v10214_v4, %v10110_v10  ;;  %v12354_v45 = vld [vmem:[#allocation29_spill] sm:$0xff] }
 0x547   :  { %v10208_v9 = vadd.f32 %v7038_v3, %v12348_v50  ;;  %v7040_v16 = vadd.f32 %v3805_v38, %v2939_v19  ;;  %v3807_v34 = vpop.f32.mrb[75].mxu1  ;;  %v10221_v3 = vpop.permute.xlu0 %4356  ;;  %v4615_v19 = vadd.f32 %v4614_v21, %v4552_v46  ;;  %v2947_v38 = vadd.f32 %v9850_v1, %v12354_v45 }
 0x548   :  { %12353 = vst [vmem:[#allocation74_spill] sm:$0xff] %v10221_v3  ;;  %v4687_v34 = vmul.f32 %v4553_v33, %v10110_v10 }
 0x549   :  { %12349 = vst [vmem:[#allocation16_spill] sm:$0xff] %v10208_v9  ;;  %v10212_v11 = vadd.f32 %v7040_v16, %v12350_v28  ;;  %v4748_v28 = vadd.f32 %v4747_v52, %v4685_v63  ;;  %v4554_v16 = vmul.f32 %v10221_v3, %v10134_v8  ;;  %v10231_v46 = vpop.permute.xlu1 %4361  ;;  %v4616_v21 = vadd.f32 %v4615_v19, %v4553_v33  ;;  %v12358_v52 = vld [vmem:[#allocation78_spill] sm:$0xff]  ;;  %v12361_v33 = vld [vmem:[#allocation31_spill] sm:$0xff] }
 0x54a   :  { %12357 = vst [vmem:[#allocation21_spill] sm:$0xff] %v10231_v46  ;;  %v4555_v63 = vmul.f32 %v10231_v46, %v10142_v44  ;;  %v2955_v19 = vadd.f32 %v9850_v1, %v12361_v33 }
 0x54b   :  { %v4749_v50 = vadd.f32 %v4748_v28, %v4686_v32  ;;  %v4688_v45 = vmul.f32 %v4554_v16, %v10134_v8  ;;  %v4617_v32 = vadd.f32 %v4616_v21, %v4554_v16  ;;  %v12360_v28 = vld [vmem:[#allocation10_spill] sm:$0xff] }
 0x54c   :  { %v3810_v6 = vpop.f32.mrb[76].mxu1 }
 0x54d   :  { %v7042_v36 = vadd.f32 %v3810_v6, %v2944_v56  ;;  %v3812_v42 = vpop.f32.mrb[77].mxu1  ;;  %v10239_v6 = vpop.permute.xlu0 %4366  ;;  %v4618_v3 = vadd.f32 %v4617_v32, %v4555_v63  ;;  %v12367_v32 = vld [vmem:[#allocation32_spill] sm:$0xff] }
 0x54e   :  { %v3813_v35 = vpop.f32.mrb[78].mxu1  ;;  %12359 = vst [vmem:[#allocation77_spill] sm:$0xff] %v10239_v6  ;;  %v4750_v42 = vadd.f32 %v4749_v50, %v4687_v34  ;;  %v12363_v34 = vld [vmem:[#allocation81_spill] sm:$0xff] }
 0x54f   :  { %v10229_v61 = vadd.f32 %v7042_v36, %v12355_v25  ;;  %v7044_v4 = vadd.f32 %v3813_v35, %v2947_v38  ;;  %v3815_v47 = vpop.f32.mrb[79].mxu1  ;;  %v2952_v36 = vadd.f32 %v9850_v1, %v12360_v28  ;;  %v4689_v25 = vmul.f32 %v4555_v63, %v10142_v44  ;;  %v12373_v44 = vld [vmem:[#allocation82_spill] sm:$0xff] }
 0x550   :  { %v4556_v47 = vmul.f32 %v10239_v6, %v10159_v12  ;;  %v4751_v35 = vadd.f32 %v4750_v42, %v4688_v45 }
 0x551   :  { %12356 = vst [vmem:[#allocation19_spill] sm:$0xff] %v10229_v61  ;;  %v10237_v56 = vadd.f32 %v7044_v4, %v12358_v52  ;;  %v10248_v52 = vpop.permute.xlu1 %4371  ;;  %v10256_v33 = vpop.permute.xlu0 %4376 }
 0x552   :  { %12362 = vst [vmem:[#allocation79_spill] sm:$0xff] %v10248_v52  ;;  %v4690_v21 = vmul.f32 %v4556_v47, %v10159_v12  ;;  %v4557_v50 = vmul.f32 %v10248_v52, %v10167_v26  ;;  %12365 = vst [vmem:[#allocation29_spill] sm:$0xff] %v10256_v33  ;;  %v4619_v45 = vadd.f32 %v4618_v3, %v4556_v47 }
 0x553   :  { %v4752_v42 = vadd.f32 %v4751_v35, %v4689_v25 }
 0x554   :  { %v3818_v38 = vpop.f32.mrb[80].mxu1  ;;  %v4691_v52 = vmul.f32 %v4557_v50, %v10167_v26 }
 0x555   :  { %v7046_v46 = vadd.f32 %v3818_v38, %v2952_v36  ;;  %v3820_v4 = vpop.f32.mrb[81].mxu1  ;;  %v4558_v36 = vmul.f32 %v10256_v33, %v10184_v23  ;;  %v12366_v38 = vld [vmem:[#allocation83_spill] sm:$0xff]  ;;  %v4753_v12 = vadd.f32 %v4752_v42, %v4690_v21 }
 0x556   :  { %v3821_v16 = vpop.f32.mrb[82].mxu1  ;;  %v2960_v4 = vadd.f32 %v9850_v1, %v12367_v32 }
 0x557   :  { %v10254_v28 = vadd.f32 %v7046_v46, %v12363_v34  ;;  %v7048_v6 = vadd.f32 %v3821_v16, %v2955_v19  ;;  %v3823_v8 = vpop.f32.mrb[83].mxu1  ;;  %v10266_v46 = vpop.permute.xlu1 %4381  ;;  %v4620_v19 = vadd.f32 %v4619_v45, %v4557_v50  ;;  %v12369_v16 = vld [vmem:[#allocation33_spill] sm:$0xff]  ;;  %v4692_v47 = vmul.f32 %v4558_v36, %v10184_v23  ;;  %v12371_v50 = vld [vmem:[#allocation80_spill] sm:$0xff] }
 0x558   :  { %12368 = vst [vmem:[#allocation76_spill] sm:$0xff] %v10266_v46  ;;  %v2963_v3 = vadd.f32 %v9850_v1, %v12369_v16  ;;  %v4559_v35 = vmul.f32 %v10266_v46, %v10191_v41  ;;  %v10273_v34 = vpop.permute.xlu0 %4386  ;;  %v4754_v42 = vadd.f32 %v4753_v12, %v4691_v52 }
 0x559   :  { %12364 = vst [vmem:[#allocation30_spill] sm:$0xff] %v10254_v28  ;;  %v10261_v63 = vadd.f32 %v7048_v6, %v12366_v38  ;;  %12370 = vst [vmem:[#allocation78_spill] sm:$0xff] %v10273_v34  ;;  %v4621_v38 = vadd.f32 %v4620_v19, %v4558_v36  ;;  %v4560_v32 = vmul.f32 %v10273_v34, %v10208_v9  ;;  %v12375_v36 = vld [vmem:[#allocation34_spill] sm:$0xff] }
 0x55a   :  { %v4755_v26 = vadd.f32 %v4754_v42, %v4692_v47  ;;  %v4693_v23 = vmul.f32 %v4559_v35, %v10191_v41  ;;  %v2968_v12 = vadd.f32 %v9850_v1, %v12375_v36  ;;  %v12378_v36 = vld [vmem:[#allocation85_spill] sm:$0xff] }
 0x55b   :  { %v4694_v52 = vmul.f32 %v4560_v32, %v10208_v9 }
 0x55c   :  { %v3826_v8 = vpop.f32.mrb[84].mxu1 }
 0x55d   :  { %v7050_v6 = vadd.f32 %v3826_v8, %v2960_v4  ;;  %v3828_v25 = vpop.f32.mrb[85].mxu1  ;;  %v10284_v4 = vpop.permute.xlu1 %4391  ;;  %v4622_v8 = vadd.f32 %v4621_v38, %v4559_v35 }
 0x55e   :  { %v3829_v21 = vpop.f32.mrb[86].mxu1  ;;  %12374 = vst [vmem:[#allocation31_spill] sm:$0xff] %v10284_v4  ;;  %v4561_v19 = vmul.f32 %v10284_v4, %v10212_v11  ;;  %v12377_v25 = vld [vmem:[#allocation35_spill] sm:$0xff] }
 0x55f   :  { %v10278_v45 = vadd.f32 %v7050_v6, %v12371_v50  ;;  %v7052_v33 = vadd.f32 %v3829_v21, %v2963_v3  ;;  %v3831_v16 = vpop.f32.mrb[87].mxu1  ;;  %v10291_v6 = vpop.permute.xlu0 %4396  ;;  %v4623_v3 = vadd.f32 %v4622_v8, %v4560_v32  ;;  %v2971_v21 = vadd.f32 %v9850_v1, %v12377_v25 }
 0x560   :  { %12376 = vst [vmem:[#allocation81_spill] sm:$0xff] %v10291_v6  ;;  %v4695_v16 = vmul.f32 %v4561_v19, %v10212_v11 }
 0x561   :  { %12372 = vst [vmem:[#allocation10_spill] sm:$0xff] %v10278_v45  ;;  %v10282_v46 = vadd.f32 %v7052_v33, %v12373_v44  ;;  %v4756_v44 = vadd.f32 %v4755_v26, %v4693_v23  ;;  %v4562_v33 = vmul.f32 %v10291_v6, %v10229_v61  ;;  %v10301_v32 = vpop.permute.xlu1 %4401  ;;  %v4624_v8 = vadd.f32 %v4623_v3, %v4561_v19  ;;  %v12380_v23 = vld [vmem:[#allocation87_spill] sm:$0xff]  ;;  %v12384_v19 = vld [vmem:[#allocation37_spill] sm:$0xff] }
 0x562   :  { %12379 = vst [vmem:[#allocation83_spill] sm:$0xff] %v10301_v32  ;;  %v4563_v26 = vmul.f32 %v10301_v32, %v10237_v56  ;;  %v2979_v3 = vadd.f32 %v9850_v1, %v12384_v19 }
 0x563   :  { %v4757_v50 = vadd.f32 %v4756_v44, %v4694_v52  ;;  %v4696_v25 = vmul.f32 %v4562_v33, %v10229_v61  ;;  %v4625_v52 = vadd.f32 %v4624_v8, %v4562_v33  ;;  %v12383_v44 = vld [vmem:[#allocation36_spill] sm:$0xff] }
 0x564   :  { %v3834_v47 = vpop.f32.mrb[88].mxu1 }
 0x565   :  { %v7054_v35 = vadd.f32 %v3834_v47, %v2968_v12  ;;  %v3836_v38 = vpop.f32.mrb[89].mxu1  ;;  %v10309_v47 = vpop.permute.xlu0 %4406  ;;  %v4626_v6 = vadd.f32 %v4625_v52, %v4563_v26  ;;  %v12390_v52 = vld [vmem:[#allocation38_spill] sm:$0xff] }
 0x566   :  { %v3837_v42 = vpop.f32.mrb[90].mxu1  ;;  %12382 = vst [vmem:[#allocation33_spill] sm:$0xff] %v10309_v47  ;;  %v4758_v38 = vadd.f32 %v4757_v50, %v4695_v16  ;;  %v12386_v16 = vld [vmem:[#allocation84_spill] sm:$0xff] }
 0x567   :  { %v10299_v34 = vadd.f32 %v7054_v35, %v12378_v36  ;;  %v7056_v4 = vadd.f32 %v3837_v42, %v2971_v21  ;;  %v3839_v9 = vpop.f32.mrb[91].mxu1  ;;  %v2976_v35 = vadd.f32 %v9850_v1, %v12383_v44  ;;  %v4697_v36 = vmul.f32 %v4563_v26, %v10237_v56 }
 0x568   :  { %v4564_v9 = vmul.f32 %v10309_v47, %v10254_v28  ;;  %v4759_v42 = vadd.f32 %v4758_v38, %v4696_v25 }
 0x569   :  { %v10307_v12 = vadd.f32 %v7056_v4, %v12380_v23  ;;  %v10318_v23 = vpop.permute.xlu1 %4411  ;;  %v10326_v19 = vpop.permute.xlu0 %4416 }
 0x56a   :  { %12385 = vst [vmem:[#allocation80_spill] sm:$0xff] %v10318_v23  ;;  %v4698_v8 = vmul.f32 %v4564_v9, %v10254_v28  ;;  %v4565_v50 = vmul.f32 %v10318_v23, %v10261_v63  ;;  %12388 = vst [vmem:[#allocation34_spill] sm:$0xff] %v10326_v19  ;;  %v4627_v25 = vadd.f32 %v4626_v6, %v4564_v9  ;;  %v10341_v6 = vld [vmem:[%s11844_s5] ss:$0 sm:$0xff] }
 0x56b   :  { %12381 = vst [vmem:[#allocation32_spill] sm:$0xff] %v10307_v12  ;;  %v4760_v38 = vadd.f32 %v4759_v42, %v4697_v36  ;;  %v12392_v9 = vld [vmem:[#allocation39_spill] sm:$0xff] }
 0x56c   :  { %v3842_v21 = vpop.f32.mrb[92].mxu1  ;;  %v4699_v23 = vmul.f32 %v4565_v50, %v10261_v63  ;;  %v2987_v42 = vadd.f32 %v10341_v6, %v12392_v9 }
 0x56d   :  { %v7058_v32 = vadd.f32 %v3842_v21, %v2976_v35  ;;  %v3844_v4 = vpop.f32.mrb[93].mxu1  ;;  %v4566_v35 = vmul.f32 %v10326_v19, %v10278_v45  ;;  %v12389_v21 = vld [vmem:[#allocation86_spill] sm:$0xff]  ;;  %v4761_v28 = vadd.f32 %v4760_v38, %v4698_v8  ;;  %v10348_v8 = vpop.permute.xlu0 %4426 }
 0x56e   :  { %v3845_v33 = vpop.f32.mrb[94].mxu1  ;;  %v2984_v4 = vadd.f32 %v9850_v1, %v12390_v52  ;;  %12393 = vst [vmem:[#allocation85_spill] sm:$0xff] %v10348_v8  ;;  %v4568_v38 = vmul.f32 %v10348_v8, %v10299_v34 }
 0x56f   :  { %v10324_v44 = vadd.f32 %v7058_v32, %v12386_v16  ;;  %v7060_v47 = vadd.f32 %v3845_v33, %v2979_v3  ;;  %v3847_v61 = vpop.f32.mrb[95].mxu1  ;;  %v10336_v32 = vpop.permute.xlu1 %4421  ;;  %v4628_v3 = vadd.f32 %v4627_v25, %v4565_v50  ;;  %v4762_v25 = vadd.f32 %v4761_v28, %v4699_v23 }
 0x570   :  { %12391 = vst [vmem:[#allocation35_spill] sm:$0xff] %v10336_v32  ;;  %v4567_v1 = vmul.f32 %v10336_v32, %v10282_v46  ;;  %v4702_v23 = vmul.f32 %v4568_v38, %v10299_v34 }
 0x571   :  { %12387 = vst [vmem:[#allocation82_spill] sm:$0xff] %v10324_v44  ;;  %v10331_v26 = vadd.f32 %v7060_v47, %v12389_v21  ;;  %v4700_v47 = vmul.f32 %v4566_v35, %v10278_v45  ;;  %v4629_v16 = vadd.f32 %v4628_v3, %v4566_v35  ;;  %v12396_v35 = vld [vmem:[#allocation40_spill] sm:$0xff]  ;;  %v10366_v3 = vpop.permute.xlu0 %4436 }
 0x572   :  { %v4701_v45 = vmul.f32 %v4567_v1, %v10282_v46  ;;  %v2992_v28 = vadd.f32 %v10341_v6, %v12396_v35  ;;  %12397 = vst [vmem:[#allocation37_spill] sm:$0xff] %v10366_v3 }
 0x573   :  { %v4763_v19 = vadd.f32 %v4762_v25, %v4700_v47 }
 0x574   :  { %v3850_v61 = vpop.f32.mrb[96].mxu1 }
 0x575   :  { %v7062_v36 = vadd.f32 %v3850_v61, %v2984_v4  ;;  %v3852_v33 = vpop.f32.mrb[97].mxu1  ;;  %v10359_v4 = vpop.permute.xlu1 %4431  ;;  %v4630_v61 = vadd.f32 %v4629_v16, %v4567_v1 }
 0x576   :  { %v3853_v50 = vpop.f32.mrb[98].mxu1  ;;  %12395 = vst [vmem:[#allocation36_spill] sm:$0xff] %v10359_v4 }
 0x577   :  { %v10353_v21 = vadd.f32 %v7062_v36, %v9746_v0  ;;  %v7064_v52 = vadd.f32 %v3853_v50, %v2987_v42  ;;  %v3855_v9 = vpop.f32.mrb[99].mxu1  ;;  %v4569_v0 = vmul.f32 %v10359_v4, %v10307_v12  ;;  %v4631_v42 = vadd.f32 %v4630_v61, %v4568_v38  ;;  %v12398_v36 = vld [vmem:[#allocation41_spill] sm:$0xff] }
 0x578   :  { %v2995_v33 = vadd.f32 %v10341_v6, %v12398_v36  ;;  %v4570_v50 = vmul.f32 %v10366_v3, %v10324_v44 }
 0x579   :  { %v10357_v32 = vadd.f32 %v7064_v52, %v9750_v14  ;;  %v4764_v14 = vadd.f32 %v4763_v19, %v4701_v45  ;;  %v4703_v9 = vmul.f32 %v4569_v0, %v10307_v12  ;;  %v10376_v38 = vpop.permute.xlu1 %4441  ;;  %v4632_v61 = vadd.f32 %v4631_v42, %v4569_v0  ;;  %v7470_v45 = vld [vmem:[%s11845_s8 + $0x28] sm:$0xff]   ;;  %v7471_v19 = vld [vmem:[%s11845_s8 + $0x30] sm:$0xff]   ;;  %v12403_v0 = vld [vmem:[#allocation42_spill] sm:$0xff] }
 0x57a   :  { %12400 = vst [vmem:[#allocation86_spill] sm:$0xff] %v10376_v38  ;;  %6815 = vmatprep.subr.bf16.mxu0 %v7470_v45  ;;  %v3000_v42 = vadd.f32 %v10341_v6, %v12403_v0 }
 0x57b   :  { %12394 = vst [vmem:[#allocation87_spill] sm:$0xff] %v10357_v32  ;;  %v4765_v52 = vadd.f32 %v4764_v14, %v4702_v23  ;;  %v4571_v23 = vmul.f32 %v10376_v38, %v10331_v26  ;;  %v4633_v36 = vadd.f32 %v4632_v61, %v4570_v50  ;;  %6816 = vmatpush3.bf16.msra.mxu0 %v7470_v45 }
 0x57c   :  { %v3858_v47 = vpop.f32.mrb[100].mxu1  ;;  %6817 = vmatprep.subr.bf16.mxu0 %v7471_v19 }
 0x57d   :  { %v7066_v1 = vadd.f32 %v3858_v47, %v2992_v28  ;;  %v3860_v16 = vpop.f32.mrb[101].mxu1  ;;  %v4704_v28 = vmul.f32 %v4570_v50, %v10324_v44  ;;  %v4705_v50 = vmul.f32 %v4571_v23, %v10331_v26  ;;  %v10402_v0 = vpop.permute.xlu1 %4451 }
 0x57e   :  { %v3861_v25 = vpop.f32.mrb[102].mxu1  ;;  %v7472_v16 = vld [vmem:[%s11845_s8 + $0x38] sm:$0xff]   ;;  %12405 = vst [vmem:[#allocation39_spill] sm:$0xff] %v10402_v0 }
 0x57f   :  { %v10374_v35 = vadd.f32 %v7066_v1, %v9738_v15  ;;  %v7068_v4 = vadd.f32 %v3861_v25, %v2995_v33  ;;  %v3863_v8 = vpop.f32.mrb[103].mxu1  ;;  %v12401_v15 = vld [vmem:[#allocation88_spill] sm:$0xff]  ;;  %v4766_v33 = vadd.f32 %v4765_v52, %v4703_v9  ;;  %v4634_v52 = vadd.f32 %v4633_v36, %v4571_v23  ;;  %6818 = vmatpush3.bf16.msra.mxu0 %v7471_v19 }
 0x580   :  { %v10390_v8 = vpop.permute.xlu0 %4446  ;;  %6819 = vmatprep.subr.bf16.mxu0 %v7472_v16 }
 0x581   :  { %12399 = vst [vmem:[#allocation84_spill] sm:$0xff] %v10374_v35  ;;  %v10388_v47 = vadd.f32 %v7068_v4, %v12401_v15  ;;  %12402 = vst [vmem:[#allocation38_spill] sm:$0xff] %v10390_v8  ;;  %v4572_v14 = vmul.f32 %v10390_v8, %v10353_v21  ;;  %v12404_v4 = vld [vmem:[#allocation43_spill] sm:$0xff]  ;;  %v4767_v15 = vadd.f32 %v4766_v33, %v4704_v28 }
 0x582   :  { %v3003_v25 = vadd.f32 %v10341_v6, %v12404_v4  ;;  %v4573_v8 = vmul.f32 %v10402_v0, %v10357_v32  ;;  %v10413_v28 = vld [vmem:[%s11846_s11] sm:$0xff]  }
 0x583   :  { %v4706_v45 = vmul.f32 %v4572_v14, %v10353_v21  ;;  %12406 = vst [vmem:[#allocation40_spill] sm:$0xff] %v10413_v28  ;;  %v4635_v23 = vadd.f32 %v4634_v52, %v4572_v14  ;;  %v4768_v36 = vadd.f32 %v4767_v15, %v4705_v50  ;;  %v12408_v33 = vld [vmem:[#allocation91_spill] sm:$0xff]  ;;  %6820 = vmatpush3.bf16.msra.mxu0 %v7472_v16  ;;  %v12411_v14 = vld [vmem:[#allocation45_spill] sm:$0xff] }
 0x584   :  { %v3866_v1 = vpop.f32.mrb[104].mxu1  ;;  %v4707_v4 = vmul.f32 %v4573_v8, %v10357_v32  ;;  %6885 = vmatprep.subr.bf16.mxu0 %v10413_v28  ;;  %v3011_v15 = vadd.f32 %v10341_v6, %v12411_v14  ;;  %v12415_v32 = vld [vmem:[#allocation90_spill] sm:$0xff] }
 0x585   :  { %v7070_v61 = vadd.f32 %v3866_v1, %v3000_v42  ;;  %v3868_v38 = vpop.f32.mrb[105].mxu1  ;;  %v4769_v19 = vadd.f32 %v4768_v36, %v4706_v45 }
 0x586   :  { %v3869_v9 = vpop.f32.mrb[106].mxu1  ;;  %v10415_v38 = vpop.permute.xlu0 %4456 }
 0x587   :  { %v10408_v3 = vadd.f32 %v7070_v61, %v9767_v51  ;;  %v7072_v44 = vadd.f32 %v3869_v9, %v3003_v25  ;;  %v3871_v12 = vpop.f32.mrb[107].mxu1  ;;  %12407 = vst [vmem:[#allocation41_spill] sm:$0xff] %v10415_v38  ;;  %v4574_v42 = vmul.f32 %v10415_v38, %v10374_v35  ;;  %v12409_v51 = vld [vmem:[#allocation44_spill] sm:$0xff]  ;;  %v10425_v25 = vpop.permute.xlu1 %4461  ;;  %v4636_v61 = vadd.f32 %v4635_v23, %v4573_v8  ;;  %v12413_v23 = vld [vmem:[#allocation89_spill] sm:$0xff] }
 0x588   :  { %v3008_v12 = vadd.f32 %v10341_v6, %v12409_v51  ;;  %12410 = vst [vmem:[#allocation88_spill] sm:$0xff] %v10425_v25  ;;  %v4770_v51 = vadd.f32 %v4769_v19, %v4707_v4 }
 0x589   :  { %v10420_v1 = vadd.f32 %v7072_v44, %v12408_v33  ;;  %v4708_v50 = vmul.f32 %v4574_v42, %v10374_v35  ;;  %v4575_v44 = vmul.f32 %v10425_v25, %v10388_v47  ;;  %v4637_v36 = vadd.f32 %v4636_v61, %v4574_v42  ;;  %v12417_v42 = vld [vmem:[#allocation46_spill] sm:$0xff] }
 0x58a   :  { %v10433_v45 = vpop.permute.xlu0 %4466  ;;  %v3016_v19 = vadd.f32 %v10341_v6, %v12417_v42 }
 0x58b   :  { %12412 = vst [vmem:[#allocation42_spill] sm:$0xff] %v10433_v45  ;;  %v4576_v8 = vmul.f32 %v10433_v45, %v10408_v3  ;;  %v4771_v28 = vadd.f32 %v4770_v51, %v4708_v50  ;;  %v4709_v35 = vmul.f32 %v4575_v44, %v10388_v47 }
 0x58c   :  { %v3874_v9 = vpop.f32.mrb[108].mxu1 }
 0x58d   :  { %v7074_v52 = vadd.f32 %v3874_v9, %v3008_v12  ;;  %v3876_v33 = vpop.f32.mrb[109].mxu1  ;;  %v10444_v12 = vpop.permute.xlu1 %4471  ;;  %v4638_v9 = vadd.f32 %v4637_v36, %v4575_v44  ;;  %v4710_v4 = vmul.f32 %v4576_v8, %v10408_v3 }
 0x58e   :  { %v3877_v16 = vpop.f32.mrb[110].mxu1  ;;  %12416 = vst [vmem:[#allocation91_spill] sm:$0xff] %v10444_v12  ;;  %v4577_v61 = vmul.f32 %v10444_v12, %v10420_v1  ;;  %v12419_v33 = vld [vmem:[#allocation47_spill] sm:$0xff] }
 0x58f   :  { %v10438_v0 = vadd.f32 %v7074_v52, %v12413_v23  ;;  %v7076_v38 = vadd.f32 %v3877_v16, %v3011_v15  ;;  %v3879_v14 = vpop.f32.mrb[111].mxu1  ;;  %v10451_v52 = vpop.permute.xlu0 %4476  ;;  %v4639_v15 = vadd.f32 %v4638_v9, %v4576_v8  ;;  %v3019_v16 = vadd.f32 %v10341_v6, %v12419_v33 }
 0x590   :  { %12418 = vst [vmem:[#allocation44_spill] sm:$0xff] %v10451_v52  ;;  %v4711_v14 = vmul.f32 %v4577_v61, %v10420_v1 }
 0x591   :  { %12414 = vst [vmem:[#allocation43_spill] sm:$0xff] %v10438_v0  ;;  %v10442_v25 = vadd.f32 %v7076_v38, %v12415_v32  ;;  %v4772_v32 = vadd.f32 %v4771_v28, %v4709_v35  ;;  %v4578_v38 = vmul.f32 %v10451_v52, %v10438_v0  ;;  %v10461_v8 = vpop.permute.xlu1 %4481  ;;  %v4640_v9 = vadd.f32 %v4639_v15, %v4577_v61  ;;  %v12422_v28 = vld [vmem:[#allocation94_spill] sm:$0xff]  ;;  %v12426_v61 = vld [vmem:[#allocation49_spill] sm:$0xff] }
 0x592   :  { %12421 = vst [vmem:[#allocation89_spill] sm:$0xff] %v10461_v8  ;;  %v3027_v15 = vadd.f32 %v10341_v6, %v12426_v61 }
 0x593   :  { %v4773_v23 = vadd.f32 %v4772_v32, %v4710_v4  ;;  %v4712_v33 = vmul.f32 %v4578_v38, %v10438_v0  ;;  %v4579_v35 = vmul.f32 %v10461_v8, %v10442_v25  ;;  %v4641_v4 = vadd.f32 %v4640_v9, %v4578_v38  ;;  %v12425_v32 = vld [vmem:[#allocation48_spill] sm:$0xff] }
 0x594   :  { %v3882_v50 = vpop.f32.mrb[112].mxu1 }
 0x595   :  { %v7078_v44 = vadd.f32 %v3882_v50, %v3016_v19  ;;  %v3884_v36 = vpop.f32.mrb[113].mxu1  ;;  %v10469_v50 = vpop.permute.xlu0 %4486  ;;  %v4642_v52 = vadd.f32 %v4641_v4, %v4579_v35  ;;  %v12432_v4 = vld [vmem:[#allocation50_spill] sm:$0xff] }
 0x596   :  { %v3885_v51 = vpop.f32.mrb[114].mxu1  ;;  %12424 = vst [vmem:[#allocation46_spill] sm:$0xff] %v10469_v50 }
 0x597   :  { %v10459_v42 = vadd.f32 %v7078_v44, %v9788_v20  ;;  %v7080_v12 = vadd.f32 %v3885_v51, %v3019_v16  ;;  %v3887_v45 = vpop.f32.mrb[115].mxu1  ;;  %v3024_v20 = vadd.f32 %v10341_v6, %v12425_v32  ;;  %v4774_v44 = vadd.f32 %v4773_v23, %v4711_v14  ;;  %v12428_v14 = vld [vmem:[#allocation92_spill] sm:$0xff] }
 0x598   :  { %v4713_v51 = vmul.f32 %v4579_v35, %v10442_v25 }
 0x599   :  { %12420 = vst [vmem:[#allocation45_spill] sm:$0xff] %v10459_v42  ;;  %v10467_v19 = vadd.f32 %v7080_v12, %v12422_v28  ;;  %v4580_v45 = vmul.f32 %v10469_v50, %v10459_v42  ;;  %v4775_v36 = vadd.f32 %v4774_v44, %v4712_v33  ;;  %v10478_v28 = vpop.permute.xlu1 %4491  ;;  %v10486_v61 = vpop.permute.xlu0 %4496 }
 0x59a   :  { %12427 = vst [vmem:[#allocation47_spill] sm:$0xff] %v10478_v28  ;;  %12429 = vst [vmem:[#allocation94_spill] sm:$0xff] %v10486_v61 }
 0x59b   :  { %12423 = vst [vmem:[#allocation90_spill] sm:$0xff] %v10467_v19  ;;  %v4714_v9 = vmul.f32 %v4580_v45, %v10459_v42  ;;  %v4581_v23 = vmul.f32 %v10478_v28, %v10467_v19  ;;  %v4776_v33 = vadd.f32 %v4775_v36, %v4713_v51  ;;  %v4643_v44 = vadd.f32 %v4642_v52, %v4580_v45 }
 0x59c   :  { %v3890_v16 = vpop.f32.mrb[116].mxu1 }
 0x59d   :  { %v7082_v8 = vadd.f32 %v3890_v16, %v3024_v20  ;;  %v3892_v12 = vpop.f32.mrb[117].mxu1  ;;  %v12430_v16 = vld [vmem:[#allocation93_spill] sm:$0xff]  ;;  %v4777_v42 = vadd.f32 %v4776_v33, %v4714_v9  ;;  %v4715_v28 = vmul.f32 %v4581_v23, %v10467_v19  ;;  %v4644_v36 = vadd.f32 %v4643_v44, %v4581_v23 }
 0x59e   :  { %v3893_v38 = vpop.f32.mrb[118].mxu1  ;;  %v3032_v12 = vadd.f32 %v10341_v6, %v12432_v4 }
 0x59f   :  { %v10484_v32 = vadd.f32 %v7082_v8, %v12428_v14  ;;  %v7084_v50 = vadd.f32 %v3893_v38, %v3027_v15  ;;  %v3895_v0 = vpop.f32.mrb[119].mxu1  ;;  %v12433_v8 = vld [vmem:[#allocation51_spill] sm:$0xff] }
 0x5a0   :  { %v3035_v15 = vadd.f32 %v10341_v6, %v12433_v8  ;;  %v10498_v0 = vpop.permute.xlu1 %4501  ;;  %v10506_v8 = vpop.permute.xlu0 %4506 }
 0x5a1   :  { %v4582_v20 = vmul.f32 %v10486_v61, %v10484_v32  ;;  %v10491_v35 = vadd.f32 %v7084_v50, %v12430_v16  ;;  %12434 = vst [vmem:[#allocation49_spill] sm:$0xff] %v10498_v0  ;;  %v4778_v16 = vadd.f32 %v4777_v42, %v4715_v28  ;;  %12436 = vst [vmem:[#allocation93_spill] sm:$0xff] %v10506_v8  ;;  %v12438_v42 = vld [vmem:[#allocation52_spill] sm:$0xff] }
 0x5a2   :  { %v3040_v28 = vadd.f32 %v10341_v6, %v12438_v42 }
 0x5a3   :  { %12431 = vst [vmem:[#allocation48_spill] sm:$0xff] %v10491_v35  ;;  %v4716_v52 = vmul.f32 %v4582_v20, %v10484_v32  ;;  %v4583_v45 = vmul.f32 %v10498_v0, %v10491_v35  ;;  %v4645_v4 = vadd.f32 %v4644_v36, %v4582_v20 }
 0x5a4   :  { %v3898_v38 = vpop.f32.mrb[120].mxu1 }
 0x5a5   :  { %v7086_v50 = vadd.f32 %v3898_v38, %v3032_v12  ;;  %v3900_v51 = vpop.f32.mrb[121].mxu1  ;;  %v4779_v19 = vadd.f32 %v4778_v16, %v4716_v52  ;;  %v4717_v23 = vmul.f32 %v4583_v45, %v10491_v35  ;;  %v10514_v12 = vpop.permute.xlu1 %4511  ;;  %v4646_v20 = vadd.f32 %v4645_v4, %v4583_v45  ;;  %v12439_v38 = vld [vmem:[#allocation53_spill] sm:$0xff] }
 0x5a6   :  { %v3901_v14 = vpop.f32.mrb[122].mxu1  ;;  %12437 = vst [vmem:[#allocation50_spill] sm:$0xff] %v10514_v12  ;;  %v3043_v36 = vadd.f32 %v10341_v6, %v12439_v38 }
 0x5a7   :  { %v7088_v9 = vadd.f32 %v3901_v14, %v3035_v15  ;;  %v10504_v33 = vadd.f32 %v7086_v50, %v10129_v62  ;;  %v3903_v61 = vpop.f32.mrb[123].mxu1  ;;  %v4780_v50 = vadd.f32 %v4779_v19, %v4717_v23 }
 0x5a9   :  { %12435 = vst [vmem:[#allocation92_spill] sm:$0xff] %v10504_v33  ;;  %v4584_v44 = vmul.f32 %v10506_v8, %v10504_v33  ;;  %v10512_v0 = vadd.f32 %v7088_v9, %v10138_v5  ;;  %v10525_v8 = vpop.permute.xlu0 %4516  ;;  %v10529_v6 = vpop.permute.xlu1 %4521 }
 0x5aa   :  { %12440 = vst [vmem:[#allocation51_spill] sm:$0xff] %v10525_v8  ;;  %12441 = vst [vmem:[#allocation52_spill] sm:$0xff] %v10529_v6 }
 0x5ab   :  { %v4718_v62 = vmul.f32 %v4584_v44, %v10504_v33  ;;  %v4585_v61 = vmul.f32 %v10514_v12, %v10512_v0  ;;  %v4647_v52 = vadd.f32 %v4646_v20, %v4584_v44 }
 0x5ac   :  { %v3906_v15 = vpop.f32.mrb[124].mxu1 }
 0x5ad   :  { %v7090_v51 = vadd.f32 %v3906_v15, %v3040_v28  ;;  %v3908_v5 = vpop.f32.mrb[125].mxu1  ;;  %v4781_v16 = vadd.f32 %v4780_v50, %v4718_v62  ;;  %v4719_v9 = vmul.f32 %v4585_v61, %v10512_v0  ;;  %v4648_v33 = vadd.f32 %v4647_v52, %v4585_v61 }
 0x5ae   :  { %v3909_v14 = vpop.f32.mrb[126].mxu1 }
 0x5af   :  { %v4196_v42 = vadd.f32 %v7090_v51, %v10124_v57  ;;  %v7092_v45 = vadd.f32 %v3909_v14, %v3043_v36  ;;  %v3911_v4 = vpop.f32.mrb[127].mxu1  ;;  %v4782_v19 = vadd.f32 %v4781_v16, %v4719_v9 }
 0x5b1   :  { %v4586_v12 = vmul.f32 %v10525_v8, %v4196_v42  ;;  %v4199_v35 = vadd.f32 %v7092_v45, %v10136_v24 }
 0x5b3   :  { %v4649_v23 = vadd.f32 %v4648_v33, %v4586_v12  ;;  %v4720_v44 = vmul.f32 %v4586_v12, %v4196_v42  ;;  %v4587_v28 = vmul.f32 %v10529_v6, %v4199_v35 }
 0x5b5   :  { %v4783_v20 = vadd.f32 %v4782_v19, %v4720_v44  ;;  %v4650_v62 = vadd.f32 %v4649_v23, %v4587_v28  ;;  %v4721_v15 = vmul.f32 %v4587_v28, %v4199_v35  ;;  %v4202_v44 = vld [vmem:[%s11847_s6] sm:$0x1] }
 0x5b7   :  { %v4651_v57 = vrot.slane %v4650_v62, 4  ;;  %v4784_v38 = vadd.f32 %v4783_v20, %v4721_v15  ;;  %v12442_v15 = vld [vmem:[#allocation28_spill] sm:$0xff] }
 0x5b9   :  { %v4652_v36 = vadd.f32 %v4651_v57, %v4650_v62  ;;  %v4785_v50 = vrot.slane %v4784_v38, 4  ;;  %v4203_v62 = vld [vmem:[%s11848_s7] sm:$0x1] }
 0x5bb   :  { %v4653_v51 = vrot.slane %v4652_v36, 2  ;;  %v4786_v61 = vadd.f32 %v4785_v50, %v4784_v38 }
 0x5bd   :  { %v4654_v52 = vadd.f32 %v4653_v51, %v4652_v36  ;;  %v4787_v5 = vrot.slane %v4786_v61, 2 }
 0x5bf   :  { %v4655_v14 = vrot.slane %v4654_v52, 1  ;;  %v4788_v24 = vadd.f32 %v4787_v5, %v4786_v61 }
 0x5c1   :  { %v4656_v45 = vadd.f32 %v4655_v14, %v4654_v52  ;;  %v4789_v4 = vrot.slane %v4788_v24, 1 }
 0x5c3   :  { %v4657_v16 = vmul.f32 0.0078125, %v4656_v45  ;;  %v4790_v33 = vadd.f32 %v4789_v4, %v4788_v24 }
 0x5c5   :  { %v4791_v12 = vmul.f32 0.0078125, %v4790_v33  ;;  %v4792_v9 = vmul.f32 %v4657_v16, %v4657_v16 }
 0x5c7   :  { %v4793_v6 = vsub.f32 %v4791_v12, %v4792_v9  ;;  %v12445_v12 = vld [vmem:[#allocation26_spill] sm:$0xff] }
 0x5c9   :  { %v4794_v19 = vmax.f32 %v4793_v6, 0.0 }
 0x5cb   :  { %v4795_v23 = vadd.f32 1e-05, %v4794_v19 }
 0x5cd   :  { %7483 = vrsqrt.f32 %v4795_v23 }
 0x5d7   :  { %v7484_v28 = vpop.eup %7483 }
 0x5d8   :  { %v4797_v20 = vmul.f32 %v7484_v28, %v4202_v44  ;;  %v12450_v28 = vld [vmem:[#allocation8_spill] sm:$0xff] }
 0x5da   :  { %v10539_v57 = vrot.slane %v4797_v20, %v12442_v15  ;;  %v4868_v38 = vmul.f32 %v4797_v20, %v4657_v16 }
 0x5dc   :  { %v4866_v36 = vmul.f32 %v10539_v57, %v4196_v42  ;;  %v4867_v6 = vmul.f32 %v10539_v57, %v4199_v35  ;;  %v4869_v50 = vsub.f32 %v4203_v62, %v4868_v38  ;;  %v10545_v51 = vmul.f32 %v10539_v57, %v9858_v29  ;;  %v12451_v62 = vld [vmem:[#allocation7_spill] sm:$0xff] }
 0x5dd   :  { %v10549_v61 = vmul.f32 %v10539_v57, %v9861_v39  ;;  %v10553_v52 = vmul.f32 %v10539_v57, %v9869_v7  ;;  %v10557_v5 = vmul.f32 %v10539_v57, %v9872_v59  ;;  %v10561_v35 = vmul.f32 %v10539_v57, %v9880_v55 }
 0x5de   :  { %v10564_v42 = vrot.slane %v4869_v50, %v12442_v15  ;;  %v10568_v29 = vmul.f32 %v10539_v57, %v9883_v43  ;;  %v10572_v39 = vmul.f32 %v10539_v57, %v9891_v49  ;;  %v10576_v7 = vmul.f32 %v10539_v57, %v9894_v13  ;;  %v12470_v15 = vld [vmem:[#allocation32_spill] sm:$0xff] }
 0x5df   :  { %v10580_v59 = vmul.f32 %v10539_v57, %v9901_v18  ;;  %v10584_v55 = vmul.f32 %v10539_v57, %v9904_v53  ;;  %v4814_v43 = vmul.f32 %v10539_v57, %v9912_v2  ;;  %v4815_v14 = vmul.f32 %v10539_v57, %v9915_v37 }
 0x5e0   :  { %v4938_v49 = vadd.f32 %v10564_v42, %v4866_v36  ;;  %v4939_v24 = vadd.f32 %v10564_v42, %v4867_v6  ;;  %v10594_v13 = vmul.f32 %v10539_v57, %v9922_v54  ;;  %v10598_v18 = vmul.f32 %v10539_v57, %v9925_v22  ;;  %v12454_v6 = vld [vmem:[#allocation11_spill] sm:$0xff] }
 0x5e1   :  { %v4818_v53 = vmul.f32 %v10539_v57, %v9934_v48  ;;  %v4819_v2 = vmul.f32 %v10539_v57, %v9940_v27  ;;  %v10606_v37 = vmul.f32 %v10539_v57, %v9953_v58  ;;  %v10610_v45 = vmul.f32 %v10539_v57, %v9960_v31  ;;  %v12443_v48 = vld [vmem:[#allocation22_spill] sm:$0xff]  ;;  %v12444_v58 = vld [vmem:[#allocation27_spill] sm:$0xff] }
 0x5e2   :  { %v5002_v54 = vmax.f32 %v4938_v49, 0.0  ;;  %v5003_v4 = vmax.f32 %v4939_v24, 0.0  ;;  %v4822_v22 = vmul.f32 %v10539_v57, %v9978_v30  ;;  %v4823_v16 = vmul.f32 %v10539_v57, %v9987_v40  ;;  %v12447_v30 = vld [vmem:[#allocation3_spill] sm:$0xff]  ;;  %v12448_v40 = vld [vmem:[#allocation60_spill] sm:$0xff]  ;;  %v12455_v49 = vld [vmem:[#allocation13_spill] sm:$0xff] }
 0x5e3   :  { %v10618_v33 = vmul.f32 %v10539_v57, %v12443_v48  ;;  %v10622_v27 = vmul.f32 %v10539_v57, %v10012_v17  ;;  %v4826_v31 = vmul.f32 %v10539_v57, %v12444_v58  ;;  %v4827_v9 = vmul.f32 %v10539_v57, %v12445_v12  ;;  %v12458_v48 = vld [vmem:[#allocation68_spill] sm:$0xff]  ;;  %v12460_v58 = vld [vmem:[#allocation17_spill] sm:$0xff] }
 0x5e4   :  { %v10628_v19 = vpack.c.bf16 %v5003_v4, %v5002_v54  ;;  %v10632_v23 = vmul.f32 %v10539_v57, %v12447_v30  ;;  %v10636_v44 = vmul.f32 %v10539_v57, %v12448_v40  ;;  %v4830_v17 = vmul.f32 %v10539_v57, %v12450_v28  ;;  %v12456_v54 = vld [vmem:[#allocation9_spill] sm:$0xff]  ;;  %v12461_v30 = vld [vmem:[#allocation16_spill] sm:$0xff] }
 0x5e5   :  { %v4831_v20 = vmul.f32 %v10539_v57, %v10088_v60  ;;  %v10644_v38 = vmul.f32 %v10539_v57, %v12451_v62  ;;  %v10648_v36 = vmul.f32 %v10539_v57, %v10110_v10  ;;  %v4834_v50 = vmul.f32 %v10539_v57, %v12454_v6  ;;  %v12464_v62 = vld [vmem:[#allocation19_spill] sm:$0xff] }
 0x5e6   :  { %12446 = vst [vmem:[#allocation53_spill] sm:$0xff] %v10628_v19  ;;  %12449 = vst [vmem:[#allocation22_spill] sm:$0xff] %v10636_v44  ;;  %v4835_v24 = vmul.f32 %v10539_v57, %v12455_v49  ;;  %v10656_v4 = vmul.f32 %v10539_v57, %v12456_v54  ;;  %v10660_v60 = vmul.f32 %v10539_v57, %v12458_v48  ;;  %v12465_v54 = vld [vmem:[#allocation30_spill] sm:$0xff]  ;;  %v12474_v19 = vld [vmem:[#allocation87_spill] sm:$0xff] }
 0x5e7   :  { %12452 = vst [vmem:[#allocation27_spill] sm:$0xff] %v10644_v38  ;;  %12453 = vst [vmem:[#allocation26_spill] sm:$0xff] %v10648_v36  ;;  %v4838_v12 = vmul.f32 %v10539_v57, %v12460_v58  ;;  %v4839_v10 = vmul.f32 %v10539_v57, %v10191_v41  ;;  %v10668_v40 = vmul.f32 %v10539_v57, %v12461_v30  ;;  %v12468_v58 = vld [vmem:[#allocation10_spill] sm:$0xff] }
 0x5e8   :  { %12457 = vst [vmem:[#allocation3_spill] sm:$0xff] %v10656_v4  ;;  %12459 = vst [vmem:[#allocation60_spill] sm:$0xff] %v10660_v60  ;;  %v10672_v28 = vmul.f32 %v10539_v57, %v10212_v11  ;;  %v4842_v6 = vmul.f32 %v10539_v57, %v12464_v62  ;;  %v4843_v49 = vmul.f32 %v10539_v57, %v10237_v56 }
 0x5e9   :  { %12462 = vst [vmem:[#allocation8_spill] sm:$0xff] %v10668_v40  ;;  %v10680_v48 = vmul.f32 %v10539_v57, %v12465_v54  ;;  %v10684_v41 = vmul.f32 %v10539_v57, %v10261_v63  ;;  %v4846_v30 = vmul.f32 %v10539_v57, %v12468_v58  ;;  %v4847_v11 = vmul.f32 %v10539_v57, %v10282_v46  ;;  %v12472_v54 = vld [vmem:[#allocation82_spill] sm:$0xff] }
 0x5ea   :  { %12463 = vst [vmem:[#allocation7_spill] sm:$0xff] %v10672_v28  ;;  %v10692_v62 = vmul.f32 %v10539_v57, %v10299_v34  ;;  %v10696_v56 = vmul.f32 %v10539_v57, %v12470_v15  ;;  %v4850_v8 = vmul.f32 %v10539_v57, %v12472_v54  ;;  %v4851_v63 = vmul.f32 %v10539_v57, %v10331_v26  ;;  %v12476_v34 = vld [vmem:[#allocation84_spill] sm:$0xff] }
 0x5eb   :  { %12466 = vst [vmem:[#allocation11_spill] sm:$0xff] %v10680_v48  ;;  %12467 = vst [vmem:[#allocation13_spill] sm:$0xff] %v10684_v41  ;;  %v10704_v58 = vmul.f32 %v10539_v57, %v10353_v21  ;;  %v10708_v46 = vmul.f32 %v10539_v57, %v12474_v19  ;;  %v4855_v15 = vmul.f32 %v10539_v57, %v10388_v47  ;;  %v12479_v21 = vld [vmem:[#allocation43_spill] sm:$0xff] }
 0x5ec   :  { %12469 = vst [vmem:[#allocation9_spill] sm:$0xff] %v10692_v62  ;;  %12471 = vst [vmem:[#allocation68_spill] sm:$0xff] %v10696_v56  ;;  %v4854_v62 = vmul.f32 %v10539_v57, %v12476_v34  ;;  %v10716_v54 = vmul.f32 %v10539_v57, %v10408_v3  ;;  %v10720_v26 = vmul.f32 %v10539_v57, %v10420_v1  ;;  %v12482_v56 = vld [vmem:[#allocation90_spill] sm:$0xff] }
 0x5ed   :  { %12473 = vst [vmem:[#allocation17_spill] sm:$0xff] %v10704_v58  ;;  %12475 = vst [vmem:[#allocation16_spill] sm:$0xff] %v10708_v46  ;;  %v4858_v58 = vmul.f32 %v10539_v57, %v12479_v21  ;;  %v4859_v19 = vmul.f32 %v10539_v57, %v10442_v25  ;;  %v12480_v46 = vld [vmem:[#allocation45_spill] sm:$0xff]  ;;  %v10732_v47 = vmul.f32 %v10539_v57, %v12482_v56 }
 0x5ee   :  { %12477 = vst [vmem:[#allocation19_spill] sm:$0xff] %v10716_v54  ;;  %12478 = vst [vmem:[#allocation30_spill] sm:$0xff] %v10720_v26  ;;  %v10728_v34 = vmul.f32 %v10539_v57, %v12480_v46  ;;  %v4862_v3 = vmul.f32 %v10539_v57, %v10484_v32  ;;  %v12484_v54 = vld [vmem:[#allocation48_spill] sm:$0xff]  ;;  %v10744_v25 = vmul.f32 %v10539_v57, %v10512_v0 }
 0x5ef   :  { %12483 = vst [vmem:[#allocation32_spill] sm:$0xff] %v10732_v47  ;;  %v4863_v1 = vmul.f32 %v10539_v57, %v12484_v54  ;;  %v12485_v26 = vld [vmem:[#allocation92_spill] sm:$0xff]  ;;  %v4878_v46 = vadd.f32 %v10564_v42, %v10553_v52  ;;  %v4879_v56 = vadd.f32 %v10564_v42, %v10557_v5  ;;  %v4882_v32 = vadd.f32 %v10564_v42, %v10572_v39 }
 0x5f0   :  { %12481 = vst [vmem:[#allocation10_spill] sm:$0xff] %v10728_v34  ;;  %v10740_v21 = vmul.f32 %v10539_v57, %v12485_v26  ;;  %12487 = vst [vmem:[#allocation87_spill] sm:$0xff] %v10744_v25  ;;  %v4883_v54 = vadd.f32 %v10564_v42, %v10576_v7  ;;  %v4886_v47 = vadd.f32 %v10564_v42, %v4814_v43 }
 0x5f1   :  { %v4887_v26 = vadd.f32 %v10564_v42, %v4815_v14  ;;  %v4891_v0 = vadd.f32 %v10564_v42, %v4819_v2  ;;  %v4894_v57 = vadd.f32 %v10564_v42, %v4822_v22  ;;  %v4895_v52 = vadd.f32 %v10564_v42, %v4823_v16 }
 0x5f2   :  { %12486 = vst [vmem:[#allocation82_spill] sm:$0xff] %v10740_v21  ;;  %v4890_v21 = vadd.f32 %v10564_v42, %v4818_v53  ;;  %v4898_v5 = vadd.f32 %v10564_v42, %v4826_v31  ;;  %v4899_v25 = vadd.f32 %v10564_v42, %v4827_v9  ;;  %v4902_v39 = vadd.f32 %v10564_v42, %v4830_v17 }
 0x5f3   :  { %v4903_v7 = vadd.f32 %v10564_v42, %v4831_v20  ;;  %v4906_v43 = vadd.f32 %v10564_v42, %v4834_v50  ;;  %v4907_v14 = vadd.f32 %v10564_v42, %v4835_v24  ;;  %v4910_v53 = vadd.f32 %v10564_v42, %v4838_v12 }
 0x5f4   :  { %v4911_v2 = vadd.f32 %v10564_v42, %v4839_v10  ;;  %v4914_v22 = vadd.f32 %v10564_v42, %v4842_v6  ;;  %v4915_v16 = vadd.f32 %v10564_v42, %v4843_v49  ;;  %v4918_v31 = vadd.f32 %v10564_v42, %v4846_v30 }
 0x5f5   :  { %v4919_v9 = vadd.f32 %v10564_v42, %v4847_v11  ;;  %v4922_v17 = vadd.f32 %v10564_v42, %v4850_v8  ;;  %v4923_v20 = vadd.f32 %v10564_v42, %v4851_v63  ;;  %v4926_v50 = vadd.f32 %v10564_v42, %v4854_v62 }
 0x5f6   :  { %v4927_v24 = vadd.f32 %v10564_v42, %v4855_v15  ;;  %v4930_v12 = vadd.f32 %v10564_v42, %v4858_v58  ;;  %v4931_v10 = vadd.f32 %v10564_v42, %v4859_v19  ;;  %v4934_v6 = vadd.f32 %v10564_v42, %v4862_v3 }
 0x5f7   :  { %v4935_v49 = vadd.f32 %v10564_v42, %v4863_v1  ;;  %v4942_v34 = vmax.f32 %v4878_v46, 0.0  ;;  %v4943_v30 = vmax.f32 %v4879_v56, 0.0  ;;  %v4946_v41 = vmax.f32 %v4882_v32, 0.0 }
 0x5f8   :  { %v4947_v11 = vmax.f32 %v4883_v54, 0.0  ;;  %v4950_v48 = vmax.f32 %v4886_v47, 0.0  ;;  %v4951_v8 = vmax.f32 %v4887_v26, 0.0  ;;  %v4954_v28 = vmax.f32 %v4890_v21, 0.0 }
 0x5f9   :  { %v4955_v63 = vmax.f32 %v4891_v0, 0.0  ;;  %v4958_v40 = vmax.f32 %v4894_v57, 0.0  ;;  %v4959_v62 = vmax.f32 %v4895_v52, 0.0  ;;  %v4962_v60 = vmax.f32 %v4898_v5, 0.0 }
 0x5fa   :  { %v4963_v15 = vmax.f32 %v4899_v25, 0.0  ;;  %v4966_v4 = vmax.f32 %v4902_v39, 0.0  ;;  %v4967_v58 = vmax.f32 %v4903_v7, 0.0  ;;  %v4970_v36 = vmax.f32 %v4906_v43, 0.0 }
 0x5fb   :  { %v4971_v19 = vmax.f32 %v4907_v14, 0.0  ;;  %v4974_v38 = vmax.f32 %v4910_v53, 0.0  ;;  %v4975_v3 = vmax.f32 %v4911_v2, 0.0  ;;  %v4978_v44 = vmax.f32 %v4914_v22, 0.0 }
 0x5fc   :  { %v4979_v1 = vmax.f32 %v4915_v16, 0.0  ;;  %v4982_v46 = vmax.f32 %v4918_v31, 0.0  ;;  %v4983_v56 = vmax.f32 %v4919_v9, 0.0  ;;  %v4986_v32 = vmax.f32 %v4922_v17, 0.0 }
 0x5fd   :  { %v4987_v54 = vmax.f32 %v4923_v20, 0.0  ;;  %v4990_v47 = vmax.f32 %v4926_v50, 0.0  ;;  %v4991_v26 = vmax.f32 %v4927_v24, 0.0  ;;  %v4994_v21 = vmax.f32 %v4930_v12, 0.0 }
 0x5fe   :  { %v4995_v0 = vmax.f32 %v4931_v10, 0.0  ;;  %v4998_v57 = vmax.f32 %v4934_v6, 0.0  ;;  %v4999_v52 = vmax.f32 %v4935_v49, 0.0  ;;  %v5005_v5 = vpack.c.bf16 %v4943_v30, %v4942_v34  ;;  %v7474_v49 = vld [vmem:[%s11846_s11 + $0x8] sm:$0xff]  }
 0x5ff   :  { %v10780_v25 = vpack.c.bf16 %v4947_v11, %v4946_v41  ;;  %v10782_v39 = vpack.c.bf16 %v4951_v8, %v4950_v48  ;;  %v10784_v7 = vpack.c.bf16 %v4955_v63, %v4954_v28  ;;  %v10786_v43 = vpack.c.bf16 %v4959_v62, %v4958_v40 }
 0x600   :  { %v10788_v14 = vpack.c.bf16 %v4963_v15, %v4962_v60  ;;  %v10790_v53 = vpack.c.bf16 %v4967_v58, %v4966_v4  ;;  %v10792_v2 = vpack.c.bf16 %v4971_v19, %v4970_v36  ;;  %v10794_v22 = vpack.c.bf16 %v4975_v3, %v4974_v38  ;;  %v12488_v15 = vld [vmem:[#allocation22_spill] sm:$0xff] }
 0x601   :  { %v10796_v16 = vpack.c.bf16 %v4979_v1, %v4978_v44  ;;  %v10798_v31 = vpack.c.bf16 %v4983_v56, %v4982_v46  ;;  %v10800_v41 = vpack.c.bf16 %v4987_v54, %v4986_v32  ;;  %v10802_v48 = vpack.c.bf16 %v4991_v26, %v4990_v47  ;;  %v12491_v46 = vld [vmem:[#allocation26_spill] sm:$0xff]  ;;  %v12492_v56 = vld [vmem:[#allocation3_spill] sm:$0xff]  ;;  %v7475_v54 = vld [vmem:[%s11846_s11 + $0x10] sm:$0xff]  }
 0x602   :  { %v10804_v28 = vpack.c.bf16 %v4995_v0, %v4994_v21  ;;  %v10806_v40 = vpack.c.bf16 %v4999_v52, %v4998_v57  ;;  %v4876_v4 = vadd.f32 %v10564_v42, %v10545_v51  ;;  %v4877_v36 = vadd.f32 %v10564_v42, %v10549_v61  ;;  %v12493_v21 = vld [vmem:[#allocation60_spill] sm:$0xff] }
 0x603   :  { %v4880_v44 = vadd.f32 %v10564_v42, %v10561_v35  ;;  %v4881_v38 = vadd.f32 %v10564_v42, %v10568_v29  ;;  %v4884_v60 = vadd.f32 %v10564_v42, %v10580_v59  ;;  %v4885_v34 = vadd.f32 %v10564_v42, %v10584_v55 }
 0x604   :  { %v4940_v9 = vmax.f32 %v4876_v4, 0.0  ;;  %v4941_v17 = vmax.f32 %v4877_v36, 0.0  ;;  %v4888_v51 = vadd.f32 %v10564_v42, %v10594_v13  ;;  %v4889_v61 = vadd.f32 %v10564_v42, %v10598_v18  ;;  %v12494_v4 = vld [vmem:[#allocation8_spill] sm:$0xff] }
 0x605   :  { %v4944_v20 = vmax.f32 %v4880_v44, 0.0  ;;  %v4945_v50 = vmax.f32 %v4881_v38, 0.0  ;;  %v4948_v35 = vmax.f32 %v4884_v60, 0.0  ;;  %v4949_v24 = vmax.f32 %v4885_v34, 0.0  ;;  %v12495_v60 = vld [vmem:[#allocation7_spill] sm:$0xff] }
 0x606   :  { %v5004_v12 = vpack.c.bf16 %v4941_v17, %v4940_v9  ;;  %v4952_v29 = vmax.f32 %v4888_v51, 0.0  ;;  %v4953_v10 = vmax.f32 %v4889_v61, 0.0  ;;  %v4892_v59 = vadd.f32 %v10564_v42, %v10606_v37  ;;  %v12496_v9 = vld [vmem:[#allocation11_spill] sm:$0xff] }
 0x607   :  { %v5006_v6 = vpack.c.bf16 %v4945_v50, %v4944_v20  ;;  %v5008_v55 = vpack.c.bf16 %v4949_v24, %v4948_v35  ;;  %v4893_v13 = vadd.f32 %v10564_v42, %v10610_v45  ;;  %v4896_v18 = vadd.f32 %v10564_v42, %v10618_v33  ;;  %v12489_v45 = vld [vmem:[#allocation27_spill] sm:$0xff]  ;;  %v12490_v33 = vld [vmem:[#allocation40_spill] sm:$0xff]  ;;  %v12497_v20 = vld [vmem:[#allocation13_spill] sm:$0xff] }
 0x608   :  { %6821 = vmatprep.mubr.bf16.mxu0 %v5004_v12  ;;  %v10833_v30 = vpack.c.bf16 %v4953_v10, %v4952_v29  ;;  %v4956_v11 = vmax.f32 %v4892_v59, 0.0  ;;  %v4897_v8 = vadd.f32 %v10564_v42, %v10622_v27  ;;  %v4900_v37 = vadd.f32 %v10564_v42, %v10632_v23  ;;  %v12498_v35 = vld [vmem:[#allocation9_spill] sm:$0xff]  ;;  %v7476_v12 = vld [vmem:[%s11846_s11 + $0x18] sm:$0xff]  }
 0x609   :  { %6822 = vmatmul.mubr.bf16.vlgmr.msra.gmra.mrb[0].mxu0 %v5005_v5  ;;  %v4957_v63 = vmax.f32 %v4893_v13, 0.0  ;;  %v4960_v62 = vmax.f32 %v4896_v18, 0.0  ;;  %v4901_v58 = vadd.f32 %v10564_v42, %v12488_v15  ;;  %v4904_v19 = vadd.f32 %v10564_v42, %v12489_v45 }
 0x60a   :  { %6886 = vmatpush3.bf16.msra.mxu0 %v12490_v33  ;;  %6825 = vmatprep.mubr.bf16.mxu0 %v5006_v6  ;;  %v4961_v3 = vmax.f32 %v4897_v8, 0.0  ;;  %v4964_v1 = vmax.f32 %v4900_v37, 0.0  ;;  %v4905_v27 = vadd.f32 %v10564_v42, %v12491_v46  ;;  %v4908_v23 = vadd.f32 %v10564_v42, %v12492_v56  ;;  %v12499_v6 = vld [vmem:[#allocation68_spill] sm:$0xff] }
 0x60b   :  { %6887 = vmatprep.subr.bf16.mxu0 %v7474_v49  ;;  %v10848_v32 = vpack.c.bf16 %v4957_v63, %v4956_v11  ;;  %v4965_v47 = vmax.f32 %v4901_v58, 0.0  ;;  %v4968_v26 = vmax.f32 %v4904_v19, 0.0  ;;  %v4909_v0 = vadd.f32 %v10564_v42, %v12493_v21  ;;  %v12500_v11 = vld [vmem:[#allocation17_spill] sm:$0xff]  ;;  %v12501_v37 = vld [vmem:[#allocation16_spill] sm:$0xff]  ;;  %v12502_v58 = vld [vmem:[#allocation19_spill] sm:$0xff] }
 0x60c   :  { %v10855_v57 = vpack.c.bf16 %v4961_v3, %v4960_v62  ;;  %v4969_v52 = vmax.f32 %v4905_v27, 0.0  ;;  %v4972_v5 = vmax.f32 %v4908_v23, 0.0  ;;  %v4912_v36 = vadd.f32 %v10564_v42, %v12494_v4  ;;  %v12503_v19 = vld [vmem:[#allocation30_spill] sm:$0xff]  ;;  %v12505_v21 = vld [vmem:[#allocation32_spill] sm:$0xff]  ;;  %v12507_v4 = vld [vmem:[#allocation87_spill] sm:$0xff] }
 0x60d   :  { %v10859_v44 = vpack.c.bf16 %v4965_v47, %v4964_v1  ;;  %v4973_v38 = vmax.f32 %v4909_v0, 0.0  ;;  %v4913_v34 = vadd.f32 %v10564_v42, %v12495_v60  ;;  %v4916_v17 = vadd.f32 %v10564_v42, %v12496_v9  ;;  %v12504_v27 = vld [vmem:[#allocation10_spill] sm:$0xff] }
 0x60e   :  { %6888 = vmatpush3.bf16.msra.mxu0 %v7474_v49  ;;  %v5018_v51 = vpack.c.bf16 %v4969_v52, %v4968_v26  ;;  %v4976_v61 = vmax.f32 %v4912_v36, 0.0  ;;  %v4917_v50 = vadd.f32 %v10564_v42, %v12497_v20  ;;  %v4920_v24 = vadd.f32 %v10564_v42, %v12498_v35  ;;  %v7507_v35 = vld [vmem:[%s11839_s0 + $0x88] sm:$0xff]  }
 0x60f   :  { %6889 = vmatprep.subr.bf16.mxu0 %v7475_v54  ;;  %v5020_v29 = vpack.c.bf16 %v4973_v38, %v4972_v5  ;;  %v4977_v10 = vmax.f32 %v4913_v34, 0.0  ;;  %v4980_v59 = vmax.f32 %v4916_v17, 0.0  ;;  %v4921_v13 = vadd.f32 %v10564_v42, %v12499_v6  ;;  %v7478_v17 = vld [vmem:[%s11846_s11 + $0x28] sm:$0xff]  }
 0x610   :  { %v4981_v49 = vmax.f32 %v4917_v50, 0.0  ;;  %v4984_v18 = vmax.f32 %v4920_v24, 0.0  ;;  %v4924_v8 = vadd.f32 %v10564_v42, %v12500_v11  ;;  %v4925_v63 = vadd.f32 %v10564_v42, %v12501_v37  ;;  %v7480_v50 = vld [vmem:[%s11846_s11 + $0x38] sm:$0xff]   ;;  %v7508_v24 = vld [vmem:[%s11839_s0 + $0x90] sm:$0xff]  }
 0x611   :  { %6826 = vmatmul.mubr.bf16.gmra.mrb[4].mxu0 %v10780_v25  ;;  %v5022_v62 = vpack.c.bf16 %v4977_v10, %v4976_v61  ;;  %v4985_v15 = vmax.f32 %v4921_v13, 0.0  ;;  %v4928_v45 = vadd.f32 %v10564_v42, %v12502_v58  ;;  %v4929_v33 = vadd.f32 %v10564_v42, %v12503_v19  ;;  %v7477_v25 = vld [vmem:[%s11846_s11 + $0x20] sm:$0xff]   ;;  %v7511_v10 = vld [vmem:[%s11839_s0 + $0xa8] sm:$0xff]   ;;  %v12510_v37 = vld [vmem:[#allocation54_spill] sm:$0xff] }
 0x612   :  { %6829 = vmatprep.mubr.bf16.mxu0 %v5008_v55  ;;  %6890 = vmatpush3.bf16.msra.mxu0 %v7475_v54  ;;  %v5024_v3 = vpack.c.bf16 %v4981_v49, %v4980_v59  ;;  %v4988_v1 = vmax.f32 %v4924_v8, 0.0  ;;  %v4989_v46 = vmax.f32 %v4925_v63, 0.0  ;;  %v4932_v56 = vadd.f32 %v10564_v42, %v12504_v27  ;;  %v12506_v54 = vld [vmem:[#allocation82_spill] sm:$0xff]  ;;  %v7512_v59 = vld [vmem:[%s11839_s0 + $0xb0] sm:$0xff]   ;;  %v12512_v19 = vld [vmem:[#allocation55_spill] sm:$0xff] }
 0x613   :  { %6891 = vmatprep.subr.bf16.mxu0 %v7476_v12  ;;  %v5026_v23 = vpack.c.bf16 %v4985_v15, %v4984_v18  ;;  %v4992_v47 = vmax.f32 %v4928_v45, 0.0  ;;  %v4993_v26 = vmax.f32 %v4929_v33, 0.0  ;;  %v4933_v0 = vadd.f32 %v10564_v42, %v12505_v21  ;;  %v12509_v49 = vld [vmem:[#allocation18_spill] sm:$0xff] }
 0x614   :  { %v5028_v52 = vpack.c.bf16 %v4989_v46, %v4988_v1  ;;  %v4996_v55 = vmax.f32 %v4932_v56, 0.0  ;;  %v4936_v5 = vadd.f32 %v10564_v42, %v12506_v54  ;;  %v4937_v36 = vadd.f32 %v10564_v42, %v12507_v4  ;;  %v7479_v42 = vld [vmem:[%s11846_s11 + $0x30] sm:$0xff]   ;;  %v7513_v58 = vld [vmem:[%s11839_s0 + $0xb8] sm:$0xff]   ;;  %v7514_v46 = vld [vmem:[%s11839_s0 + $0xc0] sm:$0xff]  }
 0x615   :  { %v5030_v38 = vpack.c.bf16 %v4993_v26, %v4992_v47  ;;  %v4997_v60 = vmax.f32 %v4933_v0, 0.0 }
 0x616   :  { %6892 = vmatpush3.bf16.msra.mxu0 %v7476_v12  ;;  %v5000_v34 = vmax.f32 %v4936_v5, 0.0  ;;  %v5001_v9 = vmax.f32 %v4937_v36, 0.0  ;;  %v7509_v12 = vld [vmem:[%s11839_s0 + $0x98] sm:$0xff]   ;;  %v12514_v5 = vld [vmem:[#allocation57_spill] sm:$0xff] }
 0x617   :  { %6893 = vmatprep.subr.bf16.mxu0 %v7477_v25  ;;  %v5032_v61 = vpack.c.bf16 %v4997_v60, %v4996_v55 }
 0x618   :  { %v5034_v20 = vpack.c.bf16 %v5001_v9, %v5000_v34  ;;  %v12515_v9 = vld [vmem:[#allocation25_spill] sm:$0xff] }
 0x619   :  { %6830 = vmatmul.mubr.bf16.gmra.mrb[8].mxu0 %v10782_v39  ;;  %v12508_v39 = vld [vmem:[#allocation53_spill] sm:$0xff] }
 0x61a   :  { %6833 = vmatprep.mubr.bf16.mxu0 %v10833_v30  ;;  %6894 = vmatpush3.bf16.msra.mxu0 %v7477_v25  ;;  %v7502_v30 = vld [vmem:[%s11839_s0 + $0x60] sm:$0xff]  }
 0x61b   :  { %6895 = vmatprep.subr.bf16.mxu0 %v7478_v17 }
 0x61e   :  { %6896 = vmatpush3.bf16.msra.mxu0 %v7478_v17 }
 0x61f   :  { %6897 = vmatprep.subr.bf16.mxu0 %v7479_v42 }
 0x621   :  { %6834 = vmatmul.mubr.bf16.gmra.mrb[12].mxu0 %v10784_v7  ;;  %v7490_v7 = vld [vmem:[%s11839_s0] sm:$0xff]  }
 0x622   :  { %6837 = vmatprep.mubr.bf16.mxu0 %v10848_v32  ;;  %6898 = vmatpush3.bf16.msra.mxu0 %v7479_v42  ;;  %v7503_v32 = vld [vmem:[%s11839_s0 + $0x68] sm:$0xff]   ;;  %v12516_v42 = vld [vmem:[#allocation59_spill] sm:$0xff] }
 0x623   :  { %6899 = vmatprep.subr.bf16.mxu0 %v7480_v50 }
 0x626   :  { %6900 = vmatpush3.bf16.msra.mxu0 %v7480_v50 }
 0x629   :  { %6838 = vmatmul.mubr.bf16.gmra.mrb[16].mxu0 %v10786_v43  ;;  %v7491_v43 = vld [vmem:[%s11839_s0 + $0x8] sm:$0xff]  }
 0x62a   :  { %6841 = vmatprep.mubr.bf16.mxu0 %v10855_v57  ;;  %v7504_v57 = vld [vmem:[%s11839_s0 + $0x70] sm:$0xff]  }
 0x631   :  { %6842 = vmatmul.mubr.bf16.gmra.mrb[20].mxu0 %v10788_v14  ;;  %v7492_v14 = vld [vmem:[%s11839_s0 + $0x10] sm:$0xff]  }
 0x632   :  { %6845 = vmatprep.mubr.bf16.mxu0 %v10859_v44  ;;  %v7505_v44 = vld [vmem:[%s11839_s0 + $0x78] sm:$0xff]  }
 0x639   :  { %6846 = vmatmul.mubr.bf16.gmra.mrb[24].mxu0 %v10790_v53  ;;  %v7493_v53 = vld [vmem:[%s11839_s0 + $0x18] sm:$0xff]  }
 0x63a   :  { %6849 = vmatprep.mubr.bf16.mxu0 %v5018_v51  ;;  %v7506_v51 = vld [vmem:[%s11839_s0 + $0x80] sm:$0xff]  }
 0x641   :  { %6850 = vmatmul.mubr.bf16.gmra.mrb[28].mxu0 %v10792_v2  ;;  %v7494_v2 = vld [vmem:[%s11839_s0 + $0x20] sm:$0xff]  }
 0x642   :  { %6853 = vmatprep.mubr.bf16.mxu0 %v5020_v29  ;;  %v7510_v29 = vld [vmem:[%s11839_s0 + $0xa0] sm:$0xff]  }
 0x649   :  { %6854 = vmatmul.mubr.bf16.gmra.mrb[32].mxu0 %v10794_v22  ;;  %v7495_v22 = vld [vmem:[%s11839_s0 + $0x28] sm:$0xff]  }
 0x64a   :  { %6857 = vmatprep.mubr.bf16.mxu0 %v5022_v62  ;;  %v12511_v62 = vld [vmem:[#allocation20_spill] sm:$0xff] }
 0x651   :  { %6858 = vmatmul.mubr.bf16.gmra.mrb[36].mxu0 %v10796_v16  ;;  %v7496_v16 = vld [vmem:[%s11839_s0 + $0x30] sm:$0xff]  }
 0x652   :  { %6861 = vmatprep.mubr.bf16.mxu0 %v5024_v3 }
 0x659   :  { %6862 = vmatmul.mubr.bf16.gmra.mrb[40].mxu0 %v10798_v31  ;;  %v7497_v31 = vld [vmem:[%s11839_s0 + $0x38] sm:$0xff]  }
 0x65a   :  { %6865 = vmatprep.mubr.bf16.mxu0 %v5026_v23 }
 0x661   :  { %6866 = vmatmul.mubr.bf16.gmra.mrb[44].mxu0 %v10800_v41  ;;  %v7498_v41 = vld [vmem:[%s11839_s0 + $0x40] sm:$0xff]  }
 0x662   :  { %6869 = vmatprep.mubr.bf16.mxu0 %v5028_v52  ;;  %v12513_v52 = vld [vmem:[#allocation23_spill] sm:$0xff] }
 0x669   :  { %6870 = vmatmul.mubr.bf16.gmra.mrb[48].mxu0 %v10802_v48  ;;  %v7499_v48 = vld [vmem:[%s11839_s0 + $0x48] sm:$0xff]  }
 0x66a   :  { %6873 = vmatprep.mubr.bf16.mxu0 %v5030_v38 }
 0x671   :  { %6874 = vmatmul.mubr.bf16.gmra.mrb[52].mxu0 %v10804_v28  ;;  %v7500_v28 = vld [vmem:[%s11839_s0 + $0x50] sm:$0xff]  }
 0x672   :  { %6877 = vmatprep.mubr.bf16.mxu0 %v5032_v61  ;;  %v7515_v61 = vld [vmem:[%s11839_s0 + $0xc8] sm:$0xff]  }
 0x679   :  { %6878 = vmatmul.mubr.bf16.gmra.mrb[56].mxu0 %v10806_v40  ;;  %v7501_v40 = vld [vmem:[%s11839_s0 + $0x58] sm:$0xff]  }
 0x67a   :  { %6881 = vmatprep.mubr.bf16.mxu0 %v5034_v20 }
 0x681   :  { %6882 = vmatmul.mubr.bf16.gmra.mrb[60].mxu0 %v12508_v39 }
 0x682   :  { %6901 = vmatprep.mubr.bf16.mxu0 %v7490_v7 }
 0x689   :  { %6902 = vmatmul.mubr.bf16.vlgmr.msra.gmra.mrb[64].mxu0 %v7491_v43  ;;  %v7516_v43 = vld [vmem:[%s11839_s0 + $0xd0] sm:$0xff]  }
 0x68a   :  { %6905 = vmatprep.mubr.bf16.mxu0 %v7492_v14 }
 0x691   :  { %6906 = vmatmul.mubr.bf16.gmra.mrb[68].mxu0 %v7493_v53 }
 0x692   :  { %6909 = vmatprep.mubr.bf16.mxu0 %v7494_v2 }
 0x699   :  { %6910 = vmatmul.mubr.bf16.gmra.mrb[72].mxu0 %v7495_v22 }
 0x69a   :  { %6913 = vmatprep.mubr.bf16.mxu0 %v7496_v16 }
 0x6a1   :  { %6914 = vmatmul.mubr.bf16.gmra.mrb[76].mxu0 %v7497_v31 }
 0x6a2   :  { %6917 = vmatprep.mubr.bf16.mxu0 %v7498_v41 }
 0x6a9   :  { %6918 = vmatmul.mubr.bf16.gmra.mrb[80].mxu0 %v7499_v48 }
 0x6aa   :  { %6921 = vmatprep.mubr.bf16.mxu0 %v7500_v28  ;;  %v12517_v28 = vld [vmem:[#allocation24_spill] sm:$0xff] }
 0x6b1   :  { %6922 = vmatmul.mubr.bf16.gmra.mrb[84].mxu0 %v7501_v40 }
 0x6b2   :  { %6925 = vmatprep.mubr.bf16.mxu0 %v7502_v30 }
 0x6b9   :  { %6926 = vmatmul.mubr.bf16.gmra.mrb[88].mxu0 %v7503_v32  ;;  %v12518_v32 = vld [vmem:[#allocation58_spill] sm:$0xff] }
 0x6ba   :  { %6929 = vmatprep.mubr.bf16.mxu0 %v7504_v57 }
 0x6c1   :  { %6930 = vmatmul.mubr.bf16.gmra.mrb[92].mxu0 %v7505_v44 }
 0x6c2   :  { %6933 = vmatprep.mubr.bf16.mxu0 %v7506_v51 }
 0x6c9   :  { %6934 = vmatmul.mubr.bf16.gmra.mrb[96].mxu0 %v7507_v35 }
 0x6ca   :  { %6937 = vmatprep.mubr.bf16.mxu0 %v7508_v24 }
 0x6d1   :  { %6938 = vmatmul.mubr.bf16.gmra.mrb[100].mxu0 %v7509_v12  ;;  %v12519_v12 = vld [vmem:[#allocation56_spill] sm:$0xff] }
 0x6d2   :  { %6941 = vmatprep.mubr.bf16.mxu0 %v7510_v29 }
 0x6d9   :  { %6942 = vmatmul.mubr.bf16.gmra.mrb[104].mxu0 %v7511_v10  ;;  %v7517_v10 = vld [vmem:[%s11839_s0 + $0xd8] sm:$0xff]  }
 0x6da   :  { %6945 = vmatprep.mubr.bf16.mxu0 %v7512_v59 }
 0x6dc   :  { %v10990_v6 = vpop.f32.mrb[0].mxu0 }
 0x6dd   :  { %v10992_v13 = vpop.f32.mrb[1].mxu0  ;;  %v5393_v63 = vmul.f32 %v10990_v6, %v12510_v37 }
 0x6de   :  { %v5391_v18 = vmul.f32 %v10992_v13, %v12509_v49  ;;  %v10996_v11 = vpop.f32.mrb[2].mxu0  ;;  %v12520_v49 = vld [vmem:[#allocation61_spill] sm:$0xff] }
 0x6df   :  { %v10998_v8 = vpop.f32.mrb[3].mxu0  ;;  %v5394_v33 = vmul.f32 %v10996_v11, %v12512_v19  ;;  %v5527_v27 = vmul.f32 %v10990_v6, %v5393_v63 }
 0x6e0   :  { %v5392_v15 = vmul.f32 %v10998_v8, %v12511_v62  ;;  %v5525_v45 = vmul.f32 %v5391_v18, %v10992_v13  ;;  %v7518_v62 = vld [vmem:[%s11839_s0 + $0xe0] sm:$0xff]  }
 0x6e1   :  { %6946 = vmatmul.mubr.bf16.gmra.mrb[108].mxu0 %v7513_v58  ;;  %v5528_v26 = vmul.f32 %v10996_v11, %v5394_v33 }
 0x6e2   :  { %v5455_v3 = vadd.f32 %v5392_v15, %v5391_v18  ;;  %v5526_v1 = vmul.f32 %v5392_v15, %v10998_v8  ;;  %6949 = vmatprep.mubr.bf16.mxu0 %v7514_v46 }
 0x6e4   :  { %v5456_v56 = vadd.f32 %v5455_v3, %v5393_v63  ;;  %v5589_v25 = vadd.f32 %v5526_v1, %v5525_v45  ;;  %v11015_v23 = vpop.f32.mrb[4].mxu0 }
 0x6e5   :  { %v11017_v47 = vpop.f32.mrb[5].mxu0  ;;  %v5397_v4 = vmul.f32 %v11015_v23, %v12514_v5 }
 0x6e6   :  { %v5457_v21 = vadd.f32 %v5456_v56, %v5394_v33  ;;  %v5590_v0 = vadd.f32 %v5589_v25, %v5527_v27  ;;  %v5395_v55 = vmul.f32 %v11017_v47, %v12513_v52  ;;  %v11022_v54 = vpop.f32.mrb[6].mxu0  ;;  %v12521_v27 = vld [vmem:[#allocation63_spill] sm:$0xff] }
 0x6e7   :  { %v11026_v36 = vpop.f32.mrb[7].mxu0  ;;  %v5398_v50 = vmul.f32 %v11022_v54, %v12516_v42  ;;  %v5531_v14 = vmul.f32 %v11015_v23, %v5397_v4  ;;  %v7520_v42 = vld [vmem:[%s11839_s0 + $0xf0] sm:$0xff]  }
 0x6e8   :  { %v5591_v38 = vadd.f32 %v5590_v0, %v5528_v26  ;;  %v5458_v60 = vadd.f32 %v5457_v21, %v5395_v55  ;;  %v5529_v34 = vmul.f32 %v5395_v55, %v11017_v47  ;;  %v5396_v17 = vmul.f32 %v11026_v36, %v12515_v9  ;;  %v12522_v26 = vld [vmem:[#allocation62_spill] sm:$0xff] }
 0x6e9   :  { %6950 = vmatmul.mubr.bf16.gmra.mrb[112].mxu0 %v7515_v61  ;;  %v5532_v31 = vmul.f32 %v11022_v54, %v5398_v50  ;;  %v12524_v9 = vld [vmem:[#allocation6_spill] sm:$0xff] }
 0x6ea   :  { %v5592_v20 = vadd.f32 %v5591_v38, %v5529_v34  ;;  %v5459_v39 = vadd.f32 %v5458_v60, %v5396_v17  ;;  %v5530_v7 = vmul.f32 %v5396_v17, %v11026_v36  ;;  %6953 = vmatprep.mubr.bf16.mxu0 %v7516_v43  ;;  %v7519_v60 = vld [vmem:[%s11839_s0 + $0xe8] sm:$0xff]  }
 0x6ec   :  { %v5460_v53 = vadd.f32 %v5459_v39, %v5397_v4  ;;  %v5593_v2 = vadd.f32 %v5592_v20, %v5530_v7  ;;  %v11041_v22 = vpop.f32.mrb[8].mxu0  ;;  %v12523_v4 = vld [vmem:[#allocation4_spill] sm:$0xff] }
 0x6ed   :  { %v11043_v16 = vpop.f32.mrb[9].mxu0  ;;  %v5401_v57 = vmul.f32 %v11041_v22, %v12518_v32 }
 0x6ee   :  { %v5461_v41 = vadd.f32 %v5460_v53, %v5398_v50  ;;  %v5594_v48 = vadd.f32 %v5593_v2, %v5531_v14  ;;  %v5399_v40 = vmul.f32 %v11043_v16, %v12517_v28  ;;  %v11048_v30 = vpop.f32.mrb[10].mxu0 }
 0x6ef   :  { %v11052_v44 = vpop.f32.mrb[11].mxu0  ;;  %v5402_v18 = vmul.f32 %v11048_v30, %v12520_v49  ;;  %v5535_v15 = vmul.f32 %v11041_v22, %v5401_v57  ;;  %v12528_v49 = vld [vmem:[#allocation64_spill] sm:$0xff] }
 0x6f0   :  { %v5595_v51 = vadd.f32 %v5594_v48, %v5532_v31  ;;  %v5462_v35 = vadd.f32 %v5461_v41, %v5399_v40  ;;  %v5533_v24 = vmul.f32 %v5399_v40, %v11043_v16  ;;  %v5400_v29 = vmul.f32 %v11052_v44, %v12519_v12  ;;  %v12525_v41 = vld [vmem:[#allocation65_spill] sm:$0xff]  ;;  %v12527_v12 = vld [vmem:[#allocation67_spill] sm:$0xff] }
 0x6f1   :  { %6954 = vmatmul.mubr.bf16.gmra.mrb[116].mxu0 %v7517_v10  ;;  %v5536_v3 = vmul.f32 %v11048_v30, %v5402_v18  ;;  %v12526_v40 = vld [vmem:[#allocation5_spill] sm:$0xff]  ;;  %v7521_v10 = vld [vmem:[%s11839_s0 + $0xf8] sm:$0xff]  }
 0x6f2   :  { %v5596_v59 = vadd.f32 %v5595_v51, %v5533_v24  ;;  %v5463_v37 = vadd.f32 %v5462_v35, %v5400_v29  ;;  %v5534_v63 = vmul.f32 %v5400_v29, %v11052_v44  ;;  %6957 = vmatprep.mubr.bf16.mxu0 %v7518_v62 }
 0x6f4   :  { %v5464_v58 = vadd.f32 %v5463_v37, %v5401_v57  ;;  %v5597_v45 = vadd.f32 %v5596_v59, %v5534_v63  ;;  %v11067_v19 = vpop.f32.mrb[12].mxu0 }
 0x6f5   :  { %v11069_v33 = vpop.f32.mrb[13].mxu0  ;;  %v5405_v21 = vmul.f32 %v11067_v19, %v12522_v26 }
 0x6f6   :  { %v5465_v1 = vadd.f32 %v5464_v58, %v5402_v18  ;;  %v5598_v46 = vadd.f32 %v5597_v45, %v5535_v15  ;;  %v5403_v56 = vmul.f32 %v11069_v33, %v12521_v27  ;;  %v11074_v25 = vpop.f32.mrb[14].mxu0 }
 0x6f7   :  { %v11078_v0 = vpop.f32.mrb[15].mxu0  ;;  %v5406_v17 = vmul.f32 %v11074_v25, %v12524_v9  ;;  %v5539_v50 = vmul.f32 %v11067_v19, %v5405_v21 }
 0x6f8   :  { %v5599_v52 = vadd.f32 %v5598_v46, %v5536_v3  ;;  %v5466_v55 = vadd.f32 %v5465_v1, %v5403_v56  ;;  %v5537_v5 = vmul.f32 %v5403_v56, %v11069_v33  ;;  %v5404_v38 = vmul.f32 %v11078_v0, %v12523_v4  ;;  %v12529_v56 = vld [vmem:[#allocation66_spill] sm:$0xff] }
 0x6f9   :  { %6958 = vmatmul.mubr.bf16.gmra.mrb[120].mxu0 %v7519_v60  ;;  %v5540_v53 = vmul.f32 %v11074_v25, %v5406_v17 }
 0x6fa   :  { %v5600_v34 = vadd.f32 %v5599_v52, %v5537_v5  ;;  %v5467_v61 = vadd.f32 %v5466_v55, %v5404_v38  ;;  %v5538_v20 = vmul.f32 %v5404_v38, %v11078_v0  ;;  %6961 = vmatprep.mubr.bf16.mxu0 %v7520_v42  ;;  %v12530_v52 = vld [vmem:[#allocation71_spill] sm:$0xff] }
 0x6fc   :  { %v5468_v39 = vadd.f32 %v5467_v61, %v5405_v21  ;;  %v5601_v7 = vadd.f32 %v5600_v34, %v5538_v20  ;;  %v11093_v43 = vpop.f32.mrb[16].mxu0  ;;  %v12531_v34 = vld [vmem:[#allocation69_spill] sm:$0xff]  ;;  %v12532_v61 = vld [vmem:[#allocation12_spill] sm:$0xff] }
 0x6fd   :  { %v11095_v14 = vpop.f32.mrb[17].mxu0  ;;  %v5409_v32 = vmul.f32 %v11093_v43, %v12526_v40 }
 0x6fe   :  { %v5469_v2 = vadd.f32 %v5468_v39, %v5406_v17  ;;  %v5602_v31 = vadd.f32 %v5601_v7, %v5539_v50  ;;  %v5407_v48 = vmul.f32 %v11095_v14, %v12525_v41  ;;  %v11100_v28 = vpop.f32.mrb[18].mxu0 }
 0x6ff   :  { %v11104_v57 = vpop.f32.mrb[19].mxu0  ;;  %v5410_v18 = vmul.f32 %v11100_v28, %v12528_v49  ;;  %v5543_v62 = vmul.f32 %v11093_v43, %v5409_v32 }
 0x700   :  { %v5603_v51 = vadd.f32 %v5602_v31, %v5540_v53  ;;  %v5470_v35 = vadd.f32 %v5469_v2, %v5407_v48  ;;  %v5541_v24 = vmul.f32 %v5407_v48, %v11095_v14  ;;  %v5408_v29 = vmul.f32 %v11104_v57, %v12527_v12 }
 0x701   :  { %6962 = vmatmul.mubr.bf16.gmra.mrb[124].mxu0 %v7521_v10  ;;  %v5544_v1 = vmul.f32 %v11100_v28, %v5410_v18 }
 0x702   :  { %v5604_v59 = vadd.f32 %v5603_v51, %v5541_v24  ;;  %v5471_v37 = vadd.f32 %v5470_v35, %v5408_v29  ;;  %v5542_v63 = vmul.f32 %v5408_v29, %v11104_v57  ;;  %v12535_v24 = vld [vmem:[#allocation73_spill] sm:$0xff] }
 0x704   :  { %v5472_v15 = vadd.f32 %v5471_v37, %v5409_v32  ;;  %v5605_v58 = vadd.f32 %v5604_v59, %v5542_v63  ;;  %v11116_v45 = vpop.f32.mrb[20].mxu0  ;;  %v12533_v32 = vld [vmem:[#allocation70_spill] sm:$0xff] }
 0x705   :  { %v11118_v3 = vpop.f32.mrb[21].mxu0  ;;  %v5413_v55 = vmul.f32 %v11116_v45, %v12530_v52 }
 0x706   :  { %v5473_v46 = vadd.f32 %v5472_v15, %v5410_v18  ;;  %v5606_v27 = vadd.f32 %v5605_v58, %v5543_v62  ;;  %v5411_v26 = vmul.f32 %v11118_v3, %v12529_v56  ;;  %v11123_v21 = vpop.f32.mrb[22].mxu0  ;;  %v12537_v18 = vld [vmem:[#allocation15_spill] sm:$0xff] }
 0x707   :  { %v11127_v5 = vpop.f32.mrb[23].mxu0  ;;  %v5414_v20 = vmul.f32 %v11123_v21, %v12532_v61  ;;  %v5547_v39 = vmul.f32 %v11116_v45, %v5413_v55  ;;  %v12538_v62 = vld [vmem:[#allocation75_spill] sm:$0xff] }
 0x708   :  { %v5607_v4 = vadd.f32 %v5606_v27, %v5544_v1  ;;  %v5474_v38 = vadd.f32 %v5473_v46, %v5411_v26  ;;  %v5545_v60 = vmul.f32 %v5411_v26, %v11118_v3  ;;  %v5412_v9 = vmul.f32 %v11127_v5, %v12531_v34 }
 0x709   :  { %v5548_v41 = vmul.f32 %v11123_v21, %v5414_v20 }
 0x70a   :  { %v5608_v17 = vadd.f32 %v5607_v4, %v5545_v60  ;;  %v5475_v42 = vadd.f32 %v5474_v38, %v5412_v9  ;;  %v5546_v50 = vmul.f32 %v5412_v9, %v11127_v5  ;;  %v12541_v60 = vld [vmem:[#allocation14_spill] sm:$0xff] }
 0x70c   :  { %v5476_v7 = vadd.f32 %v5475_v42, %v5413_v55  ;;  %v5609_v53 = vadd.f32 %v5608_v17, %v5546_v50  ;;  %v11136_v2 = vpop.f32.mrb[24].mxu0  ;;  %v12543_v17 = vld [vmem:[#allocation74_spill] sm:$0xff] }
 0x70d   :  { %v11138_v31 = vpop.f32.mrb[25].mxu0  ;;  %v5417_v12 = vmul.f32 %v11136_v2, %v12535_v24 }
 0x70e   :  { %v5477_v48 = vadd.f32 %v5476_v7, %v5414_v20  ;;  %v5610_v40 = vadd.f32 %v5609_v53, %v5547_v39  ;;  %v5415_v51 = vmul.f32 %v11138_v31, %v12533_v32  ;;  %v11143_v35 = vpop.f32.mrb[26].mxu0  ;;  %v12545_v7 = vld [vmem:[#allocation72_spill] sm:$0xff] }
 0x70f   :  { %12534 = vst [vmem:[#allocation84_spill] sm:$0xff] %v11143_v35  ;;  %v11147_v29 = vpop.f32.mrb[27].mxu0  ;;  %v5418_v15 = vmul.f32 %v11143_v35, %v12538_v62  ;;  %v5551_v46 = vmul.f32 %v11136_v2, %v5417_v12 }
 0x710   :  { %12536 = vst [vmem:[#allocation43_spill] sm:$0xff] %v11147_v29  ;;  %v5611_v10 = vadd.f32 %v5610_v40, %v5548_v41  ;;  %v5478_v59 = vadd.f32 %v5477_v48, %v5415_v51  ;;  %v5549_v49 = vmul.f32 %v5415_v51, %v11138_v31  ;;  %v5416_v37 = vmul.f32 %v11147_v29, %v12537_v18  ;;  %v12546_v48 = vld [vmem:[#allocation21_spill] sm:$0xff] }
 0x711   :  { %v5552_v55 = vmul.f32 %v11143_v35, %v5418_v15 }
 0x712   :  { %v5612_v63 = vadd.f32 %v5611_v10, %v5549_v49  ;;  %v5479_v58 = vadd.f32 %v5478_v59, %v5416_v37  ;;  %v5550_v1 = vmul.f32 %v5416_v37, %v11147_v29 }
 0x714   :  { %v5480_v27 = vadd.f32 %v5479_v58, %v5417_v12  ;;  %v5613_v56 = vadd.f32 %v5612_v63, %v5550_v1  ;;  %v11156_v26 = vpop.f32.mrb[28].mxu0  ;;  %v12549_v63 = vld [vmem:[#allocation77_spill] sm:$0xff] }
 0x715   :  { %12539 = vst [vmem:[#allocation45_spill] sm:$0xff] %v11156_v26  ;;  %v11158_v52 = vpop.f32.mrb[29].mxu0  ;;  %v5421_v61 = vmul.f32 %v11156_v26, %v12543_v17  ;;  %v12551_v1 = vld [vmem:[#allocation29_spill] sm:$0xff]  ;;  %v12554_v17 = vld [vmem:[#allocation76_spill] sm:$0xff] }
 0x716   :  { %12540 = vst [vmem:[#allocation90_spill] sm:$0xff] %v11158_v52  ;;  %v5481_v4 = vadd.f32 %v5480_v27, %v5418_v15  ;;  %v5614_v38 = vadd.f32 %v5613_v56, %v5551_v46  ;;  %v5419_v34 = vmul.f32 %v11158_v52, %v12541_v60  ;;  %v11163_v9 = vpop.f32.mrb[30].mxu0 }
 0x717   :  { %12542 = vst [vmem:[#allocation48_spill] sm:$0xff] %v11163_v9  ;;  %v11167_v20 = vpop.f32.mrb[31].mxu0  ;;  %v5422_v40 = vmul.f32 %v11163_v9, %v12546_v48  ;;  %v5555_v24 = vmul.f32 %v11156_v26, %v5421_v61 }
 0x718   :  { %12544 = vst [vmem:[#allocation92_spill] sm:$0xff] %v11167_v20  ;;  %v5615_v42 = vadd.f32 %v5614_v38, %v5552_v55  ;;  %v5482_v50 = vadd.f32 %v5481_v4, %v5419_v34  ;;  %v5553_v39 = vmul.f32 %v5419_v34, %v11158_v52  ;;  %v5420_v53 = vmul.f32 %v11167_v20, %v12545_v7  ;;  %v12553_v38 = vld [vmem:[#allocation79_spill] sm:$0xff] }
 0x719   :  { %v5556_v18 = vmul.f32 %v11163_v9, %v5422_v40 }
 0x71a   :  { %v5616_v41 = vadd.f32 %v5615_v42, %v5553_v39  ;;  %v5483_v32 = vadd.f32 %v5482_v50, %v5420_v53  ;;  %v5554_v51 = vmul.f32 %v5420_v53, %v11167_v20 }
 0x71c   :  { %v5484_v12 = vadd.f32 %v5483_v32, %v5421_v61  ;;  %v5617_v10 = vadd.f32 %v5616_v41, %v5554_v51  ;;  %v11176_v59 = vpop.f32.mrb[32].mxu0  ;;  %v12557_v51 = vld [vmem:[#allocation78_spill] sm:$0xff] }
 0x71d   :  { %12547 = vst [vmem:[#allocation22_spill] sm:$0xff] %v11176_v59  ;;  %v11178_v49 = vpop.f32.mrb[33].mxu0  ;;  %v5425_v46 = vmul.f32 %v11176_v59, %v12551_v1 }
 0x71e   :  { %12548 = vst [vmem:[#allocation27_spill] sm:$0xff] %v11178_v49  ;;  %v5618_v37 = vadd.f32 %v5617_v10, %v5555_v24  ;;  %v5423_v62 = vmul.f32 %v11178_v49, %v12549_v63  ;;  %v5485_v15 = vadd.f32 %v5484_v12, %v5422_v40  ;;  %v11183_v58 = vpop.f32.mrb[34].mxu0 }
 0x71f   :  { %12550 = vst [vmem:[#allocation40_spill] sm:$0xff] %v11183_v58  ;;  %v11187_v27 = vpop.f32.mrb[35].mxu0  ;;  %v5426_v61 = vmul.f32 %v11183_v58, %v12554_v17  ;;  %v5559_v39 = vmul.f32 %v11176_v59, %v5425_v46 }
 0x720   :  { %12552 = vst [vmem:[#allocation26_spill] sm:$0xff] %v11187_v27  ;;  %v5486_v56 = vadd.f32 %v5485_v15, %v5423_v62  ;;  %v5557_v55 = vmul.f32 %v5423_v62, %v11178_v49  ;;  %v5619_v4 = vadd.f32 %v5618_v37, %v5556_v18  ;;  %v5424_v60 = vmul.f32 %v11187_v27, %v12553_v38  ;;  %v12559_v18 = vld [vmem:[#allocation81_spill] sm:$0xff] }
 0x721   :  { %v5560_v40 = vmul.f32 %v11183_v58, %v5426_v61 }
 0x722   :  { %v5620_v34 = vadd.f32 %v5619_v4, %v5557_v55  ;;  %v5487_v42 = vadd.f32 %v5486_v56, %v5424_v60  ;;  %v5558_v50 = vmul.f32 %v5424_v60, %v11187_v27  ;;  %v12562_v4 = vld [vmem:[#allocation83_spill] sm:$0xff] }
 0x724   :  { %v5488_v7 = vadd.f32 %v5487_v42, %v5425_v46  ;;  %v5621_v53 = vadd.f32 %v5620_v34, %v5558_v50  ;;  %v11196_v41 = vpop.f32.mrb[36].mxu0  ;;  %v12561_v46 = vld [vmem:[#allocation31_spill] sm:$0xff] }
 0x725   :  { %12555 = vst [vmem:[#allocation3_spill] sm:$0xff] %v11196_v41  ;;  %v11198_v48 = vpop.f32.mrb[37].mxu0  ;;  %v5429_v37 = vmul.f32 %v11196_v41, %v12559_v18 }
 0x726   :  { %12556 = vst [vmem:[#allocation60_spill] sm:$0xff] %v11198_v48  ;;  %v5622_v32 = vadd.f32 %v5621_v53, %v5559_v39  ;;  %v5427_v24 = vmul.f32 %v11198_v48, %v12557_v51  ;;  %v5489_v12 = vadd.f32 %v5488_v7, %v5426_v61  ;;  %v11203_v10 = vpop.f32.mrb[38].mxu0 }
 0x727   :  { %12558 = vst [vmem:[#allocation8_spill] sm:$0xff] %v11203_v10  ;;  %v11207_v63 = vpop.f32.mrb[39].mxu0  ;;  %v5430_v38 = vmul.f32 %v11203_v10, %v12562_v4  ;;  %v5563_v17 = vmul.f32 %v11196_v41, %v5429_v37  ;;  %v12570_v4 = vld [vmem:[#allocation35_spill] sm:$0xff] }
 0x728   :  { %12560 = vst [vmem:[#allocation7_spill] sm:$0xff] %v11207_v63  ;;  %v5490_v62 = vadd.f32 %v5489_v12, %v5427_v24  ;;  %v5561_v15 = vmul.f32 %v5427_v24, %v11198_v48  ;;  %v5623_v1 = vadd.f32 %v5622_v32, %v5560_v40  ;;  %v5428_v56 = vmul.f32 %v11207_v63, %v12561_v46  ;;  %v12565_v40 = vld [vmem:[#allocation33_spill] sm:$0xff]  ;;  %v12567_v12 = vld [vmem:[#allocation34_spill] sm:$0xff]  ;;  %v12569_v46 = vld [vmem:[#allocation80_spill] sm:$0xff] }
 0x729   :  { %v5564_v7 = vmul.f32 %v11203_v10, %v5430_v38 }
 0x72a   :  { %v5624_v55 = vadd.f32 %v5623_v1, %v5561_v15  ;;  %v5491_v60 = vadd.f32 %v5490_v62, %v5428_v56  ;;  %v5562_v34 = vmul.f32 %v5428_v56, %v11207_v63 }
 0x72c   :  { %v5492_v61 = vadd.f32 %v5491_v60, %v5429_v37  ;;  %v5625_v42 = vadd.f32 %v5624_v55, %v5562_v34  ;;  %v11216_v50 = vpop.f32.mrb[40].mxu0 }
 0x72d   :  { %12563 = vst [vmem:[#allocation11_spill] sm:$0xff] %v11216_v50  ;;  %v11218_v39 = vpop.f32.mrb[41].mxu0  ;;  %v5433_v18 = vmul.f32 %v11216_v50, %v12567_v12 }
 0x72e   :  { %12564 = vst [vmem:[#allocation13_spill] sm:$0xff] %v11218_v39  ;;  %v5626_v53 = vadd.f32 %v5625_v42, %v5563_v17  ;;  %v5431_v32 = vmul.f32 %v11218_v39, %v12565_v40  ;;  %v5493_v51 = vadd.f32 %v5492_v61, %v5430_v38  ;;  %v11223_v24 = vpop.f32.mrb[42].mxu0 }
 0x72f   :  { %12566 = vst [vmem:[#allocation9_spill] sm:$0xff] %v11223_v24  ;;  %v11227_v62 = vpop.f32.mrb[43].mxu0  ;;  %v5434_v60 = vmul.f32 %v11223_v24, %v12570_v4  ;;  %v5567_v17 = vmul.f32 %v11216_v50, %v5433_v18 }
 0x730   :  { %12568 = vst [vmem:[#allocation68_spill] sm:$0xff] %v11227_v62  ;;  %v5494_v37 = vadd.f32 %v5493_v51, %v5431_v32  ;;  %v5565_v15 = vmul.f32 %v5431_v32, %v11218_v39  ;;  %v5627_v1 = vadd.f32 %v5626_v53, %v5564_v7  ;;  %v5432_v56 = vmul.f32 %v11227_v62, %v12569_v46  ;;  %v12573_v32 = vld [vmem:[#allocation85_spill] sm:$0xff] }
 0x731   :  { %v5568_v7 = vmul.f32 %v11223_v24, %v5434_v60 }
 0x732   :  { %v5628_v55 = vadd.f32 %v5627_v1, %v5565_v15  ;;  %v5495_v34 = vadd.f32 %v5494_v37, %v5432_v56  ;;  %v5566_v38 = vmul.f32 %v5432_v56, %v11227_v62  ;;  %v12575_v37 = vld [vmem:[#allocation37_spill] sm:$0xff] }
 0x734   :  { %v5496_v61 = vadd.f32 %v5495_v34, %v5433_v18  ;;  %v5629_v42 = vadd.f32 %v5628_v55, %v5566_v38  ;;  %v11236_v40 = vpop.f32.mrb[44].mxu0  ;;  %v12577_v34 = vld [vmem:[#allocation36_spill] sm:$0xff] }
 0x735   :  { %12571 = vst [vmem:[#allocation17_spill] sm:$0xff] %v11236_v40  ;;  %v11238_v51 = vpop.f32.mrb[45].mxu0  ;;  %v5437_v46 = vmul.f32 %v11236_v40, %v12575_v37 }
 0x736   :  { %12572 = vst [vmem:[#allocation16_spill] sm:$0xff] %v11238_v51  ;;  %v5630_v53 = vadd.f32 %v5629_v42, %v5567_v17  ;;  %v5435_v12 = vmul.f32 %v11238_v51, %v12573_v32  ;;  %v5497_v15 = vadd.f32 %v5496_v61, %v5434_v60  ;;  %v11243_v1 = vpop.f32.mrb[46].mxu0  ;;  %v12578_v17 = vld [vmem:[#allocation86_spill] sm:$0xff] }
 0x737   :  { %12574 = vst [vmem:[#allocation19_spill] sm:$0xff] %v11243_v1  ;;  %v11247_v56 = vpop.f32.mrb[47].mxu0  ;;  %v5438_v42 = vmul.f32 %v11243_v1, %v12578_v17  ;;  %v5571_v61 = vmul.f32 %v11236_v40, %v5437_v46 }
 0x738   :  { %12576 = vst [vmem:[#allocation30_spill] sm:$0xff] %v11247_v56  ;;  %v5498_v18 = vadd.f32 %v5497_v15, %v5435_v12  ;;  %v5569_v55 = vmul.f32 %v5435_v12, %v11238_v51  ;;  %v5631_v4 = vadd.f32 %v5630_v53, %v5568_v7  ;;  %v5436_v38 = vmul.f32 %v11247_v56, %v12577_v34  ;;  %v12581_v12 = vld [vmem:[#allocation38_spill] sm:$0xff] }
 0x739   :  { %v5572_v7 = vmul.f32 %v11243_v1, %v5438_v42 }
 0x73a   :  { %v5632_v62 = vadd.f32 %v5631_v4, %v5569_v55  ;;  %v5499_v32 = vadd.f32 %v5498_v18, %v5436_v38  ;;  %v5570_v60 = vmul.f32 %v5436_v38, %v11247_v56  ;;  %v12583_v18 = vld [vmem:[#allocation41_spill] sm:$0xff] }
 0x73c   :  { %v5500_v24 = vadd.f32 %v5499_v32, %v5437_v46  ;;  %v5633_v37 = vadd.f32 %v5632_v62, %v5570_v60  ;;  %v11256_v39 = vpop.f32.mrb[48].mxu0  ;;  %v12585_v60 = vld [vmem:[#allocation39_spill] sm:$0xff] }
 0x73d   :  { %12579 = vst [vmem:[#allocation10_spill] sm:$0xff] %v11256_v39  ;;  %v11258_v15 = vpop.f32.mrb[49].mxu0  ;;  %v5441_v38 = vmul.f32 %v11256_v39, %v12583_v18 }
 0x73e   :  { %12580 = vst [vmem:[#allocation32_spill] sm:$0xff] %v11258_v15  ;;  %v5634_v53 = vadd.f32 %v5633_v37, %v5571_v61  ;;  %v5439_v55 = vmul.f32 %v11258_v15, %v12581_v12  ;;  %v5501_v4 = vadd.f32 %v5500_v24, %v5438_v42  ;;  %v11263_v34 = vpop.f32.mrb[50].mxu0  ;;  %v12586_v61 = vld [vmem:[#allocation88_spill] sm:$0xff] }
 0x73f   :  { %12582 = vst [vmem:[#allocation82_spill] sm:$0xff] %v11263_v34  ;;  %v11267_v17 = vpop.f32.mrb[51].mxu0  ;;  %v5442_v37 = vmul.f32 %v11263_v34, %v12586_v61  ;;  %v5575_v42 = vmul.f32 %v11256_v39, %v5441_v38 }
 0x740   :  { %12584 = vst [vmem:[#allocation87_spill] sm:$0xff] %v11267_v17  ;;  %v5502_v46 = vadd.f32 %v5501_v4, %v5439_v55  ;;  %v5573_v62 = vmul.f32 %v5439_v55, %v11258_v15  ;;  %v5635_v32 = vadd.f32 %v5634_v53, %v5572_v7  ;;  %v5440_v56 = vmul.f32 %v11267_v17, %v12585_v60  ;;  %v12589_v55 = vld [vmem:[#allocation42_spill] sm:$0xff] }
 0x741   :  { %v5576_v7 = vmul.f32 %v11263_v34, %v5442_v37 }
 0x742   :  { %v5636_v1 = vadd.f32 %v5635_v32, %v5573_v62  ;;  %v5503_v12 = vadd.f32 %v5502_v46, %v5440_v56  ;;  %v5574_v24 = vmul.f32 %v5440_v56, %v11267_v17  ;;  %v12591_v46 = vld [vmem:[#allocation44_spill] sm:$0xff] }
 0x744   :  { %v5504_v51 = vadd.f32 %v5503_v12, %v5441_v38  ;;  %v5637_v18 = vadd.f32 %v5636_v1, %v5574_v24  ;;  %v11276_v40 = vpop.f32.mrb[52].mxu0  ;;  %v12593_v24 = vld [vmem:[#allocation91_spill] sm:$0xff] }
 0x745   :  { %12587 = vst [vmem:[#allocation53_spill] sm:$0xff] %v11276_v40  ;;  %v11278_v4 = vpop.f32.mrb[53].mxu0  ;;  %v5445_v56 = vmul.f32 %v11276_v40, %v12591_v46 }
 0x746   :  { %12588 = vst [vmem:[#allocation18_spill] sm:$0xff] %v11278_v4  ;;  %v5638_v53 = vadd.f32 %v5637_v18, %v5575_v42  ;;  %v5443_v62 = vmul.f32 %v11278_v4, %v12589_v55  ;;  %v5505_v32 = vadd.f32 %v5504_v51, %v5442_v37  ;;  %v11283_v60 = vpop.f32.mrb[54].mxu0  ;;  %v12594_v42 = vld [vmem:[#allocation89_spill] sm:$0xff] }
 0x747   :  { %12590 = vst [vmem:[#allocation54_spill] sm:$0xff] %v11283_v60  ;;  %v11287_v61 = vpop.f32.mrb[55].mxu0  ;;  %v5446_v18 = vmul.f32 %v11283_v60, %v12594_v42  ;;  %v5579_v37 = vmul.f32 %v11276_v40, %v5445_v56 }
 0x748   :  { %12592 = vst [vmem:[#allocation20_spill] sm:$0xff] %v11287_v61  ;;  %v5506_v38 = vadd.f32 %v5505_v32, %v5443_v62  ;;  %v5577_v1 = vmul.f32 %v5443_v62, %v11278_v4  ;;  %v5639_v12 = vadd.f32 %v5638_v53, %v5576_v7  ;;  %v5444_v17 = vmul.f32 %v11287_v61, %v12593_v24  ;;  %v12597_v62 = vld [vmem:[#allocation46_spill] sm:$0xff] }
 0x749   :  { %v5580_v7 = vmul.f32 %v11283_v60, %v5446_v18 }
 0x74a   :  { %v5640_v34 = vadd.f32 %v5639_v12, %v5577_v1  ;;  %v5507_v55 = vadd.f32 %v5506_v38, %v5444_v17  ;;  %v5578_v51 = vmul.f32 %v5444_v17, %v11287_v61  ;;  %v12599_v38 = vld [vmem:[#allocation94_spill] sm:$0xff] }
 0x74c   :  { %v5508_v15 = vadd.f32 %v5507_v55, %v5445_v56  ;;  %v5641_v46 = vadd.f32 %v5640_v34, %v5578_v51  ;;  %v11296_v39 = vpop.f32.mrb[56].mxu0  ;;  %v12601_v51 = vld [vmem:[#allocation47_spill] sm:$0xff] }
 0x74d   :  { %12595 = vst [vmem:[#allocation55_spill] sm:$0xff] %v11296_v39  ;;  %v11298_v32 = vpop.f32.mrb[57].mxu0  ;;  %v5449_v17 = vmul.f32 %v11296_v39, %v12599_v38 }
 0x74e   :  { %12596 = vst [vmem:[#allocation23_spill] sm:$0xff] %v11298_v32  ;;  %v5642_v53 = vadd.f32 %v5641_v46, %v5579_v37  ;;  %v5447_v1 = vmul.f32 %v11298_v32, %v12597_v62  ;;  %v5509_v12 = vadd.f32 %v5508_v15, %v5446_v18  ;;  %v11303_v24 = vpop.f32.mrb[58].mxu0  ;;  %v12602_v37 = vld [vmem:[#allocation49_spill] sm:$0xff] }
 0x74f   :  { %12598 = vst [vmem:[#allocation57_spill] sm:$0xff] %v11303_v24  ;;  %v11307_v42 = vpop.f32.mrb[59].mxu0  ;;  %v5450_v46 = vmul.f32 %v11303_v24, %v12602_v37  ;;  %v5583_v18 = vmul.f32 %v11296_v39, %v5449_v17 }
 0x750   :  { %12600 = vst [vmem:[#allocation25_spill] sm:$0xff] %v11307_v42  ;;  %v5510_v56 = vadd.f32 %v5509_v12, %v5447_v1  ;;  %v5581_v34 = vmul.f32 %v5447_v1, %v11298_v32  ;;  %v5643_v55 = vadd.f32 %v5642_v53, %v5580_v7  ;;  %v5448_v61 = vmul.f32 %v11307_v42, %v12601_v51  ;;  %v12605_v1 = vld [vmem:[#allocation93_spill] sm:$0xff] }
 0x751   :  { %v5584_v7 = vmul.f32 %v11303_v24, %v5450_v46 }
 0x752   :  { %v5644_v60 = vadd.f32 %v5643_v55, %v5581_v34  ;;  %v5511_v62 = vadd.f32 %v5510_v56, %v5448_v61  ;;  %v5582_v15 = vmul.f32 %v5448_v61, %v11307_v42  ;;  %v12607_v56 = vld [vmem:[#allocation51_spill] sm:$0xff] }
 0x754   :  { %v5512_v4 = vadd.f32 %v5511_v62, %v5449_v17  ;;  %v5645_v38 = vadd.f32 %v5644_v60, %v5582_v15  ;;  %v11316_v40 = vpop.f32.mrb[60].mxu0  ;;  %v12608_v15 = vld [vmem:[#allocation50_spill] sm:$0xff] }
 0x755   :  { %12603 = vst [vmem:[#allocation59_spill] sm:$0xff] %v11316_v40  ;;  %v11318_v12 = vpop.f32.mrb[61].mxu0  ;;  %v5453_v61 = vmul.f32 %v11316_v40, %v12607_v56 }
 0x756   :  { %12604 = vst [vmem:[#allocation24_spill] sm:$0xff] %v11318_v12  ;;  %v5646_v53 = vadd.f32 %v5645_v38, %v5583_v18  ;;  %v5451_v34 = vmul.f32 %v11318_v12, %v12605_v1  ;;  %v5513_v55 = vadd.f32 %v5512_v4, %v5450_v46  ;;  %v11323_v51 = vpop.f32.mrb[62].mxu0  ;;  %v12609_v18 = vld [vmem:[#allocation52_spill] sm:$0xff] }
 0x757   :  { %12606 = vst [vmem:[#allocation58_spill] sm:$0xff] %v11323_v51  ;;  %v11327_v37 = vpop.f32.mrb[63].mxu0  ;;  %v5454_v38 = vmul.f32 %v11323_v51, %v12609_v18  ;;  %v5587_v46 = vmul.f32 %v11316_v40, %v5453_v61 }
 0x758   :  { %v5514_v17 = vadd.f32 %v5513_v55, %v5451_v34  ;;  %v5585_v60 = vmul.f32 %v5451_v34, %v11318_v12  ;;  %v5647_v62 = vadd.f32 %v5646_v53, %v5584_v7  ;;  %v5452_v42 = vmul.f32 %v11327_v37, %v12608_v15 }
 0x759   :  { %v5588_v7 = vmul.f32 %v11323_v51, %v5454_v38 }
 0x75a   :  { %v5648_v24 = vadd.f32 %v5647_v62, %v5585_v60  ;;  %v5515_v1 = vadd.f32 %v5514_v17, %v5452_v42  ;;  %v5586_v4 = vmul.f32 %v5452_v42, %v11327_v37 }
 0x75c   :  { %v5516_v32 = vadd.f32 %v5515_v1, %v5453_v61  ;;  %v5649_v56 = vadd.f32 %v5648_v24, %v5586_v4  ;;  %v11336_v39 = vpop.f32.mrb[64].mxu0 }
 0x75d   :  { %v11338_v55 = vpop.f32.mrb[65].mxu0 }
 0x75e   :  { %v5517_v53 = vadd.f32 %v5516_v32, %v5454_v38  ;;  %v5650_v34 = vadd.f32 %v5649_v56, %v5587_v46  ;;  %v11341_v15 = vpop.f32.mrb[66].mxu0 }
 0x75f   :  { %v11343_v60 = vpop.f32.mrb[67].mxu0 }
 0x760   :  { %v5518_v62 = vrot.slane %v5517_v53, 4  ;;  %v5651_v17 = vadd.f32 %v5650_v34, %v5588_v7 }
 0x762   :  { %v5519_v18 = vadd.f32 %v5518_v62, %v5517_v53  ;;  %v5652_v42 = vrot.slane %v5651_v17, 4 }
 0x764   :  { %v5520_v12 = vrot.slane %v5519_v18, 2  ;;  %v5653_v40 = vadd.f32 %v5652_v42, %v5651_v17  ;;  %v11345_v61 = vpop.f32.mrb[68].mxu0 }
 0x765   :  { %v11347_v24 = vpop.f32.mrb[69].mxu0 }
 0x766   :  { %v5521_v1 = vadd.f32 %v5520_v12, %v5519_v18  ;;  %v5654_v4 = vrot.slane %v5653_v40, 2  ;;  %v11349_v50 = vpop.f32.mrb[70].mxu0 }
 0x767   :  { %v11351_v32 = vpop.f32.mrb[71].mxu0 }
 0x768   :  { %v5522_v38 = vrot.slane %v5521_v1, 1  ;;  %v5655_v46 = vadd.f32 %v5654_v4, %v5653_v40 }
 0x76a   :  { %v5523_v56 = vadd.f32 %v5522_v38, %v5521_v1  ;;  %v5656_v51 = vrot.slane %v5655_v46, 1 }
 0x76c   :  { %v5524_v63 = vmul.f32 0.0078125, %v5523_v56  ;;  %v5657_v7 = vadd.f32 %v5656_v51, %v5655_v46  ;;  %v11353_v53 = vpop.f32.mrb[72].mxu0  ;;  %v5389_v46 = vld [vmem:[%s11849_s9] sm:$0x1] }
 0x76d   :  { %v11355_v34 = vpop.f32.mrb[73].mxu0 }
 0x76e   :  { %v5658_v62 = vmul.f32 0.0078125, %v5657_v7  ;;  %v5659_v17 = vmul.f32 %v5524_v63, %v5524_v63  ;;  %v11357_v42 = vpop.f32.mrb[74].mxu0 }
 0x76f   :  { %v11359_v12 = vpop.f32.mrb[75].mxu0 }
 0x770   :  { %v5660_v18 = vsub.f32 %v5658_v62, %v5659_v17  ;;  %v12610_v17 = vld [vmem:[#allocation28_spill] sm:$0xff] }
 0x772   :  { %v5661_v10 = vmax.f32 %v5660_v18, 0.0 }
 0x774   :  { %v5662_v48 = vadd.f32 1e-05, %v5661_v10  ;;  %v11361_v41 = vpop.f32.mrb[76].mxu0 }
 0x775   :  { %v11363_v40 = vpop.f32.mrb[77].mxu0 }
 0x776   :  { %7485 = vrsqrt.f32 %v5662_v48  ;;  %v11365_v1 = vpop.f32.mrb[78].mxu0  ;;  %v5390_v48 = vld [vmem:[%s11850_s10] sm:$0x1] }
 0x777   :  { %v11367_v51 = vpop.f32.mrb[79].mxu0 }
 0x77c   :  { %v11369_v4 = vpop.f32.mrb[80].mxu0 }
 0x77d   :  { %v11371_v38 = vpop.f32.mrb[81].mxu0 }
 0x77e   :  { %v11376_v56 = vpop.f32.mrb[82].mxu0 }
 0x77f   :  { %v11378_v10 = vpop.f32.mrb[83].mxu0 }
 0x780   :  { %v7486_v7 = vpop.eup %7485 }
 0x781   :  { %v5664_v62 = vmul.f32 %v7486_v7, %v5389_v46 }
 0x783   :  { %v11384_v18 = vrot.slane %v5664_v62, %v12610_v17  ;;  %v5735_v27 = vmul.f32 %v5664_v62, %v5524_v63 }
 0x784   :  { %v11386_v58 = vpop.f32.mrb[84].mxu0 }
 0x785   :  { %v11390_v49 = vmul.f32 %v11384_v18, %v11327_v37  ;;  %v5736_v59 = vsub.f32 %v5390_v48, %v5735_v27  ;;  %v5673_v20 = vmul.f32 %v10990_v6, %v11384_v18  ;;  %v5671_v46 = vmul.f32 %v11384_v18, %v10992_v13  ;;  %v11396_v7 = vpop.f32.mrb[85].mxu0 }
 0x786   :  { %v5674_v9 = vmul.f32 %v10996_v11, %v11384_v18  ;;  %v5672_v63 = vmul.f32 %v11384_v18, %v10998_v8  ;;  %v5677_v62 = vmul.f32 %v11015_v23, %v11384_v18  ;;  %v5675_v27 = vmul.f32 %v11384_v18, %v11017_v47  ;;  %v11406_v37 = vpop.f32.mrb[86].mxu0 }
 0x787   :  { %12611 = vst [vmem:[#allocation56_spill] sm:$0xff] %v11390_v49  ;;  %v11409_v6 = vrot.slane %v5736_v59, %v12610_v17  ;;  %v5678_v13 = vmul.f32 %v11022_v54, %v11384_v18  ;;  %v5676_v11 = vmul.f32 %v11384_v18, %v11026_v36  ;;  %v5681_v8 = vmul.f32 %v11041_v22, %v11384_v18  ;;  %v11417_v48 = vpop.f32.mrb[87].mxu0 }
 0x788   :  { %v5679_v23 = vmul.f32 %v11384_v18, %v11043_v16  ;;  %v5682_v47 = vmul.f32 %v11048_v30, %v11384_v18  ;;  %v5680_v59 = vmul.f32 %v11384_v18, %v11052_v44  ;;  %v5685_v54 = vmul.f32 %v11067_v19, %v11384_v18 }
 0x789   :  { %v5745_v17 = vadd.f32 %v11409_v6, %v5673_v20  ;;  %v5743_v36 = vadd.f32 %v11409_v6, %v5671_v46  ;;  %v5746_v22 = vadd.f32 %v11409_v6, %v5674_v9  ;;  %v5744_v49 = vadd.f32 %v11409_v6, %v5672_v63 }
 0x78a   :  { %v5749_v52 = vadd.f32 %v11409_v6, %v5677_v62  ;;  %v5747_v16 = vadd.f32 %v11409_v6, %v5675_v27  ;;  %v5750_v30 = vadd.f32 %v11409_v6, %v5678_v13  ;;  %v5748_v26 = vadd.f32 %v11409_v6, %v5676_v11 }
 0x78b   :  { %v6162_v44 = vadd.f32 %v11336_v39, %v5745_v17  ;;  %v6160_v19 = vadd.f32 %v11338_v55, %v5743_v36  ;;  %v6163_v20 = vadd.f32 %v11341_v15, %v5746_v22  ;;  %v6161_v46 = vadd.f32 %v11343_v60, %v5744_v49 }
 0x78c   :  { %v6166_v9 = vadd.f32 %v11345_v61, %v5749_v52  ;;  %v6164_v63 = vadd.f32 %v11347_v24, %v5747_v16  ;;  %v6167_v62 = vadd.f32 %v11349_v50, %v5750_v30  ;;  %v6165_v27 = vadd.f32 %v11351_v32, %v5748_v26  ;;  %v11443_v29 = vpop.f32.mrb[88].mxu0 }
 0x78d   :  { %v6226_v13 = vmax.f32 %v6162_v44, 0.0  ;;  %v6224_v11 = vmax.f32 %v6160_v19, 0.0  ;;  %v6227_v35 = vmax.f32 %v6163_v20, 0.0  ;;  %v6225_v39 = vmax.f32 %v6161_v46, 0.0  ;;  %v11445_v17 = vpop.f32.mrb[89].mxu0 }
 0x78e   :  { %v6230_v55 = vmax.f32 %v6166_v9, 0.0  ;;  %v6228_v15 = vmax.f32 %v6164_v63, 0.0  ;;  %v6231_v36 = vmax.f32 %v6167_v62, 0.0  ;;  %v6229_v49 = vmax.f32 %v6165_v27, 0.0  ;;  %v11447_v60 = vpop.f32.mrb[90].mxu0 }
 0x78f   :  { %6290 = vst [vmem:[%s11851_s13 + $0x10] sm:$0xff] %v6226_v13  ;;  %6288 = vst [vmem:[%s11851_s13] sm:$0xff] %v6224_v11  ;;  %v5753_v26 = vadd.f32 %v11409_v6, %v5681_v8  ;;  %v5751_v52 = vadd.f32 %v11409_v6, %v5679_v23  ;;  %v5754_v50 = vadd.f32 %v11409_v6, %v5682_v47  ;;  %v11465_v24 = vpop.f32.mrb[91].mxu0 }
 0x790   :  { %6291 = vst [vmem:[%s11851_s13 + $0x18] sm:$0xff] %v6227_v35  ;;  %6289 = vst [vmem:[%s11851_s13 + $0x8] sm:$0xff] %v6225_v39  ;;  %v5752_v61 = vadd.f32 %v11409_v6, %v5680_v59  ;;  %v5757_v35 = vadd.f32 %v11409_v6, %v5685_v54  ;;  %v5683_v32 = vmul.f32 %v11384_v18, %v11069_v33 }
 0x791   :  { %6294 = vst [vmem:[%s11851_s13 + $0x30] sm:$0xff] %v6230_v55  ;;  %6292 = vst [vmem:[%s11851_s13 + $0x20] sm:$0xff] %v6228_v15  ;;  %v5686_v8 = vmul.f32 %v11074_v25, %v11384_v18  ;;  %v5684_v23 = vmul.f32 %v11384_v18, %v11078_v0  ;;  %v6170_v47 = vadd.f32 %v11353_v53, %v5753_v26 }
 0x792   :  { %6295 = vst [vmem:[%s11851_s13 + $0x38] sm:$0xff] %v6231_v36  ;;  %6293 = vst [vmem:[%s11851_s13 + $0x28] sm:$0xff] %v6229_v49  ;;  %v6168_v59 = vadd.f32 %v11355_v34, %v5751_v52  ;;  %v6171_v22 = vadd.f32 %v11357_v42, %v5754_v50  ;;  %v6169_v16 = vadd.f32 %v11359_v12, %v5752_v61 }
 0x793   :  { %v6174_v30 = vadd.f32 %v11361_v41, %v5757_v35  ;;  %v5755_v54 = vadd.f32 %v11409_v6, %v5683_v32  ;;  %v5758_v33 = vadd.f32 %v11409_v6, %v5686_v8  ;;  %v5756_v44 = vadd.f32 %v11409_v6, %v5684_v23 }
 0x794   :  { %v6234_v25 = vmax.f32 %v6170_v47, 0.0  ;;  %v6232_v19 = vmax.f32 %v6168_v59, 0.0  ;;  %v6235_v20 = vmax.f32 %v6171_v22, 0.0  ;;  %v6233_v0 = vmax.f32 %v6169_v16, 0.0  ;;  %v11497_v12 = vpop.f32.mrb[92].mxu0  ;;  %v12613_v59 = vld [vmem:[#allocation43_spill] sm:$0xff] }
 0x795   :  { %v6238_v46 = vmax.f32 %v6174_v30, 0.0  ;;  %v6172_v53 = vadd.f32 %v11363_v40, %v5755_v54  ;;  %v6175_v34 = vadd.f32 %v11365_v1, %v5758_v33  ;;  %v6173_v42 = vadd.f32 %v11367_v51, %v5756_v44  ;;  %v11519_v9 = vpop.f32.mrb[93].mxu0 }
 0x796   :  { %6298 = vst [vmem:[%s11851_s13 + $0x50] sm:$0xff] %v6234_v25  ;;  %6296 = vst [vmem:[%s11851_s13 + $0x40] sm:$0xff] %v6232_v19  ;;  %v5689_v41 = vmul.f32 %v11093_v43, %v11384_v18  ;;  %v5687_v40 = vmul.f32 %v11384_v18, %v11095_v14  ;;  %v5690_v1 = vmul.f32 %v11100_v28, %v11384_v18  ;;  %v11526_v13 = vpop.f32.mrb[94].mxu0 }
 0x797   :  { %6299 = vst [vmem:[%s11851_s13 + $0x58] sm:$0xff] %v6235_v20  ;;  %6297 = vst [vmem:[%s11851_s13 + $0x48] sm:$0xff] %v6233_v0  ;;  %v5688_v51 = vmul.f32 %v11384_v18, %v11104_v57  ;;  %v6236_v63 = vmax.f32 %v6172_v53, 0.0  ;;  %v6239_v62 = vmax.f32 %v6175_v34, 0.0  ;;  %v6237_v27 = vmax.f32 %v6173_v42, 0.0  ;;  %v11532_v39 = vpop.f32.mrb[95].mxu0 }
 0x798   :  { %6302 = vst [vmem:[%s11851_s13 + $0x70] sm:$0xff] %v6238_v46  ;;  %v5693_v43 = vmul.f32 %v11116_v45, %v11384_v18  ;;  %v5761_v14 = vadd.f32 %v11409_v6, %v5689_v41  ;;  %v5759_v28 = vadd.f32 %v11409_v6, %v5687_v40  ;;  %v5762_v57 = vadd.f32 %v11409_v6, %v5690_v1  ;;  %v12615_v34 = vld [vmem:[#allocation90_spill] sm:$0xff]  ;;  %v12616_v41 = vld [vmem:[#allocation48_spill] sm:$0xff] }
 0x799   :  { %v5760_v11 = vadd.f32 %v11409_v6, %v5688_v51  ;;  %6300 = vst [vmem:[%s11851_s13 + $0x60] sm:$0xff] %v6236_v63  ;;  %6303 = vst [vmem:[%s11851_s13 + $0x78] sm:$0xff] %v6239_v62  ;;  %v5691_v55 = vmul.f32 %v11384_v18, %v11118_v3  ;;  %v5694_v15 = vmul.f32 %v11123_v21, %v11384_v18  ;;  %v12617_v1 = vld [vmem:[#allocation92_spill] sm:$0xff] }
 0x79a   :  { %6301 = vst [vmem:[%s11851_s13 + $0x68] sm:$0xff] %v6237_v27  ;;  %v5765_v45 = vadd.f32 %v11409_v6, %v5693_v43  ;;  %v5692_v36 = vmul.f32 %v11384_v18, %v11127_v5  ;;  %v6178_v49 = vadd.f32 %v11369_v4, %v5761_v14  ;;  %v6176_v26 = vadd.f32 %v11371_v38, %v5759_v28 }
 0x79b   :  { %v6179_v52 = vadd.f32 %v11376_v56, %v5762_v57  ;;  %v6177_v50 = vadd.f32 %v11378_v10, %v5760_v11  ;;  %v5763_v35 = vadd.f32 %v11409_v6, %v5691_v55  ;;  %v5766_v3 = vadd.f32 %v11409_v6, %v5694_v15 }
 0x79c   :  { %v6182_v61 = vadd.f32 %v11386_v58, %v5765_v45  ;;  %v5764_v32 = vadd.f32 %v11409_v6, %v5692_v36  ;;  %v6242_v21 = vmax.f32 %v6178_v49, 0.0  ;;  %v6240_v8 = vmax.f32 %v6176_v26, 0.0  ;;  %v11561_v10 = vpop.f32.mrb[96].mxu0  ;;  %v12620_v26 = vld [vmem:[#allocation40_spill] sm:$0xff] }
 0x79d   :  { %v6243_v23 = vmax.f32 %v6179_v52, 0.0  ;;  %v6241_v5 = vmax.f32 %v6177_v50, 0.0  ;;  %v6180_v4 = vadd.f32 %v11396_v7, %v5763_v35  ;;  %v6183_v38 = vadd.f32 %v11406_v37, %v5766_v3  ;;  %v12612_v37 = vld [vmem:[#allocation84_spill] sm:$0xff]  ;;  %v11583_v16 = vpop.f32.mrb[97].mxu0  ;;  %v12621_v50 = vld [vmem:[#allocation26_spill] sm:$0xff] }
 0x79e   :  { %v6246_v47 = vmax.f32 %v6182_v61, 0.0  ;;  %v6181_v56 = vadd.f32 %v11417_v48, %v5764_v32  ;;  %6306 = vst [vmem:[%s11851_s13 + $0x90] sm:$0xff] %v6242_v21  ;;  %6304 = vst [vmem:[%s11851_s13 + $0x80] sm:$0xff] %v6240_v8  ;;  %v5697_v58 = vmul.f32 %v11136_v2, %v11384_v18  ;;  %v5695_v7 = vmul.f32 %v11384_v18, %v11138_v31  ;;  %v12614_v2 = vld [vmem:[#allocation45_spill] sm:$0xff]  ;;  %v6936_v25 = vpop.f32.mrb[98].mxu0  ;;  %v12622_v8 = vld [vmem:[#allocation3_spill] sm:$0xff] }
 0x79f   :  { %6307 = vst [vmem:[%s11851_s13 + $0x98] sm:$0xff] %v6243_v23  ;;  %6305 = vst [vmem:[%s11851_s13 + $0x88] sm:$0xff] %v6241_v5  ;;  %v5698_v48 = vmul.f32 %v12612_v37, %v11384_v18  ;;  %v5696_v22 = vmul.f32 %v11384_v18, %v12613_v59  ;;  %v6244_v30 = vmax.f32 %v6180_v4, 0.0  ;;  %v6247_v54 = vmax.f32 %v6183_v38, 0.0  ;;  %v6036_v46 = vpop.f32.mrb[99].mxu0  ;;  %v12623_v37 = vld [vmem:[#allocation60_spill] sm:$0xff] }
 0x7a0   :  { %6310 = vst [vmem:[%s11851_s13 + $0xb0] sm:$0xff] %v6246_v47  ;;  %v6245_v33 = vmax.f32 %v6181_v56, 0.0  ;;  %v5701_v44 = vmul.f32 %v12614_v2, %v11384_v18  ;;  %v5769_v31 = vadd.f32 %v11409_v6, %v5697_v58  ;;  %v5767_v19 = vadd.f32 %v11409_v6, %v5695_v7  ;;  %v12624_v59 = vld [vmem:[#allocation8_spill] sm:$0xff] }
 0x7a1   :  { %v5770_v20 = vadd.f32 %v11409_v6, %v5698_v48  ;;  %v5768_v0 = vadd.f32 %v11409_v6, %v5696_v22  ;;  %6308 = vst [vmem:[%s11851_s13 + $0xa0] sm:$0xff] %v6244_v30  ;;  %6311 = vst [vmem:[%s11851_s13 + $0xb8] sm:$0xff] %v6247_v54  ;;  %v5699_v42 = vmul.f32 %v11384_v18, %v12615_v34  ;;  %v12625_v30 = vld [vmem:[#allocation7_spill] sm:$0xff] }
 0x7a2   :  { %6309 = vst [vmem:[%s11851_s13 + $0xa8] sm:$0xff] %v6245_v33  ;;  %v5773_v53 = vadd.f32 %v11409_v6, %v5701_v44  ;;  %v5702_v40 = vmul.f32 %v12616_v41, %v11384_v18  ;;  %v5700_v51 = vmul.f32 %v11384_v18, %v12617_v1  ;;  %v6186_v63 = vadd.f32 %v11443_v29, %v5769_v31 }
 0x7a3   :  { %v6184_v62 = vadd.f32 %v11445_v17, %v5767_v19  ;;  %v6187_v27 = vadd.f32 %v11447_v60, %v5770_v20  ;;  %v6185_v43 = vadd.f32 %v11465_v24, %v5768_v0  ;;  %v5771_v28 = vadd.f32 %v11409_v6, %v5699_v42 }
 0x7a4   :  { %v6190_v14 = vadd.f32 %v11497_v12, %v5773_v53  ;;  %v5774_v57 = vadd.f32 %v11409_v6, %v5702_v40  ;;  %v5772_v11 = vadd.f32 %v11409_v6, %v5700_v51  ;;  %v6250_v45 = vmax.f32 %v6186_v63, 0.0  ;;  %v6939_v24 = vpop.f32.mrb[100].mxu0  ;;  %v12618_v12 = vld [vmem:[#allocation22_spill] sm:$0xff] }
 0x7a5   :  { %v6248_v55 = vmax.f32 %v6184_v62, 0.0  ;;  %v6251_v15 = vmax.f32 %v6187_v27, 0.0  ;;  %v6249_v36 = vmax.f32 %v6185_v43, 0.0  ;;  %v6188_v29 = vadd.f32 %v11519_v9, %v5771_v28  ;;  %v6049_v35 = vpop.f32.mrb[101].mxu0 }
 0x7a6   :  { %v6254_v49 = vmax.f32 %v6190_v14, 0.0  ;;  %v6191_v17 = vadd.f32 %v11526_v13, %v5774_v57  ;;  %v6189_v60 = vadd.f32 %v11532_v39, %v5772_v11  ;;  %6314 = vst [vmem:[%s11851_s13 + $0xd0] sm:$0xff] %v6250_v45  ;;  %v5705_v9 = vmul.f32 %v12618_v12, %v11384_v18  ;;  %v12619_v13 = vld [vmem:[#allocation27_spill] sm:$0xff]  ;;  %v6940_v5 = vpop.f32.mrb[102].mxu0  ;;  %v12628_v14 = vld [vmem:[#allocation9_spill] sm:$0xff]  ;;  %v12629_v57 = vld [vmem:[#allocation68_spill] sm:$0xff] }
 0x7a7   :  { %6312 = vst [vmem:[%s11851_s13 + $0xc0] sm:$0xff] %v6248_v55  ;;  %6315 = vst [vmem:[%s11851_s13 + $0xd8] sm:$0xff] %v6251_v15  ;;  %v5703_v39 = vmul.f32 %v11384_v18, %v12619_v13  ;;  %v5706_v52 = vmul.f32 %v12620_v26, %v11384_v18  ;;  %v5704_v61 = vmul.f32 %v11384_v18, %v12621_v50  ;;  %v6252_v3 = vmax.f32 %v6188_v29, 0.0  ;;  %v6052_v58 = vpop.f32.mrb[103].mxu0 }
 0x7a8   :  { %6313 = vst [vmem:[%s11851_s13 + $0xc8] sm:$0xff] %v6249_v36  ;;  %6318 = vst [vmem:[%s11851_s13 + $0xf0] sm:$0xff] %v6254_v49  ;;  %v6255_v32 = vmax.f32 %v6191_v17, 0.0  ;;  %v6253_v21 = vmax.f32 %v6189_v60, 0.0  ;;  %v5709_v23 = vmul.f32 %v12622_v8, %v11384_v18  ;;  %v5777_v47 = vadd.f32 %v11409_v6, %v5705_v9  ;;  %v12630_v49 = vld [vmem:[#allocation17_spill] sm:$0xff] }
 0x7a9   :  { %v5775_v4 = vadd.f32 %v11409_v6, %v5703_v39  ;;  %v5778_v38 = vadd.f32 %v11409_v6, %v5706_v52  ;;  %v5776_v56 = vadd.f32 %v11409_v6, %v5704_v61  ;;  %6316 = vst [vmem:[%s11851_s13 + $0xe0] sm:$0xff] %v6252_v3  ;;  %v5707_v48 = vmul.f32 %v11384_v18, %v12623_v37  ;;  %v12631_v39 = vld [vmem:[#allocation16_spill] sm:$0xff]  ;;  %v12632_v52 = vld [vmem:[#allocation19_spill] sm:$0xff]  ;;  %v12633_v61 = vld [vmem:[#allocation30_spill] sm:$0xff] }
 0x7aa   :  { %6319 = vst [vmem:[%s11851_s13 + $0xf8] sm:$0xff] %v6255_v32  ;;  %6317 = vst [vmem:[%s11851_s13 + $0xe8] sm:$0xff] %v6253_v21  ;;  %v5781_v7 = vadd.f32 %v11409_v6, %v5709_v23  ;;  %v5710_v22 = vmul.f32 %v12624_v59, %v11384_v18  ;;  %v5708_v54 = vmul.f32 %v11384_v18, %v12625_v30 }
 0x7ab   :  { %v6194_v33 = vadd.f32 %v11561_v10, %v5777_v47  ;;  %v6192_v2 = vadd.f32 %v11583_v16, %v5775_v4  ;;  %v6195_v44 = vadd.f32 %v6936_v25, %v5778_v38  ;;  %v6193_v31 = vadd.f32 %v6036_v46, %v5776_v56  ;;  %v12626_v16 = vld [vmem:[#allocation11_spill] sm:$0xff]  ;;  %v12627_v46 = vld [vmem:[#allocation13_spill] sm:$0xff]  ;;  %v12634_v4 = vld [vmem:[#allocation10_spill] sm:$0xff] }
 0x7ac   :  { %v6198_v19 = vadd.f32 %v6939_v24, %v5781_v7  ;;  %v5779_v20 = vadd.f32 %v11409_v6, %v5707_v48  ;;  %v5782_v0 = vadd.f32 %v11409_v6, %v5710_v22  ;;  %v5780_v53 = vadd.f32 %v11409_v6, %v5708_v54  ;;  %v6943_v10 = vpop.f32.mrb[104].mxu0  ;;  %v12635_v22 = vld [vmem:[#allocation32_spill] sm:$0xff]  ;;  %v12636_v54 = vld [vmem:[#allocation82_spill] sm:$0xff] }
 0x7ad   :  { %v6258_v34 = vmax.f32 %v6194_v33, 0.0  ;;  %v6256_v42 = vmax.f32 %v6192_v2, 0.0  ;;  %v6259_v41 = vmax.f32 %v6195_v44, 0.0  ;;  %v6257_v40 = vmax.f32 %v6193_v31, 0.0  ;;  %v6065_v43 = vpop.f32.mrb[105].mxu0  ;;  %v12637_v2 = vld [vmem:[#allocation87_spill] sm:$0xff] }
 0x7ae   :  { %v6262_v1 = vmax.f32 %v6198_v19, 0.0  ;;  %v6196_v51 = vadd.f32 %v6049_v35, %v5779_v20  ;;  %v6199_v63 = vadd.f32 %v6940_v5, %v5782_v0  ;;  %v6197_v62 = vadd.f32 %v6052_v58, %v5780_v53  ;;  %v6944_v36 = vpop.f32.mrb[106].mxu0  ;;  %v12638_v20 = vld [vmem:[#allocation53_spill] sm:$0xff]  ;;  %v12639_v53 = vld [vmem:[#allocation18_spill] sm:$0xff] }
 0x7af   :  { %6322 = vst [vmem:[%s11851_s13 + $0x110] sm:$0xff] %v6258_v34  ;;  %6320 = vst [vmem:[%s11851_s13 + $0x100] sm:$0xff] %v6256_v42  ;;  %v5713_v25 = vmul.f32 %v12626_v16, %v11384_v18  ;;  %v5711_v27 = vmul.f32 %v11384_v18, %v12627_v46  ;;  %v5714_v28 = vmul.f32 %v12628_v14, %v11384_v18  ;;  %v6068_v9 = vpop.f32.mrb[107].mxu0  ;;  %v12640_v42 = vld [vmem:[#allocation54_spill] sm:$0xff] }
 0x7b0   :  { %6323 = vst [vmem:[%s11851_s13 + $0x118] sm:$0xff] %v6259_v41  ;;  %6321 = vst [vmem:[%s11851_s13 + $0x108] sm:$0xff] %v6257_v40  ;;  %v5712_v11 = vmul.f32 %v11384_v18, %v12629_v57  ;;  %v6260_v45 = vmax.f32 %v6196_v51, 0.0  ;;  %v6263_v55 = vmax.f32 %v6199_v63, 0.0  ;;  %v6261_v15 = vmax.f32 %v6197_v62, 0.0  ;;  %v12641_v57 = vld [vmem:[#allocation20_spill] sm:$0xff] }
 0x7b1   :  { %6326 = vst [vmem:[%s11851_s13 + $0x130] sm:$0xff] %v6262_v1  ;;  %v5717_v29 = vmul.f32 %v12630_v49, %v11384_v18  ;;  %v5785_v17 = vadd.f32 %v11409_v6, %v5713_v25  ;;  %v5783_v60 = vadd.f32 %v11409_v6, %v5711_v27  ;;  %v5786_v24 = vadd.f32 %v11409_v6, %v5714_v28 }
 0x7b2   :  { %v5784_v12 = vadd.f32 %v11409_v6, %v5712_v11  ;;  %6324 = vst [vmem:[%s11851_s13 + $0x120] sm:$0xff] %v6260_v45  ;;  %6327 = vst [vmem:[%s11851_s13 + $0x138] sm:$0xff] %v6263_v55  ;;  %v5715_v26 = vmul.f32 %v11384_v18, %v12631_v39  ;;  %v5718_v50 = vmul.f32 %v12632_v52, %v11384_v18  ;;  %v12642_v55 = vld [vmem:[#allocation55_spill] sm:$0xff] }
 0x7b3   :  { %6325 = vst [vmem:[%s11851_s13 + $0x128] sm:$0xff] %v6261_v15  ;;  %v5789_v13 = vadd.f32 %v11409_v6, %v5717_v29  ;;  %v5716_v35 = vmul.f32 %v11384_v18, %v12633_v61  ;;  %v6202_v3 = vadd.f32 %v6943_v10, %v5785_v17  ;;  %v6200_v32 = vadd.f32 %v6065_v43, %v5783_v60  ;;  %v12644_v29 = vld [vmem:[#allocation57_spill] sm:$0xff]  ;;  %v12647_v61 = vld [vmem:[#allocation24_spill] sm:$0xff] }
 0x7b4   :  { %v6203_v21 = vadd.f32 %v6944_v36, %v5786_v24  ;;  %v6201_v8 = vadd.f32 %v6068_v9, %v5784_v12  ;;  %v5787_v23 = vadd.f32 %v11409_v6, %v5715_v26  ;;  %v5790_v5 = vadd.f32 %v11409_v6, %v5718_v50  ;;  %v6947_v48 = vpop.f32.mrb[108].mxu0  ;;  %v12643_v36 = vld [vmem:[#allocation23_spill] sm:$0xff]  ;;  %v12645_v12 = vld [vmem:[#allocation25_spill] sm:$0xff] }
 0x7b5   :  { %v5788_v47 = vadd.f32 %v11409_v6, %v5716_v35  ;;  %v5721_v38 = vmul.f32 %v12634_v4, %v11384_v18  ;;  %v6266_v56 = vmax.f32 %v6202_v3, 0.0  ;;  %v6264_v58 = vmax.f32 %v6200_v32, 0.0  ;;  %v6081_v19 = vpop.f32.mrb[109].mxu0 }
 0x7b6   :  { %v6267_v7 = vmax.f32 %v6203_v21, 0.0  ;;  %v6265_v37 = vmax.f32 %v6201_v8, 0.0  ;;  %v5719_v30 = vmul.f32 %v11384_v18, %v12635_v22  ;;  %v5722_v33 = vmul.f32 %v12636_v54, %v11384_v18  ;;  %v6948_v1 = vpop.f32.mrb[110].mxu0  ;;  %v12648_v8 = vld [vmem:[#allocation58_spill] sm:$0xff] }
 0x7b7   :  { %v5793_v59 = vadd.f32 %v11409_v6, %v5721_v38  ;;  %v5720_v44 = vmul.f32 %v11384_v18, %v12637_v2  ;;  %6330 = vst [vmem:[%s11851_s13 + $0x150] sm:$0xff] %v6266_v56  ;;  %6328 = vst [vmem:[%s11851_s13 + $0x140] sm:$0xff] %v6264_v58  ;;  %v6206_v31 = vadd.f32 %v6947_v48, %v5789_v13  ;;  %v6084_v25 = vpop.f32.mrb[111].mxu0  ;;  %v12646_v13 = vld [vmem:[#allocation59_spill] sm:$0xff] }
 0x7b8   :  { %6331 = vst [vmem:[%s11851_s13 + $0x158] sm:$0xff] %v6267_v7  ;;  %6329 = vst [vmem:[%s11851_s13 + $0x148] sm:$0xff] %v6265_v37  ;;  %v5725_v0 = vmul.f32 %v12638_v20, %v11384_v18  ;;  %v5723_v34 = vmul.f32 %v11384_v18, %v12639_v53  ;;  %v5726_v41 = vmul.f32 %v12640_v42, %v11384_v18 }
 0x7b9   :  { %v6204_v40 = vadd.f32 %v6081_v19, %v5787_v23  ;;  %v5791_v51 = vadd.f32 %v11409_v6, %v5719_v30  ;;  %v5794_v63 = vadd.f32 %v11409_v6, %v5722_v33  ;;  %v5792_v62 = vadd.f32 %v11409_v6, %v5720_v44 }
 0x7ba   :  { %v6270_v10 = vmax.f32 %v6206_v31, 0.0  ;;  %v6207_v16 = vadd.f32 %v6948_v1, %v5790_v5  ;;  %v5797_v46 = vadd.f32 %v11409_v6, %v5725_v0  ;;  %v5795_v27 = vadd.f32 %v11409_v6, %v5723_v34  ;;  %v12649_v5 = vld [vmem:[#allocation56_spill] sm:$0xff] }
 0x7bb   :  { %v6268_v43 = vmax.f32 %v6204_v40, 0.0  ;;  %v6205_v14 = vadd.f32 %v6084_v25, %v5788_v47  ;;  %v5798_v28 = vadd.f32 %v11409_v6, %v5726_v41  ;;  %v5724_v11 = vmul.f32 %v11384_v18, %v12641_v57 }
 0x7bc   :  { %6334 = vst [vmem:[%s11851_s13 + $0x170] sm:$0xff] %v6270_v10  ;;  %v6271_v45 = vmax.f32 %v6207_v16, 0.0  ;;  %v5729_v15 = vmul.f32 %v12642_v55, %v11384_v18  ;;  %v5727_v49 = vmul.f32 %v11384_v18, %v12643_v36  ;;  %v5730_v17 = vmul.f32 %v12644_v29, %v11384_v18  ;;  %v6951_v3 = vpop.f32.mrb[112].mxu0 }
 0x7bd   :  { %6332 = vst [vmem:[%s11851_s13 + $0x160] sm:$0xff] %v6268_v43  ;;  %v6269_v60 = vmax.f32 %v6205_v14, 0.0  ;;  %v5796_v24 = vadd.f32 %v11409_v6, %v5724_v11  ;;  %v5728_v9 = vmul.f32 %v11384_v18, %v12645_v12  ;;  %v5733_v39 = vmul.f32 %v12646_v13, %v11384_v18  ;;  %v6097_v38 = vpop.f32.mrb[113].mxu0 }
 0x7be   :  { %6335 = vst [vmem:[%s11851_s13 + $0x178] sm:$0xff] %v6271_v45  ;;  %v5801_v26 = vadd.f32 %v11409_v6, %v5729_v15  ;;  %v5799_v52 = vadd.f32 %v11409_v6, %v5727_v49  ;;  %v5802_v50 = vadd.f32 %v11409_v6, %v5730_v17  ;;  %v5731_v35 = vmul.f32 %v11384_v18, %v12647_v61  ;;  %v6952_v7 = vpop.f32.mrb[114].mxu0 }
 0x7bf   :  { %6333 = vst [vmem:[%s11851_s13 + $0x168] sm:$0xff] %v6269_v60  ;;  %v5800_v32 = vadd.f32 %v11409_v6, %v5728_v9  ;;  %v5805_v21 = vadd.f32 %v11409_v6, %v5733_v39  ;;  %v5734_v23 = vmul.f32 %v12648_v8, %v11384_v18  ;;  %v5804_v47 = vadd.f32 %v11409_v6, %v12649_v5  ;;  %v6100_v30 = vpop.f32.mrb[115].mxu0 }
 0x7c0   :  { %v6210_v4 = vadd.f32 %v6951_v3, %v5793_v59  ;;  %v5803_v56 = vadd.f32 %v11409_v6, %v5731_v35  ;;  %v6208_v58 = vadd.f32 %v6097_v38, %v5791_v51  ;;  %v6211_v22 = vadd.f32 %v6952_v7, %v5794_v63 }
 0x7c1   :  { %v5806_v37 = vadd.f32 %v11409_v6, %v5734_v23  ;;  %v6209_v33 = vadd.f32 %v6100_v30, %v5792_v62 }
 0x7c2   :  { %v6274_v48 = vmax.f32 %v6210_v4, 0.0  ;;  %v6272_v54 = vmax.f32 %v6208_v58, 0.0  ;;  %v6275_v18 = vmax.f32 %v6211_v22, 0.0 }
 0x7c3   :  { %v6273_v59 = vmax.f32 %v6209_v33, 0.0 }
 0x7c4   :  { %6338 = vst [vmem:[%s11851_s13 + $0x190] sm:$0xff] %v6274_v48  ;;  %6336 = vst [vmem:[%s11851_s13 + $0x180] sm:$0xff] %v6272_v54  ;;  %v6955_v6 = vpop.f32.mrb[116].mxu0 }
 0x7c5   :  { %6339 = vst [vmem:[%s11851_s13 + $0x198] sm:$0xff] %v6275_v18  ;;  %6337 = vst [vmem:[%s11851_s13 + $0x188] sm:$0xff] %v6273_v59  ;;  %v6214_v2 = vadd.f32 %v6955_v6, %v5797_v46  ;;  %v6113_v44 = vpop.f32.mrb[117].mxu0 }
 0x7c6   :  { %v6212_v31 = vadd.f32 %v6113_v44, %v5795_v27  ;;  %v6956_v19 = vpop.f32.mrb[118].mxu0 }
 0x7c7   :  { %v6278_v20 = vmax.f32 %v6214_v2, 0.0  ;;  %v6215_v0 = vadd.f32 %v6956_v19, %v5798_v28  ;;  %v6116_v53 = vpop.f32.mrb[119].mxu0 }
 0x7c8   :  { %v6276_v34 = vmax.f32 %v6212_v31, 0.0  ;;  %v6213_v42 = vadd.f32 %v6116_v53, %v5796_v24 }
 0x7c9   :  { %6342 = vst [vmem:[%s11851_s13 + $0x1b0] sm:$0xff] %v6278_v20  ;;  %v6279_v41 = vmax.f32 %v6215_v0, 0.0 }
 0x7ca   :  { %6340 = vst [vmem:[%s11851_s13 + $0x1a0] sm:$0xff] %v6276_v34  ;;  %v6277_v40 = vmax.f32 %v6213_v42, 0.0 }
 0x7cb   :  { %6343 = vst [vmem:[%s11851_s13 + $0x1b8] sm:$0xff] %v6279_v41 }
 0x7cc   :  { %6341 = vst [vmem:[%s11851_s13 + $0x1a8] sm:$0xff] %v6277_v40  ;;  %v6959_v1 = vpop.f32.mrb[120].mxu0 }
 0x7cd   :  { %v6218_v51 = vadd.f32 %v6959_v1, %v5801_v26  ;;  %v6129_v63 = vpop.f32.mrb[121].mxu0 }
 0x7ce   :  { %v6216_v62 = vadd.f32 %v6129_v63, %v5799_v52  ;;  %v6960_v10 = vpop.f32.mrb[122].mxu0 }
 0x7cf   :  { %v6282_v16 = vmax.f32 %v6218_v51, 0.0  ;;  %v6219_v25 = vadd.f32 %v6960_v10, %v5802_v50  ;;  %v6132_v46 = vpop.f32.mrb[123].mxu0 }
 0x7d0   :  { %v6280_v27 = vmax.f32 %v6216_v62, 0.0  ;;  %v6217_v43 = vadd.f32 %v6132_v46, %v5800_v32 }
 0x7d1   :  { %6346 = vst [vmem:[%s11851_s13 + $0x1d0] sm:$0xff] %v6282_v16  ;;  %v6283_v14 = vmax.f32 %v6219_v25, 0.0 }
 0x7d2   :  { %6344 = vst [vmem:[%s11851_s13 + $0x1c0] sm:$0xff] %v6280_v27  ;;  %v6281_v28 = vmax.f32 %v6217_v43, 0.0 }
 0x7d3   :  { %6347 = vst [vmem:[%s11851_s13 + $0x1d8] sm:$0xff] %v6283_v14 }
 0x7d4   :  { %6345 = vst [vmem:[%s11851_s13 + $0x1c8] sm:$0xff] %v6281_v28  ;;  %v6963_v57 = vpop.f32.mrb[124].mxu0 }
 0x7d5   :  { %v6222_v11 = vadd.f32 %v6963_v57, %v5805_v21  ;;  %v6145_v45 = vpop.f32.mrb[125].mxu0 }
 0x7d6   :  { %v6220_v55 = vadd.f32 %v6145_v45, %v5803_v56  ;;  %v6964_v15 = vpop.f32.mrb[126].mxu0 }
 0x7d7   :  { %v6286_v36 = vmax.f32 %v6222_v11, 0.0  ;;  %v6223_v49 = vadd.f32 %v6964_v15, %v5806_v37  ;;  %v6148_v29 = vpop.f32.mrb[127].mxu0 }
 0x7d8   :  { %v6284_v17 = vmax.f32 %v6220_v55, 0.0  ;;  %v6221_v60 = vadd.f32 %v6148_v29, %v5804_v47 }
 0x7d9   :  { %6350 = vst [vmem:[%s11851_s13 + $0x1f0] sm:$0xff] %v6286_v36  ;;  %v6287_v24 = vmax.f32 %v6223_v49, 0.0 }
 0x7da   :  { %6348 = vst [vmem:[%s11851_s13 + $0x1e0] sm:$0xff] %v6284_v17  ;;  %v6285_v12 = vmax.f32 %v6221_v60, 0.0 }
 0x7db   :  { %6351 = vst [vmem:[%s11851_s13 + $0x1f8] sm:$0xff] %v6287_v24 }
 0x7dc   :  { %6349 = vst [vmem:[%s11851_s13 + $0x1e8] sm:$0xff] %v6285_v12 }

</bundles_post_ra>
